<compile_context>
chip_gen: v7x
topology: tpu7x:2x2x1
jax: 0.10.0
libtpu: 0.0.40
codegen_flags: <defaults>
</compile_context>

<pallas_src>
import math

import numpy as np
import jax
import jax.numpy as jnp
from jax.experimental import pallas as pl
from jax.experimental.pallas import tpu as pltpu

A_ACT = 1.7159
S_ACT = 2.0 / 3.0

# C3 sparse connection table (LeCun 1998, Table I): output map -> input maps.
_C3_TABLE = [
    (0, 1, 2), (1, 2, 3), (2, 3, 4), (3, 4, 5), (4, 5, 0), (5, 0, 1),
    (0, 1, 2, 3), (1, 2, 3, 4), (2, 3, 4, 5), (3, 4, 5, 0), (4, 5, 0, 1),
    (5, 0, 1, 2), (0, 1, 3, 4), (1, 2, 4, 5), (0, 2, 3, 5),
    (0, 1, 2, 3, 4, 5),
]


def _act(x):
    # RescaledTanh; kept in f32 so the EUP/VPU path is valid on v5e as well.
    return A_ACT * jnp.tanh(S_ACT * x)


# --------------------------- fused forward kernel ---------------------------

def _lenet5_kernel(x_ref,
                   w1_ref, b1_ref, pw1_ref, s2s_ref, s2b_ref,
                   w3_ref, b3_ref, pw2_ref, s4s_ref, s4b_ref,
                   w5_ref, b5_ref, w6_ref, b6_ref, rbf_ref,
                   out_ref, a2_ref, a4_ref):
    bb = x_ref.shape[0]

    def dot(a, w_ref):
        # bf16 operands, f32 accumulation on the MXU.
        return jnp.dot(a.astype(jnp.bfloat16), w_ref[...],
                       preferred_element_type=jnp.float32)

    # ---- C1: 1x32x32 -> 6x28x28.  The 5 kernel-row bands are concatenated
    # on the lane axis so the conv is ONE (bb*28, 160) @ (160, 168) matmul.
    xc = jnp.concatenate([x_ref[:, i:i + 28, :] for i in range(5)], axis=-1)
    a1 = _act(dot(xc.reshape(bb * 28, 160), w1_ref) + b1_ref[...])  # (bb*28,168)

    # ---- S2: coeff * sum(2x2) + bias, then act.
    # H half: even/odd row add (VPU).  W half + channel remap: 0/1 matmul.
    a1p = a1.reshape(bb * 14, 2, 168)
    h1 = a1p[:, 0, :] + a1p[:, 1, :]                               # (bb*14,168)
    a2 = _act(dot(h1, pw1_ref) * s2s_ref[...] + s2b_ref[...])      # (bb*14,84)
    a2_ref[...] = a2.reshape(bb, 14, 84)

    # ---- C3: sparse 6->16 5x5 (unconnected weights are zero in w3) ---------
    xc3 = jnp.concatenate([a2_ref[:, i:i + 10, :] for i in range(5)], axis=-1)
    a3 = _act(dot(xc3.reshape(bb * 10, 420), w3_ref) + b3_ref[...])  # (bb*10,160)

    # ---- S4 ----------------------------------------------------------------
    a3p = a3.reshape(bb * 5, 2, 160)
    h3 = a3p[:, 0, :] + a3p[:, 1, :]                               # (bb*5,160)
    a4 = _act(dot(h3, pw2_ref) * s4s_ref[...] + s4b_ref[...])      # (bb*5,80)
    a4_ref[...] = a4.reshape(bb, 5, 80)

    # ---- C5: 16x5x5 -> 120 (a plain FC once the 5 rows are lane-concat'd) --
    xc5 = jnp.concatenate([a4_ref[:, i:i + 1, :] for i in range(5)], axis=-1)
    a5 = _act(dot(xc5.reshape(bb, 400), w5_ref) + b5_ref[...])     # (bb, 120)

    # ---- F6 (linear; the reference forward applies no activation here) -----
    a6 = dot(a5, w6_ref) + b6_ref[...]                             # (bb, 84)

    # ---- RBF output: y[n, i] = sum_j (x[n, j] - w[i, j])^2 (direct form) ----
    d = a6[:, None, :] - rbf_ref[...][None, :, :]                  # (bb,10,84)
    out_ref[...] = jnp.sum(d * d, axis=-1)                         # (bb, 10)


# -------------------- weight preparation (done once at init) ----------------

def _conv_cat(w, w_in):
    """(Cout,Cin,KH,KW) conv -> (KH*Cin*w_in, Cout*OW) lane-concat band matrix."""
    cout, cin, kh, kw = w.shape
    ow_n = w_in - kw + 1
    m = np.zeros((kh * cin * w_in, cout * ow_n), np.float32)
    co, ci, ii, jj, ow = np.meshgrid(
        np.arange(cout), np.arange(cin), np.arange(kh), np.arange(kw),
        np.arange(ow_n), indexing='ij')
    m[ii * (cin * w_in) + ci * w_in + ow + jj, co * ow_n + ow] = w[co, ci, ii, jj]
    return m


def _pool_w(c, w):
    """0/1 matrix summing adjacent column pairs per channel: (c*w, c*(w//2))."""
    p = np.zeros((c * w, c * (w // 2)), np.float32)
    cc = np.repeat(np.arange(c), w)
    ww = np.tile(np.arange(w), c)
    p[cc * w + ww, cc * (w // 2) + ww // 2] = 1.0
    return p


def init_params(key):
    ks = jax.random.split(key, 12)

    def u(k, shape, bound):
        return np.asarray(jax.random.uniform(k, shape, jnp.float32, -bound, bound))

    # c1 / c5 follow the module's explicit uniform(-2.4/in_ch, 2.4/in_ch) init.
    c1_w = u(ks[0], (6, 1, 5, 5), 2.4 / 1)
    c1_b = u(ks[1], (6,), 2.4 / 1)
    s2_c = u(ks[2], (6,), 1.0)
    s2_b = u(ks[3], (6,), 1.0)
    mask = np.zeros((16, 6), np.float32)
    for o, ins in enumerate(_C3_TABLE):
        mask[o, list(ins)] = 1.0
    # Sparse C3 expressed as a dense conv with zeroed unconnected weights.
    c3_w = u(ks[4], (16, 6, 5, 5), 2.4 / 6) * mask[:, :, None, None]
    c3_b = u(ks[5], (16,), 2.4 / 6)
    s4_c = u(ks[6], (16,), 1.0)
    s4_b = u(ks[7], (16,), 1.0)
    c5_w = u(ks[8], (120, 16, 5, 5), 2.4 / 16)
    c5_b = u(ks[9], (120,), 2.4 / 16)
    fb = 1.0 / math.sqrt(120.0)
    f6_w = u(ks[10], (84, 120), fb)
    f6_b = u(ks[11], (84,), fb)
    # TODO(synk): original RBF prototypes are fixed 7x12 ASCII bitmaps; use
    # deterministic +/-1 stand-ins here.
    rbf_w = np.sign(np.asarray(
        jax.random.normal(jax.random.fold_in(key, 99), (10, 84)))).astype(np.float32)

    jb = lambda a: jnp.asarray(a, jnp.bfloat16)   # matmul operands
    jf = lambda a: jnp.asarray(a, jnp.float32)    # elementwise params
    return {
        'w1': jb(_conv_cat(c1_w, 32)),                  # (160, 168)
        'b1': jf(np.repeat(c1_b, 28)[None, :]),         # (1, 168)
        'pw1': jb(_pool_w(6, 28)),                      # (168, 84)
        's2s': jf(np.repeat(s2_c, 14)[None, :]),        # (1, 84)
        's2b': jf(np.repeat(s2_b, 14)[None, :]),
        'w3': jb(_conv_cat(c3_w, 14)),                  # (420, 160)
        'b3': jf(np.repeat(c3_b, 10)[None, :]),         # (1, 160)
        'pw2': jb(_pool_w(16, 10)),                     # (160, 80)
        's4s': jf(np.repeat(s4_c, 5)[None, :]),         # (1, 80)
        's4b': jf(np.repeat(s4_b, 5)[None, :]),
        'w5': jb(_conv_cat(c5_w, 5)),                   # (400, 120)
        'b5': jf(c5_b[None, :]),                        # (1, 120)
        'w6': jb(f6_w.T.copy()),                        # (120, 84)
        'b6': jf(f6_b[None, :]),                        # (1, 84)
        'rbf': jf(rbf_w),                               # (10, 84)
    }


# --------------------------------- wrapper ----------------------------------

def lenet5_forward(params, x):
    n = x.shape[0]
    assert x.shape[1:] == (1, 32, 32), "LeNet-5 expects (N, 1, 32, 32) input"
    x = x.reshape(n, 32, 32).astype(jnp.float32)

    # Batch block: large enough to amortize grid-step overhead and fill the
    # MXU, small enough (~a few MB of activations) to fit every generation's
    # VMEM (v7x: 64 MiB physical).  Pad the batch to a multiple of the block.
    bb = 128 if n >= 128 else ((n + 7) // 8) * 8
    n_pad = pl.cdiv(n, bb) * bb
    if n_pad != n:
        x = jnp.pad(x, ((0, n_pad - n), (0, 0), (0, 0)))
    grid = (n_pad // bb,)

    weight_names = ['w1', 'b1', 'pw1', 's2s', 's2b',
                    'w3', 'b3', 'pw2', 's4s', 's4b',
                    'w5', 'b5', 'w6', 'b6', 'rbf']
    weights = [params[k] for k in weight_names]

    def _const_spec(a):
        zeros = (0,) * a.ndim
        return pl.BlockSpec(a.shape, lambda i, _z=zeros: _z)

    in_specs = [pl.BlockSpec((bb, 32, 32), lambda i: (i, 0, 0))]
    in_specs += [_const_spec(w) for w in weights]

    per_img_flops = 2 * (28 * 160 * 168 + 14 * 168 * 84 + 10 * 420 * 160
                         + 5 * 160 * 80 + 400 * 120 + 120 * 84 + 10 * 84)
    weight_bytes = sum(int(w.size) * w.dtype.itemsize for w in weights)
    cost = pl.CostEstimate(
        flops=per_img_flops * n_pad,
        transcendentals=8000 * n_pad,
        bytes_accessed=4 * int(x.size) + weight_bytes + 4 * n_pad * 10)

    out = pl.pallas_call(
        _lenet5_kernel,
        out_shape=jax.ShapeDtypeStruct((n_pad, 10), jnp.float32),
        grid=grid,
        in_specs=in_specs,
        out_specs=pl.BlockSpec((bb, 10), lambda i: (i, 0)),
        scratch_shapes=[pltpu.VMEM((bb, 14, 84), jnp.float32),
                        pltpu.VMEM((bb, 5, 80), jnp.float32)],
        compiler_params=pltpu.CompilerParams(
            dimension_semantics=("parallel",),
            vmem_limit_bytes=32 * 1024 * 1024),
        cost_estimate=cost,
    )(x, *weights)
    return out[:n]


if __name__ == "__main__":
    key = jax.random.PRNGKey(0)
    pk, xk = jax.random.split(key)
    params = init_params(pk)
    # LeNet-5 requires 32x32 single-channel input for the conv arithmetic.
    x = jax.random.normal(xk, (2, 1, 32, 32), jnp.float32)
    out = jax.jit(lenet5_forward)(params, x)
    jax.block_until_ready(out)
    assert out.shape == (2, 10) and out.dtype == jnp.float32
    assert bool(jnp.all(jnp.isfinite(out)))
    print("KERNEL_OK")
</pallas_src>

<mosaic_0001>
module attributes {stable_mosaic.version = 11 : i64} {
  func.func @_lenet5_kernel(%arg0: i32, %arg1: memref<8x32x32xf32, #tpu.memory_space<vmem>>, %arg2: memref<160x168xbf16, #tpu.memory_space<vmem>>, %arg3: memref<1x168xf32, #tpu.memory_space<vmem>>, %arg4: memref<168x84xbf16, #tpu.memory_space<vmem>>, %arg5: memref<1x84xf32, #tpu.memory_space<vmem>>, %arg6: memref<1x84xf32, #tpu.memory_space<vmem>>, %arg7: memref<420x160xbf16, #tpu.memory_space<vmem>>, %arg8: memref<1x160xf32, #tpu.memory_space<vmem>>, %arg9: memref<160x80xbf16, #tpu.memory_space<vmem>>, %arg10: memref<1x80xf32, #tpu.memory_space<vmem>>, %arg11: memref<1x80xf32, #tpu.memory_space<vmem>>, %arg12: memref<400x120xbf16, #tpu.memory_space<vmem>>, %arg13: memref<1x120xf32, #tpu.memory_space<vmem>>, %arg14: memref<120x84xbf16, #tpu.memory_space<vmem>>, %arg15: memref<1x84xf32, #tpu.memory_space<vmem>>, %arg16: memref<10x84xf32, #tpu.memory_space<vmem>>, %arg17: memref<8x10xf32, #tpu.memory_space<vmem>>, %arg18: memref<8x14x84xf32, #tpu.memory_space<vmem>>, %arg19: memref<8x5x80xf32, #tpu.memory_space<vmem>>) attributes {dimension_semantics = [#tpu.dimension_semantics<parallel>], iteration_bounds = array<i64: 1>, scalar_prefetch = 0 : i64, scratch_operands = 2 : i64, tpu.core_type = #tpu.core_type<tc>, window_params = [{transform_indices = @transform_0, window_bounds = array<i64: 8, 32, 32>}, {pipeline_mode = #tpu.pipeline_mode<synchronous>, transform_indices = @transform_1, window_bounds = array<i64: 160, 168>}, {pipeline_mode = #tpu.pipeline_mode<synchronous>, transform_indices = @transform_2, window_bounds = array<i64: 1, 168>}, {pipeline_mode = #tpu.pipeline_mode<synchronous>, transform_indices = @transform_3, window_bounds = array<i64: 168, 84>}, {pipeline_mode = #tpu.pipeline_mode<synchronous>, transform_indices = @transform_4, window_bounds = array<i64: 1, 84>}, {pipeline_mode = #tpu.pipeline_mode<synchronous>, transform_indices = @transform_5, window_bounds = array<i64: 1, 84>}, {pipeline_mode = #tpu.pipeline_mode<synchronous>, transform_indices = @transform_6, window_bounds = array<i64: 420, 160>}, {pipeline_mode = #tpu.pipeline_mode<synchronous>, transform_indices = @transform_7, window_bounds = array<i64: 1, 160>}, {pipeline_mode = #tpu.pipeline_mode<synchronous>, transform_indices = @transform_8, window_bounds = array<i64: 160, 80>}, {pipeline_mode = #tpu.pipeline_mode<synchronous>, transform_indices = @transform_9, window_bounds = array<i64: 1, 80>}, {pipeline_mode = #tpu.pipeline_mode<synchronous>, transform_indices = @transform_10, window_bounds = array<i64: 1, 80>}, {pipeline_mode = #tpu.pipeline_mode<synchronous>, transform_indices = @transform_11, window_bounds = array<i64: 400, 120>}, {pipeline_mode = #tpu.pipeline_mode<synchronous>, transform_indices = @transform_12, window_bounds = array<i64: 1, 120>}, {pipeline_mode = #tpu.pipeline_mode<synchronous>, transform_indices = @transform_13, window_bounds = array<i64: 120, 84>}, {pipeline_mode = #tpu.pipeline_mode<synchronous>, transform_indices = @transform_14, window_bounds = array<i64: 1, 84>}, {pipeline_mode = #tpu.pipeline_mode<synchronous>, transform_indices = @transform_15, window_bounds = array<i64: 10, 84>}, {transform_indices = @transform_16, window_bounds = array<i64: 8, 10>}]} {
    %c0 = arith.constant 0 : index
    %c0_0 = arith.constant 0 : index
    %c0_1 = arith.constant 0 : index
    %0 = vector.load %arg1[%c0, %c0_0, %c0_1] : memref<8x32x32xf32, #tpu.memory_space<vmem>>, vector<8x28x32xf32>
    %c0_2 = arith.constant 0 : index
    %c1 = arith.constant 1 : index
    %c0_3 = arith.constant 0 : index
    %1 = vector.load %arg1[%c0_2, %c1, %c0_3] : memref<8x32x32xf32, #tpu.memory_space<vmem>>, vector<8x28x32xf32>
    %c0_4 = arith.constant 0 : index
    %c2 = arith.constant 2 : index
    %c0_5 = arith.constant 0 : index
    %2 = vector.load %arg1[%c0_4, %c2, %c0_5] : memref<8x32x32xf32, #tpu.memory_space<vmem>>, vector<8x28x32xf32>
    %c0_6 = arith.constant 0 : index
    %c3 = arith.constant 3 : index
    %c0_7 = arith.constant 0 : index
    %3 = vector.load %arg1[%c0_6, %c3, %c0_7] : memref<8x32x32xf32, #tpu.memory_space<vmem>>, vector<8x28x32xf32>
    %c0_8 = arith.constant 0 : index
    %c4 = arith.constant 4 : index
    %c0_9 = arith.constant 0 : index
    %4 = vector.load %arg1[%c0_8, %c4, %c0_9] : memref<8x32x32xf32, #tpu.memory_space<vmem>>, vector<8x28x32xf32>
    %5 = tpu.concatenate %0, %1, %2, %3, %4 in 2 : vector<8x28x32xf32>, vector<8x28x32xf32>, vector<8x28x32xf32>, vector<8x28x32xf32>, vector<8x28x32xf32> -> vector<8x28x160xf32>
    %6 = vector.shape_cast %5 : vector<8x28x160xf32> to vector<224x160xf32>
    %7 = arith.truncf %6 : vector<224x160xf32> to vector<224x160xbf16>
    %c0_10 = arith.constant 0 : index
    %c0_11 = arith.constant 0 : index
    %8 = vector.load %arg2[%c0_10, %c0_11] : memref<160x168xbf16, #tpu.memory_space<vmem>>, vector<160x168xbf16>
    %cst = arith.constant dense<0.000000e+00> : vector<224x168xf32>
    %9 = tpu.matmul %7, %8, %cst {dimension_numbers = #tpu.dot_dimension_numbers<[1], [0], [0], [1], [0, 0, 1, 1], [], []>} : vector<224x160xbf16>, vector<160x168xbf16>, vector<224x168xf32> -> vector<224x168xf32>
    %c0_12 = arith.constant 0 : index
    %c0_13 = arith.constant 0 : index
    %10 = vector.load %arg3[%c0_12, %c0_13] : memref<1x168xf32, #tpu.memory_space<vmem>>, vector<1x168xf32>
    %11 = vector.broadcast %10 : vector<1x168xf32> to vector<224x168xf32>
    %12 = arith.addf %9, %11 : vector<224x168xf32>
    %cst_14 = arith.constant 0.666666686 : f32
    %13 = vector.broadcast %cst_14 : f32 to vector<224x168xf32>
    %14 = arith.mulf %13, %12 : vector<224x168xf32>
    %15 = math.tanh %14 : vector<224x168xf32>
    %cst_15 = arith.constant 1.715900e+00 : f32
    %16 = vector.broadcast %cst_15 : f32 to vector<224x168xf32>
    %17 = arith.mulf %16, %15 : vector<224x168xf32>
    %18 = vector.shape_cast %17 : vector<224x168xf32> to vector<112x2x168xf32>
    %19 = vector.extract_strided_slice %18 {offsets = [0, 0, 0], sizes = [112, 1, 168], strides = [1, 1, 1]} : vector<112x2x168xf32> to vector<112x1x168xf32>
    %20 = vector.shape_cast %19 : vector<112x1x168xf32> to vector<112x168xf32>
    %21 = vector.extract_strided_slice %18 {offsets = [0, 1, 0], sizes = [112, 1, 168], strides = [1, 1, 1]} : vector<112x2x168xf32> to vector<112x1x168xf32>
    %22 = vector.shape_cast %21 : vector<112x1x168xf32> to vector<112x168xf32>
    %23 = arith.addf %20, %22 : vector<112x168xf32>
    %24 = arith.truncf %23 : vector<112x168xf32> to vector<112x168xbf16>
    %c0_16 = arith.constant 0 : index
    %c0_17 = arith.constant 0 : index
    %25 = vector.load %arg4[%c0_16, %c0_17] : memref<168x84xbf16, #tpu.memory_space<vmem>>, vector<168x84xbf16>
    %cst_18 = arith.constant dense<0.000000e+00> : vector<112x84xf32>
    %26 = tpu.matmul %24, %25, %cst_18 {dimension_numbers = #tpu.dot_dimension_numbers<[1], [0], [0], [1], [0, 0, 1, 1], [], []>} : vector<112x168xbf16>, vector<168x84xbf16>, vector<112x84xf32> -> vector<112x84xf32>
    %c0_19 = arith.constant 0 : index
    %c0_20 = arith.constant 0 : index
    %27 = vector.load %arg5[%c0_19, %c0_20] : memref<1x84xf32, #tpu.memory_space<vmem>>, vector<1x84xf32>
    %28 = vector.broadcast %27 : vector<1x84xf32> to vector<112x84xf32>
    %29 = arith.mulf %26, %28 : vector<112x84xf32>
    %c0_21 = arith.constant 0 : index
    %c0_22 = arith.constant 0 : index
    %30 = vector.load %arg6[%c0_21, %c0_22] : memref<1x84xf32, #tpu.memory_space<vmem>>, vector<1x84xf32>
    %31 = vector.broadcast %30 : vector<1x84xf32> to vector<112x84xf32>
    %32 = arith.addf %29, %31 : vector<112x84xf32>
    %cst_23 = arith.constant 0.666666686 : f32
    %33 = vector.broadcast %cst_23 : f32 to vector<112x84xf32>
    %34 = arith.mulf %33, %32 : vector<112x84xf32>
    %35 = math.tanh %34 : vector<112x84xf32>
    %cst_24 = arith.constant 1.715900e+00 : f32
    %36 = vector.broadcast %cst_24 : f32 to vector<112x84xf32>
    %37 = arith.mulf %36, %35 : vector<112x84xf32>
    %38 = vector.shape_cast %37 : vector<112x84xf32> to vector<8x14x84xf32>
    %c0_25 = arith.constant 0 : index
    %c0_26 = arith.constant 0 : index
    %c0_27 = arith.constant 0 : index
    %39 = vector.load %arg18[%c0_25, %c0_26, %c0_27] : memref<8x14x84xf32, #tpu.memory_space<vmem>>, vector<8x14x84xf32>
    tpu.vector_store %arg18[%c0_25, %c0_26, %c0_27], %38 {strides = array<i32>} : memref<8x14x84xf32, #tpu.memory_space<vmem>>, vector<8x14x84xf32>,
    %c0_28 = arith.constant 0 : index
    %c0_29 = arith.constant 0 : index
    %c0_30 = arith.constant 0 : index
    %40 = vector.load %arg18[%c0_28, %c0_29, %c0_30] : memref<8x14x84xf32, #tpu.memory_space<vmem>>, vector<8x10x84xf32>
    %c0_31 = arith.constant 0 : index
    %c1_32 = arith.constant 1 : index
    %c0_33 = arith.constant 0 : index
    %41 = vector.load %arg18[%c0_31, %c1_32, %c0_33] : memref<8x14x84xf32, #tpu.memory_space<vmem>>, vector<8x10x84xf32>
    %c0_34 = arith.constant 0 : index
    %c2_35 = arith.constant 2 : index
    %c0_36 = arith.constant 0 : index
    %42 = vector.load %arg18[%c0_34, %c2_35, %c0_36] : memref<8x14x84xf32, #tpu.memory_space<vmem>>, vector<8x10x84xf32>
    %c0_37 = arith.constant 0 : index
    %c3_38 = arith.constant 3 : index
    %c0_39 = arith.constant 0 : index
    %43 = vector.load %arg18[%c0_37, %c3_38, %c0_39] : memref<8x14x84xf32, #tpu.memory_space<vmem>>, vector<8x10x84xf32>
    %c0_40 = arith.constant 0 : index
    %c4_41 = arith.constant 4 : index
    %c0_42 = arith.constant 0 : index
    %44 = vector.load %arg18[%c0_40, %c4_41, %c0_42] : memref<8x14x84xf32, #tpu.memory_space<vmem>>, vector<8x10x84xf32>
    %45 = tpu.concatenate %40, %41, %42, %43, %44 in 2 : vector<8x10x84xf32>, vector<8x10x84xf32>, vector<8x10x84xf32>, vector<8x10x84xf32>, vector<8x10x84xf32> -> vector<8x10x420xf32>
    %46 = vector.shape_cast %45 : vector<8x10x420xf32> to vector<80x420xf32>
    %47 = arith.truncf %46 : vector<80x420xf32> to vector<80x420xbf16>
    %c0_43 = arith.constant 0 : index
    %c0_44 = arith.constant 0 : index
    %48 = vector.load %arg7[%c0_43, %c0_44] : memref<420x160xbf16, #tpu.memory_space<vmem>>, vector<420x160xbf16>
    %cst_45 = arith.constant dense<0.000000e+00> : vector<80x160xf32>
    %49 = tpu.matmul %47, %48, %cst_45 {dimension_numbers = #tpu.dot_dimension_numbers<[1], [0], [0], [1], [0, 0, 1, 1], [], []>} : vector<80x420xbf16>, vector<420x160xbf16>, vector<80x160xf32> -> vector<80x160xf32>
    %c0_46 = arith.constant 0 : index
    %c0_47 = arith.constant 0 : index
    %50 = vector.load %arg8[%c0_46, %c0_47] : memref<1x160xf32, #tpu.memory_space<vmem>>, vector<1x160xf32>
    %51 = vector.broadcast %50 : vector<1x160xf32> to vector<80x160xf32>
    %52 = arith.addf %49, %51 : vector<80x160xf32>
    %cst_48 = arith.constant 0.666666686 : f32
    %53 = vector.broadcast %cst_48 : f32 to vector<80x160xf32>
    %54 = arith.mulf %53, %52 : vector<80x160xf32>
    %55 = math.tanh %54 : vector<80x160xf32>
    %cst_49 = arith.constant 1.715900e+00 : f32
    %56 = vector.broadcast %cst_49 : f32 to vector<80x160xf32>
    %57 = arith.mulf %56, %55 : vector<80x160xf32>
    %58 = vector.shape_cast %57 : vector<80x160xf32> to vector<40x2x160xf32>
    %59 = vector.extract_strided_slice %58 {offsets = [0, 0, 0], sizes = [40, 1, 160], strides = [1, 1, 1]} : vector<40x2x160xf32> to vector<40x1x160xf32>
    %60 = vector.shape_cast %59 : vector<40x1x160xf32> to vector<40x160xf32>
    %61 = vector.extract_strided_slice %58 {offsets = [0, 1, 0], sizes = [40, 1, 160], strides = [1, 1, 1]} : vector<40x2x160xf32> to vector<40x1x160xf32>
    %62 = vector.shape_cast %61 : vector<40x1x160xf32> to vector<40x160xf32>
    %63 = arith.addf %60, %62 : vector<40x160xf32>
    %64 = arith.truncf %63 : vector<40x160xf32> to vector<40x160xbf16>
    %c0_50 = arith.constant 0 : index
    %c0_51 = arith.constant 0 : index
    %65 = vector.load %arg9[%c0_50, %c0_51] : memref<160x80xbf16, #tpu.memory_space<vmem>>, vector<160x80xbf16>
    %cst_52 = arith.constant dense<0.000000e+00> : vector<40x80xf32>
    %66 = tpu.matmul %64, %65, %cst_52 {dimension_numbers = #tpu.dot_dimension_numbers<[1], [0], [0], [1], [0, 0, 1, 1], [], []>} : vector<40x160xbf16>, vector<160x80xbf16>, vector<40x80xf32> -> vector<40x80xf32>
    %c0_53 = arith.constant 0 : index
    %c0_54 = arith.constant 0 : index
    %67 = vector.load %arg10[%c0_53, %c0_54] : memref<1x80xf32, #tpu.memory_space<vmem>>, vector<1x80xf32>
    %68 = vector.broadcast %67 : vector<1x80xf32> to vector<40x80xf32>
    %69 = arith.mulf %66, %68 : vector<40x80xf32>
    %c0_55 = arith.constant 0 : index
    %c0_56 = arith.constant 0 : index
    %70 = vector.load %arg11[%c0_55, %c0_56] : memref<1x80xf32, #tpu.memory_space<vmem>>, vector<1x80xf32>
    %71 = vector.broadcast %70 : vector<1x80xf32> to vector<40x80xf32>
    %72 = arith.addf %69, %71 : vector<40x80xf32>
    %cst_57 = arith.constant 0.666666686 : f32
    %73 = vector.broadcast %cst_57 : f32 to vector<40x80xf32>
    %74 = arith.mulf %73, %72 : vector<40x80xf32>
    %75 = math.tanh %74 : vector<40x80xf32>
    %cst_58 = arith.constant 1.715900e+00 : f32
    %76 = vector.broadcast %cst_58 : f32 to vector<40x80xf32>
    %77 = arith.mulf %76, %75 : vector<40x80xf32>
    %78 = vector.shape_cast %77 : vector<40x80xf32> to vector<8x5x80xf32>
    %c0_59 = arith.constant 0 : index
    %c0_60 = arith.constant 0 : index
    %c0_61 = arith.constant 0 : index
    %79 = vector.load %arg19[%c0_59, %c0_60, %c0_61] : memref<8x5x80xf32, #tpu.memory_space<vmem>>, vector<8x5x80xf32>
    tpu.vector_store %arg19[%c0_59, %c0_60, %c0_61], %78 {strides = array<i32>} : memref<8x5x80xf32, #tpu.memory_space<vmem>>, vector<8x5x80xf32>,
    %c0_62 = arith.constant 0 : index
    %c0_63 = arith.constant 0 : index
    %c0_64 = arith.constant 0 : index
    %80 = vector.load %arg19[%c0_62, %c0_63, %c0_64] : memref<8x5x80xf32, #tpu.memory_space<vmem>>, vector<8x1x80xf32>
    %c0_65 = arith.constant 0 : index
    %c1_66 = arith.constant 1 : index
    %c0_67 = arith.constant 0 : index
    %81 = vector.load %arg19[%c0_65, %c1_66, %c0_67] : memref<8x5x80xf32, #tpu.memory_space<vmem>>, vector<8x1x80xf32>
    %c0_68 = arith.constant 0 : index
    %c2_69 = arith.constant 2 : index
    %c0_70 = arith.constant 0 : index
    %82 = vector.load %arg19[%c0_68, %c2_69, %c0_70] : memref<8x5x80xf32, #tpu.memory_space<vmem>>, vector<8x1x80xf32>
    %c0_71 = arith.constant 0 : index
    %c3_72 = arith.constant 3 : index
    %c0_73 = arith.constant 0 : index
    %83 = vector.load %arg19[%c0_71, %c3_72, %c0_73] : memref<8x5x80xf32, #tpu.memory_space<vmem>>, vector<8x1x80xf32>
    %c0_74 = arith.constant 0 : index
    %c4_75 = arith.constant 4 : index
    %c0_76 = arith.constant 0 : index
    %84 = vector.load %arg19[%c0_74, %c4_75, %c0_76] : memref<8x5x80xf32, #tpu.memory_space<vmem>>, vector<8x1x80xf32>
    %85 = tpu.concatenate %80, %81, %82, %83, %84 in 2 : vector<8x1x80xf32>, vector<8x1x80xf32>, vector<8x1x80xf32>, vector<8x1x80xf32>, vector<8x1x80xf32> -> vector<8x1x400xf32>
    %86 = vector.shape_cast %85 : vector<8x1x400xf32> to vector<8x400xf32>
    %87 = arith.truncf %86 : vector<8x400xf32> to vector<8x400xbf16>
    %c0_77 = arith.constant 0 : index
    %c0_78 = arith.constant 0 : index
    %88 = vector.load %arg12[%c0_77, %c0_78] : memref<400x120xbf16, #tpu.memory_space<vmem>>, vector<400x120xbf16>
    %cst_79 = arith.constant dense<0.000000e+00> : vector<8x120xf32>
    %89 = tpu.matmul %87, %88, %cst_79 {dimension_numbers = #tpu.dot_dimension_numbers<[1], [0], [0], [1], [0, 0, 1, 1], [], []>} : vector<8x400xbf16>, vector<400x120xbf16>, vector<8x120xf32> -> vector<8x120xf32>
    %c0_80 = arith.constant 0 : index
    %c0_81 = arith.constant 0 : index
    %90 = vector.load %arg13[%c0_80, %c0_81] : memref<1x120xf32, #tpu.memory_space<vmem>>, vector<1x120xf32>
    %91 = vector.broadcast %90 : vector<1x120xf32> to vector<8x120xf32>
    %92 = arith.addf %89, %91 : vector<8x120xf32>
    %cst_82 = arith.constant 0.666666686 : f32
    %93 = vector.broadcast %cst_82 : f32 to vector<8x120xf32>
    %94 = arith.mulf %93, %92 : vector<8x120xf32>
    %95 = math.tanh %94 : vector<8x120xf32>
    %cst_83 = arith.constant 1.715900e+00 : f32
    %96 = vector.broadcast %cst_83 : f32 to vector<8x120xf32>
    %97 = arith.mulf %96, %95 : vector<8x120xf32>
    %98 = arith.truncf %97 : vector<8x120xf32> to vector<8x120xbf16>
    %c0_84 = arith.constant 0 : index
    %c0_85 = arith.constant 0 : index
    %99 = vector.load %arg14[%c0_84, %c0_85] : memref<120x84xbf16, #tpu.memory_space<vmem>>, vector<120x84xbf16>
    %cst_86 = arith.constant dense<0.000000e+00> : vector<8x84xf32>
    %100 = tpu.matmul %98, %99, %cst_86 {dimension_numbers = #tpu.dot_dimension_numbers<[1], [0], [0], [1], [0, 0, 1, 1], [], []>} : vector<8x120xbf16>, vector<120x84xbf16>, vector<8x84xf32> -> vector<8x84xf32>
    %c0_87 = arith.constant 0 : index
    %c0_88 = arith.constant 0 : index
    %101 = vector.load %arg15[%c0_87, %c0_88] : memref<1x84xf32, #tpu.memory_space<vmem>>, vector<1x84xf32>
    %102 = vector.broadcast %101 : vector<1x84xf32> to vector<8x84xf32>
    %103 = arith.addf %100, %102 : vector<8x84xf32>
    %104 = vector.shape_cast %103 : vector<8x84xf32> to vector<8x1x84xf32>
    %c0_89 = arith.constant 0 : index
    %c0_90 = arith.constant 0 : index
    %105 = vector.load %arg16[%c0_89, %c0_90] : memref<10x84xf32, #tpu.memory_space<vmem>>, vector<10x84xf32>
    %106 = vector.shape_cast %105 : vector<10x84xf32> to vector<1x10x84xf32>
    %107 = vector.broadcast %104 : vector<8x1x84xf32> to vector<8x10x84xf32>
    %108 = vector.broadcast %106 : vector<1x10x84xf32> to vector<8x10x84xf32>
    %109 = arith.subf %107, %108 : vector<8x10x84xf32>
    %110 = arith.mulf %109, %109 : vector<8x10x84xf32>
    %cst_91 = arith.constant dense<0.000000e+00> : vector<8x10xf32>
    %111 = vector.multi_reduction <add>, %110, %cst_91 [2] : vector<8x10x84xf32> to vector<8x10xf32>
    %c0_92 = arith.constant 0 : index
    %c0_93 = arith.constant 0 : index
    %112 = vector.load %arg17[%c0_92, %c0_93] : memref<8x10xf32, #tpu.memory_space<vmem>>, vector<8x10xf32>
    tpu.vector_store %arg17[%c0_92, %c0_93], %111 {strides = array<i32>} : memref<8x10xf32, #tpu.memory_space<vmem>>, vector<8x10xf32>,
    return
  }
  func.func @transform_0(%arg0: i32) -> (i32, i32, i32) {
    %c0_i32 = arith.constant 0 : i32
    %c0_i32_0 = arith.constant 0 : i32
    %c0_i32_1 = arith.constant 0 : i32
    return %arg0, %c0_i32, %c0_i32_0 : i32, i32, i32
  }
  func.func @transform_1(%arg0: i32) -> (i32, i32) {
    %c0_i32 = arith.constant 0 : i32
    %c0_i32_0 = arith.constant 0 : i32
    %c0_i32_1 = arith.constant 0 : i32
    return %c0_i32, %c0_i32_0 : i32, i32
  }
  func.func @transform_2(%arg0: i32) -> (i32, i32) {
    %c0_i32 = arith.constant 0 : i32
    %c0_i32_0 = arith.constant 0 : i32
    %c0_i32_1 = arith.constant 0 : i32
    return %c0_i32, %c0_i32_0 : i32, i32
  }
  func.func @transform_3(%arg0: i32) -> (i32, i32) {
    %c0_i32 = arith.constant 0 : i32
    %c0_i32_0 = arith.constant 0 : i32
    %c0_i32_1 = arith.constant 0 : i32
    return %c0_i32, %c0_i32_0 : i32, i32
  }
  func.func @transform_4(%arg0: i32) -> (i32, i32) {
    %c0_i32 = arith.constant 0 : i32
    %c0_i32_0 = arith.constant 0 : i32
    %c0_i32_1 = arith.constant 0 : i32
    return %c0_i32, %c0_i32_0 : i32, i32
  }
  func.func @transform_5(%arg0: i32) -> (i32, i32) {
    %c0_i32 = arith.constant 0 : i32
    %c0_i32_0 = arith.constant 0 : i32
    %c0_i32_1 = arith.constant 0 : i32
    return %c0_i32, %c0_i32_0 : i32, i32
  }
  func.func @transform_6(%arg0: i32) -> (i32, i32) {
    %c0_i32 = arith.constant 0 : i32
    %c0_i32_0 = arith.constant 0 : i32
    %c0_i32_1 = arith.constant 0 : i32
    return %c0_i32, %c0_i32_0 : i32, i32
  }
  func.func @transform_7(%arg0: i32) -> (i32, i32) {
    %c0_i32 = arith.constant 0 : i32
    %c0_i32_0 = arith.constant 0 : i32
    %c0_i32_1 = arith.constant 0 : i32
    return %c0_i32, %c0_i32_0 : i32, i32
  }
  func.func @transform_8(%arg0: i32) -> (i32, i32) {
    %c0_i32 = arith.constant 0 : i32
    %c0_i32_0 = arith.constant 0 : i32
    %c0_i32_1 = arith.constant 0 : i32
    return %c0_i32, %c0_i32_0 : i32, i32
  }
  func.func @transform_9(%arg0: i32) -> (i32, i32) {
    %c0_i32 = arith.constant 0 : i32
    %c0_i32_0 = arith.constant 0 : i32
    %c0_i32_1 = arith.constant 0 : i32
    return %c0_i32, %c0_i32_0 : i32, i32
  }
  func.func @transform_10(%arg0: i32) -> (i32, i32) {
    %c0_i32 = arith.constant 0 : i32
    %c0_i32_0 = arith.constant 0 : i32
    %c0_i32_1 = arith.constant 0 : i32
    return %c0_i32, %c0_i32_0 : i32, i32
  }
  func.func @transform_11(%arg0: i32) -> (i32, i32) {
    %c0_i32 = arith.constant 0 : i32
    %c0_i32_0 = arith.constant 0 : i32
    %c0_i32_1 = arith.constant 0 : i32
    return %c0_i32, %c0_i32_0 : i32, i32
  }
  func.func @transform_12(%arg0: i32) -> (i32, i32) {
    %c0_i32 = arith.constant 0 : i32
    %c0_i32_0 = arith.constant 0 : i32
    %c0_i32_1 = arith.constant 0 : i32
    return %c0_i32, %c0_i32_0 : i32, i32
  }
  func.func @transform_13(%arg0: i32) -> (i32, i32) {
    %c0_i32 = arith.constant 0 : i32
    %c0_i32_0 = arith.constant 0 : i32
    %c0_i32_1 = arith.constant 0 : i32
    return %c0_i32, %c0_i32_0 : i32, i32
  }
  func.func @transform_14(%arg0: i32) -> (i32, i32) {
    %c0_i32 = arith.constant 0 : i32
    %c0_i32_0 = arith.constant 0 : i32
    %c0_i32_1 = arith.constant 0 : i32
    return %c0_i32, %c0_i32_0 : i32, i32
  }
  func.func @transform_15(%arg0: i32) -> (i32, i32) {
    %c0_i32 = arith.constant 0 : i32
    %c0_i32_0 = arith.constant 0 : i32
    %c0_i32_1 = arith.constant 0 : i32
    return %c0_i32, %c0_i32_0 : i32, i32
  }
  func.func @transform_16(%arg0: i32) -> (i32, i32) {
    %c0_i32 = arith.constant 0 : i32
    %c0_i32_0 = arith.constant 0 : i32
    return %arg0, %c0_i32 : i32, i32
  }
}

</mosaic_0001>

<bundles_post_ra>
// kernel: lenet5_forward.1
= control target key start
LH: loop header
LB: loop body
LE: loop exit
PB: predicated region body
PF: predicated region fallthrough
CT: control target
= control target key end

     0   :  { %s11674_s19 = smov 96   ;;  %s16118_s20 = smov 32   ;;  %vm598_vm0 = vcmask 261120   ;;  %vm631_vm1 = vcmask 523264   ;;  %vm664_vm2 = vcmask 785408   ;;  %vm5022_vm3 = vcmask 1043456   ;;  %s16100_s0 = inlined_call_operand.vmem [shape: f32[8,32,32], index: 0, kind: input, shape index: {}]   ;;  %s16101_s1 = inlined_call_operand.vmem [shape: bf16[160,168], index: 1, kind: input, shape index: {}]   ;;  %s16102_s3 = inlined_call_operand.vmem [shape: bf16[168,84], index: 3, kind: input, shape index: {}]   ;;  %s16103_s2 = inlined_call_operand.vmem [shape: f32[1,168], index: 2, kind: input, shape index: {}]   ;;  %s16104_s4 = inlined_call_operand.vmem [shape: f32[1,84], index: 4, kind: input, shape index: {}]   ;;  %s16105_s5 = inlined_call_operand.vmem [shape: f32[1,84], index: 5, kind: input, shape index: {}]   ;;  %s16106_s6 = inlined_call_operand.vmem [shape: bf16[420,160], index: 6, kind: input, shape index: {}]   ;;  %s16107_s8 = inlined_call_operand.vmem [shape: bf16[160,80], index: 8, kind: input, shape index: {}]   ;;  %s16108_s7 = inlined_call_operand.vmem [shape: f32[1,160], index: 7, kind: input, shape index: {}]   ;;  %s16109_s9 = inlined_call_operand.vmem [shape: f32[1,80], index: 9, kind: input, shape index: {}]   ;;  %s16110_s10 = inlined_call_operand.vmem [shape: f32[1,80], index: 10, kind: input, shape index: {}]   ;;  %s16111_s11 = inlined_call_operand.vmem [shape: bf16[400,120], index: 11, kind: input, shape index: {}]   ;;  %s16112_s13 = inlined_call_operand.vmem [shape: bf16[120,84], index: 13, kind: input, shape index: {}]   ;;  %s16113_s12 = inlined_call_operand.vmem [shape: f32[1,120], index: 12, kind: input, shape index: {}]   ;;  %s16114_s14 = inlined_call_operand.vmem [shape: f32[1,84], index: 14, kind: input, shape index: {}]   ;;  %s16115_s15 = inlined_call_operand.vmem [shape: f32[10,84], index: 15, kind: input, shape index: {}]   ;;  %s16116_s16 = inlined_call_operand.vmem [shape: f32[8,10], index: 16, kind: output, shape index: {}]  }
   0x1   :  { %16197 = sst [smem:[#allocation58_spill]] %s16100_s0  ;;  %s16120_s24 = smov 64   ;;  %v11314_v23 = vld [vmem:[%s16101_s1 + $0x4] ss:$8 sps:$4 sm:$0xff]   ;;  %v11316_v24 = vld [vmem:[%s16101_s1] ss:$8 sps:$4 sm:$0xff]  }
   0x2   :  { %s16198_s23 = sld [smem:[#allocation58_spill]]  ;;  %1131 = vmatprep.subr.bf16.mxu0 %v11314_v23  ;;  %v11317_v26 = vld [vmem:[%s16101_s1 + $0x14] ss:$8 sps:$4 sm:$0xff]   ;;  %v11319_v27 = vld [vmem:[%s16101_s1 + $0x10] ss:$8 sps:$4 sm:$0xff]   ;;  %s16199_s28 = smov 32  }
   0x3   :  { %1132 = vmatpush1.bf16.msra.mxu0 %v11316_v24  ;;  %v11320_v28 = vld [vmem:[%s16101_s1 + $0x24] ss:$8 sps:$4 sm:$0xff]   ;;  %v11322_v31 = vld [vmem:[%s16101_s1 + $0x20] ss:$8 sps:$4 sm:$0xff]   ;;  %v11323_v32 = vld [vmem:[%s16101_s1 + $0x34] ss:$8 sps:$4 sm:$0xff]  }
   0x4   :  { %1133 = vmatprep.subr.bf16.mxu0 %v11317_v26  ;;  %v11325_v35 = vld [vmem:[%s16101_s1 + $0x30] ss:$8 sps:$4 sm:$0xff]   ;;  %v11326_v36 = vld [vmem:[%s16101_s1 + $0x44] ss:$8 sps:$4 sm:$0xff]   ;;  %v11328_v39 = vld [vmem:[%s16101_s1 + $0x40] ss:$8 sps:$4 sm:$0xff]  }
   0x5   :  { %v11329_v42 = vld [vmem:[%s16101_s1 + $0x54] ss:$8 sps:$4 sm:$0xff]   ;;  %v11331_v45 = vld [vmem:[%s16101_s1 + $0x50] ss:$8 sps:$4 sm:$0xff]   ;;  %v11332_v48 = vld [vmem:[%s16101_s1 + $0x64] ss:$8 sps:$4 sm:$0xff]  }
   0x6   :  { %v11334_v55 = vld [vmem:[%s16101_s1 + $0x60] ss:$8 sps:$4 sm:$0xff]   ;;  %v11335_v58 = vld [vmem:[%s16101_s1 + $0x74] ss:$8 sps:$4 sm:$0xff]   ;;  %v11337_v60 = vld [vmem:[%s16101_s1 + $0x70] ss:$8 sps:$4 sm:$0xff]  }
   0x7   :  { %1134 = vmatpush1.bf16.msra.mxu0 %v11319_v27  ;;  %v11338_v61 = vld [vmem:[%s16101_s1 + $0x84] ss:$8 sps:$4 sm:$0xff]   ;;  %s16200_s21 = smov 64   ;;  %vm4518_vm4 = vcmask 1041409   ;;  %vm4521_vm5 = vcmask 1042434   ;;  %vm4524_vm6 = vcmask 1043459  }
   0x8   :  { %v150_v0 = vld [vmem:[%s16198_s23 + $0x3] sm:$0xff]  ;;  %v151_v1 = vld [vmem:[%s16198_s23 + $0xb] sm:$0xff]  ;;  %v89_v8 = vld [vmem:[%s16198_s23 + $0x19] sm:$0xf]  ;;  %1135 = vmatprep.subr.bf16.mxu0 %v11320_v28  ;;  %vm4527_vm7 = vcmask 1044484   ;;  %vm4530_vm8 = vcmask 1045509  }
   0x9   :  { %v86_v2 = vld [vmem:[%s16198_s23 + $0x1] sm:$0xff]  ;;  %v11154_v3 = vpack.i.bf16 %v151_v1, %v150_v0  ;;  %v87_v4 = vld [vmem:[%s16198_s23 + $0x9] sm:$0xff]  ;;  %v121_v10 = vld [vmem:[%s16198_s23 + $0x1a] sm:$0xf]  ;;  %vm4533_vm9 = vcmask 1046534   ;;  %vm4536_vm10 = vcmask 1047559  }
   0xa   :  { %v118_v5 = vld [vmem:[%s16198_s23 + $0x2] sm:$0xff]  ;;  %v11144_v6 = vpack.i.bf16 %v87_v4, %v86_v2  ;;  %v119_v7 = vld [vmem:[%s16198_s23 + $0xa] sm:$0xff]  ;;  %v152_v17 = vld [vmem:[%s16198_s23 + $0x13] sm:$0xff]  ;;  %vm5000_vm11 = vcmask 326656   ;;  %vm5733_vm12 = vcmask 685056   ;;  %vm5731_vm13 = vcmask 687104  }
   0xb   :  { %11155 = vrot.lane.b32.xlu1 %v11154_v3, %s11674_s19  ;;  %v11149_v9 = vpack.i.bf16 %v119_v7, %v118_v5  ;;  %v88_v11 = vld [vmem:[%s16198_s23 + $0x11] sm:$0xff]  ;;  %v94_v12 = vld [vmem:[%s16198_s23 + $0x41] sm:$0xff]  ;;  %v153_v19 = vld [vmem:[%s16198_s23 + $0x1b] sm:$0xf]  ;;  %1136 = vmatpush1.bf16.msra.mxu0 %v11322_v31  ;;  %vm6117_vm14 = vcmask 1014784   ;;  %vm6134_vm15 = vcmask 654336  }
   0xc   :  { %11145 = vrot.lane.b32.xlu0 %v11144_v6, %s16118_s20  ;;  %v90_v13 = vld [vmem:[%s16198_s23 + $0x21] sm:$0xff]  ;;  %v11159_v14 = vpack.i.bf16 %v94_v12, %v88_v11  ;;  %v120_v20 = vld [vmem:[%s16198_s23 + $0x12] sm:$0xff]  ;;  %v91_v30 = vld [vmem:[%s16198_s23 + $0x29] sm:$0xff]  ;;  %1137 = vmatprep.subr.bf16.mxu0 %v11323_v32  ;;  %s11684_s17 = smov 112  }
   0xd   :  { %v122_v15 = vld [vmem:[%s16198_s23 + $0x22] sm:$0xff]  ;;  %v92_v29 = vld [vmem:[%s16198_s23 + $0x31] sm:$0xff]  ;;  %v125_v40 = vld [vmem:[%s16198_s23 + $0x3a] sm:$0xf] }
   0xe   :  { %v154_v16 = vld [vmem:[%s16198_s23 + $0x23] sm:$0xff]  ;;  %v124_v33 = vld [vmem:[%s16198_s23 + $0x32] sm:$0xff]  ;;  %v157_v47 = vld [vmem:[%s16198_s23 + $0x3b] sm:$0xf] }
   0xf   :  { %252 = vrot.lane.b32.xlu1 %v89_v8, %s16118_s20  ;;  %v158_v18 = vld [vmem:[%s16198_s23 + $0x43] sm:$0xff]  ;;  %v156_v37 = vld [vmem:[%s16198_s23 + $0x33] sm:$0xff]  ;;  %v155_v38 = vld [vmem:[%s16198_s23 + $0x2b] sm:$0xff]  ;;  %1138 = vmatpush1.bf16.msra.mxu0 %v11325_v35 }
  0x10   :  { %11150 = vrot.lane.b32.xlu0 %v11149_v9, %s16120_s24  ;;  %v126_v21 = vld [vmem:[%s16198_s23 + $0x42] sm:$0xff]  ;;  %v11169_v22 = vpack.i.bf16 %v158_v18, %v152_v17  ;;  %v123_v34 = vld [vmem:[%s16198_s23 + $0x2a] sm:$0xff]  ;;  %1139 = vmatprep.subr.bf16.mxu0 %v11326_v36  ;;  %v93_v44 = vld [vmem:[%s16198_s23 + $0x39] sm:$0xf] }
  0x11   :  { %v11164_v25 = vpack.i.bf16 %v126_v21, %v120_v20  ;;  %v95_v41 = vld [vmem:[%s16198_s23 + $0x49] sm:$0xff]  ;;  %v96_v43 = vld [vmem:[%s16198_s23 + $0x51] sm:$0xff]  ;;  %v98_v62 = vld [vmem:[%s16198_s23 + $0x61] sm:$0xff] }
  0x12   :  { %v11174_v46 = vpack.i.bf16 %v96_v43, %v95_v41  ;;  %v159_v49 = vld [vmem:[%s16198_s23 + $0x4b] sm:$0xff]  ;;  %v160_v50 = vld [vmem:[%s16198_s23 + $0x53] sm:$0xff]  ;;  %v130_v2 = vld [vmem:[%s16198_s23 + $0x62] sm:$0xff] }
  0x13   :  { %380 = vrot.lane.b32.xlu1 %v121_v10, %s16120_s24  ;;  %1140 = vmatpush1.bf16.msra.mxu0 %v11328_v39  ;;  %v127_v51 = vld [vmem:[%s16198_s23 + $0x4a] sm:$0xff]  ;;  %v128_v52 = vld [vmem:[%s16198_s23 + $0x52] sm:$0xff]  ;;  %v11184_v57 = vpack.i.bf16 %v160_v50, %v159_v49  ;;  %v129_v7 = vld [vmem:[%s16198_s23 + $0x5a] sm:$0xf] }
  0x14   :  { %254 = vrot.lane.b32.xlu0 %v90_v13, %s16118_s20  ;;  %1141 = vmatprep.subr.bf16.mxu0 %v11329_v42  ;;  %v182_v53 = vld [vmem:[%s16198_s23 + $0x4] sm:$0xff]  ;;  %v183_v54 = vld [vmem:[%s16198_s23 + $0xc] sm:$0xff]  ;;  %v11179_v59 = vpack.i.bf16 %v128_v52, %v127_v51  ;;  %v11341_v1 = vld [vmem:[%s16101_s1 + $0x94] ss:$8 sps:$4 sm:$0xff]  }
  0x15   :  { %v930_v56 = vpack.c.bf16 %v183_v54, %v182_v53  ;;  %v99_v63 = vld [vmem:[%s16198_s23 + $0x69] sm:$0xff]  ;;  %v97_v5 = vld [vmem:[%s16198_s23 + $0x59] sm:$0xf]  ;;  %v100_v9 = vld [vmem:[%s16198_s23 + $0x71] sm:$0xff] }
  0x16   :  { %v11340_v0 = vld [vmem:[%s16101_s1 + $0x80] ss:$8 sps:$4 sm:$0xff]   ;;  %v11343_v4 = vld [vmem:[%s16101_s1 + $0x90] ss:$8 sps:$4 sm:$0xff]   ;;  %s11682_s1 = smov 80  }
  0x17   :  { %11160 = vrot.lane.b32.xlu1 %v11159_v14, %s16118_s20  ;;  %1142 = vmatpush1.bf16.msra.mxu0 %v11331_v45  ;;  %v131_v3 = vld [vmem:[%s16198_s23 + $0x6a] sm:$0xff]  ;;  %v161_v10 = vld [vmem:[%s16198_s23 + $0x5b] sm:$0xf]  ;;  %v132_v11 = vld [vmem:[%s16198_s23 + $0x72] sm:$0xff] }
  0x18   :  { %382 = vrot.lane.b32.xlu0 %v122_v15, %s16120_s24  ;;  %1143 = vmatprep.subr.bf16.mxu0 %v11332_v48  ;;  %v163_v6 = vld [vmem:[%s16198_s23 + $0x6b] sm:$0xff]  ;;  %v162_v8 = vld [vmem:[%s16198_s23 + $0x63] sm:$0xff]  ;;  %v101_v12 = vld [vmem:[%s16198_s23 + $0x79] sm:$0xf] }
  0x19   :  { %10714 = vmatprep.mubr.msk.bf16.mxu0 %vm598_vm0, %v930_v56  ;;  %v164_v13 = vld [vmem:[%s16198_s23 + $0x73] sm:$0xff]  ;;  %v102_v14 = vld [vmem:[%s16198_s23 + $0x81] sm:$0xff]  ;;  %v103_v15 = vld [vmem:[%s16198_s23 + $0x89] sm:$0xff] }
  0x1a   :  { %v11189_v17 = vpack.i.bf16 %v103_v15, %v102_v14  ;;  %v166_v18 = vld [vmem:[%s16198_s23 + $0x83] sm:$0xff]  ;;  %v165_v20 = vld [vmem:[%s16198_s23 + $0x7b] sm:$0xf]  ;;  %v108_v42 = vld [vmem:[%s16198_s23 + $0xb1] sm:$0xff] }
  0x1b   :  { %510 = vrot.lane.b32.xlu1 %v154_v16, %s11674_s19  ;;  %1144 = vmatpush1.bf16.msra.mxu0 %v11334_v55  ;;  %v133_v16 = vld [vmem:[%s16198_s23 + $0x7a] sm:$0xf]  ;;  %v134_v21 = vld [vmem:[%s16198_s23 + $0x82] sm:$0xff]  ;;  %v139_v41 = vld [vmem:[%s16198_s23 + $0xaa] sm:$0xff] }
  0x1c   :  { %508 = vrot.lane.b32.xlu0 %v153_v19, %s11674_s19  ;;  %1145 = vmatprep.subr.bf16.mxu0 %v11335_v58  ;;  %v167_v19 = vld [vmem:[%s16198_s23 + $0x8b] sm:$0xff]  ;;  %v105_v26 = vld [vmem:[%s16198_s23 + $0x99] sm:$0xf]  ;;  %v138_v27 = vld [vmem:[%s16198_s23 + $0xa2] sm:$0xff] }
  0x1d   :  { %v11199_v23 = vpack.i.bf16 %v167_v19, %v166_v18  ;;  %v137_v28 = vld [vmem:[%s16198_s23 + $0x9a] sm:$0xf]  ;;  %v170_v36 = vld [vmem:[%s16198_s23 + $0xa3] sm:$0xff]  ;;  %v171_v43 = vld [vmem:[%s16198_s23 + $0xab] sm:$0xff] }
  0x1e   :  { %v169_v31 = vld [vmem:[%s16198_s23 + $0x9b] sm:$0xf]  ;;  %v107_v39 = vld [vmem:[%s16198_s23 + $0xa9] sm:$0xff]  ;;  %v144_v49 = vld [vmem:[%s16198_s23 + $0xd2] sm:$0xff] }
  0x1f   :  { %11170 = vrot.lane.b32.xlu1 %v11169_v22, %s11674_s19  ;;  %1146 = vmatpush1.bf16.msra.mxu0 %v11337_v60  ;;  %v135_v22 = vld [vmem:[%s16198_s23 + $0x8a] sm:$0xff]  ;;  %v109_v45 = vld [vmem:[%s16198_s23 + $0xb9] sm:$0xf] }
  0x20   :  { %11165 = vrot.lane.b32.xlu0 %v11164_v25, %s16120_s24  ;;  %1147 = vmatprep.subr.bf16.mxu0 %v11338_v61  ;;  %v11194_v24 = vpack.i.bf16 %v135_v22, %v134_v21  ;;  %v106_v25 = vld [vmem:[%s16198_s23 + $0xa1] sm:$0xff]  ;;  %v143_v48 = vld [vmem:[%s16198_s23 + $0xca] sm:$0xff]  ;;  %v141_v51 = vld [vmem:[%s16198_s23 + $0xba] sm:$0xf] }
  0x21   :  { %v111_v52 = vld [vmem:[%s16198_s23 + $0xc9] sm:$0xff]  ;;  %v112_v53 = vld [vmem:[%s16198_s23 + $0xd1] sm:$0xff]  ;;  %v11224_v55 = vpack.i.bf16 %v144_v49, %v143_v48  ;;  %v185_v56 = vld [vmem:[%s16198_s23 + $0x1c] sm:$0xf] }
  0x22   :  { %v175_v60 = vld [vmem:[%s16198_s23 + $0xcb] sm:$0xff]  ;;  %v176_v61 = vld [vmem:[%s16198_s23 + $0xd3] sm:$0xff] }
  0x23   :  { %258 = vrot.lane.b32.xlu1 %v92_v29, %s16199_s28  ;;  %1148 = vmatpush1.bf16.msra.mxu0 %v11340_v0  ;;  %v104_v29 = vld [vmem:[%s16198_s23 + $0x91] sm:$0xff]  ;;  %v145_v49 = vld [vmem:[%s16198_s23 + $0xda] sm:$0xf] }
  0x24   :  { %256 = vrot.lane.b32.xlu0 %v91_v30, %s16199_s28  ;;  %1149 = vmatprep.subr.bf16.mxu0 %v11341_v1  ;;  %v110_v30 = vld [vmem:[%s16198_s23 + $0xc1] sm:$0xff]  ;;  %v147_v21 = vld [vmem:[%s16198_s23 + $0xea] sm:$0xff] }
  0x25   :  { %v11204_v32 = vpack.i.bf16 %v110_v30, %v104_v29  ;;  %v12154_v1 = vld [vmem:[%s16198_s23 + $0x24] sm:$0xff] }
  0x26   :  { %v146_v29 = vld [vmem:[%s16198_s23 + $0xe2] sm:$0xff] }
  0x27   :  { %386 = vrot.lane.b32.xlu1 %v124_v33, %s16120_s24  ;;  %1150 = vmatpush1.bf16.msra.mxu0 %v11343_v4  ;;  %v136_v33 = vld [vmem:[%s16198_s23 + $0x92] sm:$0xff] }
  0x28   :  { %384 = vrot.lane.b32.xlu0 %v123_v34, %s16120_s24  ;;  %v142_v34 = vld [vmem:[%s16198_s23 + $0xc2] sm:$0xff] }
  0x29   :  { %v11209_v35 = vpack.i.bf16 %v142_v34, %v136_v33  ;;  %v178_v34 = vld [vmem:[%s16198_s23 + $0xe3] sm:$0xff] }
  0x2b   :  { %514 = vrot.lane.b32.xlu1 %v156_v37, %s11674_s19  ;;  %v168_v37 = vld [vmem:[%s16198_s23 + $0x93] sm:$0xff] }
  0x2c   :  { %512 = vrot.lane.b32.xlu0 %v155_v38, %s11674_s19  ;;  %v174_v38 = vld [vmem:[%s16198_s23 + $0xc3] sm:$0xff] }
  0x2f   :  { %388 = vrot.lane.b32.xlu1 %v125_v40, %s16120_s24  ;;  %v11214_v40 = vpack.i.bf16 %v174_v38, %v168_v37 }
  0x30   :  { %260 = vrot.lane.b32.xlu0 %v93_v44, %s16199_s28  ;;  %v140_v44 = vld [vmem:[%s16198_s23 + $0xb2] sm:$0xff] }
  0x33   :  { %11175 = vrot.lane.b32.xlu1 %v11174_v46, %s16199_s28  ;;  %v172_v46 = vld [vmem:[%s16198_s23 + $0xb3] sm:$0xff] }
  0x34   :  { %516 = vrot.lane.b32.xlu0 %v157_v47, %s11674_s19  ;;  %v173_v47 = vld [vmem:[%s16198_s23 + $0xbb] sm:$0xf] }
  0x37   :  { %11185 = vrot.lane.b32.xlu1 %v11184_v57, %s11674_s19 }
  0x38   :  { %11180 = vrot.lane.b32.xlu0 %v11179_v59, %s16200_s21  ;;  %v11219_v59 = vpack.i.bf16 %v112_v53, %v111_v52 }
  0x3b   :  { %270 = vrot.lane.b32.xlu1 %v98_v62, %s16199_s28  ;;  %v54_v62 = vld [vmem:[%s16198_s23] sm:$0xff] }
  0x3c   :  { %272 = vrot.lane.b32.xlu0 %v99_v63, %s16199_s28  ;;  %v55_v63 = vld [vmem:[%s16198_s23 + $0x8] sm:$0xff] }
  0x3f   :  { %398 = vrot.lane.b32.xlu1 %v130_v2, %s16200_s21 }
  0x40   :  { %400 = vrot.lane.b32.xlu0 %v131_v3, %s16200_s21  ;;  %v10663_v3 = vcombine.low %v185_v56, %v12154_v1 }
  0x43   :  { %268 = vrot.lane.b32.xlu1 %v97_v5, %s16199_s28 }
  0x44   :  { %528 = vrot.lane.b32.xlu0 %v163_v6, %s11674_s19  ;;  %v11229_v6 = vpack.i.bf16 %v176_v61, %v175_v60  ;;  %v188_v61 = vld [vmem:[%s16198_s23 + $0x34] sm:$0xff] }
  0x47   :  { %396 = vrot.lane.b32.xlu1 %v129_v7, %s16200_s21  ;;  %v184_v7 = vld [vmem:[%s16198_s23 + $0x14] sm:$0xff] }
  0x48   :  { %526 = vrot.lane.b32.xlu0 %v162_v8, %s11674_s19  ;;  %v932_v19 = vpack.c.bf16 %v10663_v3, %v184_v7 }
  0x4b   :  { %274 = vrot.lane.b32.xlu1 %v100_v9, %s16199_s28 }
  0x4c   :  { %524 = vrot.lane.b32.xlu0 %v161_v10, %s11674_s19 }
  0x4f   :  { %402 = vrot.lane.b32.xlu1 %v132_v11, %s16200_s21 }
  0x50   :  { %276 = vrot.lane.b32.xlu0 %v101_v12, %s16199_s28  ;;  %v115_v12 = vld [vmem:[%s16198_s23 + $0xe9] sm:$0xff] }
  0x53   :  { %530 = vrot.lane.b32.xlu1 %v164_v13, %s11674_s19 }
  0x54   :  { %404 = vrot.lane.b32.xlu0 %v133_v16, %s16200_s21 }
  0x57   :  { %11190 = vrot.lane.b32.xlu1 %v11189_v17, %s16199_s28 }
  0x58   :  { %532 = vrot.lane.b32.xlu0 %v165_v20, %s11674_s19 }
  0x5b   :  { %11200 = vrot.lane.b32.xlu1 %v11199_v23, %s11674_s19  ;;  %v114_v23 = vld [vmem:[%s16198_s23 + $0xe1] sm:$0xff] }
  0x5c   :  { %11195 = vrot.lane.b32.xlu0 %v11194_v24, %s16200_s21 }
  0x5f   :  { %286 = vrot.lane.b32.xlu1 %v106_v25, %s16199_s28  ;;  %v179_v25 = vld [vmem:[%s16198_s23 + $0xeb] sm:$0xff] }
  0x60   :  { %284 = vrot.lane.b32.xlu0 %v105_v26, %s16199_s28  ;;  %v57_v26 = vld [vmem:[%s16198_s23 + $0x18] sm:$0xf] }
  0x63   :  { %414 = vrot.lane.b32.xlu1 %v138_v27, %s16200_s21  ;;  %v58_v27 = vld [vmem:[%s16198_s23 + $0x20] sm:$0xff] }
  0x64   :  { %412 = vrot.lane.b32.xlu0 %v137_v28, %s16200_s21 }
  0x67   :  { %540 = vrot.lane.b32.xlu1 %v169_v31, %s11674_s19 }
  0x68   :  { %11205 = vrot.lane.b32.xlu0 %v11204_v32, %s16199_s28 }
  0x6b   :  { %11210 = vrot.lane.b32.xlu1 %v11209_v35, %s16200_s21 }
  0x6c   :  { %542 = vrot.lane.b32.xlu0 %v170_v36, %s11674_s19  ;;  %v56_v36 = vld [vmem:[%s16198_s23 + $0x10] sm:$0xff] }
  0x6f   :  { %288 = vrot.lane.b32.xlu1 %v107_v39, %s16199_s28  ;;  %v113_v39 = vld [vmem:[%s16198_s23 + $0xd9] sm:$0xf] }
  0x70   :  { %11215 = vrot.lane.b32.xlu0 %v11214_v40, %s11674_s19 }
  0x73   :  { %416 = vrot.lane.b32.xlu1 %v139_v41, %s16200_s21 }
  0x74   :  { %290 = vrot.lane.b32.xlu0 %v108_v42, %s16199_s28 }
  0x77   :  { %544 = vrot.lane.b32.xlu1 %v171_v43, %s11674_s19 }
  0x78   :  { %418 = vrot.lane.b32.xlu0 %v140_v44, %s16200_s21 }
  0x7b   :  { %292 = vrot.lane.b32.xlu1 %v109_v45, %s16199_s28 }
  0x7c   :  { %546 = vrot.lane.b32.xlu0 %v172_v46, %s11674_s19  ;;  %v177_v46 = vld [vmem:[%s16198_s23 + $0xdb] sm:$0xf] }
  0x7d   :  { %v11156_v50 = vpop.permute.xlu1 %11155 }
  0x7e   :  { %v11146_v54 = vpop.permute.xlu0 %11145  ;;  %v11158_v8 = vunpack.i.h.bf16 %v11156_v50  ;;  %v11157_v9 = vunpack.i.l.bf16 %v11156_v50 }
  0x7f   :  { %548 = vrot.lane.b32.xlu1 %v173_v47, %s11674_s19  ;;  %v11148_v57 = vunpack.i.h.bf16 %v11146_v54  ;;  %v11147_v58 = vunpack.i.l.bf16 %v11146_v54  ;;  %v117_v54 = vld [vmem:[%s16198_s23 + $0xf9] sm:$0xf] }
  0x80   :  { %420 = vrot.lane.b32.xlu0 %v141_v51, %s16200_s21 }
  0x81   :  { %v253_v0 = vpop.permute.xlu1 %252  ;;  %v599_v10 = vsel %vm598_vm0, %v54_v62, %v11147_v58  ;;  %v600_v11 = vsel %vm598_vm0, %v55_v63, %v11148_v57  ;;  %v116_v57 = vld [vmem:[%s16198_s23 + $0xf1] sm:$0xff]  ;;  %v59_v58 = vld [vmem:[%s16198_s23 + $0x28] sm:$0xff]  ;;  %v149_v62 = vld [vmem:[%s16198_s23 + $0xfa] sm:$0xf] }
  0x82   :  { %v11151_v2 = vpop.permute.xlu0 %11150  ;;  %v602_v31 = vsel %vm598_vm0, %v57_v26, %v253_v0 }
  0x83   :  { %v11153_v4 = vunpack.i.h.bf16 %v11151_v2  ;;  %v11152_v5 = vunpack.i.l.bf16 %v11151_v2  ;;  %11225 = vrot.lane.b32.xlu1 %v11224_v55, %s16200_s21  ;;  %v60_v55 = vld [vmem:[%s16198_s23 + $0x30] sm:$0xff] }
  0x84   :  { %11220 = vrot.lane.b32.xlu0 %v11219_v59, %s16199_s28  ;;  %v187_v2 = vld [vmem:[%s16198_s23 + $0x2c] sm:$0xff] }
  0x85   :  { %v381_v13 = vpop.permute.xlu1 %380  ;;  %v632_v14 = vsel %vm631_vm1, %v599_v10, %v11152_v5  ;;  %v633_v15 = vsel %vm631_vm1, %v600_v11, %v11153_v4  ;;  %v148_v4 = vld [vmem:[%s16198_s23 + $0xf2] sm:$0xff] }
  0x86   :  { %v255_v16 = vpop.permute.xlu0 %254  ;;  %v665_v17 = vsel %vm664_vm2, %v632_v14, %v11157_v9  ;;  %v666_v18 = vsel %vm664_vm2, %v633_v15, %v11158_v8  ;;  %v635_v35 = vsel %vm631_vm1, %v602_v31, %v381_v13  ;;  %v61_v13 = vld [vmem:[%s16198_s23 + $0x38] sm:$0xf] }
  0x87   :  { %304 = vrot.lane.b32.xlu1 %v115_v12, %s16199_s28  ;;  %v929_v20 = vpack.c.bf16 %v666_v18, %v665_v17  ;;  %v603_v32 = vsel %vm598_vm0, %v58_v27, %v255_v16  ;;  %v181_v14 = vld [vmem:[%s16198_s23 + $0xfb] sm:$0xf]  ;;  %v180_v17 = vld [vmem:[%s16198_s23 + $0xf3] sm:$0xff]  ;;  %v62_v27 = vld [vmem:[%s16198_s23 + $0x40] sm:$0xff] }
  0x88   :  { %11230 = vrot.lane.b32.xlu0 %v11229_v6, %s11674_s19 }
  0x89   :  { %1164 = vmatmul.mubr.bf16.vlgmr.msra.gmra.mrb[0].mxu0 %v929_v20  ;;  %v12176_v22 = vpop.permute.xlu1 %11160 }
  0x8a   :  { %v383_v24 = vpop.permute.xlu0 %382  ;;  %10715 = vmatprep.mubr.msk.bf16.mxu0 %vm598_vm0, %v932_v19  ;;  %v11162_v33 = vunpack.i.l.bf16 %v12176_v22 }
  0x8b   :  { %432 = vrot.lane.b32.xlu1 %v147_v21, %s16200_s21  ;;  %v636_v37 = vsel %vm631_vm1, %v603_v32, %v383_v24  ;;  %v11163_v24 = vunpack.i.h.bf16 %v12176_v22 }
  0x8c   :  { %302 = vrot.lane.b32.xlu0 %v114_v23, %s16199_s28  ;;  %v601_v45 = vsel %vm598_vm0, %v56_v36, %v11162_v33  ;;  %v190_v36 = vld [vmem:[%s16198_s23 + $0x44] sm:$0xff] }
  0x8d   :  { %v511_v28 = vpop.permute.xlu1 %510  ;;  %v607_v33 = vsel %vm598_vm0, %v62_v27, %v11163_v24 }
  0x8e   :  { %v509_v30 = vpop.permute.xlu0 %508  ;;  %v669_v40 = vsel %vm664_vm2, %v636_v37, %v511_v28 }
  0x8f   :  { %560 = vrot.lane.b32.xlu1 %v179_v25, %s11674_s19  ;;  %v668_v41 = vsel %vm664_vm2, %v635_v35, %v509_v30  ;;  %v769_v10 = vcombine.high %v669_v40, %v12154_v1 }
  0x90   :  { %430 = vrot.lane.b32.xlu0 %v146_v29, %s16200_s21  ;;  %v10662_v47 = vcombine.low %v668_v41, %v669_v40  ;;  %v191_v41 = vld [vmem:[%s16198_s23 + $0x4c] sm:$0xff] }
  0x91   :  { %v12209_v38 = vpop.permute.xlu1 %11170 }
  0x92   :  { %v11172_v42 = vunpack.i.l.bf16 %v12209_v38  ;;  %v12217_v43 = vpop.permute.xlu0 %11165 }
  0x93   :  { %v11167_v44 = vunpack.i.l.bf16 %v12217_v43  ;;  %558 = vrot.lane.b32.xlu1 %v178_v34, %s11674_s19  ;;  %v11168_v28 = vunpack.i.h.bf16 %v12217_v43  ;;  %v11173_v34 = vunpack.i.h.bf16 %v12209_v38 }
  0x94   :  { %300 = vrot.lane.b32.xlu0 %v113_v39, %s16199_s28 }
  0x95   :  { %v259_v48 = vpop.permute.xlu1 %258  ;;  %v634_v50 = vsel %vm631_vm1, %v601_v45, %v11167_v44  ;;  %v640_v40 = vsel %vm631_vm1, %v607_v33, %v11168_v28 }
  0x96   :  { %v257_v51 = vpop.permute.xlu0 %256  ;;  %v667_v52 = vsel %vm664_vm2, %v634_v50, %v11172_v42  ;;  %v605_v60 = vsel %vm598_vm0, %v60_v55, %v259_v48  ;;  %v192_v42 = vld [vmem:[%s16198_s23 + $0x54] sm:$0xff] }
  0x97   :  { %556 = vrot.lane.b32.xlu1 %v177_v46, %s11674_s19  ;;  %v931_v53 = vpack.c.bf16 %v10662_v47, %v667_v52  ;;  %v604_v63 = vsel %vm598_vm0, %v59_v58, %v257_v51  ;;  %v63_v46 = vld [vmem:[%s16198_s23 + $0x48] sm:$0xff]  ;;  %v64_v47 = vld [vmem:[%s16198_s23 + $0x50] sm:$0xff]  ;;  %v673_v51 = vsel %vm664_vm2, %v640_v40, %v11173_v34  ;;  %v938_v52 = vpack.c.bf16 %v192_v42, %v191_v41 }
  0x98   :  { %428 = vrot.lane.b32.xlu0 %v145_v49, %s16200_s21  ;;  %v196_v41 = vld [vmem:[%s16198_s23 + $0x74] sm:$0xff] }
  0x99   :  { %1174 = vmatmul.mubr.bf16.gmra.mrb[4].mxu0 %v931_v53  ;;  %v387_v56 = vpop.permute.xlu1 %386 }
  0x9a   :  { %v385_v59 = vpop.permute.xlu0 %384  ;;  %v638_v0 = vsel %vm631_vm1, %v605_v60, %v387_v56 }
  0x9b   :  { %308 = vrot.lane.b32.xlu1 %v117_v54, %s16199_s28  ;;  %v637_v5 = vsel %vm631_vm1, %v604_v63, %v385_v59  ;;  %v67_v63 = vld [vmem:[%s16198_s23 + $0x68] sm:$0xff] }
  0x9c   :  { %306 = vrot.lane.b32.xlu0 %v116_v57, %s16199_s28 }
  0x9d   :  { %v515_v3 = vpop.permute.xlu1 %514 }
  0x9e   :  { %v671_v6 = vsel %vm664_vm2, %v638_v0, %v515_v3  ;;  %v513_v7 = vpop.permute.xlu0 %512 }
  0x9f   :  { %v772_v8 = vcombine.low %v671_v6, %v188_v61  ;;  %v670_v9 = vsel %vm664_vm2, %v637_v5, %v513_v7  ;;  %436 = vrot.lane.b32.xlu1 %v149_v62, %s16200_s21  ;;  %v773_v22 = vcombine.high %v671_v6, %v188_v61 }
  0xa0   :  { %v770_v11 = vcombine.low %v670_v9, %v187_v2  ;;  %v771_v12 = vcombine.high %v670_v9, %v187_v2  ;;  %434 = vrot.lane.b32.xlu0 %v148_v4, %s16200_s21  ;;  %v10664_v18 = vcombine.low %v769_v10, %v670_v9  ;;  %v194_v9 = vld [vmem:[%s16198_s23 + $0x64] sm:$0xff] }
  0xa1   :  { %v10667_v15 = vcombine.high %v187_v2, %v772_v8  ;;  %v389_v16 = vpop.permute.xlu1 %388  ;;  %v193_v8 = vld [vmem:[%s16198_s23 + $0x5c] sm:$0xf]  ;;  %v66_v10 = vld [vmem:[%s16198_s23 + $0x60] sm:$0xff] }
  0xa2   :  { %v10665_v19 = vcombine.high %v12154_v1, %v770_v11  ;;  %v261_v20 = vpop.permute.xlu0 %260  ;;  %v10666_v21 = vcombine.low %v771_v12, %v671_v6  ;;  %v189_v1 = vld [vmem:[%s16198_s23 + $0x3c] sm:$0xf]  ;;  %v195_v6 = vld [vmem:[%s16198_s23 + $0x6c] sm:$0xff] }
  0xa3   :  { %v606_v23 = vsel %vm598_vm0, %v61_v13, %v261_v20  ;;  %564 = vrot.lane.b32.xlu1 %v181_v14, %s11674_s19 }
  0xa4   :  { %562 = vrot.lane.b32.xlu0 %v180_v17, %s11674_s19  ;;  %v934_v25 = vpack.c.bf16 %v10667_v15, %v10665_v19  ;;  %v933_v26 = vpack.c.bf16 %v10666_v21, %v10664_v18  ;;  %v639_v31 = vsel %vm631_vm1, %v606_v23, %v389_v16  ;;  %v10671_v15 = vcombine.low %v193_v8, %v194_v9  ;;  %v65_v19 = vld [vmem:[%s16198_s23 + $0x58] sm:$0xf] }
  0xa5   :  { %v11176_v29 = vpop.permute.xlu1 %11175 }
  0xa6   :  { %v517_v30 = vpop.permute.xlu0 %516  ;;  %10716 = vmatprep.mubr.msk.bf16.mxu0 %vm598_vm0, %v934_v25  ;;  %v11178_v43 = vunpack.i.h.bf16 %v11176_v29  ;;  %v11177_v44 = vunpack.i.l.bf16 %v11176_v29 }
  0xa7   :  { %v672_v32 = vsel %vm664_vm2, %v639_v31, %v517_v30  ;;  %1184 = vmatmul.mubr.bf16.gmra.mrb[8].mxu0 %v933_v26 }
  0xa8   :  { %v774_v35 = vcombine.low %v672_v32, %v189_v1  ;;  %v10668_v37 = vcombine.low %v773_v22, %v672_v32  ;;  %v608_v55 = vsel %vm598_vm0, %v63_v46, %v11177_v44  ;;  %v609_v56 = vsel %vm598_vm0, %v64_v47, %v11178_v43  ;;  %v68_v32 = vld [vmem:[%s16198_s23 + $0x70] sm:$0xff] }
  0xa9   :  { %v11186_v39 = vpop.permute.xlu1 %11185 }
  0xaa   :  { %v10669_v38 = vcombine.high %v188_v61, %v774_v35  ;;  %v11181_v45 = vpop.permute.xlu0 %11180  ;;  %v935_v54 = vpack.c.bf16 %v673_v51, %v10668_v37  ;;  %v11188_v57 = vunpack.i.h.bf16 %v11186_v39  ;;  %v11187_v58 = vunpack.i.l.bf16 %v11186_v39  ;;  %v69_v39 = vld [vmem:[%s16198_s23 + $0x78] sm:$0xf] }
  0xab   :  { %v11183_v48 = vunpack.i.h.bf16 %v11181_v45  ;;  %v11182_v49 = vunpack.i.l.bf16 %v11181_v45 }
  0xac   :  { %v936_v50 = vpack.c.bf16 %v190_v36, %v10669_v38  ;;  %v197_v38 = vld [vmem:[%s16198_s23 + $0x7c] sm:$0xf] }
  0xad   :  { %v271_v53 = vpop.permute.xlu1 %270  ;;  %v641_v60 = vsel %vm631_vm1, %v608_v55, %v11182_v49  ;;  %v642_v61 = vsel %vm631_vm1, %v609_v56, %v11183_v48  ;;  %v199_v55 = vld [vmem:[%s16198_s23 + $0x8c] sm:$0xff] }
  0xae   :  { %v273_v59 = vpop.permute.xlu0 %272  ;;  %10717 = vmatprep.mubr.msk.bf16.mxu0 %vm598_vm0, %v936_v50  ;;  %v674_v2 = vsel %vm664_vm2, %v641_v60, %v11187_v58  ;;  %v675_v3 = vsel %vm664_vm2, %v642_v61, %v11188_v57  ;;  %v611_v16 = vsel %vm598_vm0, %v66_v10, %v271_v53 }
  0xaf   :  { %1194 = vmatmul.mubr.bf16.gmra.mrb[12].mxu0 %v935_v54  ;;  %v612_v4 = vsel %vm598_vm0, %v67_v63, %v273_v59  ;;  %v937_v7 = vpack.c.bf16 %v675_v3, %v674_v2  ;;  %v198_v54 = vld [vmem:[%s16198_s23 + $0x84] sm:$0xff] }
  0xb0   :  { %10718 = vmatprep.mubr.msk.bf16.mxu0 %vm598_vm0, %v938_v52  ;;  %v71_v63 = vld [vmem:[%s16198_s23 + $0x88] sm:$0xff] }
  0xb1   :  { %v399_v62 = vpop.permute.xlu1 %398 }
  0xb2   :  { %v401_v0 = vpop.permute.xlu0 %400  ;;  %v644_v18 = vsel %vm631_vm1, %v611_v16, %v399_v62  ;;  %v70_v62 = vld [vmem:[%s16198_s23 + $0x80] sm:$0xff] }
  0xb3   :  { %v645_v11 = vsel %vm631_vm1, %v612_v4, %v401_v0  ;;  %v944_v4 = vpack.c.bf16 %v199_v55, %v198_v54  ;;  %v203_v54 = vld [vmem:[%s16198_s23 + $0xac] sm:$0xff] }
  0xb5   :  { %v269_v5 = vpop.permute.xlu1 %268 }
  0xb6   :  { %v529_v12 = vpop.permute.xlu0 %528  ;;  %v610_v26 = vsel %vm598_vm0, %v65_v19, %v269_v5 }
  0xb7   :  { %v678_v13 = vsel %vm664_vm2, %v645_v11, %v529_v12  ;;  %1204 = vmatmul.mubr.bf16.gmra.mrb[16].mxu0 %v937_v7 }
  0xb8   :  { %v784_v14 = vcombine.low %v678_v13, %v195_v6  ;;  %v785_v51 = vcombine.high %v678_v13, %v195_v6 }
  0xb9   :  { %v397_v17 = vpop.permute.xlu1 %396 }
  0xba   :  { %v527_v20 = vpop.permute.xlu0 %526  ;;  %v10673_v21 = vcombine.high %v194_v9, %v784_v14  ;;  %v643_v28 = vsel %vm631_vm1, %v610_v26, %v397_v17 }
  0xbb   :  { %v677_v23 = vsel %vm664_vm2, %v644_v18, %v527_v20  ;;  %v200_v18 = vld [vmem:[%s16198_s23 + $0x94] sm:$0xff] }
  0xbc   :  { %v783_v24 = vcombine.high %v677_v23, %v194_v9  ;;  %v940_v25 = vpack.c.bf16 %v10673_v21, %v10671_v15  ;;  %v12388_v15 = vld [vmem:[%s16198_s23 + $0xa4] sm:$0xff] }
  0xbd   :  { %v275_v27 = vpop.permute.xlu1 %274 }
  0xbe   :  { %v525_v29 = vpop.permute.xlu0 %524  ;;  %10719 = vmatprep.mubr.msk.bf16.mxu0 %vm598_vm0, %v940_v25  ;;  %v10672_v30 = vcombine.low %v783_v24, %v678_v13  ;;  %v613_v35 = vsel %vm598_vm0, %v68_v32, %v275_v27  ;;  %v74_v27 = vld [vmem:[%s16198_s23 + $0xa0] sm:$0xff]  ;;  %v72_v32 = vld [vmem:[%s16198_s23 + $0x90] sm:$0xff] }
  0xbf   :  { %v676_v1 = vsel %vm664_vm2, %v643_v28, %v525_v29  ;;  %v73_v29 = vld [vmem:[%s16198_s23 + $0x98] sm:$0xf] }
  0xc0   :  { %v10670_v31 = vcombine.low %v676_v1, %v677_v23 }
  0xc1   :  { %v403_v22 = vpop.permute.xlu1 %402 }
  0xc2   :  { %v277_v33 = vpop.permute.xlu0 %276  ;;  %v939_v34 = vpack.c.bf16 %v10672_v30, %v10670_v31  ;;  %v646_v37 = vsel %vm631_vm1, %v613_v35, %v403_v22 }
  0xc3   :  { %v614_v43 = vsel %vm598_vm0, %v69_v39, %v277_v33 }
  0xc4   :  { %1214 = vmatmul.mubr.bf16.gmra.mrb[20].mxu0 %v939_v34 }
  0xc5   :  { %v531_v36 = vpop.permute.xlu1 %530 }
  0xc6   :  { %v405_v40 = vpop.permute.xlu0 %404  ;;  %v679_v42 = vsel %vm664_vm2, %v646_v37, %v531_v36 }
  0xc7   :  { %v786_v45 = vcombine.low %v679_v42, %v196_v41  ;;  %v647_v46 = vsel %vm631_vm1, %v614_v43, %v405_v40  ;;  %v787_v48 = vcombine.high %v679_v42, %v196_v41  ;;  %v10674_v61 = vcombine.low %v785_v51, %v679_v42 }
  0xc9   :  { %v11191_v44 = vpop.permute.xlu1 %11190  ;;  %v10675_v56 = vcombine.high %v195_v6, %v786_v45  ;;  %v201_v6 = vld [vmem:[%s16198_s23 + $0x9c] sm:$0xf] }
  0xca   :  { %v533_v47 = vpop.permute.xlu0 %532  ;;  %v11193_v57 = vunpack.i.h.bf16 %v11191_v44  ;;  %v11192_v58 = vunpack.i.l.bf16 %v11191_v44  ;;  %v10679_v16 = vcombine.low %v201_v6, %v12388_v15 }
  0xcb   :  { %v680_v49 = vsel %vm664_vm2, %v647_v46, %v533_v47  ;;  %v75_v46 = vld [vmem:[%s16198_s23 + $0xa8] sm:$0xff] }
  0xcc   :  { %v788_v50 = vcombine.low %v680_v49, %v197_v38  ;;  %v10676_v52 = vcombine.low %v787_v48, %v680_v49  ;;  %v615_v8 = vsel %vm598_vm0, %v70_v62, %v11192_v58  ;;  %v616_v9 = vsel %vm598_vm0, %v71_v63, %v11193_v57  ;;  %v204_v58 = vld [vmem:[%s16198_s23 + $0xb4] sm:$0xff] }
  0xcd   :  { %v11201_v53 = vpop.permute.xlu1 %11200  ;;  %v946_v23 = vpack.c.bf16 %v10679_v16, %v200_v18  ;;  %v77_v63 = vld [vmem:[%s16198_s23 + $0xb8] sm:$0xf] }
  0xce   :  { %v10677_v59 = vcombine.high %v196_v41, %v788_v50  ;;  %v11196_v60 = vpop.permute.xlu0 %11195  ;;  %v941_v7 = vpack.c.bf16 %v10676_v52, %v10674_v61  ;;  %v11203_v10 = vunpack.i.h.bf16 %v11201_v53  ;;  %v11202_v11 = vunpack.i.l.bf16 %v11201_v53  ;;  %v76_v52 = vld [vmem:[%s16198_s23 + $0xb0] sm:$0xff] }
  0xcf   :  { %v11198_v0 = vunpack.i.h.bf16 %v11196_v60  ;;  %v11197_v2 = vunpack.i.l.bf16 %v11196_v60 }
  0xd0   :  { %v942_v3 = vpack.c.bf16 %v10677_v59, %v10675_v56 }
  0xd1   :  { %v287_v5 = vpop.permute.xlu1 %286  ;;  %v648_v13 = vsel %vm631_vm1, %v615_v8, %v11197_v2  ;;  %v649_v14 = vsel %vm631_vm1, %v616_v9, %v11198_v0  ;;  %v205_v9 = vld [vmem:[%s16198_s23 + $0xbc] sm:$0xf] }
  0xd2   :  { %v285_v12 = vpop.permute.xlu0 %284  ;;  %10720 = vmatprep.mubr.msk.bf16.mxu0 %vm598_vm0, %v942_v3  ;;  %v681_v20 = vsel %vm664_vm2, %v648_v13, %v11202_v11  ;;  %v682_v21 = vsel %vm664_vm2, %v649_v14, %v11203_v10  ;;  %v619_v30 = vsel %vm598_vm0, %v74_v27, %v287_v5 }
  0xd3   :  { %1224 = vmatmul.mubr.bf16.gmra.mrb[24].mxu0 %v941_v7  ;;  %v943_v25 = vpack.c.bf16 %v682_v21, %v681_v20  ;;  %v618_v34 = vsel %vm598_vm0, %v73_v29, %v285_v12  ;;  %v206_v20 = vld [vmem:[%s16198_s23 + $0xc4] sm:$0xff] }
  0xd4   :  { %10721 = vmatprep.mubr.msk.bf16.mxu0 %vm598_vm0, %v944_v4  ;;  %v78_v21 = vld [vmem:[%s16198_s23 + $0xc0] sm:$0xff] }
  0xd5   :  { %v415_v17 = vpop.permute.xlu1 %414 }
  0xd6   :  { %v413_v19 = vpop.permute.xlu0 %412  ;;  %v652_v22 = vsel %vm631_vm1, %v619_v30, %v415_v17  ;;  %v207_v30 = vld [vmem:[%s16198_s23 + $0xcc] sm:$0xff] }
  0xd7   :  { %v651_v37 = vsel %vm631_vm1, %v618_v34, %v413_v19  ;;  %v79_v34 = vld [vmem:[%s16198_s23 + $0xc8] sm:$0xff] }
  0xd9   :  { %v541_v24 = vpop.permute.xlu1 %540 }
  0xda   :  { %v12397_v26 = vpop.permute.xlu0 %11205  ;;  %v684_v40 = vsel %vm664_vm2, %v651_v37, %v541_v24  ;;  %v83_v37 = vld [vmem:[%s16198_s23 + $0xe8] sm:$0xff] }
  0xdb   :  { %1234 = vmatmul.mubr.bf16.gmra.mrb[28].mxu0 %v943_v25  ;;  %v11207_v31 = vunpack.i.l.bf16 %v12397_v26  ;;  %v11208_v19 = vunpack.i.h.bf16 %v12397_v26 }
  0xdc   :  { %10722 = vmatprep.mubr.msk.bf16.mxu0 %vm598_vm0, %v946_v23 }
  0xdd   :  { %v12403_v28 = vpop.permute.xlu1 %11210  ;;  %v617_v41 = vsel %vm598_vm0, %v72_v32, %v11207_v31  ;;  %v208_v31 = vld [vmem:[%s16198_s23 + $0xd4] sm:$0xff] }
  0xde   :  { %v543_v1 = vpop.permute.xlu0 %542  ;;  %v11212_v33 = vunpack.i.l.bf16 %v12403_v28  ;;  %v11213_v23 = vunpack.i.h.bf16 %v12403_v28 }
  0xdf   :  { %v685_v35 = vsel %vm664_vm2, %v652_v22, %v543_v1  ;;  %v623_v22 = vsel %vm598_vm0, %v78_v21, %v11208_v19 }
  0xe0   :  { %v10678_v43 = vcombine.low %v684_v40, %v685_v35  ;;  %v650_v44 = vsel %vm631_vm1, %v617_v41, %v11212_v33  ;;  %v797_v3 = vcombine.high %v685_v35, %v12388_v15  ;;  %v80_v35 = vld [vmem:[%s16198_s23 + $0xd0] sm:$0xff]  ;;  %v952_v40 = vpack.c.bf16 %v208_v31, %v207_v30 }
  0xe1   :  { %v289_v36 = vpop.permute.xlu1 %288  ;;  %v84_v30 = vld [vmem:[%s16198_s23 + $0xf0] sm:$0xff] }
  0xe2   :  { %v12418_v39 = vpop.permute.xlu0 %11215  ;;  %v620_v49 = vsel %vm598_vm0, %v75_v46, %v289_v36  ;;  %v656_v36 = vsel %vm631_vm1, %v623_v22, %v11213_v23 }
  0xe3   :  { %v11217_v42 = vunpack.i.l.bf16 %v12418_v39  ;;  %v11218_v27 = vunpack.i.h.bf16 %v12418_v39 }
  0xe5   :  { %v417_v38 = vpop.permute.xlu1 %416  ;;  %v683_v45 = vsel %vm664_vm2, %v650_v44, %v11217_v42  ;;  %v689_v39 = vsel %vm664_vm2, %v656_v36, %v11218_v27  ;;  %v11352_v27 = vld [vmem:[%s16102_s3 + $0x20] sm:$0xff]  }
  0xe6   :  { %v291_v47 = vpop.permute.xlu0 %290  ;;  %v945_v48 = vpack.c.bf16 %v10678_v43, %v683_v45  ;;  %v653_v51 = vsel %vm631_vm1, %v620_v49, %v417_v38  ;;  %v11348_v38 = vld [vmem:[%s16102_s3] sm:$0xff]  }
  0xe7   :  { %v621_v56 = vsel %vm598_vm0, %v76_v52, %v291_v47  ;;  %v210_v52 = vld [vmem:[%s16198_s23 + $0xe4] sm:$0xff] }
  0xe8   :  { %1244 = vmatmul.mubr.bf16.gmra.mrb[32].mxu0 %v945_v48 }
  0xe9   :  { %v545_v50 = vpop.permute.xlu1 %544 }
  0xea   :  { %v419_v53 = vpop.permute.xlu0 %418  ;;  %v686_v55 = vsel %vm664_vm2, %v653_v51, %v545_v50  ;;  %v12491_v50 = vld [vmem:[%s16198_s23 + $0xec] sm:$0xff]  ;;  %v209_v51 = vld [vmem:[%s16198_s23 + $0xdc] sm:$0xf] }
  0xeb   :  { %v798_v59 = vcombine.low %v686_v55, %v203_v54  ;;  %v654_v60 = vsel %vm631_vm1, %v621_v56, %v419_v53  ;;  %v799_v62 = vcombine.high %v686_v55, %v203_v54  ;;  %v10680_v11 = vcombine.low %v797_v3, %v686_v55 }
  0xec   :  { %v16124_v53 = vmov 0   ;;  %v10687_v3 = vcombine.low %v209_v51, %v210_v52 }
  0xed   :  { %v293_v57 = vpop.permute.xlu1 %292  ;;  %v10681_v7 = vcombine.high %v12388_v15, %v798_v59  ;;  %5026 = vmatprep.subr.bf16.mxu1 %v16124_v53  ;;  %8940 = vmatprep.subr.bf16.mxu0 %v16124_v53 }
  0xee   :  { %v547_v61 = vpop.permute.xlu0 %546  ;;  %v622_v6 = vsel %vm598_vm0, %v77_v63, %v293_v57  ;;  %5027 = vmatpush1.bf16.msra.mxu1 %v11348_v38 }
  0xef   :  { %v687_v0 = vsel %vm664_vm2, %v654_v60, %v547_v61  ;;  %5028 = vmatprep.subr.bf16.mxu1 %v16124_v53  ;;  %v11349_v60 = vld [vmem:[%s16102_s3 + $0x8] sm:$0xff]  }
  0xf0   :  { %v800_v2 = vcombine.low %v687_v0, %v204_v58  ;;  %v10682_v4 = vcombine.low %v799_v62, %v687_v0  ;;  %v801_v24 = vcombine.high %v687_v0, %v204_v58 }
  0xf1   :  { %v549_v5 = vpop.permute.xlu1 %548 }
  0xf2   :  { %v10683_v8 = vcombine.high %v203_v54, %v800_v2  ;;  %v421_v10 = vpop.permute.xlu0 %420  ;;  %v947_v18 = vpack.c.bf16 %v10682_v4, %v10680_v11  ;;  %v82_v54 = vld [vmem:[%s16198_s23 + $0xe0] sm:$0xff]  ;;  %5029 = vmatpush1.bf16.msra.mxu1 %v11349_v60 }
  0xf3   :  { %v655_v12 = vsel %vm631_vm1, %v622_v6, %v421_v10  ;;  %5030 = vmatprep.subr.bf16.mxu1 %v16124_v53 }
  0xf4   :  { %v688_v13 = vsel %vm664_vm2, %v655_v12, %v549_v5  ;;  %v948_v14 = vpack.c.bf16 %v10683_v8, %v10681_v7  ;;  %v81_v12 = vld [vmem:[%s16198_s23 + $0xd8] sm:$0xf] }
  0xf5   :  { %v802_v16 = vcombine.low %v688_v13, %v205_v9  ;;  %v11226_v17 = vpop.permute.xlu1 %11225  ;;  %v10684_v29 = vcombine.low %v801_v24, %v688_v13  ;;  %v11350_v9 = vld [vmem:[%s16102_s3 + $0x10] sm:$0xff]  }
  0xf6   :  { %v11221_v15 = vpop.permute.xlu0 %11220  ;;  %10723 = vmatprep.mubr.msk.bf16.mxu0 %vm598_vm0, %v948_v14  ;;  %v11228_v41 = vunpack.i.h.bf16 %v11226_v17  ;;  %v11227_v42 = vunpack.i.l.bf16 %v11226_v17  ;;  %5031 = vmatpush1.bf16.msra.mxu1 %v11350_v9  ;;  %v11351_v17 = vld [vmem:[%s16102_s3 + $0x18] sm:$0xff]  }
  0xf7   :  { %v10685_v25 = vcombine.high %v204_v58, %v802_v16  ;;  %1254 = vmatmul.mubr.bf16.gmra.mrb[36].mxu0 %v947_v18  ;;  %v11223_v32 = vunpack.i.h.bf16 %v11221_v15  ;;  %v11222_v28 = vunpack.i.l.bf16 %v11221_v15  ;;  %v949_v44 = vpack.c.bf16 %v689_v39, %v10684_v29  ;;  %5032 = vmatprep.subr.bf16.mxu1 %v16124_v53 }
  0xf9   :  { %v305_v26 = vpop.permute.xlu1 %304  ;;  %v950_v1 = vpack.c.bf16 %v206_v20, %v10685_v25  ;;  %v624_v45 = vsel %vm598_vm0, %v79_v34, %v11222_v28  ;;  %v625_v46 = vsel %vm598_vm0, %v80_v35, %v11223_v32  ;;  %v213_v32 = vld [vmem:[%s16198_s23 + $0xfc] sm:$0xf]  ;;  %v212_v34 = vld [vmem:[%s16198_s23 + $0xf4] sm:$0xff] }
  0xfa   :  { %v11231_v33 = vpop.permute.xlu0 %11230  ;;  %v628_v55 = vsel %vm598_vm0, %v83_v37, %v305_v26  ;;  %v657_v58 = vsel %vm631_vm1, %v624_v45, %v11227_v42  ;;  %v658_v59 = vsel %vm631_vm1, %v625_v46, %v11228_v41  ;;  %5033 = vmatpush1.bf16.msra.mxu1 %v11351_v17  ;;  %v85_v26 = vld [vmem:[%s16198_s23 + $0xf8] sm:$0xf]  ;;  %v11353_v42 = vld [vmem:[%s16102_s3 + $0x28] sm:$0xff]   ;;  %s11681_s23 = smov 124  }
  0xfb   :  { %10724 = vmatprep.mubr.msk.bf16.mxu0 %vm598_vm0, %v950_v1  ;;  %v11233_v47 = vunpack.i.h.bf16 %v11231_v33  ;;  %v11232_v48 = vunpack.i.l.bf16 %v11231_v33  ;;  %5034 = vmatprep.subr.bf16.mxu1 %v16124_v53 }
  0xfd   :  { %v433_v43 = vpop.permute.xlu1 %432  ;;  %v690_v63 = vsel %vm664_vm2, %v657_v58, %v11232_v48  ;;  %v691_v0 = vsel %vm664_vm2, %v658_v59, %v11233_v47 }
  0xfe   :  { %v303_v49 = vpop.permute.xlu0 %302  ;;  %v661_v56 = vsel %vm631_vm1, %v628_v55, %v433_v43  ;;  %v951_v8 = vpack.c.bf16 %v691_v0, %v690_v63  ;;  %5035 = vmatpush1.bf16.msra.mxu1 %v11352_v27  ;;  %v11357_v55 = vld [vmem:[%s16102_s3 + $0x48] sm:$0xff]  }
  0xff   :  { %1264 = vmatmul.mubr.bf16.gmra.mrb[40].mxu0 %v949_v44  ;;  %v627_v4 = vsel %vm598_vm0, %v82_v54, %v303_v49  ;;  %5036 = vmatprep.subr.bf16.mxu1 %v16124_v53  ;;  %v11355_v54 = vld [vmem:[%s16102_s3 + $0x38] sm:$0xff]  }
 0x100   :  { %10725 = vmatprep.mubr.msk.bf16.mxu0 %vm598_vm0, %v952_v40 }
 0x101   :  { %v561_v57 = vpop.permute.xlu1 %560 }
 0x102   :  { %v694_v61 = vsel %vm664_vm2, %v661_v56, %v561_v57  ;;  %v431_v62 = vpop.permute.xlu0 %430  ;;  %5037 = vmatpush1.bf16.msra.mxu1 %v11353_v42  ;;  %v16122_v56 = vlaneseq  ;;  %v11358_v57 = vld [vmem:[%s16102_s3 + $0x50] ss:$0 sps:$4 sm:$0xff]  }
 0x103   :  { %v812_v2 = vcombine.low %v694_v61, %v12491_v50  ;;  %v660_v5 = vsel %vm631_vm1, %v627_v4, %v431_v62  ;;  %v813_v43 = vcombine.high %v694_v61, %v12491_v50  ;;  %5038 = vmatprep.subr.bf16.mxu1 %v16124_v53  ;;  %v5024_v58 = vsel %vm5022_vm3, %v11358_v57, 0 }
 0x104   :  { %v12586_v59 = vshrl.u32 %v16122_v56, 7 }
 0x105   :  { %v559_v7 = vpop.permute.xlu1 %558  ;;  %v10689_v6 = vcombine.high %v210_v52, %v812_v2 }
 0x106   :  { %v693_v10 = vsel %vm664_vm2, %v660_v5, %v559_v7  ;;  %v301_v11 = vpop.permute.xlu0 %300  ;;  %16201 = vst [vmem:[#allocation4_spill] sm:$0xff] %v12586_v59  ;;  %v12589_v60 = vsub.s32 0, %v12586_v59  ;;  %v16123_v62 = vsub.s32 1, %v12586_v59 }
 0x107   :  { %1274 = vmatmul.mubr.bf16.gmra.mrb[44].mxu0 %v951_v8  ;;  %v954_v13 = vpack.c.bf16 %v10689_v6, %v10687_v3  ;;  %v811_v14 = vcombine.high %v693_v10, %v210_v52  ;;  %v626_v18 = vsel %vm598_vm0, %v81_v12, %v301_v11  ;;  %v11354_v52 = vld [vmem:[%s16102_s3 + $0x30] sm:$0xff]  }
 0x108   :  { %5039 = vmatpush1.bf16.msra.mxu1 %v11354_v52 }
 0x109   :  { %v557_v16 = vpop.permute.xlu1 %556  ;;  %10726 = vmatprep.mubr.msk.bf16.mxu0 %vm598_vm0, %v954_v13  ;;  %v10688_v21 = vcombine.low %v811_v14, %v694_v61  ;;  %5040 = vmatprep.subr.bf16.mxu1 %v16124_v53  ;;  %v977_v61 = vld [vmem:[%s16103_s2] sm:$0x3]  ;;  %v11678_v14 = vmov 1983009808  }
 0x10a   :  { %v429_v19 = vpop.permute.xlu0 %428  ;;  %v12596_v63 = vrot.slane %v977_v61, %v12589_v60  ;;  %v12600_v0 = vrot.slane %v977_v61, %v16123_v62 }
 0x10b   :  { %v659_v15 = vsel %vm631_vm1, %v626_v18, %v429_v19 }
 0x10c   :  { %v692_v20 = vsel %vm664_vm2, %v659_v15, %v557_v16  ;;  %5041 = vmatpush1.bf16.msra.mxu1 %v11355_v54  ;;  %v1531_v16 = vunpack.c.l.s4 %v11678_v14 }
 0x10d   :  { %v10686_v23 = vcombine.low %v692_v20, %v693_v10  ;;  %v309_v24 = vpop.permute.xlu1 %308  ;;  %5042 = vmatprep.subr.bf16.mxu1 %v16124_v53 }
 0x10e   :  { %v307_v25 = vpop.permute.xlu0 %306  ;;  %v630_v22 = vsel %vm598_vm0, %v85_v26, %v309_v24  ;;  %v1532_v17 = vunpack.c.0.s8 %v1531_v16 }
 0x10f   :  { %v953_v29 = vpack.c.bf16 %v10688_v21, %v10686_v23  ;;  %v629_v28 = vsel %vm598_vm0, %v84_v30, %v307_v25 }
 0x110   :  { %v12607_v24 = vsub.s32 %v1532_v17, %v12586_v59 }
 0x111   :  { %1284 = vmatmul.mubr.bf16.gmra.mrb[48].mxu0 %v953_v29  ;;  %v437_v1 = vpop.permute.xlu1 %436 }
 0x112   :  { %v435_v31 = vpop.permute.xlu0 %434  ;;  %v663_v33 = vsel %vm631_vm1, %v630_v22, %v437_v1  ;;  %16202 = vst [vmem:[#allocation5_spill] sm:$0xff] %v12607_v24 }
 0x113   :  { %v662_v36 = vsel %vm631_vm1, %v629_v28, %v435_v31 }
 0x115   :  { %v565_v35 = vpop.permute.xlu1 %564 }
 0x116   :  { %v696_v37 = vsel %vm664_vm2, %v663_v33, %v565_v35  ;;  %v563_v39 = vpop.permute.xlu0 %562 }
 0x117   :  { %v816_v40 = vcombine.low %v696_v37, %v213_v32  ;;  %v695_v41 = vsel %vm664_vm2, %v662_v36, %v563_v39  ;;  %vm7389_vm2 = vcmask 1041408  }
 0x118   :  { %v814_v44 = vcombine.low %v695_v41, %v212_v34  ;;  %v815_v38 = vcombine.high %v695_v41, %v212_v34  ;;  %v10690_v46 = vcombine.low %v813_v43, %v695_v41  ;;  %v12615_v41 = vsub.s32 2, %v12586_v59 }
 0x119   :  { %v10693_v45 = vcombine.high %v212_v34, %v816_v40 }
 0x11a   :  { %v10691_v47 = vcombine.high %v12491_v50, %v814_v44  ;;  %v10692_v48 = vcombine.low %v815_v38, %v696_v37  ;;  %v11356_v50 = vld [vmem:[%s16102_s3 + $0x40] sm:$0xff]  }
 0x11b   :  { %5043 = vmatpush1.bf16.msra.mxu1 %v11356_v50 }
 0x11c   :  { %v956_v49 = vpack.c.bf16 %v10693_v45, %v10691_v47  ;;  %v955_v51 = vpack.c.bf16 %v10692_v48, %v10690_v46  ;;  %5044 = vmatprep.subr.bf16.mxu1 %v16124_v53 }
 0x11e   :  { %10727 = vmatprep.mubr.msk.bf16.mxu0 %vm598_vm0, %v956_v49 }
 0x11f   :  { %1294 = vmatmul.mubr.bf16.gmra.mrb[52].mxu0 %v955_v51  ;;  %5045 = vmatpush1.bf16.msra.mxu1 %v11357_v55 }
 0x120   :  { %5046 = vmatprep.subr.bf16.mxu1 %v16124_v53 }
 0x123   :  { %5047 = vmatpush1.bf16.msra.mxu1 %v5024_v58 }
 0x15c   :  { %v1165_v2 = vpop.f32.mrb[0].mxu0 }
 0x15d   :  { %v1166_v3 = vadd.f32 %v1165_v2, %v12596_v63  ;;  %v1167_v4 = vpop.f32.mrb[1].mxu0 }
 0x15e   :  { %v1168_v5 = vadd.f32 %v1167_v4, %v12600_v0  ;;  %v1169_v7 = vpop.f32.mrb[2].mxu0 }
 0x15f   :  { %v1304_v6 = vmul.f32 0.6666667, %v1166_v3  ;;  %v1170_v8 = vadd.f32 %v1169_v7, %v12596_v63  ;;  %v1171_v9 = vpop.f32.mrb[3].mxu0 }
 0x160   :  { %v1305_v10 = vmul.f32 0.6666667, %v1168_v5  ;;  %v1172_v11 = vadd.f32 %v1171_v9, %v12600_v0 }
 0x161   :  { %11482 = vtanh.f32 %v1304_v6  ;;  %v1306_v12 = vmul.f32 0.6666667, %v1170_v8 }
 0x162   :  { %11484 = vtanh.f32 %v1305_v10  ;;  %v1307_v13 = vmul.f32 0.6666667, %v1172_v11 }
 0x163   :  { %11486 = vtanh.f32 %v1306_v12 }
 0x164   :  { %11488 = vtanh.f32 %v1307_v13 }
 0x16b   :  { %v11483_v18 = vpop.eup %11482 }
 0x16c   :  { %v11485_v19 = vpop.eup %11484  ;;  %v1416_v15 = vmul.f32 1.7159, %v11483_v18  ;;  %v1175_v20 = vpop.f32.mrb[4].mxu0 }
 0x16d   :  { %v11487_v21 = vpop.eup %11486  ;;  %v1417_v23 = vmul.f32 1.7159, %v11485_v19  ;;  %v1176_v25 = vadd.f32 %v1175_v20, %v12596_v63  ;;  %v1177_v27 = vpop.f32.mrb[5].mxu0 }
 0x16e   :  { %v11489_v29 = vpop.eup %11488  ;;  %v1418_v26 = vmul.f32 1.7159, %v11487_v21  ;;  %v1178_v1 = vadd.f32 %v1177_v27, %v12600_v0  ;;  %v1179_v30 = vpop.f32.mrb[6].mxu0 }
 0x16f   :  { %v1528_v31 = vcombine.low %v1416_v15, %v1417_v23  ;;  %v1529_v22 = vcombine.high %v1416_v15, %v1417_v23  ;;  %v1419_v32 = vmul.f32 1.7159, %v11489_v29  ;;  %v1308_v28 = vmul.f32 0.6666667, %v1176_v25  ;;  %v1181_v33 = vpop.f32.mrb[7].mxu0 }
 0x170   :  { %v1309_v34 = vmul.f32 0.6666667, %v1178_v1  ;;  %v1180_v35 = vadd.f32 %v1179_v30, %v12596_v63  ;;  %v1182_v50 = vadd.f32 %v1181_v33, %v12600_v0 }
 0x171   :  { %v1536_v36 = vrot.slane %v1528_v31, %v12607_v24  ;;  %v1543_v37 = vrot.slane %v1529_v22, %v12607_v24  ;;  %v1546_v39 = vcombine.low %v1418_v26, %v1419_v32  ;;  %v1547_v40 = vcombine.high %v1418_v26, %v1419_v32 }
 0x172   :  { %11490 = vtanh.f32 %v1308_v28  ;;  %v1310_v46 = vmul.f32 0.6666667, %v1180_v35  ;;  %v1311_v20 = vmul.f32 0.6666667, %v1182_v50 }
 0x173   :  { %v1544_v42 = vcombine.high %v1536_v36, %v1536_v36  ;;  %v1545_v43 = vcombine.high %v1543_v37, %v1543_v37  ;;  %v10728_v44 = vrot.slane %v1536_v36, 9  ;;  %v10730_v38 = vrot.slane %v1543_v37, 9 }
 0x174   :  { %v1554_v45 = vrot.slane %v1546_v39, %v12607_v24  ;;  %11492 = vtanh.f32 %v1309_v34  ;;  %v12624_v4 = vrot.slane %v1547_v40, %v12607_v24 }
 0x175   :  { %v10729_v47 = vrot.slane %v1544_v42, 9  ;;  %v10731_v48 = vrot.slane %v1545_v43, 9  ;;  %v2480_v49 = vadd.f32 %v10728_v44, %v1536_v36  ;;  %v2482_v51 = vadd.f32 %v10730_v38, %v1543_v37 }
 0x176   :  { %v1562_v52 = vcombine.high %v1554_v45, %v1554_v45  ;;  %v10732_v54 = vrot.slane %v1554_v45, 9  ;;  %11494 = vtanh.f32 %v1310_v46  ;;  %v10734_v29 = vrot.slane %v12624_v4, 9 }
 0x177   :  { %v2481_v55 = vadd.f32 %v10729_v47, %v1544_v42  ;;  %v2483_v57 = vadd.f32 %v10731_v48, %v1545_v43  ;;  %v2707_v58 = vrot.slane %v2480_v49, %v12589_v60  ;;  %v2711_v61 = vrot.slane %v2480_v49, %v12615_v41 }
 0x178   :  { %v2723_v2 = vrot.slane %v2482_v51, %v12589_v60  ;;  %v2727_v3 = vrot.slane %v2482_v51, %v12615_v41  ;;  %v10733_v8 = vrot.slane %v1562_v52, 9  ;;  %v2484_v18 = vadd.f32 %v10732_v54, %v1554_v45 }
 0x179   :  { %v2715_v5 = vrot.slane %v2481_v55, %v12589_v60  ;;  %v2719_v7 = vrot.slane %v2481_v55, %v12615_v41  ;;  %v2731_v6 = vrot.slane %v2483_v57, %v12589_v60  ;;  %v3824_v9 = vpack.c.bf16 %v2707_v58, %v2707_v58 }
 0x17a   :  { %v3825_v10 = vpack.c.bf16 %v2711_v61, %v2711_v61  ;;  %v3828_v11 = vpack.c.bf16 %v2723_v2, %v2723_v2  ;;  %v3829_v12 = vpack.c.bf16 %v2727_v3, %v2727_v3  ;;  %v1185_v13 = vpop.f32.mrb[8].mxu0  ;;  %v12630_v23 = vrot.slane %v2483_v57, %v12615_v41 }
 0x17b   :  { %v3826_v14 = vpack.c.bf16 %v2715_v5, %v2715_v5  ;;  %v3827_v16 = vpack.c.bf16 %v2719_v7, %v2719_v7  ;;  %v3830_v17 = vpack.c.bf16 %v2731_v6, %v2731_v6  ;;  %v1187_v19 = vpop.f32.mrb[9].mxu0  ;;  %v12637_v30 = vunpack.c.l.b16 %v3824_v9 }
 0x17c   :  { %v11491_v15 = vpop.eup %11490  ;;  %v1189_v21 = vpop.f32.mrb[10].mxu0  ;;  %v12632_v25 = vunpack.c.l.b16 %v3828_v11  ;;  %v12634_v27 = vunpack.c.l.b16 %v3829_v12  ;;  %v12639_v31 = vunpack.c.l.b16 %v3825_v10  ;;  %v12641_v22 = vadd.f32 %v10733_v8, %v1562_v52 }
 0x17d   :  { %v1191_v26 = vpop.f32.mrb[11].mxu0  ;;  %v1420_v32 = vmul.f32 1.7159, %v11491_v15  ;;  %v12643_v28 = vunpack.c.l.b16 %v3826_v14  ;;  %v12645_v33 = vunpack.c.l.b16 %v3827_v16  ;;  %v12647_v34 = vunpack.c.l.b16 %v3830_v17 }
 0x17e   :  { %v11493_v1 = vpop.eup %11492  ;;  %v2739_v35 = vrot.slane %v2484_v18, %v12589_v60  ;;  %11496 = vtanh.f32 %v1311_v20  ;;  %v1186_v37 = vadd.f32 %v1185_v13, %v12596_v63  ;;  %v1188_v39 = vadd.f32 %v1187_v19, %v12600_v0 }
 0x17f   :  { %16203 = vst [vmem:[#allocation6_spill] sm:$0xff] %v12647_v34  ;;  %v1421_v36 = vmul.f32 1.7159, %v11493_v1  ;;  %v1190_v43 = vadd.f32 %v1189_v21, %v12596_v63  ;;  %v1192_v44 = vadd.f32 %v1191_v26, %v12600_v0  ;;  %v12658_v52 = vrot.slane %v2484_v18, %v12615_v41 }
 0x180   :  { %v11495_v38 = vpop.eup %11494  ;;  %v1312_v47 = vmul.f32 0.6666667, %v1186_v37  ;;  %v1313_v48 = vmul.f32 0.6666667, %v1188_v39  ;;  %v3832_v54 = vpack.c.bf16 %v2739_v35, %v2739_v35  ;;  %v1563_v6 = vcombine.high %v12624_v4, %v12624_v4 }
 0x181   :  { %v1564_v45 = vcombine.low %v1420_v32, %v1421_v36  ;;  %v1565_v46 = vcombine.high %v1420_v32, %v1421_v36  ;;  %v1314_v50 = vmul.f32 0.6666667, %v1190_v43  ;;  %v1315_v3 = vmul.f32 0.6666667, %v1192_v44 }
 0x182   :  { %v1195_v49 = vpop.f32.mrb[12].mxu0  ;;  %11498 = vtanh.f32 %v1312_v47  ;;  %v12667_v13 = vunpack.c.l.b16 %v3832_v54  ;;  %v1422_v14 = vmul.f32 1.7159, %v11495_v38  ;;  %v10735_v37 = vrot.slane %v1563_v6, 9 }
 0x183   :  { %v1197_v55 = vpop.f32.mrb[13].mxu0  ;;  %v1572_v58 = vrot.slane %v1564_v45, %v12607_v24  ;;  %v1579_v61 = vrot.slane %v1565_v46, %v12607_v24  ;;  %11500 = vtanh.f32 %v1313_v48  ;;  %v1196_v5 = vadd.f32 %v1195_v49, %v12596_v63 }
 0x184   :  { %v1199_v2 = vpop.f32.mrb[14].mxu0  ;;  %11502 = vtanh.f32 %v1314_v50  ;;  %v1198_v20 = vadd.f32 %v1197_v55, %v12600_v0 }
 0x185   :  { %v1201_v7 = vpop.f32.mrb[15].mxu0  ;;  %v1580_v8 = vcombine.high %v1572_v58, %v1572_v58  ;;  %v1581_v9 = vcombine.high %v1579_v61, %v1579_v61  ;;  %v10736_v10 = vrot.slane %v1572_v58, 9  ;;  %v10738_v11 = vrot.slane %v1579_v61, 9 }
 0x186   :  { %11504 = vtanh.f32 %v1315_v3  ;;  %v1316_v15 = vmul.f32 0.6666667, %v1196_v5  ;;  %v1200_v21 = vadd.f32 %v1199_v2, %v12596_v63  ;;  %v1202_v38 = vadd.f32 %v1201_v7, %v12600_v0 }
 0x187   :  { %v10737_v16 = vrot.slane %v1580_v8, 9  ;;  %v10739_v17 = vrot.slane %v1581_v9, 9  ;;  %v2488_v18 = vadd.f32 %v10736_v10, %v1572_v58  ;;  %v2490_v19 = vadd.f32 %v10738_v11, %v1579_v61 }
 0x188   :  { %v11497_v26 = vpop.eup %11496  ;;  %v1317_v61 = vmul.f32 0.6666667, %v1198_v20  ;;  %11506 = vtanh.f32 %v1316_v15  ;;  %v1318_v11 = vmul.f32 0.6666667, %v1200_v21  ;;  %v12700_v21 = vadd.f32 %v10735_v37, %v1563_v6 }
 0x189   :  { %v2489_v1 = vadd.f32 %v10737_v16, %v1580_v8  ;;  %v2491_v32 = vadd.f32 %v10739_v17, %v1581_v9  ;;  %v2771_v35 = vrot.slane %v2488_v18, %v12589_v60  ;;  %v2787_v39 = vrot.slane %v2490_v19, %v12589_v60 }
 0x18a   :  { %v12672_v36 = vpop.f32.mrb[16].mxu0  ;;  %v2791_v43 = vrot.slane %v2490_v19, %v12615_v41  ;;  %v1423_v44 = vmul.f32 1.7159, %v11497_v26  ;;  %v2775_v46 = vrot.slane %v2488_v18, %v12615_v41  ;;  %v1319_v16 = vmul.f32 0.6666667, %v1202_v38 }
 0x18b   :  { %v12677_v45 = vpop.f32.mrb[17].mxu0  ;;  %v2779_v47 = vrot.slane %v2489_v1, %v12589_v60  ;;  %v2783_v48 = vrot.slane %v2489_v1, %v12615_v41  ;;  %v2795_v49 = vrot.slane %v2491_v32, %v12589_v60  ;;  %v3840_v50 = vpack.c.bf16 %v2771_v35, %v2771_v35 }
 0x18c   :  { %v12683_v54 = vpop.f32.mrb[18].mxu0  ;;  %v3844_v55 = vpack.c.bf16 %v2787_v39, %v2787_v39  ;;  %v3845_v58 = vpack.c.bf16 %v2791_v43, %v2791_v43  ;;  %v11499_v3 = vpop.eup %11498  ;;  %v1582_v9 = vcombine.low %v1422_v14, %v1423_v44  ;;  %v12690_v17 = vadd.f32 %v10734_v29, %v12624_v4 }
 0x18d   :  { %v12685_v2 = vpop.f32.mrb[19].mxu0  ;;  %v3842_v5 = vpack.c.bf16 %v2779_v47, %v2779_v47  ;;  %v3843_v7 = vpack.c.bf16 %v2783_v48, %v2783_v48  ;;  %v3846_v8 = vpack.c.bf16 %v2795_v49, %v2795_v49  ;;  %v11501_v10 = vpop.eup %11500  ;;  %v3841_v18 = vpack.c.bf16 %v2775_v46, %v2775_v46 }
 0x18e   :  { %v12692_v19 = vunpack.c.l.b16 %v3844_v55  ;;  %v12694_v20 = vunpack.c.l.b16 %v3845_v58  ;;  %v1583_v26 = vcombine.high %v1422_v14, %v1423_v44  ;;  %v11503_v1 = vpop.eup %11502  ;;  %v12697_v35 = vrot.slane %v2491_v32, %v12615_v41 }
 0x18f   :  { %v1590_v39 = vrot.slane %v1582_v9, %v12607_v24  ;;  %v1424_v15 = vmul.f32 1.7159, %v11499_v3  ;;  %v12702_v43 = vunpack.c.l.b16 %v3840_v50  ;;  %v12704_v38 = vunpack.c.l.b16 %v3842_v5 }
 0x190   :  { %16204 = vst [vmem:[#allocation7_spill] sm:$0xff] %v12692_v19  ;;  %v12706_v4 = vunpack.c.l.b16 %v3843_v7  ;;  %v12708_v29 = vunpack.c.l.b16 %v3846_v8  ;;  %v11505_v46 = vpop.eup %11504  ;;  %v12711_v14 = vrot.slane %v1583_v26, %v12607_v24  ;;  %v1425_v32 = vmul.f32 1.7159, %v11501_v10 }
 0x191   :  { %16205 = vst [vmem:[#allocation8_spill] sm:$0xff] %v12702_v43  ;;  %16206 = vst [vmem:[#allocation9_spill] sm:$0xff] %v12704_v38  ;;  %v10740_v44 = vrot.slane %v1590_v39, 9  ;;  %v1426_v47 = vmul.f32 1.7159, %v11503_v1  ;;  %v12713_v48 = vunpack.c.l.b16 %v3841_v18  ;;  %v12717_v50 = vcombine.high %v1590_v39, %v1590_v39 }
 0x192   :  { %16207 = vst [vmem:[#allocation10_spill] sm:$0xff] %v12708_v29  ;;  %v1427_v49 = vmul.f32 1.7159, %v11505_v46  ;;  %v1600_v58 = vcombine.low %v1424_v15, %v1425_v32  ;;  %v1601_v3 = vcombine.high %v1424_v15, %v1425_v32  ;;  %11508 = vtanh.f32 %v1317_v61 }
 0x193   :  { %v12719_v55 = vadd.f32 %v10740_v44, %v1590_v39  ;;  %v1206_v44 = vadd.f32 %v12672_v36, %v12596_v63  ;;  %11510 = vtanh.f32 %v1318_v11 }
 0x194   :  { %v1618_v8 = vcombine.low %v1426_v47, %v1427_v49  ;;  %v1619_v9 = vcombine.high %v1426_v47, %v1427_v49  ;;  %v1608_v26 = vrot.slane %v1600_v58, %v12607_v24  ;;  %v1615_v15 = vrot.slane %v1601_v3, %v12607_v24  ;;  %v11507_v47 = vpop.eup %11506 }
 0x195   :  { %v2803_v39 = vrot.slane %v12719_v55, %v12589_v60  ;;  %v10741_v49 = vrot.slane %v12717_v50, 9  ;;  %11512 = vtanh.f32 %v1319_v16  ;;  %v12742_v37 = vmul.f32 1.7159, %v11507_v47 }
 0x196   :  { %v1626_v46 = vrot.slane %v1618_v8, %v12607_v24  ;;  %v1616_v56 = vcombine.high %v1608_v26, %v1608_v26  ;;  %v10744_v58 = vrot.slane %v1608_v26, 9  ;;  %v1633_v61 = vrot.slane %v1619_v9, %v12607_v24 }
 0x197   :  { %v12726_v1 = vpop.f32.mrb[20].mxu0  ;;  %v1617_v53 = vcombine.high %v1615_v15, %v1615_v15  ;;  %v10746_v7 = vrot.slane %v1615_v15, 9  ;;  %v3848_v5 = vpack.c.bf16 %v2803_v39, %v2803_v39 }
 0x198   :  { %v12734_v32 = vpop.f32.mrb[21].mxu0  ;;  %v1634_v6 = vcombine.high %v1626_v46, %v1626_v46  ;;  %v10745_v8 = vrot.slane %v1616_v56, 9  ;;  %v2496_v57 = vadd.f32 %v10744_v58, %v1608_v26  ;;  %v10748_v36 = vrot.slane %v1626_v46, 9 }
 0x199   :  { %v12738_v62 = vpop.f32.mrb[22].mxu0  ;;  %v10747_v40 = vrot.slane %v1617_v53, 9  ;;  %v2498_v51 = vadd.f32 %v10746_v7, %v1615_v15  ;;  %v1635_v12 = vcombine.high %v1633_v61, %v1633_v61  ;;  %v10750_v39 = vrot.slane %v1633_v61, 9 }
 0x19a   :  { %v12740_v3 = vpop.f32.mrb[23].mxu0  ;;  %v2497_v10 = vadd.f32 %v10745_v8, %v1616_v56  ;;  %v2835_v9 = vrot.slane %v2496_v57, %v12589_v60  ;;  %v2839_v42 = vrot.slane %v2496_v57, %v12615_v41  ;;  %v10749_v29 = vrot.slane %v1634_v6, 9 }
 0x19b   :  { %v2499_v18 = vadd.f32 %v10747_v40, %v1617_v53  ;;  %v2851_v11 = vrot.slane %v2498_v51, %v12589_v60  ;;  %v2855_v59 = vrot.slane %v2498_v51, %v12615_v41  ;;  %v2500_v7 = vadd.f32 %v10748_v36, %v1626_v46 }
 0x19c   :  { %v2843_v26 = vrot.slane %v2497_v10, %v12589_v60  ;;  %v2847_v16 = vrot.slane %v2497_v10, %v12615_v41  ;;  %v11509_v57 = vpop.eup %11508  ;;  %v3856_v8 = vpack.c.bf16 %v2835_v9, %v2835_v9  ;;  %v3857_v53 = vpack.c.bf16 %v2839_v42, %v2839_v42 }
 0x19d   :  { %v2859_v15 = vrot.slane %v2499_v18, %v12589_v60  ;;  %v2863_v56 = vrot.slane %v2499_v18, %v12615_v41  ;;  %v3860_v47 = vpack.c.bf16 %v2851_v11, %v2851_v11  ;;  %v3861_v58 = vpack.c.bf16 %v2855_v59, %v2855_v59  ;;  %v11511_v42 = vpop.eup %11510 }
 0x19e   :  { %v3858_v40 = vpack.c.bf16 %v2843_v26, %v2843_v26  ;;  %v3859_v19 = vpack.c.bf16 %v2847_v16, %v2847_v16  ;;  %v12757_v10 = vadd.f32 %v10741_v49, %v12717_v50  ;;  %v12761_v18 = vrot.slane %v12719_v55, %v12615_v41 }
 0x19f   :  { %v3862_v34 = vpack.c.bf16 %v2859_v15, %v2859_v15  ;;  %v3863_v51 = vpack.c.bf16 %v2863_v56, %v2863_v56  ;;  %v12752_v38 = vunpack.c.l.b16 %v3860_v47  ;;  %v12754_v43 = vunpack.c.l.b16 %v3861_v58  ;;  %v11513_v16 = vpop.eup %11512 }
 0x1a0   :  { %v12763_v59 = vunpack.c.l.b16 %v3858_v40  ;;  %v4328_v46 = vunpack.c.l.b16 %v3859_v19  ;;  %v12765_v36 = vunpack.c.l.b16 %v3848_v5  ;;  %v12767_v9 = vadd.f32 %v10749_v29, %v1634_v6 }
 0x1a1   :  { %16208 = vst [vmem:[#allocation11_spill] sm:$0xff] %v12752_v38  ;;  %16209 = vst [vmem:[#allocation12_spill] sm:$0xff] %v12754_v43  ;;  %v12769_v11 = vadd.f32 %v10750_v39, %v1633_v61  ;;  %v1320_v26 = vmul.f32 0.6666667, %v1206_v44  ;;  %v12771_v15 = vunpack.c.l.b16 %v3856_v8  ;;  %v4326_v50 = vunpack.c.l.b16 %v3857_v53 }
 0x1a2   :  { %16210 = vst [vmem:[#allocation13_spill] sm:$0xff] %v12763_v59  ;;  %16211 = vst [vmem:[#allocation14_spill] sm:$0xff] %v12767_v9  ;;  %v12773_v49 = vunpack.c.l.b16 %v3862_v34  ;;  %v10751_v56 = vrot.slane %v1635_v12, 9  ;;  %v12775_v55 = vunpack.c.l.b16 %v3863_v51  ;;  %v2867_v5 = vrot.slane %v2500_v7, %v12589_v60 }
 0x1a3   :  { %16212 = vst [vmem:[#allocation15_spill] sm:$0xff] %v12769_v11  ;;  %16213 = vst [vmem:[#allocation16_spill] sm:$0xff] %v12771_v15  ;;  %v4594_v44 = vrot.slane %v4328_v46, 7  ;;  %v2871_v61 = vrot.slane %v2500_v7, %v12615_v41  ;;  %v1429_v39 = vmul.f32 1.7159, %v11509_v57  ;;  %v2879_v34 = vrot.slane %v12767_v9, %v12615_v41 }
 0x1a4   :  { %16214 = vst [vmem:[#allocation17_spill] sm:$0xff] %v12773_v49  ;;  %16215 = vst [vmem:[#allocation18_spill] sm:$0xff] %v12775_v55  ;;  %v12790_v8 = vrot.slane %v12769_v11, %v12615_v41  ;;  %v1430_v53 = vmul.f32 1.7159, %v11511_v42  ;;  %v1431_v40 = vmul.f32 1.7159, %v11513_v16  ;;  %v12795_v6 = vadd.f32 %v10751_v56, %v1635_v12 }
 0x1a5   :  { %v1636_v7 = vcombine.low %v12742_v37, %v1429_v39  ;;  %v1637_v57 = vcombine.high %v12742_v37, %v1429_v39  ;;  %v3864_v38 = vpack.c.bf16 %v2867_v5, %v2867_v5  ;;  %v12803_v42 = vsel %vm4518_vm4, %v4594_v44, %v4326_v50 }
 0x1a6   :  { %v12780_v29 = vpop.f32.mrb[24].mxu0  ;;  %16217 = vst [vmem:[#allocation20_spill] sm:$0xff] %v12790_v8  ;;  %16219 = vst [vmem:[#allocation22_spill] sm:$0xff] %v12795_v6  ;;  %v1654_v59 = vcombine.low %v1430_v53, %v1431_v40  ;;  %v1655_v15 = vcombine.high %v1430_v53, %v1431_v40  ;;  %v3865_v16 = vpack.c.bf16 %v2871_v61, %v2871_v61  ;;  %11514 = vtanh.f32 %v1320_v26 }
 0x1a7   :  { %v12784_v58 = vpop.f32.mrb[25].mxu0  ;;  %16221 = vst [vmem:[#allocation24_spill] sm:$0xff] %v12803_v42  ;;  %v1644_v11 = vrot.slane %v1636_v7, %v12607_v24  ;;  %v1651_v12 = vrot.slane %v1637_v57, %v12607_v24  ;;  %v3867_v56 = vpack.c.bf16 %v2879_v34, %v2879_v34  ;;  %v12811_v40 = vunpack.c.l.b16 %v3864_v38 }
 0x1a8   :  { %16216 = vst [vmem:[#allocation19_spill] sm:$0xff] %v12784_v58  ;;  %v12792_v51 = vpop.f32.mrb[26].mxu0  ;;  %v1662_v37 = vrot.slane %v1654_v59, %v12607_v24  ;;  %v1669_v39 = vrot.slane %v1655_v15, %v12607_v24  ;;  %v12817_v59 = vunpack.c.l.b16 %v3865_v16 }
 0x1a9   :  { %16218 = vst [vmem:[#allocation21_spill] sm:$0xff] %v12792_v51  ;;  %v12799_v46 = vpop.f32.mrb[27].mxu0  ;;  %v1652_v19 = vcombine.high %v1644_v11, %v1644_v11  ;;  %v1653_v5 = vcombine.high %v1651_v12, %v1651_v12  ;;  %v10752_v49 = vrot.slane %v1644_v11, 9  ;;  %v10754_v53 = vrot.slane %v1651_v12, 9  ;;  %16222 = vst [vmem:[#allocation25_spill] sm:$0xff] %v12811_v40 }
 0x1aa   :  { %16220 = vst [vmem:[#allocation23_spill] sm:$0xff] %v12799_v46  ;;  %v1670_v50 = vcombine.high %v1662_v37, %v1662_v37  ;;  %v1671_v44 = vcombine.high %v1669_v39, %v1669_v39  ;;  %v10756_v61 = vrot.slane %v1662_v37, 9  ;;  %v10758_v43 = vrot.slane %v1669_v39, 9 }
 0x1ab   :  { %v10753_v57 = vrot.slane %v1652_v19, 9  ;;  %v10755_v34 = vrot.slane %v1653_v5, 9  ;;  %v2504_v9 = vadd.f32 %v10752_v49, %v1644_v11  ;;  %v2506_v55 = vadd.f32 %v10754_v53, %v1651_v12 }
 0x1ac   :  { %v10757_v15 = vrot.slane %v1670_v50, 9  ;;  %v10759_v12 = vrot.slane %v1671_v44, 9  ;;  %v2508_v16 = vadd.f32 %v10756_v61, %v1662_v37  ;;  %v12831_v58 = vunpack.c.l.b16 %v3867_v56 }
 0x1ad   :  { %v2505_v38 = vadd.f32 %v10753_v57, %v1652_v19  ;;  %v2507_v40 = vadd.f32 %v10755_v34, %v1653_v5  ;;  %v2899_v8 = vrot.slane %v2504_v9, %v12589_v60  ;;  %v2903_v6 = vrot.slane %v2504_v9, %v12615_v41 }
 0x1ae   :  { %v12813_v7 = vpop.f32.mrb[28].mxu0  ;;  %v2915_v11 = vrot.slane %v2506_v55, %v12589_v60  ;;  %v2919_v49 = vrot.slane %v2506_v55, %v12615_v41  ;;  %v1208_v61 = vadd.f32 %v12677_v45, %v12600_v0  ;;  %v12849_v56 = vadd.f32 %v10758_v43, %v1669_v39 }
 0x1af   :  { %16223 = vst [vmem:[#allocation26_spill] sm:$0xff] %v12813_v7  ;;  %v12815_v47 = vpop.f32.mrb[29].mxu0  ;;  %v2907_v53 = vrot.slane %v2505_v38, %v12589_v60  ;;  %v2911_v26 = vrot.slane %v2505_v38, %v12615_v41  ;;  %v2927_v19 = vrot.slane %v2507_v40, %v12615_v41  ;;  %v3872_v5 = vpack.c.bf16 %v2899_v8, %v2899_v8 }
 0x1b0   :  { %16224 = vst [vmem:[#allocation27_spill] sm:$0xff] %v12815_v47  ;;  %v12819_v42 = vpop.f32.mrb[30].mxu0  ;;  %v3873_v57 = vpack.c.bf16 %v2903_v6, %v2903_v6  ;;  %v3876_v34 = vpack.c.bf16 %v2915_v11, %v2915_v11  ;;  %v3877_v9 = vpack.c.bf16 %v2919_v49, %v2919_v49  ;;  %v1210_v6 = vadd.f32 %v12683_v54, %v12596_v63 }
 0x1b1   :  { %16225 = vst [vmem:[#allocation28_spill] sm:$0xff] %v12819_v42  ;;  %v12823_v7 = vpop.f32.mrb[31].mxu0  ;;  %v2923_v42 = vrot.slane %v2507_v40, %v12589_v60  ;;  %v3874_v47 = vpack.c.bf16 %v2907_v53, %v2907_v53  ;;  %v3879_v51 = vpack.c.bf16 %v2927_v19, %v2927_v19  ;;  %16233 = vst [vmem:[#allocation36_spill] sm:$0xff] %v12849_v56 }
 0x1b2   :  { %16226 = vst [vmem:[#allocation29_spill] sm:$0xff] %v12823_v7  ;;  %v3875_v7 = vpack.c.bf16 %v2911_v26, %v2911_v26  ;;  %v12833_v55 = vunpack.c.l.b16 %v3876_v34  ;;  %v12835_v37 = vunpack.c.l.b16 %v3877_v9  ;;  %v2935_v49 = vrot.slane %v2508_v16, %v12615_v41 }
 0x1b3   :  { %v3878_v46 = vpack.c.bf16 %v2923_v42, %v2923_v42  ;;  %v12839_v38 = vunpack.c.l.b16 %v3874_v47  ;;  %v12845_v11 = vunpack.c.l.b16 %v3879_v51  ;;  %v12847_v42 = vadd.f32 %v10757_v15, %v1670_v50 }
 0x1b4   :  { %16227 = vst [vmem:[#allocation30_spill] sm:$0xff] %v12833_v55  ;;  %16228 = vst [vmem:[#allocation31_spill] sm:$0xff] %v12835_v37  ;;  %v4344_v40 = vunpack.c.l.b16 %v3875_v7  ;;  %v12853_v26 = vunpack.c.l.b16 %v3872_v5  ;;  %v4342_v45 = vunpack.c.l.b16 %v3873_v57  ;;  %v12855_v47 = vadd.f32 %v10759_v12, %v1671_v44 }
 0x1b5   :  { %16229 = vst [vmem:[#allocation32_spill] sm:$0xff] %v12839_v38  ;;  %v12841_v8 = vunpack.c.l.b16 %v3878_v46  ;;  %16231 = vst [vmem:[#allocation34_spill] sm:$0xff] %v12845_v11  ;;  %v11515_v46 = vpop.eup %11514  ;;  %v2931_v51 = vrot.slane %v2508_v16, %v12589_v60  ;;  %v1321_v50 = vmul.f32 0.6666667, %v1208_v61  ;;  %v1322_v15 = vmul.f32 0.6666667, %v1210_v6 }
 0x1b6   :  { %16232 = vst [vmem:[#allocation35_spill] sm:$0xff] %v12847_v42  ;;  %16234 = vst [vmem:[#allocation37_spill] sm:$0xff] %v12853_v26  ;;  %v4622_v19 = vrot.slane %v4344_v40, 7  ;;  %v2943_v44 = vrot.slane %v12847_v42, %v12615_v41  ;;  %v12867_v12 = vrot.slane %v12849_v56, %v12615_v41  ;;  %v3881_v57 = vpack.c.bf16 %v2935_v49, %v2935_v49 }
 0x1b7   :  { %16230 = vst [vmem:[#allocation33_spill] sm:$0xff] %v12841_v8  ;;  %11516 = vtanh.f32 %v1321_v50  ;;  %v1212_v16 = vadd.f32 %v12685_v2, %v12600_v0  ;;  %v1216_v34 = vadd.f32 %v12726_v1, %v12596_v63  ;;  %v1218_v9 = vadd.f32 %v12734_v32, %v12600_v0 }
 0x1b8   :  { %v12876_v61 = vsel %vm4518_vm4, %v4622_v19, %v4342_v45  ;;  %v3880_v40 = vpack.c.bf16 %v2931_v51, %v2931_v51  ;;  %11518 = vtanh.f32 %v1322_v15  ;;  %v1220_v6 = vadd.f32 %v12738_v62, %v12596_v63 }
 0x1b9   :  { %v1323_v39 = vmul.f32 0.6666667, %v1212_v16  ;;  %v1324_v49 = vmul.f32 0.6666667, %v1216_v34  ;;  %v1325_v50 = vmul.f32 0.6666667, %v1218_v9  ;;  %v1222_v2 = vadd.f32 %v12740_v3, %v12600_v0 }
 0x1ba   :  { %v3883_v7 = vpack.c.bf16 %v2943_v44, %v2943_v44  ;;  %v1432_v1 = vmul.f32 1.7159, %v11515_v46  ;;  %v1599_v32 = vcombine.high %v12711_v14, %v12711_v14  ;;  %v16235_v45 = vrot.slane %v12711_v14, 9 }
 0x1bb   :  { %v12889_v51 = vunpack.c.l.b16 %v3881_v57  ;;  %11520 = vtanh.f32 %v1323_v39  ;;  %v2751_v62 = vrot.slane %v12641_v22, %v12615_v41  ;;  %v2759_v3 = vrot.slane %v12690_v17, %v12615_v41  ;;  %v12895_v15 = vpop.f32.mrb[32].mxu0 }
 0x1bc   :  { %v12887_v19 = vadd.f32 %v16235_v45, %v12711_v14  ;;  %16237 = vst [vmem:[#allocation39_spill] sm:$0xff] %v12895_v15  ;;  %11522 = vtanh.f32 %v1324_v49  ;;  %v1326_v46 = vmul.f32 0.6666667, %v1220_v6  ;;  %v10743_v44 = vrot.slane %v1599_v32, 9 }
 0x1bd   :  { %16236 = vst [vmem:[#allocation38_spill] sm:$0xff] %v12889_v51  ;;  %v2767_v16 = vrot.slane %v12700_v21, %v12615_v41  ;;  %11524 = vtanh.f32 %v1325_v50  ;;  %v1327_v14 = vmul.f32 0.6666667, %v1222_v2  ;;  %v3831_v39 = vpack.c.bf16 %v12630_v23, %v12630_v23 }
 0x1be   :  { %v3833_v57 = vpack.c.bf16 %v12658_v52, %v12658_v52  ;;  %v12905_v9 = vadd.f32 %v10743_v44, %v1599_v32  ;;  %v2815_v6 = vrot.slane %v12757_v10, %v12615_v41  ;;  %v2823_v49 = vrot.slane %v12887_v19, %v12615_v41 }
 0x1bf   :  { %v12911_v45 = vunpack.c.l.b16 %v3880_v40  ;;  %v12913_v50 = vunpack.c.l.b16 %v3883_v7  ;;  %v3835_v2 = vpack.c.bf16 %v2751_v62, %v2751_v62  ;;  %v3837_v23 = vpack.c.bf16 %v2759_v3, %v2759_v3 }
 0x1c0   :  { %11526 = vtanh.f32 %v1326_v46  ;;  %v3839_v52 = vpack.c.bf16 %v2767_v16, %v2767_v16  ;;  %v4300_v5 = vunpack.c.l.b16 %v3831_v39  ;;  %v3847_v32 = vpack.c.bf16 %v12697_v35, %v12697_v35  ;;  %v12930_v39 = vpop.f32.mrb[33].mxu0 }
 0x1c1   :  { %16238 = vst [vmem:[#allocation40_spill] sm:$0xff] %v12911_v45  ;;  %16239 = vst [vmem:[#allocation41_spill] sm:$0xff] %v12913_v50  ;;  %v11517_v54 = vpop.eup %11516  ;;  %11528 = vtanh.f32 %v1327_v14  ;;  %v3849_v44 = vpack.c.bf16 %v12761_v18, %v12761_v18  ;;  %v4302_v53 = vunpack.c.l.b16 %v3833_v57  ;;  %v2831_v7 = vrot.slane %v12905_v9, %v12615_v41 }
 0x1c2   :  { %v11519_v40 = vpop.eup %11518  ;;  %v1433_v34 = vmul.f32 1.7159, %v11517_v54  ;;  %v3851_v62 = vpack.c.bf16 %v2815_v6, %v2815_v6  ;;  %v3853_v3 = vpack.c.bf16 %v2823_v49, %v2823_v49  ;;  %v12922_v43 = vunpack.c.l.b16 %v3835_v2  ;;  %16241 = vst [vmem:[#allocation42_spill] sm:$0xff] %v12930_v39 }
 0x1c3   :  { %v12924_v46 = vunpack.c.l.b16 %v3837_v23  ;;  %v16240_v16 = vrot.slane %v12645_v33, 7  ;;  %v4542_v14 = vrot.slane %v4300_v5, 5  ;;  %v12932_v54 = vunpack.c.l.b16 %v3839_v52 }
 0x1c4   :  { %v1672_v18 = vcombine.low %v1432_v1, %v1433_v34  ;;  %v1673_v57 = vcombine.high %v1432_v1, %v1433_v34  ;;  %v16242_v15 = vrot.slane %v12634_v27, 6  ;;  %v1434_v2 = vmul.f32 1.7159, %v11519_v40 }
 0x1c5   :  { %v4539_v35 = vsel %vm4518_vm4, %v16240_v16, %v12639_v31  ;;  %v11521_v49 = vpop.eup %11520  ;;  %v12937_v23 = vunpack.c.l.b16 %v3847_v32  ;;  %v4544_v33 = vrot.slane %v4302_v53, 4  ;;  %v3855_v1 = vpack.c.bf16 %v2831_v7, %v2831_v7 }
 0x1c6   :  { %v4541_v6 = vsel %vm4521_vm5, %v16242_v15, %v4539_v35  ;;  %v11523_v55 = vpop.eup %11522  ;;  %v1680_v31 = vrot.slane %v1672_v18, %v12607_v24  ;;  %v1687_v5 = vrot.slane %v1673_v57, %v12607_v24  ;;  %v1435_v16 = vmul.f32 1.7159, %v11521_v49 }
 0x1c7   :  { %v4543_v8 = vsel %vm4524_vm6, %v4542_v14, %v4541_v6  ;;  %v11525_v34 = vpop.eup %11524  ;;  %v12942_v52 = vmul.f32 1.7159, %v11523_v55  ;;  %v12944_v27 = vunpack.c.l.b16 %v3849_v44  ;;  %v12946_v15 = vunpack.c.l.b16 %v3851_v62 }
 0x1c8   :  { %v12949_v32 = vsel %vm4527_vm7, %v4544_v33, %v4543_v8  ;;  %v1688_v40 = vcombine.high %v1680_v31, %v1680_v31  ;;  %v1689_v35 = vcombine.high %v1687_v5, %v1687_v5  ;;  %v10760_v53 = vrot.slane %v1680_v31, 9 }
 0x1c9   :  { %v10762_v14 = vrot.slane %v1687_v5, 9  ;;  %v1690_v6 = vcombine.low %v1434_v2, %v1435_v16  ;;  %v1691_v18 = vcombine.high %v1434_v2, %v1435_v16  ;;  %v1437_v39 = vmul.f32 1.7159, %v11525_v34 }
 0x1ca   :  { %v12951_v57 = vunpack.c.l.b16 %v3853_v3  ;;  %v11527_v7 = vpop.eup %11526  ;;  %v10761_v49 = vrot.slane %v1688_v40, 9  ;;  %v10763_v55 = vrot.slane %v1689_v35, 9  ;;  %v2512_v45 = vadd.f32 %v10760_v53, %v1680_v31 }
 0x1cb   :  { %v2514_v44 = vadd.f32 %v10762_v14, %v1687_v5  ;;  %v12953_v38 = vpop.eup %11528  ;;  %v1698_v62 = vrot.slane %v1690_v6, %v12607_v24  ;;  %v1708_v8 = vcombine.low %v12942_v52, %v1437_v39  ;;  %v1709_v33 = vcombine.high %v12942_v52, %v1437_v39 }
 0x1cc   :  { %v12958_v26 = vunpack.c.l.b16 %v3855_v1  ;;  %v2513_v56 = vadd.f32 %v10761_v49, %v1688_v40  ;;  %v2515_v2 = vadd.f32 %v10763_v55, %v1689_v35  ;;  %v2963_v3 = vrot.slane %v2512_v45, %v12589_v60  ;;  %v12970_v40 = vpop.f32.mrb[34].mxu0 }
 0x1cd   :  { %v2967_v16 = vrot.slane %v2512_v45, %v12615_v41  ;;  %v2979_v34 = vrot.slane %v2514_v44, %v12589_v60  ;;  %v2983_v31 = vrot.slane %v2514_v44, %v12615_v41  ;;  %v1705_v5 = vrot.slane %v1691_v18, %v12607_v24  ;;  %16243 = vst [vmem:[#allocation43_spill] sm:$0xff] %v12970_v40  ;;  %v12972_v55 = vpop.f32.mrb[35].mxu0 }
 0x1ce   :  { %v2971_v14 = vrot.slane %v2513_v56, %v12589_v60  ;;  %v2975_v39 = vrot.slane %v2513_v56, %v12615_v41  ;;  %v2987_v1 = vrot.slane %v2515_v2, %v12589_v60  ;;  %v2991_v52 = vrot.slane %v2515_v2, %v12615_v41  ;;  %16244 = vst [vmem:[#allocation44_spill] sm:$0xff] %v12972_v55 }
 0x1cf   :  { %v3888_v35 = vpack.c.bf16 %v2963_v3, %v2963_v3  ;;  %v3892_v45 = vpack.c.bf16 %v2979_v34, %v2979_v34  ;;  %v3893_v6 = vpack.c.bf16 %v2983_v31, %v2983_v31  ;;  %v1706_v49 = vcombine.high %v1698_v62, %v1698_v62 }
 0x1d0   :  { %v3889_v44 = vpack.c.bf16 %v2967_v16, %v2967_v16  ;;  %v3890_v18 = vpack.c.bf16 %v2971_v14, %v2971_v14  ;;  %v3891_v42 = vpack.c.bf16 %v2975_v39, %v2975_v39  ;;  %v3894_v53 = vpack.c.bf16 %v2987_v1, %v2987_v1 }
 0x1d1   :  { %v3895_v51 = vpack.c.bf16 %v2991_v52, %v2991_v52  ;;  %v16245_v2 = vrot.slane %v12706_v4, 7  ;;  %v12982_v3 = vunpack.c.l.b16 %v3892_v45  ;;  %v12984_v34 = vunpack.c.l.b16 %v3893_v6 }
 0x1d2   :  { %v12986_v31 = vmul.f32 1.7159, %v11527_v7  ;;  %v12989_v14 = vunpack.c.l.b16 %v3890_v18  ;;  %v1707_v39 = vcombine.high %v1705_v5, %v1705_v5  ;;  %v10764_v1 = vrot.slane %v1698_v62, 9 }
 0x1d3   :  { %v12980_v40 = vsel %vm4518_vm4, %v16245_v2, %v12713_v48  ;;  %16246 = vst [vmem:[#allocation45_spill] sm:$0xff] %v12982_v3  ;;  %16247 = vst [vmem:[#allocation46_spill] sm:$0xff] %v12984_v34  ;;  %v10765_v52 = vrot.slane %v1706_v49, 9  ;;  %v12991_v56 = vunpack.c.l.b16 %v3888_v35  ;;  %v4358_v50 = vunpack.c.l.b16 %v3889_v44 }
 0x1d4   :  { %16248 = vst [vmem:[#allocation47_spill] sm:$0xff] %v12989_v14  ;;  %v4360_v4 = vunpack.c.l.b16 %v3891_v42  ;;  %v12993_v55 = vunpack.c.l.b16 %v3894_v53  ;;  %v12995_v48 = vunpack.c.l.b16 %v3895_v51  ;;  %v10766_v45 = vrot.slane %v1705_v5, 9 }
 0x1d5   :  { %16249 = vst [vmem:[#allocation48_spill] sm:$0xff] %v12991_v56  ;;  %v2516_v6 = vadd.f32 %v10764_v1, %v1698_v62  ;;  %v12997_v2 = vadd.f32 %v10765_v52, %v1706_v49  ;;  %v1716_v16 = vrot.slane %v1708_v8, %v12607_v24  ;;  %v1723_v11 = vrot.slane %v1709_v33, %v12607_v24 }
 0x1d6   :  { %16250 = vst [vmem:[#allocation49_spill] sm:$0xff] %v12993_v55  ;;  %16251 = vst [vmem:[#allocation50_spill] sm:$0xff] %v12995_v48  ;;  %v13004_v44 = vadd.f32 %v10766_v45, %v1705_v5  ;;  %v4650_v7 = vrot.slane %v4360_v4, 7  ;;  %v10767_v3 = vrot.slane %v1707_v39, 9 }
 0x1d7   :  { %16252 = vst [vmem:[#allocation51_spill] sm:$0xff] %v12997_v2  ;;  %v2995_v42 = vrot.slane %v2516_v6, %v12589_v60  ;;  %v2999_v51 = vrot.slane %v2516_v6, %v12615_v41  ;;  %v3007_v62 = vrot.slane %v12997_v2, %v12615_v41  ;;  %v1724_v53 = vcombine.high %v1716_v16, %v1716_v16 }
 0x1d8   :  { %16253 = vst [vmem:[#allocation52_spill] sm:$0xff] %v13004_v44  ;;  %v1725_v49 = vcombine.high %v1723_v11, %v1723_v11  ;;  %v10768_v1 = vrot.slane %v1716_v16, 9  ;;  %v10770_v18 = vrot.slane %v1723_v11, 9  ;;  %v13014_v6 = vrot.slane %v13004_v44, %v12615_v41 }
 0x1d9   :  { %v3897_v8 = vpack.c.bf16 %v2999_v51, %v2999_v51  ;;  %v10769_v35 = vrot.slane %v1724_v53, 9  ;;  %v3896_v14 = vpack.c.bf16 %v2995_v42, %v2995_v42  ;;  %v3899_v2 = vpack.c.bf16 %v3007_v62, %v3007_v62 }
 0x1da   :  { %v10771_v5 = vrot.slane %v1725_v49, 9  ;;  %v2520_v45 = vadd.f32 %v10768_v1, %v1716_v16  ;;  %v2522_v56 = vadd.f32 %v10770_v18, %v1723_v11  ;;  %v13030_v48 = vadd.f32 %v10767_v3, %v1707_v39 }
 0x1db   :  { %v2521_v34 = vadd.f32 %v10769_v35, %v1724_v53  ;;  %v13017_v51 = vunpack.c.l.b16 %v3897_v8  ;;  %v13034_v37 = vunpack.c.l.b16 %v3896_v14 }
 0x1dc   :  { %v2523_v52 = vadd.f32 %v10771_v5, %v1725_v49  ;;  %v3027_v4 = vrot.slane %v2520_v45, %v12589_v60  ;;  %v3031_v33 = vrot.slane %v2520_v45, %v12615_v41  ;;  %v3043_v16 = vrot.slane %v2522_v56, %v12589_v60 }
 0x1dd   :  { %v3047_v1 = vrot.slane %v2522_v56, %v12615_v41  ;;  %v3035_v55 = vrot.slane %v2521_v34, %v12589_v60  ;;  %v3039_v42 = vrot.slane %v2521_v34, %v12615_v41  ;;  %v1439_v49 = vmul.f32 1.7159, %v12953_v38 }
 0x1de   :  { %v3051_v11 = vrot.slane %v2523_v52, %v12589_v60  ;;  %v3055_v18 = vrot.slane %v2523_v52, %v12615_v41  ;;  %v3904_v35 = vpack.c.bf16 %v3027_v4, %v3027_v4  ;;  %v3905_v62 = vpack.c.bf16 %v3031_v33, %v3031_v33  ;;  %v13036_v52 = vpop.f32.mrb[36].mxu0 }
 0x1df   :  { %v3908_v53 = vpack.c.bf16 %v3043_v16, %v3043_v16  ;;  %v3906_v8 = vpack.c.bf16 %v3035_v55, %v3035_v55  ;;  %v3907_v5 = vpack.c.bf16 %v3039_v42, %v3039_v42  ;;  %v3909_v45 = vpack.c.bf16 %v3047_v1, %v3047_v1  ;;  %16254 = vst [vmem:[#allocation53_spill] sm:$0xff] %v13036_v52 }
 0x1e0   :  { %v3910_v44 = vpack.c.bf16 %v3051_v11, %v3051_v11  ;;  %v13028_v56 = vsel %vm4518_vm4, %v4650_v7, %v4358_v50  ;;  %v13038_v33 = vunpack.c.l.b16 %v3899_v2  ;;  %v3911_v55 = vpack.c.bf16 %v3055_v18, %v3055_v18 }
 0x1e1   :  { %v13041_v4 = vunpack.c.l.b16 %v3904_v35  ;;  %v4374_v16 = vunpack.c.l.b16 %v3905_v62  ;;  %v13043_v1 = vunpack.c.l.b16 %v3908_v53  ;;  %v1726_v50 = vcombine.low %v12986_v31, %v1439_v49 }
 0x1e2   :  { %v1727_v3 = vcombine.high %v12986_v31, %v1439_v49  ;;  %v13047_v39 = vunpack.c.l.b16 %v3906_v8  ;;  %v4376_v14 = vunpack.c.l.b16 %v3907_v5  ;;  %v13049_v7 = vunpack.c.l.b16 %v3909_v45 }
 0x1e3   :  { %v13051_v42 = vunpack.c.l.b16 %v3910_v44  ;;  %v1734_v2 = vrot.slane %v1726_v50, %v12607_v24  ;;  %v16256_v18 = vrot.slane %v12922_v43, 3  ;;  %v16257_v62 = vrot.slane %v12694_v20, 6 }
 0x1e4   :  { %v1741_v11 = vrot.slane %v1727_v3, %v12607_v24  ;;  %v13063_v53 = vunpack.c.l.b16 %v3911_v55  ;;  %v16258_v49 = vrot.slane %v12924_v46, 2  ;;  %v16259_v8 = vrot.slane %v12937_v23, 5 }
 0x1e5   :  { %16255 = vst [vmem:[#allocation54_spill] sm:$0xff] %v13051_v42  ;;  %v4547_v35 = vsel %vm4530_vm8, %v16256_v18, %v12949_v32  ;;  %v4569_v31 = vsel %vm4521_vm5, %v16257_v62, %v12980_v40  ;;  %v4572_v45 = vrot.slane %v12944_v27, 4  ;;  %v1742_v43 = vcombine.high %v1734_v2, %v1734_v2 }
 0x1e6   :  { %v4549_v44 = vsel %vm4533_vm9, %v16258_v49, %v4547_v35  ;;  %v4571_v5 = vsel %vm4524_vm6, %v16259_v8, %v4569_v31  ;;  %v1743_v50 = vcombine.high %v1741_v11, %v1741_v11  ;;  %v10772_v32 = vrot.slane %v1734_v2, 9 }
 0x1e7   :  { %v10774_v3 = vrot.slane %v1741_v11, 9  ;;  %v16260_v40 = vrot.slane %v12932_v54, 1  ;;  %v4573_v46 = vsel %vm4527_vm7, %v4572_v45, %v4571_v5  ;;  %v4574_v18 = vrot.slane %v12946_v15, 3  ;;  %v13090_v5 = vpop.f32.mrb[37].mxu0 }
 0x1e8   :  { %v10773_v35 = vrot.slane %v1742_v43, 9  ;;  %v2524_v62 = vadd.f32 %v10772_v32, %v1734_v2  ;;  %v4678_v27 = vrot.slane %v4376_v14, 7  ;;  %v10775_v49 = vrot.slane %v1743_v50, 9  ;;  %16261 = vst [vmem:[#allocation55_spill] sm:$0xff] %v13090_v5 }
 0x1e9   :  { %v4551_v55 = vsel %vm4536_vm10, %v16260_v40, %v4549_v44  ;;  %v13079_v31 = vadd.f32 %v10774_v3, %v1741_v11  ;;  %v4575_v8 = vsel %vm4530_vm8, %v4574_v18, %v4573_v46  ;;  %v4576_v20 = vrot.slane %v12951_v57, 2 }
 0x1ea   :  { %v13083_v38 = vadd.f32 %v10773_v35, %v1742_v43  ;;  %v13086_v54 = vrot.slane %v2524_v62, %v12589_v60  ;;  %v3063_v44 = vrot.slane %v2524_v62, %v12615_v41  ;;  %v4578_v15 = vrot.slane %v12958_v26, 1 }
 0x1eb   :  { %v13095_v14 = vrot.slane %v13079_v31, %v12615_v41  ;;  %v4577_v11 = vsel %vm4533_vm9, %v4576_v20, %v4575_v8  ;;  %v2747_v26 = vrot.slane %v12641_v22, %v12589_v60  ;;  %v2755_v46 = vrot.slane %v12690_v17, %v12589_v60 }
 0x1ec   :  { %v13100_v57 = vrot.slane %v13083_v38, %v12615_v41  ;;  %v3913_v45 = vpack.c.bf16 %v3063_v44, %v3063_v44  ;;  %v4579_v43 = vsel %vm4536_vm10, %v4578_v15, %v4577_v11  ;;  %v13110_v20 = vsel %vm4518_vm4, %v4678_v27, %v4374_v16 }
 0x1ed   :  { %v4917_v40 = vpack.c.b16 %v4579_v43, %v4551_v55  ;;  %v13112_v18 = vadd.f32 %v10775_v49, %v1743_v50  ;;  %v3912_v35 = vpack.c.bf16 %v13086_v54, %v13086_v54  ;;  %v2763_v62 = vrot.slane %v12700_v21, %v12589_v60  ;;  %v13127_v50 = vpop.f32.mrb[38].mxu0 }
 0x1ee   :  { %v2811_v55 = vrot.slane %v12757_v10, %v12589_v60  ;;  %v2819_v17 = vrot.slane %v12887_v19, %v12589_v60  ;;  %v2827_v16 = vrot.slane %v12905_v9, %v12589_v60  ;;  %16262 = vst [vmem:[#allocation56_spill] sm:$0xff] %v13127_v50  ;;  %v3915_v27 = vpack.c.bf16 %v13100_v57, %v13100_v57  ;;  %v13133_v44 = vpop.f32.mrb[39].mxu0 }
 0x1ef   :  { %10851 = vmatprep.mubr.msk.bf16.mxu1 %vm5000_vm11, %v4917_v40  ;;  %v13131_v21 = vunpack.c.l.b16 %v3913_v45  ;;  %v3834_v49 = vpack.c.bf16 %v2747_v26, %v2747_v26  ;;  %v3836_v8 = vpack.c.bf16 %v2755_v46, %v2755_v46  ;;  %16263 = vst [vmem:[#allocation57_spill] sm:$0xff] %v13133_v44  ;;  %v3838_v15 = vpack.c.bf16 %v2763_v62, %v2763_v62 }
 0x1f0   :  { %v3850_v11 = vpack.c.bf16 %v2811_v55, %v2811_v55  ;;  %v3852_v10 = vpack.c.bf16 %v2819_v17, %v2819_v17  ;;  %v3854_v43 = vpack.c.bf16 %v2827_v16, %v2827_v16  ;;  %v16264_v9 = vrot.slane %v12643_v28, 7  ;;  %v16266_v16 = vld [vmem:[#allocation8_spill] sm:$0xff]  ;;  %v16269_v28 = vld [vmem:[#allocation6_spill] sm:$0xff] }
 0x1f1   :  { %v4303_v40 = vunpack.c.l.b16 %v3834_v49  ;;  %v4305_v19 = vunpack.c.l.b16 %v3836_v8  ;;  %v4526_v2 = vrot.slane %v12667_v13, 4  ;;  %v4307_v3 = vunpack.c.l.b16 %v3838_v15  ;;  %v16267_v49 = vld [vmem:[#allocation9_spill] sm:$0xff]  ;;  %v16271_v15 = vld [vmem:[#allocation7_spill] sm:$0xff] }
 0x1f2   :  { %v4519_v32 = vsel %vm4518_vm4, %v16264_v9, %v12637_v30  ;;  %v4319_v45 = vunpack.c.l.b16 %v3850_v11  ;;  %v4321_v23 = vunpack.c.l.b16 %v3852_v10  ;;  %v4323_v26 = vunpack.c.l.b16 %v3854_v43  ;;  %v13154_v43 = vpop.f32.mrb[40].mxu0 }
 0x1f3   :  { %v16265_v46 = vrot.slane %v12632_v25, 6  ;;  %v4529_v55 = vrot.slane %v4303_v40, 3  ;;  %v4532_v17 = vrot.slane %v4305_v19, 2  ;;  %v16268_v8 = vrot.slane %v16267_v49, 7  ;;  %16273 = vst [vmem:[#allocation8_spill] sm:$0xff] %v13154_v43  ;;  %v16274_v40 = vld [vmem:[#allocation10_spill] sm:$0xff] }
 0x1f4   :  { %v16270_v34 = vrot.slane %v16269_v28, 5  ;;  %v4535_v13 = vrot.slane %v4307_v3, 1  ;;  %v16272_v11 = vrot.slane %v16271_v15, 6  ;;  %v4558_v25 = vrot.slane %v12765_v36, 4  ;;  %v13160_v49 = vpop.f32.mrb[41].mxu0  ;;  %v16278_v28 = vld [vmem:[#allocation19_spill] sm:$0xff] }
 0x1f5   :  { %v4522_v62 = vsel %vm4521_vm5, %v16265_v46, %v4519_v32  ;;  %v4553_v22 = vsel %vm4518_vm4, %v16268_v8, %v16266_v16  ;;  %v16275_v19 = vrot.slane %v16274_v40, 5  ;;  %v4560_v46 = vrot.slane %v4319_v45, 3  ;;  %16276 = vst [vmem:[#allocation9_spill] sm:$0xff] %v13160_v49  ;;  %v16282_v40 = vld [vmem:[#allocation26_spill] sm:$0xff] }
 0x1f6   :  { %v4525_v30 = vsel %vm4524_vm6, %v16270_v34, %v4522_v62  ;;  %v4555_v10 = vsel %vm4521_vm5, %v16272_v11, %v4553_v22  ;;  %v4562_v16 = vrot.slane %v4321_v23, 2  ;;  %v4564_v62 = vrot.slane %v4323_v26, 1  ;;  %v13166_v22 = vpop.f32.mrb[42].mxu0  ;;  %v16279_v23 = vld [vmem:[#allocation21_spill] sm:$0xff] }
 0x1f7   :  { %v4528_v32 = vsel %vm4527_vm7, %v4526_v2, %v4525_v30  ;;  %v4557_v9 = vsel %vm4524_vm6, %v16275_v19, %v4555_v10  ;;  %v1226_v36 = vadd.f32 %v12780_v29, %v12596_v63  ;;  %16277 = vst [vmem:[#allocation6_spill] sm:$0xff] %v13166_v22  ;;  %v1228_v45 = vadd.f32 %v16278_v28, %v12600_v0  ;;  %v13174_v15 = vpop.f32.mrb[43].mxu0  ;;  %v16281_v29 = vld [vmem:[#allocation23_spill] sm:$0xff] }
 0x1f8   :  { %v4531_v34 = vsel %vm4530_vm8, %v4529_v55, %v4528_v32  ;;  %v4559_v3 = vsel %vm4527_vm7, %v4558_v25, %v4557_v9  ;;  %v1230_v30 = vadd.f32 %v16279_v23, %v12596_v63  ;;  %16280 = vst [vmem:[#allocation7_spill] sm:$0xff] %v13174_v15  ;;  %v1232_v10 = vadd.f32 %v16281_v29, %v12600_v0 }
 0x1f9   :  { %v4534_v2 = vsel %vm4533_vm9, %v4532_v17, %v4531_v34  ;;  %v4561_v8 = vsel %vm4530_vm8, %v4560_v46, %v4559_v3  ;;  %v1328_v11 = vmul.f32 0.6666667, %v1226_v36  ;;  %v1329_v25 = vmul.f32 0.6666667, %v1228_v45  ;;  %v16283_v34 = vld [vmem:[#allocation27_spill] sm:$0xff]  ;;  %v16286_v45 = vld [vmem:[#allocation20_spill] sm:$0xff] }
 0x1fa   :  { %v4537_v55 = vsel %vm4536_vm10, %v4535_v13, %v4534_v2  ;;  %v4563_v26 = vsel %vm4533_vm9, %v4562_v16, %v4561_v8  ;;  %v1330_v32 = vmul.f32 0.6666667, %v1230_v30  ;;  %v1236_v19 = vadd.f32 %v16282_v40, %v12596_v63  ;;  %v16284_v16 = vld [vmem:[#allocation28_spill] sm:$0xff]  ;;  %v16285_v2 = vld [vmem:[#allocation22_spill] sm:$0xff] }
 0x1fb   :  { %v4565_v17 = vsel %vm4536_vm10, %v4564_v62, %v4563_v26  ;;  %11530 = vtanh.f32 %v1328_v11  ;;  %v1331_v46 = vmul.f32 0.6666667, %v1232_v10  ;;  %v1238_v3 = vadd.f32 %v16283_v34, %v12600_v0 }
 0x1fc   :  { %v4916_v9 = vpack.c.b16 %v4565_v17, %v4537_v55  ;;  %11532 = vtanh.f32 %v1329_v25  ;;  %v1332_v13 = vmul.f32 0.6666667, %v1236_v19  ;;  %v1240_v36 = vadd.f32 %v16284_v16, %v12596_v63  ;;  %v13194_v55 = vpop.f32.mrb[44].mxu0  ;;  %v16290_v25 = vld [vmem:[#allocation24_spill] sm:$0xff] }
 0x1fd   :  { %v2895_v8 = vrot.slane %v16285_v2, %v12615_v41  ;;  %11534 = vtanh.f32 %v1330_v32  ;;  %v1333_v62 = vmul.f32 0.6666667, %v1238_v3  ;;  %v2959_v28 = vrot.slane %v12855_v47, %v12615_v41  ;;  %16288 = vst [vmem:[#allocation10_spill] sm:$0xff] %v13194_v55  ;;  %v16291_v32 = vld [vmem:[#allocation12_spill] sm:$0xff]  ;;  %v16293_v3 = vld [vmem:[#allocation18_spill] sm:$0xff] }
 0x1fe   :  { %5059 = vmatmul.mubr.bf16.vlgmr.msra.gmra.mrb[0].mxu1 %v4916_v9  ;;  %v16287_v23 = vpack.c.bf16 %v16286_v45, %v16286_v45  ;;  %11536 = vtanh.f32 %v1331_v46  ;;  %v1334_v26 = vmul.f32 0.6666667, %v1240_v36  ;;  %v16289_v29 = vpack.c.bf16 %v12867_v12, %v12867_v12  ;;  %v16297_v45 = vld [vmem:[#allocation31_spill] sm:$0xff] }
 0x1ff   :  { %v3871_v11 = vpack.c.bf16 %v2895_v8, %v2895_v8  ;;  %11538 = vtanh.f32 %v1332_v13  ;;  %v3887_v17 = vpack.c.bf16 %v2959_v28, %v2959_v28  ;;  %v16292_v40 = vrot.slane %v16291_v32, 6  ;;  %v13207_v8 = vpop.f32.mrb[45].mxu0 }
 0x200   :  { %v4338_v30 = vunpack.c.l.b16 %v16287_v23  ;;  %v4354_v10 = vunpack.c.l.b16 %v16289_v29  ;;  %v4602_v9 = vrot.slane %v12831_v58, 3  ;;  %11540 = vtanh.f32 %v1333_v62  ;;  %16295 = vst [vmem:[#allocation19_spill] sm:$0xff] %v13207_v8  ;;  %v13216_v62 = vpop.f32.mrb[46].mxu0 }
 0x201   :  { %v4597_v19 = vsel %vm4521_vm5, %v16292_v40, %v16290_v25  ;;  %v4340_v34 = vunpack.c.l.b16 %v3871_v11  ;;  %v16294_v16 = vrot.slane %v16293_v3, 5  ;;  %11542 = vtanh.f32 %v1334_v26  ;;  %16299 = vst [vmem:[#allocation21_spill] sm:$0xff] %v13216_v62  ;;  %v16300_v25 = vld [vmem:[#allocation34_spill] sm:$0xff]  ;;  %v16302_v26 = vld [vmem:[#allocation41_spill] sm:$0xff]  ;;  %v13223_v40 = vpop.f32.mrb[47].mxu0 }
 0x202   :  { %v4604_v36 = vrot.slane %v4338_v30, 2  ;;  %v4356_v12 = vunpack.c.l.b16 %v3887_v17  ;;  %v16296_v13 = vrot.slane %v12817_v59, 4  ;;  %v16298_v23 = vrot.slane %v16297_v45, 6  ;;  %16303 = vst [vmem:[#allocation23_spill] sm:$0xff] %v13223_v40  ;;  %v16307_v45 = vld [vmem:[#allocation14_spill] sm:$0xff] }
 0x203   :  { %v4599_v46 = vsel %vm4524_vm6, %v16294_v16, %v4597_v19  ;;  %v4606_v29 = vrot.slane %v4340_v34, 1  ;;  %v16301_v30 = vrot.slane %v16300_v25, 5  ;;  %v4630_v17 = vrot.slane %v16302_v26, 3  ;;  %v16304_v19 = vld [vmem:[#allocation38_spill] sm:$0xff]  ;;  %v16306_v34 = vld [vmem:[#allocation29_spill] sm:$0xff] }
 0x204   :  { %v4601_v28 = vsel %vm4527_vm7, %v16296_v13, %v4599_v46  ;;  %v4625_v58 = vsel %vm4521_vm5, %v16298_v23, %v12876_v61  ;;  %v16305_v3 = vrot.slane %v16304_v19, 4  ;;  %v4632_v61 = vrot.slane %v4354_v10, 2  ;;  %v16308_v10 = vld [vmem:[#allocation15_spill] sm:$0xff] }
 0x205   :  { %v4603_v11 = vsel %vm4530_vm8, %v4602_v9, %v4601_v28  ;;  %v4627_v32 = vsel %vm4524_vm6, %v16301_v30, %v4625_v58  ;;  %v4634_v46 = vrot.slane %v4356_v12, 1  ;;  %v1242_v28 = vadd.f32 %v16306_v34, %v12600_v0  ;;  %v11531_v58 = vpop.eup %11530 }
 0x206   :  { %v4605_v59 = vsel %vm4533_vm9, %v4604_v36, %v4603_v11  ;;  %v4629_v16 = vsel %vm4527_vm7, %v16305_v3, %v4627_v32  ;;  %v2875_v23 = vrot.slane %v16307_v45, %v12589_v60  ;;  %v13238_v36 = vunpack.c.l.b16 %v3912_v35  ;;  %v11533_v25 = vpop.eup %11532 }
 0x207   :  { %v4607_v13 = vsel %vm4536_vm10, %v4606_v29, %v4605_v59  ;;  %v4631_v9 = vsel %vm4530_vm8, %v4630_v17, %v4629_v16  ;;  %v2883_v12 = vrot.slane %v16308_v10, %v12589_v60  ;;  %v13245_v29 = vrot.slane %v16285_v2, %v12589_v60  ;;  %v16309_v17 = vld [vmem:[#allocation35_spill] sm:$0xff]  ;;  %v11535_v54 = vpop.eup %11534 }
 0x208   :  { %v4633_v11 = vsel %vm4533_vm9, %v4632_v61, %v4631_v9  ;;  %v1440_v30 = vmul.f32 1.7159, %v11531_v58  ;;  %v1335_v26 = vmul.f32 0.6666667, %v1242_v28  ;;  %v13250_v59 = vrot.slane %v16309_v17, %v12589_v60  ;;  %v11537_v16 = vpop.eup %11536  ;;  %v16310_v9 = vld [vmem:[#allocation36_spill] sm:$0xff] }
 0x209   :  { %v4635_v32 = vsel %vm4536_vm10, %v4634_v46, %v4633_v11  ;;  %v13255_v35 = vunpack.c.l.b16 %v3915_v27  ;;  %v1441_v3 = vmul.f32 1.7159, %v11533_v25  ;;  %v1442_v61 = vmul.f32 1.7159, %v11535_v54  ;;  %v11539_v45 = vpop.eup %11538 }
 0x20a   :  { %v4919_v2 = vpack.c.b16 %v4635_v32, %v4607_v13  ;;  %v13260_v46 = vrot.slane %v16310_v9, %v12589_v60  ;;  %v13264_v34 = vrot.slane %v12855_v47, %v12589_v60  ;;  %v3866_v28 = vpack.c.bf16 %v2875_v23, %v2875_v23  ;;  %v11541_v11 = vpop.eup %11540 }
 0x20b   :  { %v1744_v58 = vcombine.low %v1440_v30, %v1441_v3  ;;  %v1745_v57 = vcombine.high %v1440_v30, %v1441_v3  ;;  %v1443_v27 = vmul.f32 1.7159, %v11537_v16  ;;  %11544 = vtanh.f32 %v1335_v26  ;;  %v11543_v47 = vpop.eup %11542 }
 0x20c   :  { %10852 = vmatprep.mubr.msk.bf16.mxu1 %vm5000_vm11, %v4919_v2  ;;  %v13267_v13 = vmul.f32 1.7159, %v11539_v45  ;;  %v3868_v10 = vpack.c.bf16 %v2883_v12, %v2883_v12  ;;  %v3870_v25 = vpack.c.bf16 %v13245_v29, %v13245_v29  ;;  %v13275_v3 = vmul.f32 1.7159, %v11541_v11 }
 0x20d   :  { %v1752_v23 = vrot.slane %v1744_v58, %v12607_v24  ;;  %v1759_v17 = vrot.slane %v1745_v57, %v12607_v24  ;;  %v1762_v30 = vcombine.low %v1442_v61, %v1443_v27  ;;  %v1763_v54 = vcombine.high %v1442_v61, %v1443_v27 }
 0x20e   :  { %v13281_v2 = vunpack.c.l.b16 %v3866_v28  ;;  %v1780_v61 = vcombine.low %v13267_v13, %v13275_v3  ;;  %v1781_v27 = vcombine.high %v13267_v13, %v13275_v3  ;;  %v13289_v40 = vmul.f32 1.7159, %v11543_v47 }
 0x20f   :  { %v1760_v29 = vcombine.high %v1752_v23, %v1752_v23  ;;  %v1761_v16 = vcombine.high %v1759_v17, %v1759_v17  ;;  %v10776_v9 = vrot.slane %v1752_v23, 9  ;;  %v10778_v45 = vrot.slane %v1759_v17, 9 }
 0x210   :  { %v1770_v58 = vrot.slane %v1762_v30, %v12607_v24  ;;  %v1777_v57 = vrot.slane %v1763_v54, %v12607_v24  ;;  %v13291_v62 = vunpack.c.l.b16 %v3868_v10  ;;  %v13305_v5 = vunpack.c.l.b16 %v3870_v25 }
 0x211   :  { %v10777_v11 = vrot.slane %v1760_v29, 9  ;;  %v10779_v19 = vrot.slane %v1761_v16, 9  ;;  %v2528_v26 = vadd.f32 %v10776_v9, %v1752_v23  ;;  %v2530_v12 = vadd.f32 %v10778_v45, %v1759_v17 }
 0x212   :  { %v1778_v28 = vcombine.high %v1770_v58, %v1770_v58  ;;  %v1779_v32 = vcombine.high %v1777_v57, %v1777_v57  ;;  %v10780_v3 = vrot.slane %v1770_v58, 9  ;;  %v10782_v50 = vrot.slane %v1777_v57, 9 }
 0x213   :  { %v2529_v8 = vadd.f32 %v10777_v11, %v1760_v29  ;;  %v2531_v30 = vadd.f32 %v10779_v19, %v1761_v16  ;;  %v3091_v54 = vrot.slane %v2528_v26, %v12589_v60  ;;  %v3095_v55 = vrot.slane %v2528_v26, %v12615_v41 }
 0x214   :  { %v3107_v15 = vrot.slane %v2530_v12, %v12589_v60  ;;  %v3111_v13 = vrot.slane %v2530_v12, %v12615_v41  ;;  %v10781_v22 = vrot.slane %v1778_v28, 9 }
 0x215   :  { %v11545_v23 = vpop.eup %11544  ;;  %v3099_v17 = vrot.slane %v2529_v8, %v12589_v60  ;;  %v3103_v47 = vrot.slane %v2529_v8, %v12615_v41  ;;  %v3115_v10 = vrot.slane %v2531_v30, %v12589_v60  ;;  %v3119_v29 = vrot.slane %v2531_v30, %v12615_v41 }
 0x216   :  { %v3920_v19 = vpack.c.bf16 %v3091_v54, %v3091_v54  ;;  %v3921_v16 = vpack.c.bf16 %v3095_v55, %v3095_v55  ;;  %v3924_v9 = vpack.c.bf16 %v3107_v15, %v3107_v15  ;;  %v3925_v45 = vpack.c.bf16 %v3111_v13, %v3111_v13 }
 0x217   :  { %v3922_v26 = vpack.c.bf16 %v3099_v17, %v3099_v17  ;;  %v3923_v11 = vpack.c.bf16 %v3103_v47, %v3103_v47  ;;  %v3926_v49 = vpack.c.bf16 %v3115_v10, %v3115_v10  ;;  %v3927_v43 = vpack.c.bf16 %v3119_v29, %v3119_v29 }
 0x218   :  { %v13301_v12 = vunpack.c.l.b16 %v3924_v9  ;;  %v13303_v44 = vunpack.c.l.b16 %v3925_v45  ;;  %v10783_v30 = vrot.slane %v1779_v32, 9  ;;  %v13311_v55 = vunpack.c.l.b16 %v3920_v19 }
 0x219   :  { %v13307_v8 = vunpack.c.l.b16 %v3922_v26  ;;  %v4392_v52 = vunpack.c.l.b16 %v3923_v11  ;;  %v13309_v42 = vunpack.c.l.b16 %v3926_v49  ;;  %v13313_v15 = vunpack.c.l.b16 %v3927_v43 }
 0x21a   :  { %16311 = vst [vmem:[#allocation26_spill] sm:$0xff] %v13301_v12  ;;  %16314 = vst [vmem:[#allocation22_spill] sm:$0xff] %v13311_v55  ;;  %v2532_v54 = vadd.f32 %v10780_v3, %v1770_v58  ;;  %v13315_v13 = vadd.f32 %v10781_v22, %v1778_v28  ;;  %v4390_v17 = vunpack.c.l.b16 %v3921_v16  ;;  %v13320_v9 = vadd.f32 %v10782_v50, %v1777_v57 }
 0x21b   :  { %16312 = vst [vmem:[#allocation27_spill] sm:$0xff] %v13307_v8  ;;  %16313 = vst [vmem:[#allocation28_spill] sm:$0xff] %v13309_v42  ;;  %v4706_v29 = vrot.slane %v4392_v52, 7  ;;  %v1788_v58 = vrot.slane %v1780_v61, %v12607_v24  ;;  %v1795_v28 = vrot.slane %v1781_v27, %v12607_v24  ;;  %v1447_v57 = vmul.f32 1.7159, %v11545_v23 }
 0x21c   :  { %16315 = vst [vmem:[#allocation20_spill] sm:$0xff] %v13320_v9  ;;  %v3123_v49 = vrot.slane %v2532_v54, %v12589_v60  ;;  %v3127_v19 = vrot.slane %v2532_v54, %v12615_v41  ;;  %v3135_v22 = vrot.slane %v13315_v13, %v12615_v41  ;;  %v13332_v52 = vrot.slane %v13320_v9, %v12615_v41 }
 0x21d   :  { %v13334_v16 = vadd.f32 %v10783_v30, %v1779_v32  ;;  %v1796_v45 = vcombine.high %v1788_v58, %v1788_v58  ;;  %v1797_v26 = vcombine.high %v1795_v28, %v1795_v28  ;;  %v10784_v11 = vrot.slane %v1788_v58, 9 }
 0x21e   :  { %v3929_v50 = vpack.c.bf16 %v3127_v19, %v3127_v19  ;;  %v13337_v54 = vsel %vm4518_vm4, %v4706_v29, %v4390_v17  ;;  %v3928_v43 = vpack.c.bf16 %v3123_v49, %v3123_v49  ;;  %v3931_v61 = vpack.c.bf16 %v3135_v22, %v3135_v22 }
 0x21f   :  { %v10786_v10 = vrot.slane %v1795_v28, 9  ;;  %v10785_v47 = vrot.slane %v1796_v45, 9  ;;  %v10787_v3 = vrot.slane %v1797_v26, 9  ;;  %v2536_v25 = vadd.f32 %v10784_v11, %v1788_v58 }
 0x220   :  { %v13341_v42 = vunpack.c.l.b16 %v3929_v50  ;;  %v1798_v32 = vcombine.low %v13289_v40, %v1447_v57  ;;  %v1799_v30 = vcombine.high %v13289_v40, %v1447_v57  ;;  %v13355_v8 = vunpack.c.l.b16 %v3928_v43 }
 0x221   :  { %v2538_v23 = vadd.f32 %v10786_v10, %v1795_v28  ;;  %v2537_v19 = vadd.f32 %v10785_v47, %v1796_v45  ;;  %v2539_v12 = vadd.f32 %v10787_v3, %v1797_v26  ;;  %v3155_v17 = vrot.slane %v2536_v25, %v12589_v60 }
 0x222   :  { %v3159_v29 = vrot.slane %v2536_v25, %v12615_v41  ;;  %v1806_v27 = vrot.slane %v1798_v32, %v12607_v24  ;;  %v1813_v58 = vrot.slane %v1799_v30, %v12607_v24  ;;  %16316 = vst [vmem:[#allocation24_spill] sm:$0xff] %v13355_v8  ;;  %v13357_v32 = vunpack.c.l.b16 %v3931_v61 }
 0x223   :  { %v3171_v49 = vrot.slane %v2538_v23, %v12589_v60  ;;  %v3175_v22 = vrot.slane %v2538_v23, %v12615_v41  ;;  %v3163_v10 = vrot.slane %v2537_v19, %v12589_v60  ;;  %v3167_v28 = vrot.slane %v2537_v19, %v12615_v41 }
 0x224   :  { %v3179_v40 = vrot.slane %v2539_v12, %v12589_v60  ;;  %v3183_v47 = vrot.slane %v2539_v12, %v12615_v41  ;;  %v3936_v3 = vpack.c.bf16 %v3155_v17, %v3155_v17  ;;  %v3937_v50 = vpack.c.bf16 %v3159_v29, %v3159_v29 }
 0x225   :  { %v3940_v57 = vpack.c.bf16 %v3171_v49, %v3171_v49  ;;  %v3941_v25 = vpack.c.bf16 %v3175_v22, %v3175_v22  ;;  %v3938_v45 = vpack.c.bf16 %v3163_v10, %v3163_v10  ;;  %v3939_v26 = vpack.c.bf16 %v3167_v28, %v3167_v28 }
 0x226   :  { %v3942_v11 = vpack.c.bf16 %v3179_v40, %v3179_v40  ;;  %v3943_v23 = vpack.c.bf16 %v3183_v47, %v3183_v47  ;;  %v13370_v49 = vunpack.c.l.b16 %v3936_v3  ;;  %v1814_v22 = vcombine.high %v1806_v27, %v1806_v27  ;;  %v16326_v3 = vld [vmem:[#allocation16_spill] sm:$0xff] }
 0x227   :  { %v13359_v30 = vunpack.c.l.b16 %v3940_v57  ;;  %v13361_v55 = vunpack.c.l.b16 %v3941_v25  ;;  %v13363_v19 = vunpack.c.l.b16 %v3938_v45  ;;  %v4408_v9 = vunpack.c.l.b16 %v3939_v26 }
 0x228   :  { %v13365_v12 = vunpack.c.l.b16 %v3942_v11  ;;  %v13367_v17 = vunpack.c.l.b16 %v3943_v23  ;;  %16320 = vst [vmem:[#allocation34_spill] sm:$0xff] %v13370_v49  ;;  %v1815_v43 = vcombine.high %v1813_v58, %v1813_v58  ;;  %v4406_v10 = vunpack.c.l.b16 %v3937_v50  ;;  %v16335_v49 = vld [vmem:[#allocation40_spill] sm:$0xff] }
 0x229   :  { %16317 = vst [vmem:[#allocation12_spill] sm:$0xff] %v13359_v30  ;;  %16318 = vst [vmem:[#allocation18_spill] sm:$0xff] %v13363_v19  ;;  %v4734_v28 = vrot.slane %v4408_v9, 7  ;;  %v10788_v47 = vrot.slane %v1806_v27, 9  ;;  %v10789_v57 = vrot.slane %v1814_v22, 9  ;;  %v10790_v25 = vrot.slane %v1813_v58, 9 }
 0x22a   :  { %16319 = vst [vmem:[#allocation31_spill] sm:$0xff] %v13365_v12  ;;  %v10791_v45 = vrot.slane %v1815_v43, 9  ;;  %v16323_v9 = vpack.c.bf16 %v13250_v59, %v13250_v59  ;;  %v16324_v26 = vpack.c.bf16 %v13260_v46, %v13260_v46  ;;  %v4590_v12 = vrot.slane %v13291_v62, 2 }
 0x22b   :  { %v13377_v23 = vsel %vm4518_vm4, %v4734_v28, %v4406_v10  ;;  %v2540_v29 = vadd.f32 %v10788_v47, %v1806_v27  ;;  %v13380_v50 = vadd.f32 %v10789_v57, %v1814_v22  ;;  %v13382_v61 = vadd.f32 %v10790_v25, %v1813_v58  ;;  %v16327_v27 = vld [vmem:[#allocation13_spill] sm:$0xff] }
 0x22c   :  { %v4351_v40 = vunpack.c.l.b16 %v16323_v9  ;;  %v13387_v30 = vadd.f32 %v10791_v45, %v1815_v43  ;;  %v4353_v11 = vunpack.c.l.b16 %v16324_v26  ;;  %v16325_v10 = vpack.c.bf16 %v13264_v34, %v13264_v34  ;;  %v16329_v34 = vld [vmem:[#allocation11_spill] sm:$0xff]  ;;  %v16331_v45 = vld [vmem:[#allocation25_spill] sm:$0xff] }
 0x22d   :  { %16321 = vst [vmem:[#allocation41_spill] sm:$0xff] %v13380_v50  ;;  %16322 = vst [vmem:[#allocation38_spill] sm:$0xff] %v13382_v61  ;;  %v16328_v22 = vrot.slane %v16327_v27, 7  ;;  %v13400_v47 = vrot.slane %v2540_v29, %v12589_v60  ;;  %v3191_v59 = vrot.slane %v2540_v29, %v12615_v41  ;;  %v13405_v43 = vrot.slane %v13380_v50, %v12615_v41  ;;  %v16332_v9 = vld [vmem:[#allocation37_spill] sm:$0xff] }
 0x22e   :  { %v4355_v28 = vunpack.c.l.b16 %v16325_v10  ;;  %v13409_v46 = vrot.slane %v13382_v61, %v12615_v41  ;;  %v16330_v57 = vrot.slane %v16329_v34, 6  ;;  %v4586_v26 = vrot.slane %v16331_v45, 4  ;;  %v16333_v10 = vld [vmem:[#allocation32_spill] sm:$0xff] }
 0x22f   :  { %v4581_v58 = vsel %vm4518_vm4, %v16328_v22, %v16326_v3  ;;  %v4588_v3 = vrot.slane %v13281_v2, 3  ;;  %v16334_v27 = vrot.slane %v16333_v10, 7  ;;  %v3945_v22 = vpack.c.bf16 %v3191_v59, %v3191_v59  ;;  %v16338_v10 = vld [vmem:[#allocation30_spill] sm:$0xff] }
 0x230   :  { %v4583_v25 = vsel %vm4521_vm5, %v16330_v57, %v4581_v58  ;;  %v4592_v19 = vrot.slane %v13305_v5, 1  ;;  %v4614_v8 = vrot.slane %v16335_v49, 4  ;;  %v16336_v57 = vld [vmem:[#allocation17_spill] sm:$0xff]  ;;  %v16339_v61 = vrot.slane %v16338_v10, 6  ;;  %v13444_v10 = vpop.f32.mrb[48].mxu0 }
 0x231   :  { %v4609_v29 = vsel %vm4518_vm4, %v16334_v27, %v16332_v9  ;;  %v16337_v2 = vrot.slane %v16336_v57, 5  ;;  %v4616_v49 = vrot.slane %v4351_v40, 3  ;;  %v4618_v9 = vrot.slane %v4353_v11, 2  ;;  %v16340_v58 = vld [vmem:[#allocation33_spill] sm:$0xff]  ;;  %v16343_v40 = vld [vmem:[#allocation42_spill] sm:$0xff] }
 0x232   :  { %v4611_v59 = vsel %vm4521_vm5, %v16339_v61, %v4609_v29  ;;  %v13436_v27 = vunpack.c.l.b16 %v3945_v22  ;;  %v16341_v50 = vrot.slane %v16340_v58, 5  ;;  %v1248_v11 = vadd.f32 %v16343_v40, %v12600_v0 }
 0x233   :  { %v4585_v45 = vsel %vm4524_vm6, %v16337_v2, %v4583_v25  ;;  %v16342_v25 = vld [vmem:[#allocation39_spill] sm:$0xff]  ;;  %v16347_v40 = vpack.c.bf16 %v13095_v14, %v13095_v14  ;;  %v16352_v14 = vrot.slane %v13049_v7, 6 }
 0x234   :  { %v4587_v5 = vsel %vm4527_vm7, %v4586_v26, %v4585_v45  ;;  %v4613_v57 = vsel %vm4524_vm6, %v16341_v50, %v4611_v59  ;;  %v1246_v2 = vadd.f32 %v16342_v25, %v12596_v63  ;;  %v4620_v26 = vrot.slane %v4355_v28, 1  ;;  %v16344_v50 = vld [vmem:[#allocation43_spill] sm:$0xff]  ;;  %v16345_v25 = vld [vmem:[#allocation44_spill] sm:$0xff] }
 0x235   :  { %v4589_v34 = vsel %vm4530_vm8, %v4588_v3, %v4587_v5  ;;  %v4615_v29 = vsel %vm4527_vm7, %v4614_v8, %v4613_v57  ;;  %v1250_v45 = vadd.f32 %v16344_v50, %v12596_v63  ;;  %v1337_v5 = vmul.f32 0.6666667, %v1248_v11 }
 0x236   :  { %v4591_v61 = vsel %vm4533_vm9, %v4590_v12, %v4589_v34  ;;  %v4617_v3 = vsel %vm4530_vm8, %v4616_v49, %v4615_v29  ;;  %v1336_v58 = vmul.f32 0.6666667, %v1246_v2  ;;  %v1252_v12 = vadd.f32 %v16345_v25, %v12600_v0 }
 0x237   :  { %v4593_v22 = vsel %vm4536_vm10, %v4592_v19, %v4591_v61  ;;  %v4619_v59 = vsel %vm4533_vm9, %v4618_v9, %v4617_v3  ;;  %v3023_v8 = vrot.slane %v13030_v48, %v12615_v41  ;;  %v1338_v34 = vmul.f32 0.6666667, %v1250_v45  ;;  %v16348_v3 = vld [vmem:[#allocation46_spill] sm:$0xff] }
 0x238   :  { %v4621_v28 = vsel %vm4536_vm10, %v4620_v26, %v4619_v59  ;;  %11546 = vtanh.f32 %v1336_v58  ;;  %v3087_v19 = vrot.slane %v13112_v18, %v12615_v41  ;;  %v1339_v57 = vmul.f32 0.6666667, %v1252_v12  ;;  %v16350_v59 = vld [vmem:[#allocation50_spill] sm:$0xff] }
 0x239   :  { %v4918_v49 = vpack.c.b16 %v4621_v28, %v4593_v22  ;;  %11548 = vtanh.f32 %v1337_v5  ;;  %v3903_v2 = vpack.c.bf16 %v3023_v8, %v3023_v8  ;;  %v16346_v61 = vpack.c.bf16 %v13014_v6, %v13014_v6 }
 0x23a   :  { %11550 = vtanh.f32 %v1338_v34  ;;  %v3919_v9 = vpack.c.bf16 %v3087_v19, %v3087_v19  ;;  %v4386_v11 = vunpack.c.l.b16 %v16347_v40  ;;  %v16349_v58 = vrot.slane %v16348_v3, 6  ;;  %v16357_v40 = vld [vmem:[#allocation52_spill] sm:$0xff] }
 0x23b   :  { %v4370_v29 = vunpack.c.l.b16 %v16346_v61  ;;  %5067 = vmatmul.mubr.bf16.gmra.mrb[4].mxu1 %v4918_v49  ;;  %11552 = vtanh.f32 %v1339_v57  ;;  %v4372_v26 = vunpack.c.l.b16 %v3903_v2  ;;  %v4658_v50 = vrot.slane %v13038_v33, 3  ;;  %v13487_v49 = vpop.f32.mrb[49].mxu0 }
 0x23c   :  { %v4653_v22 = vsel %vm4521_vm5, %v16349_v58, %v13028_v56  ;;  %v4388_v45 = vunpack.c.l.b16 %v3919_v9  ;;  %v16351_v5 = vrot.slane %v16350_v59, 5  ;;  %v4681_v12 = vsel %vm4521_vm5, %v16352_v14, %v13110_v20 }
 0x23d   :  { %v4660_v25 = vrot.slane %v4370_v29, 2  ;;  %v16353_v8 = vrot.slane %v13017_v51, 4  ;;  %v4662_v34 = vrot.slane %v4372_v26, 1  ;;  %v16354_v56 = vrot.slane %v13063_v53, 5  ;;  %v16356_v53 = vld [vmem:[#allocation51_spill] sm:$0xff] }
 0x23e   :  { %v4655_v6 = vsel %vm4524_vm6, %v16351_v5, %v4653_v22  ;;  %v4686_v19 = vrot.slane %v13255_v35, 3  ;;  %v16355_v2 = vrot.slane %v13131_v21, 4  ;;  %v4688_v20 = vrot.slane %v4386_v11, 2 }
 0x23f   :  { %v4657_v28 = vsel %vm4527_vm7, %v16353_v8, %v4655_v6  ;;  %v4683_v33 = vsel %vm4524_vm6, %v16354_v56, %v4681_v12  ;;  %v4690_v9 = vrot.slane %v4388_v45, 1  ;;  %v3003_v29 = vrot.slane %v16356_v53, %v12589_v60 }
 0x240   :  { %v4659_v57 = vsel %vm4530_vm8, %v4658_v50, %v4657_v28  ;;  %v4685_v7 = vsel %vm4527_vm7, %v16355_v2, %v4683_v33  ;;  %v3011_v35 = vrot.slane %v16357_v40, %v12589_v60  ;;  %v3019_v21 = vrot.slane %v13030_v48, %v12589_v60 }
 0x241   :  { %v4661_v51 = vsel %vm4533_vm9, %v4660_v25, %v4659_v57  ;;  %v4687_v61 = vsel %vm4530_vm8, %v4686_v19, %v4685_v7  ;;  %v3067_v11 = vrot.slane %v13083_v38, %v12589_v60  ;;  %v3075_v22 = vrot.slane %v13079_v31, %v12589_v60 }
 0x242   :  { %v4663_v26 = vsel %vm4536_vm10, %v4662_v34, %v4661_v51  ;;  %v4689_v3 = vsel %vm4533_vm9, %v4688_v20, %v4687_v61  ;;  %v3083_v50 = vrot.slane %v13112_v18, %v12589_v60  ;;  %v3898_v45 = vpack.c.bf16 %v3003_v29, %v3003_v29  ;;  %v11547_v59 = vpop.eup %11546 }
 0x243   :  { %v4691_v58 = vsel %vm4536_vm10, %v4690_v9, %v4689_v3  ;;  %v16358_v5 = vpack.c.bf16 %v13400_v47, %v13400_v47  ;;  %v3900_v48 = vpack.c.bf16 %v3011_v35, %v3011_v35  ;;  %v3902_v14 = vpack.c.bf16 %v3019_v21, %v3019_v21  ;;  %v11549_v12 = vpop.eup %11548  ;;  %v16361_v9 = vld [vmem:[#allocation47_spill] sm:$0xff]  ;;  %v16363_v35 = vld [vmem:[#allocation45_spill] sm:$0xff] }
 0x244   :  { %v4921_v25 = vpack.c.b16 %v4691_v58, %v4663_v26  ;;  %v16359_v38 = vpack.c.bf16 %v13405_v43, %v13405_v43  ;;  %v1448_v31 = vmul.f32 1.7159, %v11547_v59  ;;  %v3914_v28 = vpack.c.bf16 %v3067_v11, %v3067_v11  ;;  %v11551_v18 = vpop.eup %11550  ;;  %v16360_v43 = vld [vmem:[#allocation48_spill] sm:$0xff]  ;;  %v16365_v58 = vld [vmem:[#allocation49_spill] sm:$0xff]  ;;  %v13541_v59 = vpop.f32.mrb[50].mxu0 }
 0x245   :  { %v13513_v6 = vunpack.c.l.b16 %v16358_v5  ;;  %v3916_v34 = vpack.c.bf16 %v3075_v22, %v3075_v22  ;;  %v1449_v33 = vmul.f32 1.7159, %v11549_v12  ;;  %v3918_v47 = vpack.c.bf16 %v3083_v50, %v3083_v50  ;;  %v11553_v57 = vpop.eup %11552  ;;  %v13545_v12 = vpop.f32.mrb[51].mxu0 }
 0x246   :  { %v13518_v8 = vunpack.c.l.b16 %v16359_v38  ;;  %10853 = vmatprep.mubr.msk.bf16.mxu1 %vm5000_vm11, %v4921_v25  ;;  %v4367_v19 = vunpack.c.l.b16 %v3898_v45  ;;  %v1450_v2 = vmul.f32 1.7159, %v11551_v18  ;;  %v13522_v7 = vunpack.c.l.b16 %v3900_v48 }
 0x247   :  { %v13524_v20 = vunpack.c.l.b16 %v3902_v14  ;;  %v16362_v51 = vrot.slane %v16361_v9, 7  ;;  %v1816_v53 = vcombine.low %v1448_v31, %v1449_v33  ;;  %v1817_v29 = vcombine.high %v1448_v31, %v1449_v33 }
 0x248   :  { %v1451_v40 = vmul.f32 1.7159, %v11553_v57  ;;  %v16364_v26 = vrot.slane %v16363_v35, 6  ;;  %v13533_v21 = vunpack.c.l.b16 %v3914_v28  ;;  %v13535_v11 = vunpack.c.l.b16 %v3916_v34 }
 0x249   :  { %v4637_v61 = vsel %vm4518_vm4, %v16362_v51, %v16360_v43  ;;  %v16366_v22 = vrot.slane %v16365_v58, 5  ;;  %v4642_v45 = vrot.slane %v13034_v37, 4  ;;  %v1824_v5 = vrot.slane %v1816_v53, %v12607_v24 }
 0x24a   :  { %v4639_v3 = vsel %vm4521_vm5, %v16364_v26, %v4637_v61  ;;  %v1831_v25 = vrot.slane %v1817_v29, %v12607_v24  ;;  %v1834_v48 = vcombine.low %v1450_v2, %v1451_v40  ;;  %v1835_v14 = vcombine.high %v1450_v2, %v1451_v40 }
 0x24b   :  { %v4641_v50 = vsel %vm4524_vm6, %v16366_v22, %v4639_v3  ;;  %v13547_v38 = vunpack.c.l.b16 %v3918_v47  ;;  %v4644_v28 = vrot.slane %v4367_v19, 3  ;;  %v16367_v34 = vrot.slane %v13047_v39, 7 }
 0x24c   :  { %v4643_v31 = vsel %vm4527_vm7, %v4642_v45, %v4641_v50  ;;  %v1832_v18 = vcombine.high %v1824_v5, %v1824_v5  ;;  %v1833_v33 = vcombine.high %v1831_v25, %v1831_v25  ;;  %v10792_v57 = vrot.slane %v1824_v5, 9 }
 0x24d   :  { %v4665_v37 = vsel %vm4518_vm4, %v16367_v34, %v13041_v4  ;;  %v10794_v43 = vrot.slane %v1831_v25, 9  ;;  %v1842_v9 = vrot.slane %v1834_v48, %v12607_v24  ;;  %v1849_v2 = vrot.slane %v1835_v14, %v12607_v24 }
 0x24e   :  { %v4645_v51 = vsel %vm4530_vm8, %v4644_v28, %v4643_v31  ;;  %v16368_v47 = vrot.slane %v13043_v1, 6  ;;  %v10793_v19 = vrot.slane %v1832_v18, 9  ;;  %v10795_v53 = vrot.slane %v1833_v33, 9 }
 0x24f   :  { %v2544_v29 = vadd.f32 %v10792_v57, %v1824_v5  ;;  %v2546_v39 = vadd.f32 %v10794_v43, %v1831_v25  ;;  %v1850_v40 = vcombine.high %v1842_v9, %v1842_v9  ;;  %v1851_v4 = vcombine.high %v1849_v2, %v1849_v2 }
 0x250   :  { %v4667_v61 = vsel %vm4521_vm5, %v16368_v47, %v4665_v37  ;;  %v4646_v35 = vrot.slane %v13522_v7, 2  ;;  %v4648_v26 = vrot.slane %v13524_v20, 1  ;;  %v2545_v3 = vadd.f32 %v10793_v19, %v1832_v18 }
 0x251   :  { %v2547_v58 = vadd.f32 %v10795_v53, %v1833_v33  ;;  %v3219_v22 = vrot.slane %v2544_v29, %v12589_v60  ;;  %v3223_v50 = vrot.slane %v2544_v29, %v12615_v41  ;;  %v3235_v1 = vrot.slane %v2546_v39, %v12589_v60 }
 0x252   :  { %v3239_v45 = vrot.slane %v2546_v39, %v12615_v41  ;;  %v10796_v48 = vrot.slane %v1842_v9, 9  ;;  %v10797_v14 = vrot.slane %v1850_v40, 9  ;;  %v3227_v5 = vrot.slane %v2545_v3, %v12589_v60  ;;  %v13575_v39 = vpop.f32.mrb[52].mxu0 }
 0x253   :  { %v3231_v25 = vrot.slane %v2545_v3, %v12615_v41  ;;  %v3243_v7 = vrot.slane %v2547_v58, %v12589_v60  ;;  %v3247_v20 = vrot.slane %v2547_v58, %v12615_v41  ;;  %v3952_v31 = vpack.c.bf16 %v3219_v22, %v3219_v22 }
 0x254   :  { %v3953_v28 = vpack.c.bf16 %v3223_v50, %v3223_v50  ;;  %v3956_v34 = vpack.c.bf16 %v3235_v1, %v3235_v1  ;;  %v3957_v37 = vpack.c.bf16 %v3239_v45, %v3239_v45  ;;  %v3954_v18 = vpack.c.bf16 %v3227_v5, %v3227_v5  ;;  %v13581_v1 = vpop.f32.mrb[53].mxu0 }
 0x255   :  { %v3955_v33 = vpack.c.bf16 %v3231_v25, %v3231_v25  ;;  %v3958_v57 = vpack.c.bf16 %v3243_v7, %v3243_v7  ;;  %v3959_v43 = vpack.c.bf16 %v3247_v20, %v3247_v20  ;;  %v10798_v53 = vrot.slane %v1849_v2, 9  ;;  %v13589_v20 = vpop.f32.mrb[54].mxu0 }
 0x256   :  { %v13570_v47 = vunpack.c.l.b16 %v3956_v34  ;;  %v13572_v19 = vunpack.c.l.b16 %v3957_v37  ;;  %v4670_v29 = vrot.slane %v13238_v36, 4  ;;  %v13577_v3 = vunpack.c.l.b16 %v3954_v18 }
 0x257   :  { %v4424_v58 = vunpack.c.l.b16 %v3955_v33  ;;  %v13579_v22 = vunpack.c.l.b16 %v3958_v57  ;;  %v10799_v50 = vrot.slane %v1851_v4, 9  ;;  %v13583_v45 = vunpack.c.l.b16 %v3952_v31  ;;  %v13593_v33 = vpop.f32.mrb[55].mxu0 }
 0x258   :  { %16369 = vst [vmem:[#allocation29_spill] sm:$0xff] %v13570_v47  ;;  %16370 = vst [vmem:[#allocation14_spill] sm:$0xff] %v13577_v3  ;;  %v13585_v5 = vunpack.c.l.b16 %v3959_v43  ;;  %v2548_v25 = vadd.f32 %v10796_v48, %v1842_v9  ;;  %v13587_v7 = vadd.f32 %v10797_v14, %v1850_v40  ;;  %v4422_v36 = vunpack.c.l.b16 %v3953_v28  ;;  %v16374_v28 = vld [vmem:[#allocation54_spill] sm:$0xff] }
 0x259   :  { %16371 = vst [vmem:[#allocation15_spill] sm:$0xff] %v13579_v22  ;;  %16372 = vst [vmem:[#allocation35_spill] sm:$0xff] %v13583_v45  ;;  %v4762_v37 = vrot.slane %v4424_v58, 7  ;;  %v13596_v56 = vadd.f32 %v10798_v53, %v1849_v2  ;;  %v4647_v14 = vsel %vm4533_vm9, %v4646_v35, %v4645_v51  ;;  %v16375_v43 = vrot.slane %v16374_v28, 5 }
 0x25a   :  { %v3251_v31 = vrot.slane %v2548_v25, %v12589_v60  ;;  %v3255_v9 = vrot.slane %v2548_v25, %v12615_v41  ;;  %v3263_v48 = vrot.slane %v13587_v7, %v12615_v41  ;;  %v4649_v25 = vsel %vm4536_vm10, %v4648_v26, %v4647_v14  ;;  %v16380_v14 = vld [vmem:[#allocation57_spill] sm:$0xff] }
 0x25b   :  { %16373 = vst [vmem:[#allocation36_spill] sm:$0xff] %v13596_v56  ;;  %v4669_v58 = vsel %vm4524_vm6, %v16375_v43, %v4667_v61  ;;  %v13610_v2 = vrot.slane %v13596_v56, %v12615_v41  ;;  %v13614_v40 = vsel %vm4518_vm4, %v4762_v37, %v4422_v36  ;;  %v13616_v57 = vadd.f32 %v10799_v50, %v1851_v4  ;;  %v16376_v36 = vld [vmem:[#allocation53_spill] sm:$0xff]  ;;  %v16377_v4 = vld [vmem:[#allocation55_spill] sm:$0xff] }
 0x25c   :  { %v3960_v53 = vpack.c.bf16 %v3251_v31, %v3251_v31  ;;  %v4671_v51 = vsel %vm4527_vm7, %v4670_v29, %v4669_v58  ;;  %v4672_v35 = vrot.slane %v13533_v21, 3  ;;  %v3961_v28 = vpack.c.bf16 %v3255_v9, %v3255_v9  ;;  %v16379_v9 = vld [vmem:[#allocation56_spill] sm:$0xff] }
 0x25d   :  { %v3963_v61 = vpack.c.bf16 %v3263_v48, %v3263_v48  ;;  %v4674_v34 = vrot.slane %v13535_v11, 2  ;;  %v4676_v26 = vrot.slane %v13547_v38, 1  ;;  %v1256_v37 = vadd.f32 %v16376_v36, %v12596_v63 }
 0x25e   :  { %v4673_v31 = vsel %vm4530_vm8, %v4672_v35, %v4671_v51  ;;  %v1258_v50 = vadd.f32 %v16377_v4, %v12600_v0  ;;  %v13629_v29 = vunpack.c.l.b16 %v3960_v53  ;;  %v1260_v48 = vadd.f32 %v16379_v9, %v12596_v63  ;;  %v16381_v35 = vld [vmem:[#allocation8_spill] sm:$0xff]  ;;  %v16382_v53 = vld [vmem:[#allocation9_spill] sm:$0xff] }
 0x25f   :  { %v4675_v21 = vsel %vm4533_vm9, %v4674_v34, %v4673_v31  ;;  %v1262_v11 = vadd.f32 %v16380_v14, %v12600_v0  ;;  %v1340_v51 = vmul.f32 0.6666667, %v1256_v37  ;;  %v1266_v36 = vadd.f32 %v16381_v35, %v12596_v63  ;;  %v16383_v31 = vld [vmem:[#allocation6_spill] sm:$0xff]  ;;  %v16384_v14 = vld [vmem:[#allocation7_spill] sm:$0xff] }
 0x260   :  { %16378 = vst [vmem:[#allocation16_spill] sm:$0xff] %v13629_v29  ;;  %v4677_v58 = vsel %vm4536_vm10, %v4676_v26, %v4675_v21  ;;  %v1341_v38 = vmul.f32 0.6666667, %v1258_v50  ;;  %v1342_v43 = vmul.f32 0.6666667, %v1260_v48  ;;  %v1268_v62 = vadd.f32 %v16382_v53, %v12600_v0  ;;  %v16385_v37 = vld [vmem:[#allocation10_spill] sm:$0xff] }
 0x261   :  { %v4920_v18 = vpack.c.b16 %v4677_v58, %v4649_v25  ;;  %v1343_v4 = vmul.f32 0.6666667, %v1262_v11  ;;  %11554 = vtanh.f32 %v1340_v51  ;;  %v1344_v34 = vmul.f32 0.6666667, %v1266_v36  ;;  %v16386_v25 = vld [vmem:[#allocation19_spill] sm:$0xff]  ;;  %v16387_v58 = vld [vmem:[#allocation21_spill] sm:$0xff] }
 0x262   :  { %v1270_v9 = vadd.f32 %v16383_v31, %v12596_v63  ;;  %v1272_v22 = vadd.f32 %v16384_v14, %v12600_v0  ;;  %11556 = vtanh.f32 %v1341_v38  ;;  %v1345_v26 = vmul.f32 0.6666667, %v1268_v62 }
 0x263   :  { %5075 = vmatmul.mubr.bf16.gmra.mrb[8].mxu1 %v4920_v18  ;;  %v1276_v50 = vadd.f32 %v16385_v37, %v12596_v63  ;;  %v1278_v21 = vadd.f32 %v16386_v25, %v12600_v0  ;;  %v13649_v48 = vunpack.c.l.b16 %v3961_v28  ;;  %v13651_v11 = vunpack.c.l.b16 %v3963_v61 }
 0x264   :  { %11558 = vtanh.f32 %v1342_v43  ;;  %v1280_v51 = vadd.f32 %v16387_v58, %v12596_v63  ;;  %v1346_v35 = vmul.f32 0.6666667, %v1270_v9  ;;  %v1347_v36 = vmul.f32 0.6666667, %v1272_v22 }
 0x265   :  { %11560 = vtanh.f32 %v1343_v4  ;;  %v3151_v62 = vrot.slane %v13334_v16, %v12615_v41  ;;  %v1348_v18 = vmul.f32 0.6666667, %v1276_v50  ;;  %v3215_v38 = vrot.slane %v13387_v30, %v12615_v41 }
 0x266   :  { %11562 = vtanh.f32 %v1344_v34  ;;  %v16388_v28 = vpack.c.bf16 %v13332_v52, %v13332_v52  ;;  %v1349_v43 = vmul.f32 0.6666667, %v1278_v21  ;;  %v16389_v4 = vrot.slane %v13303_v44, 6 }
 0x267   :  { %11564 = vtanh.f32 %v1345_v26  ;;  %v3935_v53 = vpack.c.bf16 %v3151_v62, %v3151_v62  ;;  %v1350_v31 = vmul.f32 0.6666667, %v1280_v51  ;;  %v3951_v9 = vpack.c.bf16 %v3215_v38, %v3215_v38 }
 0x268   :  { %v4402_v61 = vunpack.c.l.b16 %v16388_v28  ;;  %v4709_v22 = vsel %vm4521_vm5, %v16389_v4, %v13337_v54  ;;  %v16390_v34 = vrot.slane %v13313_v15, 5  ;;  %v4714_v37 = vrot.slane %v13357_v32, 3 }
 0x269   :  { %v4404_v50 = vunpack.c.l.b16 %v3935_v53  ;;  %v16391_v52 = vpack.c.bf16 %v13409_v46, %v13409_v46  ;;  %v16392_v25 = vrot.slane %v13341_v42, 4  ;;  %11566 = vtanh.f32 %v1346_v35 }
 0x26a   :  { %v4711_v14 = vsel %vm4524_vm6, %v16390_v34, %v4709_v22  ;;  %v4716_v44 = vrot.slane %v4402_v61, 2  ;;  %v4420_v54 = vunpack.c.l.b16 %v3951_v9  ;;  %v16393_v15 = vrot.slane %v13361_v55, 6  ;;  %v16396_v22 = vld [vmem:[#allocation23_spill] sm:$0xff] }
 0x26b   :  { %v4418_v26 = vunpack.c.l.b16 %v16391_v52  ;;  %v4713_v21 = vsel %vm4527_vm7, %v16392_v25, %v4711_v14  ;;  %11568 = vtanh.f32 %v1347_v36  ;;  %v4718_v62 = vrot.slane %v4404_v50, 1  ;;  %v11555_v38 = vpop.eup %11554 }
 0x26c   :  { %v4715_v58 = vsel %vm4530_vm8, %v4714_v37, %v4713_v21  ;;  %v4737_v51 = vsel %vm4521_vm5, %v16393_v15, %v13377_v23  ;;  %v16394_v46 = vrot.slane %v13367_v17, 5  ;;  %11570 = vtanh.f32 %v1348_v18  ;;  %v11557_v53 = vpop.eup %11556 }
 0x26d   :  { %v4717_v32 = vsel %vm4533_vm9, %v4716_v44, %v4715_v58  ;;  %v16395_v35 = vrot.slane %v13436_v27, 4  ;;  %v4742_v55 = vrot.slane %v13518_v8, 3  ;;  %v1452_v23 = vmul.f32 1.7159, %v11555_v38 }
 0x26e   :  { %v4739_v42 = vsel %vm4524_vm6, %v16394_v46, %v4737_v51  ;;  %v4719_v36 = vsel %vm4536_vm10, %v4718_v62, %v4717_v32  ;;  %v4744_v4 = vrot.slane %v4418_v26, 2  ;;  %v1282_v17 = vadd.f32 %v16396_v22, %v12600_v0  ;;  %v11559_v9 = vpop.eup %11558 }
 0x26f   :  { %v4741_v61 = vsel %vm4527_vm7, %v16395_v35, %v4739_v42  ;;  %v1453_v34 = vmul.f32 1.7159, %v11557_v53  ;;  %11572 = vtanh.f32 %v1349_v43  ;;  %v4746_v18 = vrot.slane %v4420_v54, 1  ;;  %v11561_v37 = vpop.eup %11560  ;;  %v16397_v54 = vld [vmem:[#allocation20_spill] sm:$0xff] }
 0x270   :  { %v4743_v14 = vsel %vm4530_vm8, %v4742_v55, %v4741_v61  ;;  %v1454_v27 = vmul.f32 1.7159, %v11559_v9  ;;  %11574 = vtanh.f32 %v1350_v31  ;;  %v1351_v8 = vmul.f32 0.6666667, %v1282_v17  ;;  %v11563_v52 = vpop.eup %11562 }
 0x271   :  { %v4745_v50 = vsel %vm4533_vm9, %v4744_v4, %v4743_v14  ;;  %v1852_v25 = vcombine.low %v1452_v23, %v1453_v34  ;;  %v1853_v21 = vcombine.high %v1452_v23, %v1453_v34  ;;  %v1455_v44 = vmul.f32 1.7159, %v11561_v37  ;;  %v11565_v58 = vpop.eup %11564 }
 0x272   :  { %v4747_v26 = vsel %vm4536_vm10, %v4746_v18, %v4745_v50  ;;  %v13696_v15 = vmul.f32 1.7159, %v11563_v52  ;;  %v13700_v43 = vrot.slane %v13315_v13, %v12589_v60  ;;  %v13704_v31 = vrot.slane %v16397_v54, %v12589_v60  ;;  %v16398_v13 = vld [vmem:[#allocation41_spill] sm:$0xff] }
 0x273   :  { %v4923_v51 = vpack.c.b16 %v4747_v26, %v4719_v36  ;;  %v1860_v32 = vrot.slane %v1852_v25, %v12607_v24  ;;  %v1867_v62 = vrot.slane %v1853_v21, %v12607_v24  ;;  %v1870_v46 = vcombine.low %v1454_v27, %v1455_v44  ;;  %v11567_v55 = vpop.eup %11566  ;;  %v16399_v21 = vld [vmem:[#allocation38_spill] sm:$0xff] }
 0x274   :  { %v1871_v42 = vcombine.high %v1454_v27, %v1455_v44  ;;  %v13708_v38 = vmul.f32 1.7159, %v11565_v58  ;;  %11576 = vtanh.f32 %v1351_v8  ;;  %v13713_v35 = vrot.slane %v13334_v16, %v12589_v60 }
 0x275   :  { %10854 = vmatprep.mubr.msk.bf16.mxu1 %vm5000_vm11, %v4923_v51  ;;  %v13717_v61 = vrot.slane %v16398_v13, %v12589_v60  ;;  %v1868_v53 = vcombine.high %v1860_v32, %v1860_v32  ;;  %v1869_v23 = vcombine.high %v1867_v62, %v1867_v62  ;;  %v10800_v36 = vrot.slane %v1860_v32, 9  ;;  %v13719_v22 = vpop.eup %11568 }
 0x276   :  { %v10802_v4 = vrot.slane %v1867_v62, 9  ;;  %v1878_v17 = vrot.slane %v1870_v46, %v12607_v24  ;;  %v1885_v9 = vrot.slane %v1871_v42, %v12607_v24  ;;  %v1888_v34 = vcombine.low %v13696_v15, %v13708_v38  ;;  %v13727_v14 = vpop.eup %11570 }
 0x277   :  { %v1889_v16 = vcombine.high %v13696_v15, %v13708_v38  ;;  %v10801_v18 = vrot.slane %v1868_v53, 9  ;;  %v10803_v37 = vrot.slane %v1869_v23, 9  ;;  %v2552_v27 = vadd.f32 %v10800_v36, %v1860_v32 }
 0x278   :  { %v2554_v50 = vadd.f32 %v10802_v4, %v1867_v62  ;;  %v1886_v8 = vcombine.high %v1878_v17, %v1878_v17  ;;  %v1887_v52 = vcombine.high %v1885_v9, %v1885_v9  ;;  %v13729_v25 = vmul.f32 1.7159, %v11567_v55 }
 0x279   :  { %v13733_v44 = vrot.slane %v16399_v21, %v12589_v60  ;;  %v13735_v26 = vpop.eup %11572  ;;  %v2553_v58 = vadd.f32 %v10801_v18, %v1868_v53  ;;  %v2555_v51 = vadd.f32 %v10803_v37, %v1869_v23  ;;  %v3283_v15 = vrot.slane %v2552_v27, %v12589_v60 }
 0x27a   :  { %v3287_v54 = vrot.slane %v2552_v27, %v12615_v41  ;;  %v13739_v46 = vpop.eup %11574  ;;  %v3299_v32 = vrot.slane %v2554_v50, %v12589_v60  ;;  %v3303_v62 = vrot.slane %v2554_v50, %v12615_v41  ;;  %v10804_v42 = vrot.slane %v1878_v17, 9 }
 0x27b   :  { %v10805_v38 = vrot.slane %v1886_v8, 9  ;;  %v3291_v13 = vrot.slane %v2553_v58, %v12589_v60  ;;  %v3295_v55 = vrot.slane %v2553_v58, %v12615_v41  ;;  %v3307_v36 = vrot.slane %v2555_v51, %v12589_v60 }
 0x27c   :  { %v3311_v53 = vrot.slane %v2555_v51, %v12615_v41  ;;  %v3968_v23 = vpack.c.bf16 %v3283_v15, %v3283_v15  ;;  %v3969_v4 = vpack.c.bf16 %v3287_v54, %v3287_v54  ;;  %v3972_v18 = vpack.c.bf16 %v3299_v32, %v3299_v32 }
 0x27d   :  { %v3973_v37 = vpack.c.bf16 %v3303_v62, %v3303_v62  ;;  %v3970_v27 = vpack.c.bf16 %v3291_v13, %v3291_v13  ;;  %v3971_v21 = vpack.c.bf16 %v3295_v55, %v3295_v55  ;;  %v3974_v28 = vpack.c.bf16 %v3307_v36, %v3307_v36 }
 0x27e   :  { %v3975_v47 = vpack.c.bf16 %v3311_v53, %v3311_v53  ;;  %v13747_v29 = vpop.eup %11576  ;;  %v13749_v50 = vunpack.c.l.b16 %v3972_v18  ;;  %v10806_v45 = vrot.slane %v1885_v9, 9  ;;  %v13755_v58 = vrot.slane %v13387_v30, %v12589_v60 }
 0x27f   :  { %v13751_v3 = vunpack.c.l.b16 %v3973_v37  ;;  %v13757_v51 = vunpack.c.l.b16 %v3970_v27  ;;  %v4440_v15 = vunpack.c.l.b16 %v3971_v21  ;;  %v13759_v54 = vunpack.c.l.b16 %v3974_v28 }
 0x280   :  { %16400 = vst [vmem:[#allocation13_spill] sm:$0xff] %v13749_v50  ;;  %v10807_v32 = vrot.slane %v1887_v52, 9  ;;  %v13761_v62 = vunpack.c.l.b16 %v3968_v23  ;;  %v13763_v13 = vunpack.c.l.b16 %v3975_v47  ;;  %v2556_v55 = vadd.f32 %v10804_v42, %v1878_v17 }
 0x281   :  { %16401 = vst [vmem:[#allocation11_spill] sm:$0xff] %v13757_v51  ;;  %16402 = vst [vmem:[#allocation25_spill] sm:$0xff] %v13759_v54  ;;  %v13765_v36 = vadd.f32 %v10805_v38, %v1886_v8  ;;  %v4438_v53 = vunpack.c.l.b16 %v3969_v4  ;;  %v4790_v27 = vrot.slane %v4440_v15, 7  ;;  %v13770_v56 = vadd.f32 %v10806_v45, %v1885_v9 }
 0x282   :  { %16403 = vst [vmem:[#allocation37_spill] sm:$0xff] %v13761_v62  ;;  %v3315_v28 = vrot.slane %v2556_v55, %v12589_v60  ;;  %v3319_v23 = vrot.slane %v2556_v55, %v12615_v41  ;;  %v1896_v8 = vrot.slane %v1888_v34, %v12607_v24  ;;  %v1903_v42 = vrot.slane %v1889_v16, %v12607_v24 }
 0x283   :  { %16404 = vst [vmem:[#allocation32_spill] sm:$0xff] %v13765_v36  ;;  %16405 = vst [vmem:[#allocation40_spill] sm:$0xff] %v13770_v56  ;;  %v3327_v17 = vrot.slane %v13765_v36, %v12615_v41  ;;  %v13782_v4 = vrot.slane %v13770_v56, %v12615_v41  ;;  %v1459_v9 = vmul.f32 1.7159, %v13719_v22  ;;  %v13786_v37 = vsel %vm4518_vm4, %v4790_v27, %v4438_v53 }
 0x284   :  { %v3976_v45 = vpack.c.bf16 %v3315_v28, %v3315_v28  ;;  %v3977_v21 = vpack.c.bf16 %v3319_v23, %v3319_v23  ;;  %v1904_v15 = vcombine.high %v1896_v8, %v1896_v8  ;;  %v1905_v55 = vcombine.high %v1903_v42, %v1903_v42 }
 0x285   :  { %v10808_v47 = vrot.slane %v1896_v8, 9  ;;  %v13788_v18 = vadd.f32 %v10807_v32, %v1887_v52  ;;  %v3979_v34 = vpack.c.bf16 %v3327_v17, %v3327_v17  ;;  %v10810_v16 = vrot.slane %v1903_v42, 9 }
 0x286   :  { %v10809_v30 = vrot.slane %v1904_v15, 9  ;;  %v10811_v54 = vrot.slane %v1905_v55, 9  ;;  %v13792_v28 = vunpack.c.l.b16 %v3976_v45  ;;  %v1906_v23 = vcombine.low %v13729_v25, %v1459_v9 }
 0x287   :  { %v2560_v50 = vadd.f32 %v10808_v47, %v1896_v8  ;;  %v2562_v22 = vadd.f32 %v10810_v16, %v1903_v42  ;;  %v1907_v51 = vcombine.high %v13729_v25, %v1459_v9  ;;  %v13796_v62 = vunpack.c.l.b16 %v3977_v21 }
 0x288   :  { %16406 = vst [vmem:[#allocation17_spill] sm:$0xff] %v13792_v28  ;;  %v2561_v53 = vadd.f32 %v10809_v30, %v1904_v15  ;;  %v2563_v52 = vadd.f32 %v10811_v54, %v1905_v55  ;;  %v1914_v47 = vrot.slane %v1906_v23, %v12607_v24 }
 0x289   :  { %v3347_v32 = vrot.slane %v2560_v50, %v12589_v60  ;;  %v3351_v27 = vrot.slane %v2560_v50, %v12615_v41  ;;  %v3363_v17 = vrot.slane %v2562_v22, %v12589_v60  ;;  %v3367_v38 = vrot.slane %v2562_v22, %v12615_v41 }
 0x28a   :  { %v3355_v8 = vrot.slane %v2561_v53, %v12589_v60  ;;  %v3359_v42 = vrot.slane %v2561_v53, %v12615_v41  ;;  %v3371_v25 = vrot.slane %v2563_v52, %v12589_v60  ;;  %v3375_v45 = vrot.slane %v2563_v52, %v12615_v41 }
 0x28b   :  { %v3984_v30 = vpack.c.bf16 %v3347_v32, %v3347_v32  ;;  %v3988_v54 = vpack.c.bf16 %v3363_v17, %v3363_v17  ;;  %v3989_v9 = vpack.c.bf16 %v3367_v38, %v3367_v38  ;;  %v1921_v21 = vrot.slane %v1907_v51, %v12607_v24 }
 0x28c   :  { %v3986_v50 = vpack.c.bf16 %v3355_v8, %v3355_v8  ;;  %v3987_v15 = vpack.c.bf16 %v3359_v42, %v3359_v42  ;;  %v3990_v55 = vpack.c.bf16 %v3371_v25, %v3371_v25  ;;  %v3991_v16 = vpack.c.bf16 %v3375_v45, %v3375_v45 }
 0x28d   :  { %v13808_v22 = vunpack.c.l.b16 %v3979_v34  ;;  %v13811_v28 = vunpack.c.l.b16 %v3988_v54  ;;  %v13813_v53 = vunpack.c.l.b16 %v3989_v9  ;;  %v3985_v56 = vpack.c.bf16 %v3351_v27, %v3351_v27 }
 0x28e   :  { %v13815_v36 = vunpack.c.l.b16 %v3986_v50  ;;  %v4456_v52 = vunpack.c.l.b16 %v3987_v15  ;;  %v13817_v32 = vunpack.c.l.b16 %v3990_v55  ;;  %v13819_v38 = vunpack.c.l.b16 %v3984_v30 }
 0x28f   :  { %16407 = vst [vmem:[#allocation30_spill] sm:$0xff] %v13811_v28  ;;  %16408 = vst [vmem:[#allocation33_spill] sm:$0xff] %v13813_v53  ;;  %v13821_v51 = vunpack.c.l.b16 %v3991_v16  ;;  %v1922_v34 = vcombine.high %v1914_v47, %v1914_v47  ;;  %v1923_v45 = vcombine.high %v1921_v21, %v1921_v21  ;;  %v10812_v54 = vrot.slane %v1914_v47, 9 }
 0x290   :  { %16409 = vst [vmem:[#allocation39_spill] sm:$0xff] %v13815_v36  ;;  %16410 = vst [vmem:[#allocation42_spill] sm:$0xff] %v13817_v32  ;;  %v4818_v27 = vrot.slane %v4456_v52, 7  ;;  %v10814_v50 = vrot.slane %v1921_v21, 9  ;;  %v4454_v15 = vunpack.c.l.b16 %v3985_v56  ;;  %v1460_v30 = vmul.f32 1.7159, %v13727_v14 }
 0x291   :  { %16411 = vst [vmem:[#allocation43_spill] sm:$0xff] %v13819_v38  ;;  %16412 = vst [vmem:[#allocation44_spill] sm:$0xff] %v13821_v51  ;;  %v10813_v9 = vrot.slane %v1922_v34, 9  ;;  %v1461_v55 = vmul.f32 1.7159, %v13735_v26  ;;  %v2564_v23 = vadd.f32 %v10812_v54, %v1914_v47  ;;  %v10815_v25 = vrot.slane %v1923_v45, 9 }
 0x292   :  { %v1462_v16 = vmul.f32 1.7159, %v13739_v46  ;;  %v13833_v42 = vadd.f32 %v10814_v50, %v1921_v21  ;;  %v1463_v28 = vmul.f32 1.7159, %v13747_v29 }
 0x293   :  { %v13831_v8 = vadd.f32 %v10813_v9, %v1922_v34  ;;  %v1924_v32 = vcombine.low %v1460_v30, %v1461_v55  ;;  %v1925_v52 = vcombine.high %v1460_v30, %v1461_v55  ;;  %v3379_v56 = vrot.slane %v2564_v23, %v12589_v60 }
 0x294   :  { %16414 = vst [vmem:[#allocation50_spill] sm:$0xff] %v13833_v42  ;;  %v3383_v14 = vrot.slane %v2564_v23, %v12615_v41  ;;  %v13842_v46 = vrot.slane %v13833_v42, %v12615_v41  ;;  %v1942_v34 = vcombine.low %v1462_v16, %v1463_v28  ;;  %v1943_v54 = vcombine.high %v1462_v16, %v1463_v28 }
 0x295   :  { %16413 = vst [vmem:[#allocation46_spill] sm:$0xff] %v13831_v8  ;;  %v3391_v26 = vrot.slane %v13831_v8, %v12615_v41  ;;  %v1932_v47 = vrot.slane %v1924_v32, %v12607_v24  ;;  %v1939_v21 = vrot.slane %v1925_v52, %v12607_v24  ;;  %v13847_v9 = vsel %vm4518_vm4, %v4818_v27, %v4454_v15 }
 0x296   :  { %16415 = vst [vmem:[#allocation51_spill] sm:$0xff] %v13842_v46  ;;  %16416 = vst [vmem:[#allocation52_spill] sm:$0xff] %v13847_v9  ;;  %v3992_v29 = vpack.c.bf16 %v3379_v56, %v3379_v56  ;;  %v3993_v50 = vpack.c.bf16 %v3383_v14, %v3383_v14  ;;  %v13849_v38 = vadd.f32 %v10815_v25, %v1923_v45 }
 0x297   :  { %v3995_v30 = vpack.c.bf16 %v3391_v26, %v3391_v26  ;;  %v1940_v23 = vcombine.high %v1932_v47, %v1932_v47  ;;  %v1941_v55 = vcombine.high %v1939_v21, %v1939_v21  ;;  %v10816_v17 = vrot.slane %v1932_v47, 9 }
 0x298   :  { %v10818_v36 = vrot.slane %v1939_v21, 9  ;;  %16417 = vst [vmem:[#allocation48_spill] sm:$0xff] %v13849_v38  ;;  %v1950_v32 = vrot.slane %v1942_v34, %v12607_v24  ;;  %v3930_v28 = vpack.c.bf16 %v13700_v43, %v13700_v43  ;;  %v13856_v56 = vunpack.c.l.b16 %v3992_v29 }
 0x299   :  { %v10817_v16 = vrot.slane %v1940_v23, 9  ;;  %v10819_v27 = vrot.slane %v1941_v55, 9  ;;  %v2568_v15 = vadd.f32 %v10816_v17, %v1932_v47  ;;  %v13858_v14 = vunpack.c.l.b16 %v3993_v50 }
 0x29a   :  { %v2570_v52 = vadd.f32 %v10818_v36, %v1939_v21  ;;  %16418 = vst [vmem:[#allocation47_spill] sm:$0xff] %v13856_v56  ;;  %v13860_v26 = vunpack.c.l.b16 %v3995_v30  ;;  %v1957_v25 = vrot.slane %v1943_v54, %v12607_v24  ;;  %v1958_v17 = vcombine.high %v1950_v32, %v1950_v32 }
 0x29b   :  { %v2569_v45 = vadd.f32 %v10817_v16, %v1940_v23  ;;  %v2571_v8 = vadd.f32 %v10819_v27, %v1941_v55  ;;  %v3411_v42 = vrot.slane %v2568_v15, %v12589_v60  ;;  %v3415_v34 = vrot.slane %v2568_v15, %v12615_v41 }
 0x29c   :  { %16419 = vst [vmem:[#allocation45_spill] sm:$0xff] %v13860_v26  ;;  %v3427_v43 = vrot.slane %v2570_v52, %v12589_v60  ;;  %v3431_v51 = vrot.slane %v2570_v52, %v12615_v41  ;;  %v1959_v36 = vcombine.high %v1957_v25, %v1957_v25  ;;  %v10820_v53 = vrot.slane %v1950_v32, 9 }
 0x29d   :  { %v3419_v47 = vrot.slane %v2569_v45, %v12589_v60  ;;  %v3423_v21 = vrot.slane %v2569_v45, %v12615_v41  ;;  %v3435_v29 = vrot.slane %v2571_v8, %v12589_v60  ;;  %v3439_v54 = vrot.slane %v2571_v8, %v12615_v41 }
 0x29e   :  { %v4000_v50 = vpack.c.bf16 %v3411_v42, %v3411_v42  ;;  %v4001_v30 = vpack.c.bf16 %v3415_v34, %v3415_v34  ;;  %v4004_v23 = vpack.c.bf16 %v3427_v43, %v3427_v43  ;;  %v4005_v55 = vpack.c.bf16 %v3431_v51, %v3431_v51 }
 0x29f   :  { %v4002_v16 = vpack.c.bf16 %v3419_v47, %v3419_v47  ;;  %v4003_v27 = vpack.c.bf16 %v3423_v21, %v3423_v21  ;;  %v4006_v15 = vpack.c.bf16 %v3435_v29, %v3435_v29  ;;  %v4007_v56 = vpack.c.bf16 %v3439_v54, %v3439_v54 }
 0x2a0   :  { %v13871_v26 = vunpack.c.l.b16 %v4004_v23  ;;  %v13873_v52 = vunpack.c.l.b16 %v4005_v55  ;;  %v10821_v9 = vrot.slane %v1958_v17, 9  ;;  %v13880_v42 = vunpack.c.l.b16 %v4000_v50 }
 0x2a1   :  { %v13876_v46 = vunpack.c.l.b16 %v4002_v16  ;;  %v4472_v38 = vunpack.c.l.b16 %v4003_v27  ;;  %v13878_v8 = vunpack.c.l.b16 %v4006_v15  ;;  %v4470_v51 = vunpack.c.l.b16 %v4001_v30 }
 0x2a2   :  { %16420 = vst [vmem:[#allocation49_spill] sm:$0xff] %v13871_v26  ;;  %16423 = vst [vmem:[#allocation55_spill] sm:$0xff] %v13880_v42  ;;  %v13882_v34 = vunpack.c.l.b16 %v4007_v56  ;;  %v10822_v43 = vrot.slane %v1957_v25, 9  ;;  %v10823_v54 = vrot.slane %v1959_v36, 9  ;;  %v2572_v55 = vadd.f32 %v10820_v53, %v1950_v32  ;;  %v16424_v26 = vld [vmem:[#allocation22_spill] sm:$0xff] }
 0x2a3   :  { %16421 = vst [vmem:[#allocation54_spill] sm:$0xff] %v13876_v46  ;;  %16422 = vst [vmem:[#allocation53_spill] sm:$0xff] %v13878_v8  ;;  %v4846_v23 = vrot.slane %v4472_v38, 7  ;;  %v13887_v16 = vadd.f32 %v10821_v9, %v1958_v17  ;;  %v3932_v56 = vpack.c.bf16 %v13704_v31, %v13704_v31  ;;  %v3934_v30 = vpack.c.bf16 %v13713_v35, %v13713_v35  ;;  %v16425_v46 = vld [vmem:[#allocation27_spill] sm:$0xff]  ;;  %v16432_v32 = vld [vmem:[#allocation34_spill] sm:$0xff] }
 0x2a4   :  { %v13889_v27 = vadd.f32 %v10822_v43, %v1957_v25  ;;  %v3946_v15 = vpack.c.bf16 %v13717_v61, %v13717_v61  ;;  %v3443_v21 = vrot.slane %v2572_v55, %v12589_v60  ;;  %v3447_v38 = vrot.slane %v2572_v55, %v12615_v41  ;;  %v16433_v42 = vld [vmem:[#allocation18_spill] sm:$0xff] }
 0x2a5   :  { %v3455_v53 = vrot.slane %v13887_v16, %v12615_v41  ;;  %v3948_v31 = vpack.c.bf16 %v13733_v44, %v13733_v44  ;;  %v3950_v35 = vpack.c.bf16 %v13755_v58, %v13755_v58  ;;  %v4399_v61 = vunpack.c.l.b16 %v3930_v28 }
 0x2a6   :  { %v13904_v9 = vrot.slane %v13889_v27, %v12615_v41  ;;  %v13912_v25 = vsel %vm4518_vm4, %v4846_v23, %v4470_v51  ;;  %v13914_v17 = vadd.f32 %v10823_v54, %v1959_v36  ;;  %v4008_v43 = vpack.c.bf16 %v3443_v21, %v3443_v21  ;;  %v16427_v36 = vld [vmem:[#allocation26_spill] sm:$0xff]  ;;  %v16429_v23 = vld [vmem:[#allocation24_spill] sm:$0xff] }
 0x2a7   :  { %v4401_v55 = vunpack.c.l.b16 %v3932_v56  ;;  %v4009_v50 = vpack.c.bf16 %v3447_v38, %v3447_v38  ;;  %v4011_v47 = vpack.c.bf16 %v3455_v53, %v3455_v53  ;;  %v4403_v29 = vunpack.c.l.b16 %v3934_v30 }
 0x2a8   :  { %v4415_v45 = vunpack.c.l.b16 %v3946_v15  ;;  %v4417_v8 = vunpack.c.l.b16 %v3948_v31  ;;  %v4419_v44 = vunpack.c.l.b16 %v3950_v35  ;;  %v16426_v58 = vrot.slane %v16425_v46, 7  ;;  %v16430_v15 = vld [vmem:[#allocation28_spill] sm:$0xff] }
 0x2a9   :  { %v13922_v51 = vunpack.c.l.b16 %v4008_v43  ;;  %v16428_v54 = vrot.slane %v16427_v36, 6  ;;  %v4698_v56 = vrot.slane %v16429_v23, 4  ;;  %v4700_v30 = vrot.slane %v4399_v61, 3 }
 0x2aa   :  { %v4693_v28 = vsel %vm4518_vm4, %v16426_v58, %v16424_v26  ;;  %v16431_v38 = vrot.slane %v16430_v15, 5  ;;  %v4702_v31 = vrot.slane %v4401_v55, 2  ;;  %v4704_v35 = vrot.slane %v4403_v29, 1  ;;  %v16435_v58 = vld [vmem:[#allocation12_spill] sm:$0xff]  ;;  %v16437_v15 = vld [vmem:[#allocation31_spill] sm:$0xff] }
 0x2ab   :  { %v4695_v21 = vsel %vm4521_vm5, %v16428_v54, %v4693_v28  ;;  %v16434_v46 = vrot.slane %v16433_v42, 7  ;;  %v16436_v36 = vrot.slane %v16435_v58, 6  ;;  %v4726_v54 = vrot.slane %v13513_v6, 4 }
 0x2ac   :  { %v4697_v53 = vsel %vm4524_vm6, %v16431_v38, %v4695_v21  ;;  %v4728_v61 = vrot.slane %v4415_v45, 3  ;;  %v16438_v21 = vrot.slane %v16437_v15, 5  ;;  %v4730_v55 = vrot.slane %v4417_v8, 2 }
 0x2ad   :  { %v4721_v26 = vsel %vm4518_vm4, %v16434_v46, %v16432_v32  ;;  %v4699_v43 = vsel %vm4527_vm7, %v4698_v56, %v4697_v53  ;;  %v4732_v38 = vrot.slane %v4419_v44, 1  ;;  %v1286_v56 = vadd.f32 %v13444_v10, %v12596_v63 }
 0x2ae   :  { %v4723_v28 = vsel %vm4521_vm5, %v16436_v36, %v4721_v26  ;;  %v4701_v23 = vsel %vm4530_vm8, %v4700_v30, %v4699_v43  ;;  %v1288_v53 = vadd.f32 %v13487_v49, %v12600_v0  ;;  %v1290_v30 = vadd.f32 %v13541_v59, %v12596_v63 }
 0x2af   :  { %v4725_v29 = vsel %vm4524_vm6, %v16438_v21, %v4723_v28  ;;  %v4703_v42 = vsel %vm4533_vm9, %v4702_v31, %v4701_v23  ;;  %v1292_v8 = vadd.f32 %v13545_v12, %v12600_v0  ;;  %v1352_v31 = vmul.f32 0.6666667, %v1286_v56 }
 0x2b0   :  { %v4727_v32 = vsel %vm4527_vm7, %v4726_v54, %v4725_v29  ;;  %v4705_v6 = vsel %vm4536_vm10, %v4704_v35, %v4703_v42  ;;  %v1353_v46 = vmul.f32 0.6666667, %v1288_v53  ;;  %v1296_v10 = vadd.f32 %v13575_v39, %v12596_v63 }
 0x2b1   :  { %v4729_v45 = vsel %vm4530_vm8, %v4728_v61, %v4727_v32  ;;  %v1354_v49 = vmul.f32 0.6666667, %v1290_v30  ;;  %v1355_v43 = vmul.f32 0.6666667, %v1292_v8  ;;  %v1298_v35 = vadd.f32 %v13581_v1, %v12600_v0 }
 0x2b2   :  { %v4731_v44 = vsel %vm4533_vm9, %v4730_v55, %v4729_v45  ;;  %11578 = vtanh.f32 %v1352_v31  ;;  %v1356_v59 = vmul.f32 0.6666667, %v1296_v10  ;;  %v1300_v12 = vadd.f32 %v13589_v20, %v12596_v63 }
 0x2b3   :  { %v4733_v26 = vsel %vm4536_vm10, %v4732_v38, %v4731_v44  ;;  %v13964_v36 = vunpack.c.l.b16 %v4009_v50  ;;  %11580 = vtanh.f32 %v1353_v46  ;;  %v1357_v28 = vmul.f32 0.6666667, %v1298_v35  ;;  %v16447_v46 = vld [vmem:[#allocation36_spill] sm:$0xff] }
 0x2b4   :  { %v4922_v58 = vpack.c.b16 %v4733_v26, %v4705_v6  ;;  %v3279_v39 = vrot.slane %v13616_v57, %v12615_v41  ;;  %v13968_v54 = vunpack.c.l.b16 %v4011_v47  ;;  %11582 = vtanh.f32 %v1354_v49 }
 0x2b5   :  { %v3343_v1 = vrot.slane %v13788_v18, %v12615_v41  ;;  %v16439_v61 = vpack.c.bf16 %v13610_v2, %v13610_v2  ;;  %11584 = vtanh.f32 %v1355_v43  ;;  %v1358_v63 = vmul.f32 0.6666667, %v1300_v12  ;;  %v16448_v43 = vld [vmem:[#allocation32_spill] sm:$0xff] }
 0x2b6   :  { %5083 = vmatmul.mubr.bf16.gmra.mrb[12].mxu1 %v4922_v58  ;;  %v1302_v20 = vadd.f32 %v13593_v33, %v12600_v0  ;;  %v3967_v50 = vpack.c.bf16 %v3279_v39, %v3279_v39  ;;  %11586 = vtanh.f32 %v1356_v59  ;;  %v16440_v47 = vpack.c.bf16 %v13782_v4, %v13782_v4  ;;  %v16449_v12 = vld [vmem:[#allocation40_spill] sm:$0xff] }
 0x2b7   :  { %v4434_v23 = vunpack.c.l.b16 %v16439_v61  ;;  %v3983_v15 = vpack.c.bf16 %v3343_v1, %v3343_v1  ;;  %v16441_v29 = vrot.slane %v13572_v19, 6  ;;  %11588 = vtanh.f32 %v1357_v28 }
 0x2b8   :  { %v4450_v21 = vunpack.c.l.b16 %v16440_v47  ;;  %v4436_v2 = vunpack.c.l.b16 %v3967_v50  ;;  %v16442_v38 = vrot.slane %v13585_v5, 5  ;;  %v4770_v0 = vrot.slane %v13651_v11, 3 }
 0x2b9   :  { %v4765_v55 = vsel %vm4521_vm5, %v16441_v29, %v13614_v40  ;;  %v4452_v33 = vunpack.c.l.b16 %v3983_v15  ;;  %v16443_v32 = vrot.slane %v13649_v48, 4  ;;  %v4772_v4 = vrot.slane %v4434_v23, 2 }
 0x2ba   :  { %v4767_v42 = vsel %vm4524_vm6, %v16442_v38, %v4765_v55  ;;  %v16444_v53 = vrot.slane %v13751_v3, 6  ;;  %v1359_v40 = vmul.f32 0.6666667, %v1302_v20  ;;  %v4774_v45 = vrot.slane %v4436_v2, 1 }
 0x2bb   :  { %v4769_v56 = vsel %vm4527_vm7, %v16443_v32, %v4767_v42  ;;  %v16445_v5 = vrot.slane %v13763_v13, 5  ;;  %11590 = vtanh.f32 %v1358_v63  ;;  %v16446_v48 = vrot.slane %v13796_v62, 4 }
 0x2bc   :  { %v4793_v19 = vsel %vm4521_vm5, %v16444_v53, %v13786_v37  ;;  %v4771_v6 = vsel %vm4530_vm8, %v4770_v0, %v4769_v56  ;;  %v4798_v44 = vrot.slane %v13808_v22, 3  ;;  %v4800_v37 = vrot.slane %v4450_v21, 2  ;;  %v11579_v10 = vpop.eup %11578 }
 0x2bd   :  { %v4795_v30 = vsel %vm4524_vm6, %v16445_v5, %v4793_v19  ;;  %v4773_v11 = vsel %vm4533_vm9, %v4772_v4, %v4771_v6  ;;  %v3259_v31 = vrot.slane %v13587_v7, %v12589_v60  ;;  %v3267_v13 = vrot.slane %v16447_v46, %v12589_v60  ;;  %v11581_v22 = vpop.eup %11580 }
 0x2be   :  { %v4797_v8 = vsel %vm4527_vm7, %v16446_v48, %v4795_v30  ;;  %v4775_v3 = vsel %vm4536_vm10, %v4774_v45, %v4773_v11  ;;  %v4802_v49 = vrot.slane %v4452_v33, 1  ;;  %v3275_v62 = vrot.slane %v13616_v57, %v12589_v60  ;;  %v11583_v39 = vpop.eup %11582 }
 0x2bf   :  { %v4799_v26 = vsel %vm4530_vm8, %v4798_v44, %v4797_v8  ;;  %v3323_v35 = vrot.slane %v16448_v43, %v12589_v60  ;;  %v1464_v58 = vmul.f32 1.7159, %v11579_v10  ;;  %v14017_v7 = vrot.slane %v16449_v12, %v12589_v60  ;;  %v11585_v63 = vpop.eup %11584 }
 0x2c0   :  { %v4801_v59 = vsel %vm4533_vm9, %v4800_v37, %v4799_v26  ;;  %v14021_v28 = vrot.slane %v13788_v18, %v12589_v60  ;;  %v1465_v61 = vmul.f32 1.7159, %v11581_v22  ;;  %v3962_v23 = vpack.c.bf16 %v3259_v31, %v3259_v31  ;;  %v11587_v21 = vpop.eup %11586 }
 0x2c1   :  { %v4803_v57 = vsel %vm4536_vm10, %v4802_v49, %v4801_v59  ;;  %v1466_v20 = vmul.f32 1.7159, %v11583_v39  ;;  %v3964_v15 = vpack.c.bf16 %v3267_v13, %v3267_v13  ;;  %v3966_v47 = vpack.c.bf16 %v3275_v62, %v3275_v62  ;;  %v11589_v38 = vpop.eup %11588 }
 0x2c2   :  { %v4925_v50 = vpack.c.b16 %v4803_v57, %v4775_v3  ;;  %v1960_v29 = vcombine.low %v1464_v58, %v1465_v61  ;;  %v1961_v55 = vcombine.high %v1464_v58, %v1465_v61  ;;  %v1467_v2 = vmul.f32 1.7159, %v11585_v63 }
 0x2c3   :  { %11592 = vtanh.f32 %v1359_v40  ;;  %v14025_v18 = vmul.f32 1.7159, %v11587_v21  ;;  %v3978_v42 = vpack.c.bf16 %v3323_v35, %v3323_v35  ;;  %v3980_v0 = vpack.c.bf16 %v14017_v7, %v14017_v7 }
 0x2c4   :  { %10855 = vmatprep.mubr.msk.bf16.mxu1 %vm5000_vm11, %v4925_v50  ;;  %v3982_v33 = vpack.c.bf16 %v14021_v28, %v14021_v28  ;;  %v1968_v32 = vrot.slane %v1960_v29, %v12607_v24  ;;  %v1975_v56 = vrot.slane %v1961_v55, %v12607_v24  ;;  %v1978_v4 = vcombine.low %v1466_v20, %v1467_v2 }
 0x2c5   :  { %v1979_v53 = vcombine.high %v1466_v20, %v1467_v2  ;;  %v14034_v19 = vmul.f32 1.7159, %v11589_v38  ;;  %v14036_v40 = vunpack.c.l.b16 %v3962_v23  ;;  %v14038_v6 = vunpack.c.l.b16 %v3964_v15  ;;  %v11591_v5 = vpop.eup %11590 }
 0x2c6   :  { %v14040_v45 = vunpack.c.l.b16 %v3966_v47  ;;  %v1976_v30 = vcombine.high %v1968_v32, %v1968_v32  ;;  %v1977_v11 = vcombine.high %v1975_v56, %v1975_v56  ;;  %v10824_v48 = vrot.slane %v1968_v32, 9 }
 0x2c7   :  { %v10826_v8 = vrot.slane %v1975_v56, 9  ;;  %v1986_v44 = vrot.slane %v1978_v4, %v12607_v24  ;;  %v1993_v3 = vrot.slane %v1979_v53, %v12607_v24  ;;  %v1996_v37 = vcombine.low %v14025_v18, %v14034_v19 }
 0x2c8   :  { %v1997_v31 = vcombine.high %v14025_v18, %v14034_v19  ;;  %v10825_v46 = vrot.slane %v1976_v30, 9  ;;  %v10827_v13 = vrot.slane %v1977_v11, 9  ;;  %v2576_v10 = vadd.f32 %v10824_v48, %v1968_v32 }
 0x2c9   :  { %v2578_v26 = vadd.f32 %v10826_v8, %v1975_v56  ;;  %v1994_v49 = vcombine.high %v1986_v44, %v1986_v44  ;;  %v1995_v62 = vcombine.high %v1993_v3, %v1993_v3  ;;  %v14048_v43 = vmul.f32 1.7159, %v11591_v5 }
 0x2ca   :  { %v14050_v35 = vunpack.c.l.b16 %v3978_v42  ;;  %v2577_v22 = vadd.f32 %v10825_v46, %v1976_v30  ;;  %v2579_v58 = vadd.f32 %v10827_v13, %v1977_v11  ;;  %v3475_v59 = vrot.slane %v2576_v10, %v12589_v60 }
 0x2cb   :  { %v3479_v12 = vrot.slane %v2576_v10, %v12615_v41  ;;  %v3491_v7 = vrot.slane %v2578_v26, %v12589_v60  ;;  %v3495_v39 = vrot.slane %v2578_v26, %v12615_v41  ;;  %v10828_v61 = vrot.slane %v1986_v44, 9 }
 0x2cc   :  { %v10829_v57 = vrot.slane %v1994_v49, 9  ;;  %v3483_v63 = vrot.slane %v2577_v22, %v12589_v60  ;;  %v3487_v20 = vrot.slane %v2577_v22, %v12615_v41  ;;  %v3499_v50 = vrot.slane %v2579_v58, %v12589_v60 }
 0x2cd   :  { %v11593_v23 = vpop.eup %11592  ;;  %v3503_v15 = vrot.slane %v2579_v58, %v12615_v41  ;;  %v4016_v47 = vpack.c.bf16 %v3475_v59, %v3475_v59  ;;  %v4017_v21 = vpack.c.bf16 %v3479_v12, %v3479_v12  ;;  %v4020_v29 = vpack.c.bf16 %v3491_v7, %v3491_v7 }
 0x2ce   :  { %v4021_v55 = vpack.c.bf16 %v3495_v39, %v3495_v39  ;;  %v4018_v2 = vpack.c.bf16 %v3483_v63, %v3483_v63  ;;  %v4019_v38 = vpack.c.bf16 %v3487_v20, %v3487_v20  ;;  %v4022_v18 = vpack.c.bf16 %v3499_v50, %v3499_v50 }
 0x2cf   :  { %v4023_v42 = vpack.c.bf16 %v3503_v15, %v3503_v15  ;;  %v14060_v32 = vunpack.c.l.b16 %v4020_v29  ;;  %v10830_v4 = vrot.slane %v1993_v3, 9  ;;  %v14064_v53 = vunpack.c.l.b16 %v3980_v0 }
 0x2d0   :  { %v14062_v56 = vunpack.c.l.b16 %v4021_v55  ;;  %v14066_v19 = vunpack.c.l.b16 %v4018_v2  ;;  %v4488_v5 = vunpack.c.l.b16 %v4019_v38  ;;  %v14068_v30 = vunpack.c.l.b16 %v4022_v18 }
 0x2d1   :  { %v10831_v11 = vrot.slane %v1995_v62, 9  ;;  %v14070_v48 = vunpack.c.l.b16 %v4016_v47  ;;  %v14072_v8 = vunpack.c.l.b16 %v4023_v42  ;;  %v2580_v46 = vadd.f32 %v10828_v61, %v1986_v44  ;;  %v14083_v39 = vpop.f32.mrb[0].mxu1 }
 0x2d2   :  { %v14074_v13 = vadd.f32 %v10829_v57, %v1994_v49  ;;  %v4486_v10 = vunpack.c.l.b16 %v4017_v21  ;;  %v4874_v58 = vrot.slane %v4488_v5, 7  ;;  %v14079_v59 = vadd.f32 %v10830_v4, %v1993_v3  ;;  %16450 = vst [vmem:[#allocation56_spill] sm:$0xff] %v14083_v39  ;;  %v5062_v63 = vpop.f32.mrb[1].mxu1 }
 0x2d3   :  { %v3507_v12 = vrot.slane %v2580_v46, %v12589_v60  ;;  %v3511_v7 = vrot.slane %v2580_v46, %v12615_v41  ;;  %v2004_v61 = vrot.slane %v1996_v37, %v12607_v24  ;;  %v2011_v57 = vrot.slane %v1997_v31, %v12607_v24  ;;  %v14095_v47 = vpop.f32.mrb[2].mxu1 }
 0x2d4   :  { %v3519_v49 = vrot.slane %v14074_v13, %v12615_v41  ;;  %v14093_v3 = vrot.slane %v14079_v59, %v12615_v41  ;;  %v1471_v15 = vmul.f32 1.7159, %v11593_v23  ;;  %16451 = vst [vmem:[#allocation57_spill] sm:$0xff] %v14095_v47  ;;  %v5065_v38 = vpop.f32.mrb[3].mxu1  ;;  %v14098_v37 = vsel %vm4518_vm4, %v4874_v58, %v4486_v10 }
 0x2d5   :  { %v4024_v50 = vpack.c.bf16 %v3507_v12, %v3507_v12  ;;  %v4025_v21 = vpack.c.bf16 %v3511_v7, %v3511_v7  ;;  %v2012_v29 = vcombine.high %v2004_v61, %v2004_v61  ;;  %v2013_v55 = vcombine.high %v2011_v57, %v2011_v57 }
 0x2d6   :  { %v10832_v2 = vrot.slane %v2004_v61, 9  ;;  %v14100_v31 = vadd.f32 %v10831_v11, %v1995_v62  ;;  %v4027_v18 = vpack.c.bf16 %v3519_v49, %v3519_v49  ;;  %v10834_v42 = vrot.slane %v2011_v57, 9 }
 0x2d7   :  { %v10833_v5 = vrot.slane %v2012_v29, 9  ;;  %v10835_v46 = vrot.slane %v2013_v55, 9  ;;  %v14104_v12 = vunpack.c.l.b16 %v4024_v50  ;;  %v2014_v63 = vcombine.low %v14048_v43, %v1471_v15 }
 0x2d8   :  { %v2584_v23 = vadd.f32 %v10832_v2, %v2004_v61  ;;  %v2586_v7 = vadd.f32 %v10834_v42, %v2011_v57  ;;  %v2015_v38 = vcombine.high %v14048_v43, %v1471_v15  ;;  %v14108_v44 = vunpack.c.l.b16 %v4025_v21 }
 0x2d9   :  { %v2585_v10 = vadd.f32 %v10833_v5, %v2012_v29  ;;  %v2587_v62 = vadd.f32 %v10835_v46, %v2013_v55  ;;  %v2022_v50 = vrot.slane %v2014_v63, %v12607_v24  ;;  %v4756_v28 = vrot.slane %v14036_v40, 3  ;;  %v16461_v40 = vld [vmem:[#allocation37_spill] sm:$0xff] }
 0x2da   :  { %v3543_v11 = vrot.slane %v2584_v23, %v12615_v41  ;;  %v14112_v58 = vrot.slane %v2584_v23, %v12589_v60  ;;  %v3555_v49 = vrot.slane %v2586_v7, %v12589_v60  ;;  %v3559_v61 = vrot.slane %v2586_v7, %v12615_v41 }
 0x2db   :  { %v3547_v57 = vrot.slane %v2585_v10, %v12589_v60  ;;  %v3551_v2 = vrot.slane %v2585_v10, %v12615_v41  ;;  %v3563_v43 = vrot.slane %v2587_v62, %v12589_v60  ;;  %v3567_v15 = vrot.slane %v2587_v62, %v12615_v41 }
 0x2dc   :  { %v4033_v21 = vpack.c.bf16 %v3543_v11, %v3543_v11  ;;  %v4036_v29 = vpack.c.bf16 %v3555_v49, %v3555_v49  ;;  %v4037_v55 = vpack.c.bf16 %v3559_v61, %v3559_v61  ;;  %v2029_v42 = vrot.slane %v2015_v38, %v12607_v24 }
 0x2dd   :  { %v4034_v5 = vpack.c.bf16 %v3547_v57, %v3547_v57  ;;  %v4035_v46 = vpack.c.bf16 %v3551_v2, %v3551_v2  ;;  %v4038_v23 = vpack.c.bf16 %v3563_v43, %v3563_v43  ;;  %v4039_v22 = vpack.c.bf16 %v3567_v15, %v3567_v15  ;;  %v16456_v2 = vld [vmem:[#allocation16_spill] sm:$0xff] }
 0x2de   :  { %v14122_v7 = vunpack.c.l.b16 %v4027_v18  ;;  %v14127_v26 = vunpack.c.l.b16 %v4037_v55  ;;  %v4502_v20 = vunpack.c.l.b16 %v4033_v21  ;;  %v14133_v38 = vunpack.c.l.b16 %v4036_v29 }
 0x2df   :  { %v14129_v62 = vunpack.c.l.b16 %v4034_v5  ;;  %v4504_v11 = vunpack.c.l.b16 %v4035_v46  ;;  %v14131_v49 = vunpack.c.l.b16 %v4039_v22  ;;  %v14135_v61 = vunpack.c.l.b16 %v4038_v23  ;;  %v16453_v46 = vld [vmem:[#allocation35_spill] sm:$0xff]  ;;  %v16454_v23 = vld [vmem:[#allocation14_spill] sm:$0xff] }
 0x2e0   :  { %v2030_v57 = vcombine.high %v2022_v50, %v2022_v50  ;;  %v2031_v18 = vcombine.high %v2029_v42, %v2029_v42  ;;  %v10836_v10 = vrot.slane %v2022_v50, 9  ;;  %v10838_v5 = vrot.slane %v2029_v42, 9 }
 0x2e1   :  { %16452 = vst [vmem:[#allocation8_spill] sm:$0xff] %v14129_v62  ;;  %v4902_v43 = vrot.slane %v4504_v11, 7  ;;  %v4451_v29 = vunpack.c.l.b16 %v3982_v33  ;;  %v16455_v0 = vrot.slane %v16454_v23, 7  ;;  %v4754_v15 = vrot.slane %v16456_v2, 4  ;;  %v16462_v2 = vld [vmem:[#allocation11_spill] sm:$0xff] }
 0x2e2   :  { %v10837_v21 = vrot.slane %v2030_v57, 9  ;;  %v10839_v63 = vrot.slane %v2031_v18, 9  ;;  %v2588_v4 = vadd.f32 %v10836_v10, %v2022_v50  ;;  %v14153_v1 = vadd.f32 %v10838_v5, %v2029_v42  ;;  %v16459_v10 = vld [vmem:[#allocation15_spill] sm:$0xff] }
 0x2e3   :  { %v14141_v22 = vsel %vm4518_vm4, %v4902_v43, %v4502_v20  ;;  %v4749_v11 = vsel %vm4518_vm4, %v16455_v0, %v16453_v46  ;;  %v16457_v20 = vld [vmem:[#allocation29_spill] sm:$0xff]  ;;  %v4758_v33 = vrot.slane %v14038_v6, 2  ;;  %v4760_v23 = vrot.slane %v14040_v45, 1 }
 0x2e4   :  { %v14151_v55 = vadd.f32 %v10837_v21, %v2030_v57  ;;  %v14155_v24 = vadd.f32 %v10839_v63, %v2031_v18  ;;  %v16458_v43 = vrot.slane %v16457_v20, 6  ;;  %v3571_v0 = vrot.slane %v2588_v4, %v12589_v60  ;;  %v16464_v21 = vld [vmem:[#allocation17_spill] sm:$0xff] }
 0x2e5   :  { %v3575_v50 = vrot.slane %v2588_v4, %v12615_v41  ;;  %v14169_v63 = vrot.slane %v14153_v1, %v12615_v41  ;;  %v16460_v57 = vrot.slane %v16459_v10, 5  ;;  %v16463_v6 = vrot.slane %v16462_v2, 7  ;;  %v16465_v10 = vld [vmem:[#allocation13_spill] sm:$0xff] }
 0x2e6   :  { %v4751_v47 = vsel %vm4521_vm5, %v16458_v43, %v4749_v11  ;;  %v3583_v42 = vrot.slane %v14151_v55, %v12615_v41  ;;  %v4782_v5 = vrot.slane %v16464_v21, 4  ;;  %v4784_v4 = vrot.slane %v14050_v35, 3 }
 0x2e7   :  { %v4753_v18 = vsel %vm4524_vm6, %v16460_v57, %v4751_v47  ;;  %v4777_v45 = vsel %vm4518_vm4, %v16463_v6, %v16461_v40  ;;  %v4040_v46 = vpack.c.bf16 %v3571_v0, %v3571_v0  ;;  %v4041_v11 = vpack.c.bf16 %v3575_v50, %v3575_v50 }
 0x2e8   :  { %v4043_v20 = vpack.c.bf16 %v3583_v42, %v3583_v42  ;;  %v4755_v39 = vsel %vm4527_vm7, %v4754_v15, %v4753_v18  ;;  %v16466_v62 = vrot.slane %v16465_v10, 6  ;;  %v4786_v57 = vrot.slane %v14064_v53, 2  ;;  %v16467_v42 = vld [vmem:[#allocation25_spill] sm:$0xff]  ;;  %v16469_v18 = vld [vmem:[#allocation48_spill] sm:$0xff] }
 0x2e9   :  { %v4788_v2 = vrot.slane %v4451_v29, 1  ;;  %v14187_v40 = vunpack.c.l.b16 %v4040_v46  ;;  %v14189_v6 = vunpack.c.l.b16 %v4041_v11  ;;  %v4757_v0 = vsel %vm4530_vm8, %v4756_v28, %v4755_v39  ;;  %v16470_v11 = vld [vmem:[#allocation51_spill] sm:$0xff]  ;;  %v16474_v29 = vld [vmem:[#allocation33_spill] sm:$0xff] }
 0x2ea   :  { %v4779_v47 = vsel %vm4521_vm5, %v16466_v62, %v4777_v45  ;;  %v14191_v35 = vunpack.c.l.b16 %v4043_v20  ;;  %v4759_v50 = vsel %vm4533_vm9, %v4758_v33, %v4757_v0  ;;  %v16468_v21 = vrot.slane %v16467_v42, 5 }
 0x2eb   :  { %v3407_v62 = vrot.slane %v16469_v18, %v12615_v41  ;;  %v3471_v53 = vrot.slane %v13914_v17, %v12615_v41  ;;  %v4761_v45 = vsel %vm4536_vm10, %v4760_v23, %v4759_v50  ;;  %v16471_v39 = vpack.c.bf16 %v16470_v11, %v16470_v11 }
 0x2ec   :  { %v4781_v15 = vsel %vm4524_vm6, %v16468_v21, %v4779_v47  ;;  %v16472_v47 = vpack.c.bf16 %v13904_v9, %v13904_v9  ;;  %v16473_v21 = vld [vmem:[#allocation52_spill] sm:$0xff]  ;;  %v16475_v43 = vrot.slane %v16474_v29, 6  ;;  %v16480_v29 = vrot.slane %v13873_v52, 6 }
 0x2ed   :  { %v4783_v46 = vsel %vm4527_vm7, %v4782_v5, %v4781_v15  ;;  %v4466_v28 = vunpack.c.l.b16 %v16471_v39  ;;  %v3999_v20 = vpack.c.bf16 %v3407_v62, %v3407_v62  ;;  %v4015_v10 = vpack.c.bf16 %v3471_v53, %v3471_v53  ;;  %v16476_v5 = vld [vmem:[#allocation45_spill] sm:$0xff]  ;;  %v16477_v62 = vld [vmem:[#allocation44_spill] sm:$0xff] }
 0x2ee   :  { %v4785_v33 = vsel %vm4530_vm8, %v4784_v4, %v4783_v46  ;;  %v4482_v0 = vunpack.c.l.b16 %v16472_v47  ;;  %v4821_v23 = vsel %vm4521_vm5, %v16475_v43, %v16473_v21  ;;  %v4826_v50 = vrot.slane %v16476_v5, 3 }
 0x2ef   :  { %v4787_v42 = vsel %vm4533_vm9, %v4786_v57, %v4785_v33  ;;  %v4828_v15 = vrot.slane %v4466_v28, 2  ;;  %v4468_v39 = vunpack.c.l.b16 %v3999_v20  ;;  %v4484_v4 = vunpack.c.l.b16 %v4015_v10 }
 0x2f0   :  { %v4789_v11 = vsel %vm4536_vm10, %v4788_v2, %v4787_v42  ;;  %v16478_v53 = vrot.slane %v16477_v62, 5  ;;  %v16479_v47 = vrot.slane %v13858_v14, 4  ;;  %v4849_v43 = vsel %vm4521_vm5, %v16480_v29, %v13912_v25  ;;  %v16483_v25 = vld [vmem:[#allocation46_spill] sm:$0xff] }
 0x2f1   :  { %v4924_v9 = vpack.c.b16 %v4789_v11, %v4761_v45  ;;  %v4854_v28 = vrot.slane %v13968_v54, 3  ;;  %v4830_v33 = vrot.slane %v4468_v39, 1  ;;  %v16481_v20 = vrot.slane %v13882_v34, 5  ;;  %v16484_v34 = vld [vmem:[#allocation50_spill] sm:$0xff] }
 0x2f2   :  { %v4823_v46 = vsel %vm4524_vm6, %v16478_v53, %v4821_v23  ;;  %v4856_v42 = vrot.slane %v4482_v0, 2  ;;  %v16482_v45 = vrot.slane %v13964_v36, 4  ;;  %v4858_v52 = vrot.slane %v4484_v4, 1 }
 0x2f3   :  { %v4825_v57 = vsel %vm4527_vm7, %v16479_v47, %v4823_v46  ;;  %v4851_v10 = vsel %vm4524_vm6, %v16481_v20, %v4849_v43  ;;  %5091 = vmatmul.mubr.bf16.gmra.mrb[16].mxu1 %v4924_v9  ;;  %v3387_v23 = vrot.slane %v16483_v25, %v12589_v60  ;;  %v3403_v0 = vrot.slane %v16469_v18, %v12589_v60 }
 0x2f4   :  { %v4827_v2 = vsel %vm4530_vm8, %v4826_v50, %v4825_v57  ;;  %v4853_v21 = vsel %vm4527_vm7, %v16482_v45, %v4851_v10  ;;  %v3395_v50 = vrot.slane %v16484_v34, %v12589_v60  ;;  %v3451_v36 = vrot.slane %v13887_v16, %v12589_v60  ;;  %v16486_v16 = vld [vmem:[#allocation39_spill] sm:$0xff] }
 0x2f5   :  { %v4829_v14 = vsel %vm4533_vm9, %v4828_v15, %v4827_v2  ;;  %v4855_v5 = vsel %vm4530_vm8, %v4854_v28, %v4853_v21  ;;  %v3459_v11 = vrot.slane %v13889_v27, %v12589_v60  ;;  %v3467_v39 = vrot.slane %v13914_v17, %v12589_v60  ;;  %v16485_v2 = vld [vmem:[#allocation43_spill] sm:$0xff]  ;;  %v16490_v21 = vld [vmem:[#allocation42_spill] sm:$0xff] }
 0x2f6   :  { %v4831_v54 = vsel %vm4536_vm10, %v4830_v33, %v4829_v14  ;;  %v4857_v15 = vsel %vm4533_vm9, %v4856_v42, %v4855_v5  ;;  %v3994_v62 = vpack.c.bf16 %v3387_v23, %v3387_v23  ;;  %v3996_v53 = vpack.c.bf16 %v3395_v50, %v3395_v50  ;;  %v16488_v42 = vld [vmem:[#allocation30_spill] sm:$0xff]  ;;  %v16492_v23 = vld [vmem:[#allocation47_spill] sm:$0xff] }
 0x2f7   :  { %v4859_v4 = vsel %vm4536_vm10, %v4858_v52, %v4857_v15  ;;  %v3998_v46 = vpack.c.bf16 %v3403_v0, %v3403_v0  ;;  %v4010_v47 = vpack.c.bf16 %v3451_v36, %v3451_v36  ;;  %v4012_v57 = vpack.c.bf16 %v3459_v11, %v3459_v11  ;;  %v16493_v0 = vld [vmem:[#allocation55_spill] sm:$0xff]  ;;  %v16494_v15 = vld [vmem:[#allocation54_spill] sm:$0xff] }
 0x2f8   :  { %v4927_v9 = vpack.c.b16 %v4859_v4, %v4831_v54  ;;  %v4014_v18 = vpack.c.bf16 %v3467_v39, %v3467_v39  ;;  %v4463_v29 = vunpack.c.l.b16 %v3994_v62  ;;  %v4465_v43 = vunpack.c.l.b16 %v3996_v53  ;;  %v16496_v53 = vld [vmem:[#allocation49_spill] sm:$0xff] }
 0x2f9   :  { %v4467_v28 = vunpack.c.l.b16 %v3998_v46  ;;  %v16487_v33 = vrot.slane %v16486_v16, 7  ;;  %v4479_v17 = vunpack.c.l.b16 %v4010_v47  ;;  %v4481_v20 = vunpack.c.l.b16 %v4012_v57 }
 0x2fa   :  { %10856 = vmatprep.mubr.msk.bf16.mxu1 %vm5000_vm11, %v4927_v9  ;;  %v4483_v10 = vunpack.c.l.b16 %v4014_v18  ;;  %v16489_v14 = vrot.slane %v16488_v42, 6  ;;  %v16491_v52 = vrot.slane %v16490_v21, 5  ;;  %v4810_v54 = vrot.slane %v16492_v23, 4 }
 0x2fb   :  { %v4805_v27 = vsel %vm4518_vm4, %v16487_v33, %v16485_v2  ;;  %v4812_v5 = vrot.slane %v4463_v29, 3  ;;  %v4814_v34 = vrot.slane %v4465_v43, 2  ;;  %v4816_v50 = vrot.slane %v4467_v28, 1  ;;  %v16498_v29 = vld [vmem:[#allocation53_spill] sm:$0xff] }
 0x2fc   :  { %v4807_v45 = vsel %vm4521_vm5, %v16489_v14, %v4805_v27  ;;  %v16495_v36 = vrot.slane %v16494_v15, 7  ;;  %v4838_v39 = vrot.slane %v13922_v51, 4  ;;  %v4840_v4 = vrot.slane %v4479_v17, 3 }
 0x2fd   :  { %v4809_v25 = vsel %vm4524_vm6, %v16491_v52, %v4807_v45  ;;  %v16497_v46 = vrot.slane %v16496_v53, 6  ;;  %v4842_v47 = vrot.slane %v4481_v20, 2  ;;  %v4844_v57 = vrot.slane %v4483_v10, 1 }
 0x2fe   :  { %v4833_v11 = vsel %vm4518_vm4, %v16495_v36, %v16493_v0  ;;  %v4811_v62 = vsel %vm4527_vm7, %v4810_v54, %v4809_v25  ;;  %v16499_v43 = vrot.slane %v16498_v29, 5  ;;  %v3535_v2 = vrot.slane %v14100_v31, %v12615_v41 }
 0x2ff   :  { %v4835_v9 = vsel %vm4521_vm5, %v16497_v46, %v4833_v11  ;;  %v4813_v18 = vsel %vm4530_vm8, %v4812_v5, %v4811_v62  ;;  %v3599_v51 = vrot.slane %v14155_v24, %v12615_v41  ;;  %v16500_v27 = vpack.c.bf16 %v14093_v3, %v14093_v3 }
 0x300   :  { %v4837_v28 = vsel %vm4524_vm6, %v16499_v43, %v4835_v9  ;;  %v4815_v16 = vsel %vm4533_vm9, %v4814_v34, %v4813_v18  ;;  %v16501_v20 = vpack.c.bf16 %v14169_v63, %v14169_v63  ;;  %v4031_v45 = vpack.c.bf16 %v3535_v2, %v3535_v2 }
 0x301   :  { %v4839_v33 = vsel %vm4527_vm7, %v4838_v39, %v4837_v28  ;;  %v4498_v17 = vunpack.c.l.b16 %v16500_v27  ;;  %v4817_v42 = vsel %vm4536_vm10, %v4816_v50, %v4815_v16  ;;  %v4047_v21 = vpack.c.bf16 %v3599_v51, %v3599_v51 }
 0x302   :  { %v4514_v10 = vunpack.c.l.b16 %v16501_v20  ;;  %v4841_v14 = vsel %vm4530_vm8, %v4840_v4, %v4839_v33  ;;  %v16502_v25 = vrot.slane %v14062_v56, 6  ;;  %v4882_v3 = vrot.slane %v14122_v7, 3 }
 0x303   :  { %v4843_v52 = vsel %vm4533_vm9, %v4842_v47, %v4841_v14  ;;  %v4884_v54 = vrot.slane %v4498_v17, 2  ;;  %v4500_v63 = vunpack.c.l.b16 %v4031_v45  ;;  %v4516_v34 = vunpack.c.l.b16 %v4047_v21 }
 0x304   :  { %v4877_v23 = vsel %vm4521_vm5, %v16502_v25, %v14098_v37  ;;  %v4845_v5 = vsel %vm4536_vm10, %v4844_v57, %v4843_v52  ;;  %v16503_v50 = vrot.slane %v14072_v8, 5  ;;  %v16504_v36 = vrot.slane %v14108_v44, 4 }
 0x305   :  { %v4926_v15 = vpack.c.b16 %v4845_v5, %v4817_v42  ;;  %v16505_v56 = vrot.slane %v14127_v26, 6  ;;  %v4910_v7 = vrot.slane %v14191_v35, 3  ;;  %v4886_v4 = vrot.slane %v4500_v63, 1 }
 0x306   :  { %v4879_v0 = vsel %vm4524_vm6, %v16503_v50, %v4877_v23  ;;  %v16506_v62 = vrot.slane %v14131_v49, 5  ;;  %v4912_v53 = vrot.slane %v4514_v10, 2  ;;  %v16507_v46 = vrot.slane %v14189_v6, 4 }
 0x307   :  { %v4881_v11 = vsel %vm4527_vm7, %v16504_v36, %v4879_v0  ;;  %v4905_v37 = vsel %vm4521_vm5, %v16505_v56, %v14141_v22  ;;  %5099 = vmatmul.mubr.bf16.gmra.mrb[20].mxu1 %v4926_v15  ;;  %v4914_v26 = vrot.slane %v4516_v34, 1  ;;  %v3515_v22 = vrot.slane %v14074_v13, %v12589_v60 }
 0x308   :  { %v4883_v39 = vsel %vm4530_vm8, %v4882_v3, %v4881_v11  ;;  %v4907_v8 = vsel %vm4524_vm6, %v16506_v62, %v4905_v37  ;;  %v3523_v49 = vrot.slane %v14079_v59, %v12589_v60  ;;  %v3531_v57 = vrot.slane %v14100_v31, %v12589_v60  ;;  %v16514_v11 = vld [vmem:[#allocation56_spill] sm:$0xff] }
 0x309   :  { %v4885_v44 = vsel %vm4533_vm9, %v4884_v54, %v4883_v39  ;;  %v4909_v9 = vsel %vm4527_vm7, %v16507_v46, %v4907_v8  ;;  %v3579_v6 = vrot.slane %v14151_v55, %v12589_v60  ;;  %v3587_v29 = vrot.slane %v14153_v1, %v12589_v60 }
 0x30a   :  { %v4887_v35 = vsel %vm4536_vm10, %v4886_v4, %v4885_v44  ;;  %v4911_v47 = vsel %vm4530_vm8, %v4910_v7, %v4909_v9  ;;  %v3595_v13 = vrot.slane %v14155_v24, %v12589_v60  ;;  %v4026_v28 = vpack.c.bf16 %v3515_v22, %v3515_v22  ;;  %v16515_v4 = vld [vmem:[#allocation57_spill] sm:$0xff] }
 0x30b   :  { %v4913_v18 = vsel %vm4533_vm9, %v4912_v53, %v4911_v47  ;;  %v4028_v2 = vpack.c.bf16 %v3523_v49, %v3523_v49  ;;  %v4030_v51 = vpack.c.bf16 %v3531_v57, %v3531_v57  ;;  %v4042_v16 = vpack.c.bf16 %v3579_v6, %v3579_v6 }
 0x30c   :  { %v4915_v43 = vsel %vm4536_vm10, %v4914_v26, %v4913_v18  ;;  %v4044_v33 = vpack.c.bf16 %v3587_v29, %v3587_v29  ;;  %v4046_v31 = vpack.c.bf16 %v3595_v13, %v3595_v13  ;;  %v4495_v27 = vunpack.c.l.b16 %v4026_v28 }
 0x30d   :  { %v4929_v59 = vpack.c.b16 %v4915_v43, %v4887_v35  ;;  %v4497_v17 = vunpack.c.l.b16 %v4028_v2  ;;  %v4499_v20 = vunpack.c.l.b16 %v4030_v51  ;;  %v16508_v55 = vrot.slane %v14066_v19, 7 }
 0x30e   :  { %v16509_v24 = vpack.c.bf16 %v14112_v58, %v14112_v58  ;;  %v4890_v42 = vrot.slane %v14133_v38, 6  ;;  %v4511_v14 = vunpack.c.l.b16 %v4042_v16  ;;  %v16510_v45 = vrot.slane %v14060_v32, 6  ;;  %v14355_v58 = vld [vmem:[%s16104_s4] ss:$0 sm:$0xff]  ;;  %v5068_v46 = vpop.f32.mrb[4].mxu1  ;;  %s11679_s4 = smov 40  }
 0x30f   :  { %v4861_v1 = vsel %vm4518_vm4, %v16508_v55, %v14070_v48  ;;  %10857 = vmatprep.mubr.msk.bf16.mxu1 %vm5000_vm11, %v4929_v59  ;;  %v4892_v52 = vrot.slane %v14135_v61, 5  ;;  %v4513_v25 = vunpack.c.l.b16 %v4044_v33  ;;  %v16511_v19 = vrot.slane %v14068_v30, 5  ;;  %v16512_v32 = vld [vmem:[#allocation8_spill] sm:$0xff]  ;;  %v5070_v35 = vpop.f32.mrb[5].mxu1 }
 0x310   :  { %v4501_v10 = vunpack.c.l.b16 %v16509_v24  ;;  %v4863_v21 = vsel %vm4521_vm5, %v16510_v45, %v4861_v1  ;;  %v4866_v23 = vrot.slane %v14104_v12, 4  ;;  %v4515_v38 = vunpack.c.l.b16 %v4046_v31  ;;  %v14366_v12 = vld [vmem:[%s16105_s5] ss:$0 sm:$0xff]  ;;  %v5071_v57 = vpop.f32.mrb[6].mxu1  ;;  %s11680_s5 = smov 84  }
 0x311   :  { %v4865_v48 = vsel %vm4524_vm6, %v16511_v19, %v4863_v21  ;;  %v4868_v3 = vrot.slane %v4495_v27, 3  ;;  %v4870_v54 = vrot.slane %v4497_v17, 2  ;;  %v16513_v5 = vrot.slane %v16512_v32, 7  ;;  %v5073_v43 = vpop.f32.mrb[7].mxu1 }
 0x312   :  { %v4867_v61 = vsel %vm4527_vm7, %v4866_v23, %v4865_v48  ;;  %v4872_v34 = vrot.slane %v4499_v20, 1  ;;  %v4894_v50 = vrot.slane %v14187_v40, 4  ;;  %v4896_v36 = vrot.slane %v4511_v14, 3  ;;  %v16516_v20 = vld [vmem:[#allocation5_spill] sm:$0xff] }
 0x313   :  { %v4889_v63 = vsel %vm4518_vm4, %v16513_v5, %v4501_v10  ;;  %v4869_v0 = vsel %vm4530_vm8, %v4868_v3, %v4867_v61  ;;  %v5122_v56 = vmul.f32 %v14355_v58, %v16514_v11  ;;  %v4898_v39 = vrot.slane %v4513_v25, 2 }
 0x314   :  { %v4891_v30 = vsel %vm4521_vm5, %v4890_v42, %v4889_v63  ;;  %v4871_v37 = vsel %vm4533_vm9, %v4870_v54, %v4869_v0  ;;  %v5123_v40 = vmul.f32 %v14355_v58, %v16515_v4  ;;  %v4900_v53 = vrot.slane %v4515_v38, 1 }
 0x315   :  { %v4893_v15 = vsel %vm4524_vm6, %v4892_v52, %v4891_v30  ;;  %v4873_v62 = vsel %vm4536_vm10, %v4872_v34, %v4871_v37  ;;  %v5143_v44 = vadd.f32 %v14366_v12, %v5122_v56  ;;  %v5124_v22 = vmul.f32 %v14355_v58, %v5068_v46 }
 0x316   :  { %v4895_v7 = vsel %vm4527_vm7, %v4894_v50, %v4893_v15  ;;  %v5144_v26 = vadd.f32 %v14366_v12, %v5123_v40  ;;  %v5125_v13 = vmul.f32 %v14355_v58, %v5071_v57 }
 0x317   :  { %v4897_v8 = vsel %vm4530_vm8, %v4896_v36, %v4895_v7  ;;  %v5157_v49 = vmul.f32 0.6666667, %v5143_v44  ;;  %v5145_v29 = vadd.f32 %v14366_v12, %v5124_v22 }
 0x318   :  { %v4899_v9 = vsel %vm4533_vm9, %v4898_v39, %v4897_v8  ;;  %v5158_v6 = vmul.f32 0.6666667, %v5144_v26  ;;  %v5146_v2 = vadd.f32 %v14366_v12, %v5125_v13 }
 0x319   :  { %v4901_v47 = vsel %vm4536_vm10, %v4900_v53, %v4899_v9  ;;  %11594 = vtanh.f32 %v5157_v49  ;;  %v5159_v28 = vmul.f32 0.6666667, %v5145_v29 }
 0x31a   :  { %v4928_v18 = vpack.c.b16 %v4901_v47, %v4873_v62  ;;  %11596 = vtanh.f32 %v5158_v6  ;;  %v5160_v51 = vmul.f32 0.6666667, %v5146_v2 }
 0x31b   :  { %11598 = vtanh.f32 %v5159_v28 }
 0x31c   :  { %5107 = vmatmul.mubr.bf16.gmra.mrb[24].mxu1 %v4928_v18  ;;  %11600 = vtanh.f32 %v5160_v51 }
 0x323   :  { %v11595_v59 = vpop.eup %11594 }
 0x324   :  { %v11597_v16 = vpop.eup %11596  ;;  %v5185_v33 = vmul.f32 1.7159, %v11595_v59 }
 0x325   :  { %v5186_v31 = vmul.f32 1.7159, %v11597_v16  ;;  %v11599_v27 = vpop.eup %11598 }
 0x326   :  { %v5213_v17 = vcombine.high %v5185_v33, %v5185_v33  ;;  %v5220_v55 = vrot.slane %v5185_v33, %v16516_v20  ;;  %v5187_v10 = vmul.f32 1.7159, %v11599_v27  ;;  %v11601_v42 = vpop.eup %11600 }
 0x327   :  { %v5230_v1 = vcombine.high %v5186_v31, %v5186_v31  ;;  %v5237_v24 = vrot.slane %v5186_v31, %v16516_v20  ;;  %v14391_v38 = vmul.f32 1.7159, %v11601_v42 }
 0x328   :  { %v5227_v14 = vrot.slane %v5213_v17, %v16516_v20  ;;  %v5228_v45 = vcombine.high %v5220_v55, %v5220_v55  ;;  %v5247_v25 = vcombine.high %v5187_v10, %v5187_v10  ;;  %v5254_v19 = vrot.slane %v5187_v10, %v16516_v20 }
 0x329   :  { %v5244_v21 = vrot.slane %v5230_v1, %v16516_v20  ;;  %v5245_v52 = vcombine.high %v5237_v24, %v5237_v24  ;;  %v5271_v0 = vrot.slane %v14391_v38, %v16516_v20  ;;  %v5264_v33 = vcombine.high %v14391_v38, %v14391_v38 }
 0x32a   :  { %v5229_v48 = vcombine.high %v5227_v14, %v5227_v14  ;;  %v5451_v23 = vcombine.low %v5220_v55, %v5228_v45  ;;  %v5261_v32 = vrot.slane %v5247_v25, %v16516_v20  ;;  %v5262_v61 = vcombine.high %v5254_v19, %v5254_v19 }
 0x32b   :  { %v5468_v3 = vcombine.low %v5237_v24, %v5245_v52  ;;  %v5246_v54 = vcombine.high %v5244_v21, %v5244_v21  ;;  %v5482_v63 = vrot.slane %v5244_v21, %v16516_v20  ;;  %v5279_v37 = vcombine.high %v5271_v0, %v5271_v0 }
 0x32c   :  { %v5452_v5 = vcombine.low %v5227_v14, %v5229_v48  ;;  %v5263_v50 = vcombine.high %v5261_v32, %v5261_v32  ;;  %v5459_v15 = vrot.slane %v5451_v23, %v16516_v20  ;;  %v5485_v11 = vcombine.low %v5262_v61, %v5261_v32 }
 0x32d   :  { %v5475_v34 = vrot.slane %v5468_v3, %v16516_v20  ;;  %v5484_v30 = vcombine.low %v5246_v54, %v5254_v19  ;;  %v5515_v8 = vrot.slane %v5279_v37, %v16516_v20  ;;  %v5278_v31 = vrot.slane %v5264_v33, %v16516_v20 }
 0x32e   :  { %v5466_v36 = vrot.slane %v5452_v5, %v16516_v20  ;;  %v5501_v7 = vcombine.low %v5263_v50, %v5271_v0  ;;  %v5499_v40 = vrot.slane %v5485_v11, %v16516_v20 }
 0x32f   :  { %v5483_v56 = vcombine.low %v5475_v34, %v5482_v63  ;;  %v5492_v4 = vrot.slane %v5484_v30, %v16516_v20  ;;  %v5280_v1 = vcombine.high %v5278_v31, %v5278_v31 }
 0x330   :  { %v5467_v39 = vcombine.low %v5459_v15, %v5466_v36  ;;  %v5508_v62 = vrot.slane %v5501_v7, %v16516_v20 }
 0x331   :  { %5734 = vst.msk [vmem:[#allocation2 + $0x8] sm:$0x3f] %vm5733_vm12, %v5483_v56  ;;  %v5500_v53 = vcombine.low %v5492_v4, %v5499_v40  ;;  %v5517_v25 = vcombine.low %v5278_v31, %v5280_v1  ;;  %v11377_v31 = vld [vmem:[%s16106_s6 + $0x60] ss:$8 sps:$4 sm:$0xff]  }
 0x332   :  { %5732 = vst.msk [vmem:[#allocation2] sm:$0xff] %vm5731_vm13, %v5467_v39  ;;  %v5516_v44 = vcombine.low %v5508_v62, %v5515_v8  ;;  %v11359_v62 = vld [vmem:[%s16106_s6] ss:$8 sps:$4 sm:$0xff]   ;;  %v11361_v8 = vld [vmem:[%s16106_s6 + $0x4] ss:$8 sps:$4 sm:$0xff]  }
 0x333   :  { %5735 = vst.msk [vmem:[#allocation2 + $0x10] sm:$0xff] %vm5731_vm13, %v5500_v53  ;;  %v5525_v61 = vrot.slane %v5517_v25, %v16516_v20  ;;  %7396 = vmatprep.subr.bf16.mxu1 %v11361_v8  ;;  %v11364_v53 = vld [vmem:[%s16106_s6 + $0x14] ss:$8 sps:$4 sm:$0xff]   ;;  %v11383_v1 = vld [vmem:[%s16106_s6 + $0x80] ss:$8 sps:$4 sm:$0xff]  }
 0x334   :  { %5736 = vst.msk [vmem:[#allocation2 + $0x18] sm:$0x3f] %vm5733_vm12, %v5516_v44  ;;  %7397 = vmatpush1.bf16.msra.mxu1 %v11359_v62  ;;  %v11362_v44 = vld [vmem:[%s16106_s6 + $0x10] ss:$8 sps:$4 sm:$0xff]  }
 0x335   :  { %7398 = vmatprep.subr.bf16.mxu1 %v11364_v53  ;;  %v11397_v53 = vld [vmem:[%s16106_s6 + $0xc4] ss:$8 sps:$4 sm:$0xff]  }
 0x336   :  { %v5076_v26 = vpop.f32.mrb[8].mxu1 }
 0x337   :  { %v5126_v22 = vmul.f32 %v14355_v58, %v5076_v26  ;;  %v5078_v49 = vpop.f32.mrb[9].mxu1  ;;  %v11370_v26 = vld [vmem:[%s16106_s6 + $0x34] ss:$8 sps:$4 sm:$0xff]  }
 0x338   :  { %v5782_v46 = vld [vmem:[#allocation2 + $0xa] sm:$0x3]  ;;  %v5079_v57 = vpop.f32.mrb[10].mxu1  ;;  %7399 = vmatpush1.bf16.msra.mxu1 %v11362_v44  ;;  %v11373_v49 = vld [vmem:[%s16106_s6 + $0x44] ss:$8 sps:$4 sm:$0xff]  }
 0x339   :  { %v5766_v9 = vld [vmem:[#allocation2 + $0x9] sm:$0x3]  ;;  %5911 = vrot.lane.b32.xlu1 %v5782_v46, %s11679_s4  ;;  %v5798_v35 = vld [vmem:[#allocation2 + $0xb] sm:$0x3]  ;;  %v5765_v47 = vld [vmem:[#allocation2 + $0x1] sm:$0xff]  ;;  %v5147_v18 = vadd.f32 %v14366_v12, %v5126_v22  ;;  %v5127_v6 = vmul.f32 %v14355_v58, %v5079_v57  ;;  %v5081_v29 = vpop.f32.mrb[11].mxu1 }
 0x33a   :  { %5847 = vrot.lane.b32.xlu0 %v5766_v9, %s11680_s5  ;;  %v5781_v28 = vld [vmem:[#allocation2 + $0x2] sm:$0xff]  ;;  %v11368_v22 = vld [vmem:[%s16106_s6 + $0x30] ss:$8 sps:$4 sm:$0xff]  }
 0x33b   :  { %v5161_v13 = vmul.f32 0.6666667, %v5147_v18  ;;  %v5148_v43 = vadd.f32 %v14366_v12, %v5127_v6  ;;  %v5797_v2 = vld [vmem:[#allocation2 + $0x3] sm:$0xff]  ;;  %v5783_v59 = vld [vmem:[#allocation2 + $0x12] sm:$0xff]  ;;  %v5784_v24 = vld [vmem:[#allocation2 + $0x1a] sm:$0x3] }
 0x33c   :  { %v5767_v16 = vld [vmem:[#allocation2 + $0x11] sm:$0xff]  ;;  %v5768_v10 = vld [vmem:[#allocation2 + $0x19] sm:$0x3]  ;;  %v5800_v19 = vld [vmem:[#allocation2 + $0x1b] sm:$0x3] }
 0x33d   :  { %5845 = vrot.lane.b32.xlu1 %v5765_v47, %s11680_s5  ;;  %11602 = vtanh.f32 %v5161_v13  ;;  %v5162_v51 = vmul.f32 0.6666667, %v5148_v43  ;;  %v5815_v27 = vld [vmem:[#allocation2 + $0x14] sm:$0xff]  ;;  %v11367_v46 = vld [vmem:[%s16106_s6 + $0x24] ss:$8 sps:$4 sm:$0xff]  }
 0x33e   :  { %5975 = vrot.lane.b32.xlu0 %v5798_v35, %s11681_s23  ;;  %v5799_v17 = vld [vmem:[#allocation2 + $0x13] sm:$0xff]  ;;  %v11365_v9 = vld [vmem:[%s16106_s6 + $0x20] ss:$8 sps:$4 sm:$0xff]   ;;  %7400 = vmatprep.subr.bf16.mxu1 %v11367_v46 }
 0x33f   :  { %11604 = vtanh.f32 %v5162_v51  ;;  %7401 = vmatpush1.bf16.msra.mxu1 %v11365_v9  ;;  %v11371_v47 = vld [vmem:[%s16106_s6 + $0x40] ss:$8 sps:$4 sm:$0xff]   ;;  %v11376_v6 = vld [vmem:[%s16106_s6 + $0x54] ss:$8 sps:$4 sm:$0xff]   ;;  %v11379_v51 = vld [vmem:[%s16106_s6 + $0x64] ss:$8 sps:$4 sm:$0xff]  }
 0x340   :  { %7402 = vmatprep.subr.bf16.mxu1 %v11370_v26  ;;  %v11395_v26 = vld [vmem:[%s16106_s6 + $0xc0] ss:$8 sps:$4 sm:$0xff]  }
 0x341   :  { %5973 = vrot.lane.b32.xlu1 %v5797_v2, %s11681_s23  ;;  %v11374_v2 = vld [vmem:[%s16106_s6 + $0x50] ss:$8 sps:$4 sm:$0xff]  }
 0x342   :  { %5909 = vrot.lane.b32.xlu0 %v5781_v28, %s11679_s4 }
 0x343   :  { %7403 = vmatpush1.bf16.msra.mxu1 %v11368_v22 }
 0x344   :  { %7404 = vmatprep.subr.bf16.mxu1 %v11373_v49  ;;  %v11398_v49 = vld [vmem:[%s16106_s6 + $0xd0] ss:$8 sps:$4 sm:$0xff]  }
 0x345   :  { %5913 = vrot.lane.b32.xlu1 %v5783_v59, %s11679_s4 }
 0x346   :  { %5849 = vrot.lane.b32.xlu0 %v5767_v16, %s11680_s5 }
 0x347   :  { %v11603_v55 = vpop.eup %11602  ;;  %7405 = vmatpush1.bf16.msra.mxu1 %v11371_v47  ;;  %v11400_v47 = vld [vmem:[%s16106_s6 + $0xd4] ss:$8 sps:$4 sm:$0xff]  }
 0x348   :  { %v5189_v42 = vmul.f32 1.7159, %v11603_v55  ;;  %7406 = vmatprep.subr.bf16.mxu1 %v11376_v6  ;;  %v11385_v55 = vld [vmem:[%s16106_s6 + $0x84] ss:$8 sps:$4 sm:$0xff]  }
 0x349   :  { %6041 = vrot.lane.b32.xlu1 %v5815_v27, %s11682_s1  ;;  %v11605_v14 = vpop.eup %11604  ;;  %v11382_v27 = vld [vmem:[%s16106_s6 + $0x74] ss:$8 sps:$4 sm:$0xff]  }
 0x34a   :  { %5977 = vrot.lane.b32.xlu0 %v5799_v17, %s11681_s23  ;;  %v5281_v45 = vcombine.high %v5189_v42, %v5189_v42  ;;  %v5288_v21 = vrot.slane %v5189_v42, %v16516_v20  ;;  %v5190_v52 = vmul.f32 1.7159, %v11605_v14  ;;  %v11380_v17 = vld [vmem:[%s16106_s6 + $0x70] ss:$8 sps:$4 sm:$0xff]  }
 0x34b   :  { %7407 = vmatpush1.bf16.msra.mxu1 %v11374_v2  ;;  %v11401_v2 = vld [vmem:[%s16106_s6 + $0xe0] ss:$8 sps:$4 sm:$0xff]  }
 0x34c   :  { %v5295_v48 = vrot.slane %v5281_v45, %v16516_v20  ;;  %v5296_v23 = vcombine.high %v5288_v21, %v5288_v21  ;;  %v5298_v38 = vcombine.high %v5190_v52, %v5190_v52  ;;  %v5305_v3 = vrot.slane %v5190_v52, %v16516_v20  ;;  %7408 = vmatprep.subr.bf16.mxu1 %v11379_v51 }
 0x34d   :  { %5915 = vrot.lane.b32.xlu1 %v5784_v24, %s11679_s4 }
 0x34e   :  { %5851 = vrot.lane.b32.xlu0 %v5768_v10, %s11680_s5  ;;  %v5297_v54 = vcombine.high %v5295_v48, %v5295_v48  ;;  %v5518_v32 = vcombine.low %v5288_v21, %v5296_v23  ;;  %v14432_v5 = vrot.slane %v5298_v38, %v16516_v20  ;;  %v5313_v63 = vcombine.high %v5305_v3, %v5305_v3  ;;  %v11388_v10 = vld [vmem:[%s16106_s6 + $0x94] ss:$8 sps:$4 sm:$0xff]  }
 0x34f   :  { %v5548_v36 = vrot.slane %v5305_v3, %v16516_v20  ;;  %7409 = vmatpush1.bf16.msra.mxu1 %v11377_v31 }
 0x350   :  { %v5532_v34 = vrot.slane %v5518_v32, %v16516_v20  ;;  %v5534_v30 = vcombine.low %v5295_v48, %v5297_v54  ;;  %v14437_v50 = vcombine.low %v5313_v63, %v14432_v5  ;;  %7410 = vmatprep.subr.bf16.mxu1 %v11382_v27  ;;  %v5314_v45 = vcombine.high %v14432_v5, %v14432_v5  ;;  %v11391_v48 = vld [vmem:[%s16106_s6 + $0xa4] ss:$8 sps:$4 sm:$0xff]   ;;  %v11406_v27 = vld [vmem:[%s16106_s6 + $0xf4] ss:$8 sps:$4 sm:$0xff]  }
 0x352   :  { %5979 = vrot.lane.b32.xlu0 %v5800_v19, %s11681_s23  ;;  %v5533_v0 = vcombine.low %v5525_v61, %v5532_v34  ;;  %v5541_v15 = vrot.slane %v5534_v30, %v16516_v20  ;;  %v11386_v19 = vld [vmem:[%s16106_s6 + $0x90] ss:$8 sps:$4 sm:$0xff]   ;;  %v5558_v32 = vrot.slane %v14437_v50, %v16516_v20 }
 0x353   :  { %7411 = vmatpush1.bf16.msra.mxu1 %v11380_v17  ;;  %v5750_v17 = vld [vmem:[#allocation2 + $0x8] sm:$0x3] }
 0x354   :  { %5737 = vst.msk [vmem:[#allocation2 + $0x20] sm:$0xff] %vm5731_vm13, %v5533_v0  ;;  %v5549_v11 = vcombine.low %v5541_v15, %v5548_v36  ;;  %7412 = vmatprep.subr.bf16.mxu1 %v11385_v55  ;;  %v11389_v0 = vld [vmem:[%s16106_s6 + $0xa0] ss:$8 sps:$4 sm:$0xff]   ;;  %v11394_v36 = vld [vmem:[%s16106_s6 + $0xb4] ss:$8 sps:$4 sm:$0xff]  }
 0x356   :  { %5738 = vst.msk [vmem:[#allocation2 + $0x28] sm:$0x3f] %vm5733_vm12, %v5549_v11 }
 0x357   :  { %7413 = vmatpush1.bf16.msra.mxu1 %v11383_v1 }
 0x358   :  { %7414 = vmatprep.subr.bf16.mxu1 %v11388_v10 }
 0x35b   :  { %7415 = vmatpush1.bf16.msra.mxu1 %v11386_v19  ;;  %v5751_v19 = vld [vmem:[#allocation2 + $0x10] sm:$0xff] }
 0x35c   :  { %7416 = vmatprep.subr.bf16.mxu1 %v11391_v48 }
 0x35d   :  { %v5786_v56 = vld [vmem:[#allocation2 + $0x2a] sm:$0x3]  ;;  %v5785_v7 = vld [vmem:[#allocation2 + $0x22] sm:$0xff] }
 0x35e   :  { %v5770_v37 = vld [vmem:[#allocation2 + $0x29] sm:$0x3]  ;;  %5919 = vrot.lane.b32.xlu0 %v5786_v56, %s11679_s4  ;;  %v5802_v39 = vld [vmem:[#allocation2 + $0x2b] sm:$0x3]  ;;  %v5769_v4 = vld [vmem:[#allocation2 + $0x21] sm:$0xff] }
 0x35f   :  { %5855 = vrot.lane.b32.xlu1 %v5770_v37, %s11680_s5  ;;  %v5801_v40 = vld [vmem:[#allocation2 + $0x23] sm:$0xff]  ;;  %7417 = vmatpush1.bf16.msra.mxu1 %v11389_v0 }
 0x360   :  { %7418 = vmatprep.subr.bf16.mxu1 %v11394_v36 }
 0x362   :  { %5917 = vrot.lane.b32.xlu0 %v5785_v7, %s11679_s4 }
 0x363   :  { %5983 = vrot.lane.b32.xlu1 %v5802_v39, %s11681_s23 }
 0x367   :  { %5853 = vrot.lane.b32.xlu1 %v5769_v4, %s11680_s5 }
 0x36b   :  { %5981 = vrot.lane.b32.xlu1 %v5801_v40, %s11681_s23  ;;  %v11392_v40 = vld [vmem:[%s16106_s6 + $0xb0] ss:$8 sps:$4 sm:$0xff]  }
 0x36c   :  { %7419 = vmatpush1.bf16.msra.mxu1 %v11392_v40 }
 0x36d   :  { %7420 = vmatprep.subr.bf16.mxu1 %v11397_v53 }
 0x370   :  { %7421 = vmatpush1.bf16.msra.mxu1 %v11395_v26 }
 0x371   :  { %7422 = vmatprep.subr.bf16.mxu1 %v11400_v47 }
 0x374   :  { %7423 = vmatpush1.bf16.msra.mxu1 %v11398_v49 }
 0x389   :  { %v5084_v35 = vpop.f32.mrb[12].mxu1 }
 0x38a   :  { %v5128_v57 = vmul.f32 %v14355_v58, %v5084_v35  ;;  %v5086_v18 = vpop.f32.mrb[13].mxu1 }
 0x38b   :  { %v5087_v29 = vpop.f32.mrb[14].mxu1 }
 0x38c   :  { %v5149_v13 = vadd.f32 %v14366_v12, %v5128_v57  ;;  %v5129_v43 = vmul.f32 %v14355_v58, %v5087_v29  ;;  %v5089_v28 = vpop.f32.mrb[15].mxu1 }
 0x38e   :  { %v5163_v59 = vmul.f32 0.6666667, %v5149_v13  ;;  %v5150_v16 = vadd.f32 %v14366_v12, %v5129_v43  ;;  %v11403_v13 = vld [vmem:[%s16106_s6 + $0xe4] ss:$8 sps:$4 sm:$0xff]  }
 0x38f   :  { %7424 = vmatprep.subr.bf16.mxu1 %v11403_v13 }
 0x390   :  { %11606 = vtanh.f32 %v5163_v59  ;;  %v5164_v33 = vmul.f32 0.6666667, %v5150_v16  ;;  %7425 = vmatpush1.bf16.msra.mxu1 %v11401_v2 }
 0x391   :  { %7426 = vmatprep.subr.bf16.mxu1 %v11406_v27 }
 0x392   :  { %11608 = vtanh.f32 %v5164_v33 }
 0x39a   :  { %v11607_v24 = vpop.eup %11606 }
 0x39b   :  { %v5191_v42 = vmul.f32 1.7159, %v11607_v24  ;;  %v5749_v24 = vld [vmem:[#allocation2] sm:$0xff] }
 0x39c   :  { %v11609_v14 = vpop.eup %11608 }
 0x39d   :  { %v5315_v21 = vcombine.high %v5191_v42, %v5191_v42  ;;  %v5322_v52 = vrot.slane %v5191_v42, %v16516_v20  ;;  %v5192_v25 = vmul.f32 1.7159, %v11609_v14  ;;  %v11404_v14 = vld [vmem:[%s16106_s6 + $0xf0] ss:$8 sps:$4 sm:$0xff]  }
 0x39e   :  { %7427 = vmatpush1.bf16.msra.mxu1 %v11404_v14 }
 0x39f   :  { %v5329_v23 = vrot.slane %v5315_v21, %v16516_v20  ;;  %v5330_v38 = vcombine.high %v5322_v52, %v5322_v52  ;;  %v5551_v3 = vcombine.low %v5314_v45, %v5322_v52  ;;  %v5332_v54 = vcombine.high %v5192_v25, %v5192_v25 }
 0x3a0   :  { %v5339_v5 = vrot.slane %v5192_v25, %v16516_v20 }
 0x3a1   :  { %v5331_v63 = vcombine.high %v5329_v23, %v5329_v23  ;;  %v5565_v61 = vrot.slane %v5551_v3, %v16516_v20  ;;  %v5567_v34 = vcombine.low %v5330_v38, %v5329_v23  ;;  %v5346_v30 = vrot.slane %v5332_v54, %v16516_v20 }
 0x3a2   :  { %v5347_v15 = vcombine.high %v5339_v5, %v5339_v5 }
 0x3a3   :  { %v5566_v50 = vcombine.low %v5558_v32, %v5565_v61  ;;  %v5574_v11 = vrot.slane %v5567_v34, %v16516_v20  ;;  %v5581_v56 = vrot.slane %v5331_v63, %v16516_v20  ;;  %v5348_v37 = vcombine.high %v5346_v30, %v5346_v30 }
 0x3a4   :  { %v5583_v7 = vcombine.low %v5339_v5, %v5347_v15 }
 0x3a5   :  { %v5582_v39 = vcombine.low %v5574_v11, %v5581_v56  ;;  %5739 = vst.msk [vmem:[#allocation2 + $0x30] sm:$0xff] %vm5731_vm13, %v5566_v50  ;;  %v5584_v4 = vcombine.low %v5346_v30, %v5348_v37 }
 0x3a6   :  { %v5591_v44 = vrot.slane %v5583_v7, %v16516_v20 }
 0x3a7   :  { %5740 = vst.msk [vmem:[#allocation2 + $0x38] sm:$0x3f] %vm5733_vm12, %v5582_v39  ;;  %v5598_v46 = vrot.slane %v5584_v4, %v16516_v20 }
 0x3a9   :  { %v5599_v9 = vcombine.low %v5591_v44, %v5598_v46 }
 0x3ab   :  { %v5912_v62 = vpop.permute.xlu1 %5911  ;;  %5741 = vst.msk [vmem:[#allocation2 + $0x40] sm:$0xff] %vm5731_vm13, %v5599_v9 }
 0x3ac   :  { %v5848_v8 = vpop.permute.xlu0 %5847 }
 0x3ad   :  { %v6102_v28 = vsel %vm5000_vm11, %v5848_v8, %v5912_v62  ;;  %v6086_v1 = vsel %vm5731_vm13, %v5750_v17, %v5848_v8 }
 0x3ae   :  { %v5787_v57 = vld [vmem:[#allocation2 + $0x32] sm:$0xff]  ;;  %v5804_v45 = vld [vmem:[#allocation2 + $0x3b] sm:$0x3] }
 0x3af   :  { %v5846_v35 = vpop.permute.xlu1 %5845  ;;  %v5771_v18 = vld [vmem:[#allocation2 + $0x31] sm:$0xff]  ;;  %5921 = vrot.lane.b32.xlu1 %v5787_v57, %s11679_s4  ;;  %v5772_v51 = vld [vmem:[#allocation2 + $0x39] sm:$0x3] }
 0x3b0   :  { %v14546_v22 = vpop.permute.xlu0 %5975  ;;  %5857 = vrot.lane.b32.xlu0 %v5771_v18, %s11680_s5  ;;  %v5803_v59 = vld [vmem:[#allocation2 + $0x33] sm:$0xff]  ;;  %v6085_v42 = vsel %vm5731_vm13, %v5749_v24, %v5846_v35 }
 0x3b1   :  { %v6119_v16 = vsel %vm6117_vm14, %v6102_v28, %v14546_v22  ;;  %v5819_v21 = vld [vmem:[#allocation2 + $0x34] sm:$0xff] }
 0x3b2   :  { %v6235_v10 = vcombine.low %v6086_v1, %v6119_v16  ;;  %v5788_v0 = vld [vmem:[#allocation2 + $0x3a] sm:$0x3] }
 0x3b3   :  { %v14555_v29 = vpop.permute.xlu1 %5973  ;;  %5859 = vrot.lane.b32.xlu1 %v5772_v51, %s11680_s5 }
 0x3b4   :  { %v5910_v6 = vpop.permute.xlu0 %5909  ;;  %5985 = vrot.lane.b32.xlu0 %v5803_v59, %s11681_s23  ;;  %v6243_v30 = vrot.slane %v6235_v10, %v16516_v20 }
 0x3b5   :  { %v6101_v43 = vsel %vm5000_vm11, %v5846_v35, %v5910_v6 }
 0x3b6   :  { %v6118_v55 = vsel %vm6117_vm14, %v6101_v43, %v14555_v29 }
 0x3b7   :  { %v5914_v33 = vpop.permute.xlu1 %5913  ;;  %v6199_v52 = vcombine.low %v6085_v42, %v6118_v55  ;;  %v6200_v25 = vcombine.high %v6085_v42, %v6118_v55  ;;  %5987 = vrot.lane.b32.xlu1 %v5804_v45, %s11681_s23 }
 0x3b8   :  { %v5850_v31 = vpop.permute.xlu0 %5849  ;;  %6049 = vrot.lane.b32.xlu0 %v5819_v21, %s11682_s1 }
 0x3b9   :  { %v6103_v48 = vsel %vm5000_vm11, %v5850_v31, %v5914_v33  ;;  %v6087_v3 = vsel %vm5731_vm13, %v5751_v19, %v5850_v31  ;;  %v6209_v15 = vrot.slane %v6199_v52, %v16516_v20  ;;  %v6216_v36 = vrot.slane %v6200_v25, %v16516_v20 }
 0x3bb   :  { %v14582_v23 = vpop.permute.xlu1 %6041  ;;  %v6633_v39 = vrot.slane %v6209_v15, %v16516_v20  ;;  %v6647_v4 = vrot.slane %v6216_v36, %v16516_v20 }
 0x3bc   :  { %v5978_v38 = vpop.permute.xlu0 %5977  ;;  %5923 = vrot.lane.b32.xlu0 %v5788_v0, %s11679_s4 }
 0x3bd   :  { %v6120_v54 = vsel %vm6117_vm14, %v6103_v48, %v5978_v38  ;;  %v14590_v32 = vsel %vm6134_vm15, %v5978_v38, %v14582_v23  ;;  %v6655_v53 = vcombine.low %v6633_v39, %v6647_v4  ;;  %v6656_v44 = vcombine.high %v6633_v39, %v6647_v4 }
 0x3be   :  { %v6252_v5 = vcombine.low %v6087_v3, %v6120_v54  ;;  %v6253_v63 = vcombine.high %v6087_v3, %v6120_v54  ;;  %v6254_v61 = vcombine.low %v14590_v32, %v14582_v23  ;;  %v6255_v34 = vcombine.high %v14590_v32, %v14582_v23  ;;  %v5813_v32 = vld [vmem:[#allocation2 + $0x4] sm:$0xff] }
 0x3c0   :  { %v6262_v50 = vrot.slane %v6252_v5, %v16516_v20  ;;  %v14601_v11 = vrot.slane %v6254_v61, %v16516_v20  ;;  %v14605_v56 = vrot.slane %v6253_v63, %v16516_v20 }
 0x3c2   :  { %v6285_v37 = vcombine.high %v6262_v50, %v14601_v11  ;;  %v10860_v7 = vcombine.low %v6243_v30, %v6262_v50 }
 0x3c4   :  { %v10862_v40 = vcombine.low %v6285_v37, %v14605_v56  ;;  %v6669_v62 = vrot.slane %v10860_v7, %v16516_v20 }
 0x3c6   :  { %v6683_v8 = vrot.slane %v10862_v40, %v16516_v20  ;;  %v5092_v47 = vpop.f32.mrb[16].mxu1 }
 0x3c7   :  { %v5130_v49 = vmul.f32 %v14355_v58, %v5092_v47  ;;  %v5094_v57 = vpop.f32.mrb[17].mxu1 }
 0x3c8   :  { %v6691_v46 = vcombine.low %v6669_v62, %v6683_v8  ;;  %v6692_v9 = vcombine.high %v6669_v62, %v6683_v8  ;;  %v5095_v18 = vpop.f32.mrb[18].mxu1 }
 0x3c9   :  { %v5151_v6 = vadd.f32 %v14366_v12, %v5130_v49  ;;  %v5131_v13 = vmul.f32 %v14355_v58, %v5095_v18  ;;  %v5097_v43 = vpop.f32.mrb[19].mxu1 }
 0x3ca   :  { %v7024_v26 = vpack.c.bf16 %v6692_v9, %v6656_v44  ;;  %v7023_v35 = vpack.c.bf16 %v6691_v46, %v6655_v53 }
 0x3cb   :  { %v5165_v28 = vmul.f32 0.6666667, %v5151_v6  ;;  %v5152_v2 = vadd.f32 %v14366_v12, %v5131_v13 }
 0x3cc   :  { %7428 = vmatprep.mubr.bf16.mxu1 %v7024_v26 }
 0x3cd   :  { %7429 = vmatmul.mubr.bf16.vlgmr.msra.gmra.mrb[28].mxu1 %v7023_v35  ;;  %11610 = vtanh.f32 %v5165_v28  ;;  %v5166_v51 = vmul.f32 0.6666667, %v5152_v2 }
 0x3cf   :  { %11612 = vtanh.f32 %v5166_v51 }
 0x3d7   :  { %v11611_v59 = vpop.eup %11610 }
 0x3d8   :  { %v5193_v33 = vmul.f32 1.7159, %v11611_v59 }
 0x3d9   :  { %v11613_v17 = vpop.eup %11612 }
 0x3da   :  { %v5100_v16 = vpop.f32.mrb[20].mxu1  ;;  %v5349_v1 = vcombine.high %v5193_v33, %v5193_v33  ;;  %v5356_v24 = vrot.slane %v5193_v33, %v16516_v20  ;;  %v5194_v10 = vmul.f32 1.7159, %v11613_v17 }
 0x3db   :  { %v5132_v31 = vmul.f32 %v14355_v58, %v5100_v16  ;;  %v5102_v27 = vpop.f32.mrb[21].mxu1 }
 0x3dc   :  { %v5103_v55 = vpop.f32.mrb[22].mxu1  ;;  %v5363_v21 = vrot.slane %v5349_v1, %v16516_v20  ;;  %v5364_v52 = vcombine.high %v5356_v24, %v5356_v24  ;;  %v5366_v25 = vcombine.high %v5194_v10, %v5194_v10  ;;  %v5373_v19 = vrot.slane %v5194_v10, %v16516_v20 }
 0x3dd   :  { %v5153_v42 = vadd.f32 %v14366_v12, %v5132_v31  ;;  %v5105_v14 = vpop.f32.mrb[23].mxu1  ;;  %v5133_v45 = vmul.f32 %v14355_v58, %v5103_v55 }
 0x3de   :  { %v5600_v3 = vcombine.low %v5356_v24, %v5364_v52  ;;  %v5365_v54 = vcombine.high %v5363_v21, %v5363_v21  ;;  %v5380_v5 = vrot.slane %v5366_v25, %v16516_v20  ;;  %v5381_v63 = vcombine.high %v5373_v19, %v5373_v19 }
 0x3df   :  { %v5167_v48 = vmul.f32 0.6666667, %v5153_v42  ;;  %v5154_v38 = vadd.f32 %v14366_v12, %v5133_v45  ;;  %v5614_v0 = vrot.slane %v5363_v21, %v16516_v20 }
 0x3e0   :  { %v5607_v30 = vrot.slane %v5600_v3, %v16516_v20  ;;  %v5616_v15 = vcombine.low %v5365_v54, %v5373_v19  ;;  %v5617_v36 = vcombine.low %v5381_v63, %v5380_v5  ;;  %v5382_v57 = vcombine.high %v5380_v5, %v5380_v5 }
 0x3e1   :  { %11614 = vtanh.f32 %v5167_v48  ;;  %v5168_v61 = vmul.f32 0.6666667, %v5154_v38 }
 0x3e2   :  { %v5615_v50 = vcombine.low %v5607_v30, %v5614_v0  ;;  %v5624_v37 = vrot.slane %v5616_v15, %v16516_v20  ;;  %v5631_v7 = vrot.slane %v5617_v36, %v16516_v20 }
 0x3e3   :  { %11616 = vtanh.f32 %v5168_v61 }
 0x3e4   :  { %5742 = vst.msk [vmem:[#allocation2 + $0x48] sm:$0x3f] %vm5733_vm12, %v5615_v50  ;;  %v5632_v39 = vcombine.low %v5624_v37, %v5631_v7 }
 0x3e6   :  { %5743 = vst.msk [vmem:[#allocation2 + $0x50] sm:$0xff] %vm5731_vm13, %v5632_v39 }
 0x3eb   :  { %v11615_v40 = vpop.eup %11614  ;;  %v5789_v9 = vld [vmem:[#allocation2 + $0x42] sm:$0xff]  ;;  %v5790_v45 = vld [vmem:[#allocation2 + $0x4a] sm:$0x3] }
 0x3ec   :  { %v5195_v53 = vmul.f32 1.7159, %v11615_v40  ;;  %v5773_v26 = vld [vmem:[#allocation2 + $0x41] sm:$0xff]  ;;  %5925 = vrot.lane.b32.xlu1 %v5789_v9, %s11679_s4  ;;  %v5774_v33 = vld [vmem:[#allocation2 + $0x49] sm:$0x3] }
 0x3ed   :  { %v11617_v46 = vpop.eup %11616  ;;  %5861 = vrot.lane.b32.xlu0 %v5773_v26, %s11680_s5  ;;  %v5805_v1 = vld [vmem:[#allocation2 + $0x43] sm:$0xff]  ;;  %v5806_v48 = vld [vmem:[#allocation2 + $0x4b] sm:$0x3] }
 0x3ee   :  { %v5383_v18 = vcombine.high %v5195_v53, %v5195_v53  ;;  %v5390_v6 = vrot.slane %v5195_v53, %v16516_v20  ;;  %v5196_v13 = vmul.f32 1.7159, %v11617_v46 }
 0x3ef   :  { %v5108_v4 = vpop.f32.mrb[24].mxu1 }
 0x3f0   :  { %v5134_v62 = vmul.f32 %v14355_v58, %v5108_v4  ;;  %v5110_v8 = vpop.f32.mrb[25].mxu1  ;;  %v5397_v2 = vrot.slane %v5383_v18, %v16516_v20  ;;  %v5398_v51 = vcombine.high %v5390_v6, %v5390_v6  ;;  %v5633_v59 = vcombine.low %v5382_v57, %v5390_v6  ;;  %5863 = vrot.lane.b32.xlu1 %v5774_v33, %s11680_s5 }
 0x3f1   :  { %v5111_v44 = vpop.f32.mrb[26].mxu1  ;;  %v5400_v16 = vcombine.high %v5196_v13, %v5196_v13  ;;  %5989 = vrot.lane.b32.xlu0 %v5805_v1, %s11681_s23 }
 0x3f2   :  { %v5155_v35 = vadd.f32 %v14366_v12, %v5134_v62  ;;  %v5135_v47 = vmul.f32 %v14355_v58, %v5111_v44  ;;  %v5113_v49 = vpop.f32.mrb[27].mxu1  ;;  %v5407_v58 = vrot.slane %v5196_v13, %v16516_v20  ;;  %v5399_v27 = vcombine.high %v5397_v2, %v5397_v2  ;;  %v11407_v13 = vld [vmem:[%s16106_s6 + $0x100] ss:$8 sps:$4 sm:$0xff]  }
 0x3f3   :  { %v5640_v17 = vrot.slane %v5633_v59, %v16516_v20  ;;  %v5647_v55 = vrot.slane %v5398_v51, %v16516_v20 }
 0x3f4   :  { %v5169_v43 = vmul.f32 0.6666667, %v5155_v35  ;;  %v5156_v28 = vadd.f32 %v14366_v12, %v5135_v47  ;;  %v5414_v12 = vrot.slane %v5400_v16, %v16516_v20  ;;  %v5415_v24 = vcombine.high %v5407_v58, %v5407_v58  ;;  %5927 = vrot.lane.b32.xlu1 %v5790_v45, %s11679_s4  ;;  %v5916_v16 = vpop.permute.xlu1 %5915 }
 0x3f5   :  { %v5648_v10 = vcombine.low %v5640_v17, %v5647_v55  ;;  %v5649_v42 = vcombine.low %v5397_v2, %v5399_v27  ;;  %v11410_v27 = vld [vmem:[%s16106_s6 + $0x110] ss:$8 sps:$4 sm:$0xff]   ;;  %v11412_v17 = vld [vmem:[%s16106_s6 + $0x114] ss:$8 sps:$4 sm:$0xff]  }
 0x3f6   :  { %11618 = vtanh.f32 %v5169_v43  ;;  %v5170_v31 = vmul.f32 0.6666667, %v5156_v28  ;;  %v5650_v14 = vcombine.low %v5407_v58, %v5415_v24  ;;  %v5416_v52 = vcombine.high %v5414_v12, %v5414_v12  ;;  %v11409_v43 = vld [vmem:[%s16106_s6 + $0x104] ss:$8 sps:$4 sm:$0xff]  }
 0x3f7   :  { %v5657_v21 = vrot.slane %v5649_v42, %v16516_v20  ;;  %5744 = vst.msk [vmem:[#allocation2 + $0x58] sm:$0x3f] %vm5733_vm12, %v5648_v10  ;;  %7479 = vmatprep.subr.bf16.mxu1 %v11409_v43  ;;  %v11415_v24 = vld [vmem:[%s16106_s6 + $0x124] ss:$8 sps:$4 sm:$0xff]   ;;  %v11413_v10 = vld [vmem:[%s16106_s6 + $0x120] ss:$8 sps:$4 sm:$0xff]  }
 0x3f8   :  { %11620 = vtanh.f32 %v5170_v31  ;;  %v5664_v25 = vrot.slane %v5650_v14, %v16516_v20  ;;  %5991 = vrot.lane.b32.xlu1 %v5806_v48, %s11681_s23  ;;  %v5666_v3 = vcombine.low %v5414_v12, %v5416_v52  ;;  %7480 = vmatpush1.bf16.msra.mxu1 %v11407_v13  ;;  %v14677_v31 = vpop.permute.xlu1 %5855  ;;  %v5852_v12 = vpop.permute.xlu0 %5851  ;;  %v11418_v42 = vld [vmem:[%s16106_s6 + $0x134] ss:$8 sps:$4 sm:$0xff]  }
 0x3f9   :  { %7481 = vmatprep.subr.bf16.mxu1 %v11412_v17  ;;  %v5814_v17 = vld [vmem:[#allocation2 + $0xc] sm:$0x3] }
 0x3fa   :  { %v5665_v19 = vcombine.low %v5657_v21, %v5664_v25  ;;  %v5673_v36 = vrot.slane %v5666_v3, %v16516_v20  ;;  %v11416_v25 = vld [vmem:[%s16106_s6 + $0x130] ss:$8 sps:$4 sm:$0xff]  }
 0x3fc   :  { %5745 = vst.msk [vmem:[#allocation2 + $0x60] sm:$0xff] %vm5731_vm13, %v5665_v19  ;;  %7482 = vmatpush1.bf16.msra.mxu1 %v11410_v27  ;;  %v14697_v45 = vpop.permute.xlu1 %5983  ;;  %v14700_v52 = vpop.permute.xlu0 %5979 }
 0x3fd   :  { %7483 = vmatprep.subr.bf16.mxu1 %v11415_v24  ;;  %v11430_v24 = vld [vmem:[%s16106_s6 + $0x174] ss:$8 sps:$4 sm:$0xff]  }
 0x3fe   :  { %v5791_v63 = vld [vmem:[#allocation2 + $0x52] sm:$0xff]  ;;  %v5792_v59 = vld [vmem:[#allocation2 + $0x5a] sm:$0x3] }
 0x3ff   :  { %v5775_v61 = vld [vmem:[#allocation2 + $0x51] sm:$0xff]  ;;  %5929 = vrot.lane.b32.xlu0 %v5791_v63, %s11679_s4  ;;  %v5776_v49 = vld [vmem:[#allocation2 + $0x59] sm:$0x3]  ;;  %v5808_v33 = vld [vmem:[#allocation2 + $0x5b] sm:$0x3] }
 0x400   :  { %v11619_v38 = vpop.eup %11618  ;;  %5865 = vrot.lane.b32.xlu1 %v5775_v61, %s11680_s5  ;;  %v5823_v40 = vld [vmem:[#allocation2 + $0x54] sm:$0xff]  ;;  %7484 = vmatpush1.bf16.msra.mxu1 %v11413_v10  ;;  %v5854_v3 = vpop.permute.xlu1 %5853  ;;  %v11419_v63 = vld [vmem:[%s16106_s6 + $0x140] ss:$8 sps:$4 sm:$0xff]   ;;  %v11421_v61 = vld [vmem:[%s16106_s6 + $0x144] ss:$8 sps:$4 sm:$0xff]  }
 0x401   :  { %v5197_v54 = vmul.f32 1.7159, %v11619_v38  ;;  %v5807_v46 = vld [vmem:[#allocation2 + $0x53] sm:$0xff]  ;;  %7485 = vmatprep.subr.bf16.mxu1 %v11418_v42  ;;  %v5920_v38 = vpop.permute.xlu0 %5919  ;;  %v5818_v42 = vld [vmem:[#allocation2 + $0x2c] sm:$0x3] }
 0x402   :  { %v11621_v5 = vpop.eup %11620 }
 0x403   :  { %v5417_v30 = vcombine.high %v5197_v54, %v5197_v54  ;;  %v5424_v0 = vrot.slane %v5197_v54, %v16516_v20  ;;  %v5198_v15 = vmul.f32 1.7159, %v11621_v5  ;;  %6057 = vrot.lane.b32.xlu0 %v5823_v40, %s11682_s1  ;;  %v11422_v40 = vld [vmem:[%s16106_s6 + $0x150] ss:$8 sps:$4 sm:$0xff]  }
 0x404   :  { %5993 = vrot.lane.b32.xlu1 %v5807_v46, %s11681_s23  ;;  %7486 = vmatpush1.bf16.msra.mxu1 %v11416_v25  ;;  %v6106_v46 = vsel %vm5000_vm11, %v14677_v31, %v5920_v38  ;;  %v11433_v25 = vld [vmem:[%s16106_s6 + $0x184] ss:$8 sps:$4 sm:$0xff]  }
 0x405   :  { %v5431_v50 = vrot.slane %v5417_v30, %v16516_v20  ;;  %v5432_v37 = vcombine.high %v5424_v0, %v5424_v0  ;;  %v5680_v7 = vrot.slane %v5424_v0, %v16516_v20  ;;  %v5434_v39 = vcombine.high %v5198_v15, %v5198_v15  ;;  %7487 = vmatprep.subr.bf16.mxu1 %v11421_v61 }
 0x406   :  { %v5441_v4 = vrot.slane %v5198_v15, %v16516_v20  ;;  %v6104_v30 = vsel %vm5000_vm11, %v5852_v12, %v5916_v16  ;;  %v5918_v15 = vpop.permute.xlu0 %5917 }
 0x407   :  { %v5681_v62 = vcombine.low %v5673_v36, %v5680_v7  ;;  %v5682_v8 = vcombine.low %v5432_v37, %v5431_v50  ;;  %v5433_v53 = vcombine.high %v5431_v50, %v5431_v50  ;;  %v5448_v44 = vrot.slane %v5434_v39, %v16516_v20  ;;  %5867 = vrot.lane.b32.xlu0 %v5776_v49, %s11680_s5  ;;  %v14717_v36 = vpop.permute.xlu1 %5981  ;;  %v11424_v50 = vld [vmem:[%s16106_s6 + $0x154] ss:$8 sps:$4 sm:$0xff]   ;;  %v5752_v7 = vld [vmem:[#allocation2 + $0x18] sm:$0x3] }
 0x408   :  { %v5449_v9 = vcombine.high %v5441_v4, %v5441_v4  ;;  %v6121_v37 = vsel %vm6117_vm14, %v6104_v30, %v14700_v52  ;;  %7488 = vmatpush1.bf16.msra.mxu1 %v11419_v63  ;;  %v5820_v63 = vld [vmem:[#allocation2 + $0x3c] sm:$0x3] }
 0x409   :  { %5746 = vst.msk [vmem:[#allocation2 + $0x68] sm:$0x3f] %vm5733_vm12, %v5681_v62  ;;  %v5450_v26 = vcombine.high %v5448_v44, %v5448_v44  ;;  %v5683_v35 = vcombine.low %v5433_v53, %v5441_v4  ;;  %v5690_v57 = vrot.slane %v5682_v8, %v16516_v20  ;;  %v6105_v4 = vsel %vm5000_vm11, %v5854_v3, %v5918_v15  ;;  %v5817_v15 = vld [vmem:[#allocation2 + $0x24] sm:$0xff] }
 0x40a   :  { %v5699_v47 = vcombine.low %v5449_v9, %v5448_v44  ;;  %v6088_v62 = vsel %vm5731_vm13, %v5752_v7, %v5852_v12  ;;  %v6122_v8 = vsel %vm6117_vm14, %v6105_v4, %v14717_v36  ;;  %7489 = vmatprep.subr.bf16.mxu1 %v11424_v50  ;;  %v5753_v9 = vld [vmem:[#allocation2 + $0x20] sm:$0xff]  ;;  %v11428_v12 = vld [vmem:[%s16106_s6 + $0x170] ss:$8 sps:$4 sm:$0xff]  }
 0x40b   :  { %v5697_v18 = vrot.slane %v5683_v35, %v16516_v20  ;;  %v5713_v6 = vrot.slane %v5450_v26, %v16516_v20  ;;  %5931 = vrot.lane.b32.xlu0 %v5792_v59, %s11679_s4  ;;  %v6288_v53 = vcombine.low %v6088_v62, %v6121_v37  ;;  %v6123_v35 = vsel %vm6117_vm14, %v6106_v46, %v14697_v45  ;;  %v11434_v37 = vld [vmem:[%s16106_s6 + $0x190] ss:$8 sps:$4 sm:$0xff]  }
 0x40c   :  { %v5706_v28 = vrot.slane %v5699_v47, %v16516_v20  ;;  %v6089_v47 = vsel %vm5731_vm13, %v5753_v9, %v5854_v3  ;;  %7490 = vmatpush1.bf16.msra.mxu1 %v11422_v40  ;;  %v5824_v40 = vld [vmem:[#allocation2 + $0x5c] sm:$0x3] }
 0x40d   :  { %v5698_v2 = vcombine.low %v5690_v57, %v5697_v18  ;;  %v14743_v57 = vrot.slane %v6255_v34, %v16516_v20  ;;  %v6305_v13 = vcombine.low %v6089_v47, %v6122_v8  ;;  %v14755_v23 = vrot.slane %v6288_v53, %v16516_v20  ;;  %v7095_v53 = vld [vmem:[%s16106_s6 + $0x1a0] sm:$0x33] }
 0x40e   :  { %v5714_v51 = vcombine.low %v5706_v28, %v5713_v6  ;;  %v5754_v6 = vld [vmem:[#allocation2 + $0x28] sm:$0x3]  ;;  %v10937_v46 = vcombine.high %v7095_v53, %v7095_v53  ;;  %v10936_v9 = vcombine.low %v7095_v53, %v7095_v53 }
 0x40f   :  { %5747 = vst.msk [vmem:[#allocation2 + $0x70] sm:$0xff] %vm5731_vm13, %v5698_v2  ;;  %5995 = vrot.lane.b32.xlu0 %v5808_v33, %s11681_s23  ;;  %v6090_v43 = vsel %vm5731_vm13, %v5754_v6, %v14677_v31  ;;  %v11425_v28 = vld [vmem:[%s16106_s6 + $0x160] ss:$8 sps:$4 sm:$0xff]   ;;  %v11427_v2 = vld [vmem:[%s16106_s6 + $0x164] ss:$8 sps:$4 sm:$0xff]   ;;  %v6287_v27 = vcombine.high %v14605_v56, %v14743_v57 }
 0x410   :  { %5748 = vst.msk [vmem:[#allocation2 + $0x78] sm:$0x3f] %vm5733_vm12, %v5714_v51  ;;  %v5777_v58 = vld [vmem:[#allocation2 + $0x61] sm:$0xff]  ;;  %v5778_v21 = vld [vmem:[#allocation2 + $0x69] sm:$0x3]  ;;  %v6341_v34 = vcombine.low %v6090_v43, %v6123_v35  ;;  %v5755_v51 = vld [vmem:[#allocation2 + $0x30] sm:$0xff]  ;;  %7491 = vmatprep.subr.bf16.mxu1 %v11427_v2 }
 0x411   :  { %5869 = vrot.lane.b32.xlu1 %v5777_v58, %s11680_s5  ;;  %v5793_v55 = vld [vmem:[#allocation2 + $0x62] sm:$0xff]  ;;  %v5794_v48 = vld [vmem:[#allocation2 + $0x6a] sm:$0x3]  ;;  %v6306_v58 = vcombine.high %v6089_v47, %v6122_v8  ;;  %7492 = vmatpush1.bf16.msra.mxu1 %v11425_v28  ;;  %v10864_v10 = vcombine.low %v6287_v27, %v14755_v23  ;;  %v7391_v35 = vsel %vm7389_vm2, %v10936_v9, 0  ;;  %v5822_v47 = vld [vmem:[#allocation2 + $0x4c] sm:$0x3] }
 0x412   :  { %v5809_v1 = vld [vmem:[#allocation2 + $0x63] sm:$0xff]  ;;  %v5810_v18 = vld [vmem:[#allocation2 + $0x6b] sm:$0x3]  ;;  %7493 = vmatprep.subr.bf16.mxu1 %v11430_v24  ;;  %vm9605_vm12 = vcmask 651264  }
 0x413   :  { %5933 = vrot.lane.b32.xlu0 %v5793_v55, %s11679_s4  ;;  %v6315_v55 = vrot.slane %v6305_v13, %v16516_v20  ;;  %v6705_v61 = vrot.slane %v10864_v10, %v16516_v20  ;;  %v11439_v43 = vld [vmem:[%s16107_s8] sm:$0xff]   ;;  %v11440_v2 = vld [vmem:[%s16107_s8 + $0x8] sm:$0xff]  }
 0x414   :  { %8941 = vmatpush1.bf16.msra.mxu0 %v11439_v43 }
 0x415   :  { %5997 = vrot.lane.b32.xlu1 %v5809_v1, %s11681_s23  ;;  %v6719_v38 = vrot.slane %v6315_v55, %v16516_v20  ;;  %7494 = vmatpush1.bf16.msra.mxu1 %v11428_v12  ;;  %v11442_v12 = vld [vmem:[%s16107_s8 + $0x18] sm:$0xff]  }
 0x416   :  { %7495 = vmatprep.subr.bf16.mxu1 %v11433_v25  ;;  %v11443_v25 = vld [vmem:[%s16107_s8 + $0x20] sm:$0xff]  }
 0x417   :  { %v5795_v14 = vld [vmem:[#allocation2 + $0x72] sm:$0xff]  ;;  %5871 = vrot.lane.b32.xlu0 %v5778_v21, %s11680_s5  ;;  %v5796_v0 = vld [vmem:[#allocation2 + $0x7a] sm:$0x3]  ;;  %v6728_v50 = vcombine.high %v6705_v61, %v6719_v38  ;;  %v5828_v6 = vld [vmem:[#allocation2 + $0x7c] sm:$0x3] }
 0x418   :  { %v5827_v19 = vld [vmem:[#allocation2 + $0x74] sm:$0xff] }
 0x419   :  { %5937 = vrot.lane.b32.xlu1 %v5795_v14, %s11679_s4  ;;  %v5780_v54 = vld [vmem:[#allocation2 + $0x79] sm:$0x3]  ;;  %v5779_v5 = vld [vmem:[#allocation2 + $0x71] sm:$0xff]  ;;  %v5812_v44 = vld [vmem:[#allocation2 + $0x7b] sm:$0x3]  ;;  %v6349_v14 = vrot.slane %v6341_v34, %v16516_v20 }
 0x41a   :  { %v5811_v39 = vld [vmem:[#allocation2 + $0x73] sm:$0xff] }
 0x41b   :  { %5935 = vrot.lane.b32.xlu0 %v5794_v48, %s11679_s4  ;;  %v5816_v48 = vld [vmem:[#allocation2 + $0x1c] sm:$0x3]  ;;  %v11441_v34 = vld [vmem:[%s16107_s8 + $0x10] sm:$0xff]  }
 0x41d   :  { %6065 = vrot.lane.b32.xlu1 %v5827_v19, %s11682_s1  ;;  %v6322_v19 = vrot.slane %v6306_v58, %v16516_v20 }
 0x41f   :  { %5873 = vrot.lane.b32.xlu0 %v5779_v5, %s11680_s5  ;;  %v11436_v5 = vld [vmem:[%s16106_s6 + $0x194] ss:$8 sps:$4 sm:$0xff]  }
 0x421   :  { %5875 = vrot.lane.b32.xlu1 %v5780_v54, %s11680_s5  ;;  %v5922_v49 = vpop.permute.xlu1 %5921  ;;  %v11431_v54 = vld [vmem:[%s16106_s6 + $0x180] ss:$8 sps:$4 sm:$0xff]  }
 0x422   :  { %v5858_v26 = vpop.permute.xlu0 %5857  ;;  %7496 = vmatpush1.bf16.msra.mxu1 %v11431_v54 }
 0x423   :  { %6001 = vrot.lane.b32.xlu0 %v5811_v39, %s11681_s23  ;;  %v6107_v59 = vsel %vm5000_vm11, %v5858_v26, %v5922_v49  ;;  %v14762_v33 = vsel %vm5731_vm13, %v5755_v51, %v5858_v26  ;;  %v6727_v39 = vcombine.low %v6705_v61, %v6719_v38  ;;  %7497 = vmatprep.subr.bf16.mxu1 %v11436_v5  ;;  %v5825_v26 = vld [vmem:[#allocation2 + $0x64] sm:$0xff]  ;;  %v16517_v49 = vmov 0  }
 0x424   :  { %8942 = vmatprep.subr.bf16.mxu0 %v16517_v49 }
 0x425   :  { %5939 = vrot.lane.b32.xlu1 %v5796_v0, %s11679_s4  ;;  %v6741_v0 = vrot.slane %v6322_v19, %v16516_v20  ;;  %v5860_v28 = vpop.permute.xlu1 %5859  ;;  %8943 = vmatpush1.bf16.msra.mxu0 %v11440_v2 }
 0x426   :  { %v14758_v16 = vpop.permute.xlu0 %5985  ;;  %7498 = vmatpush1.bf16.msra.mxu1 %v11434_v37  ;;  %8944 = vmatprep.subr.bf16.mxu0 %v16517_v49 }
 0x427   :  { %5999 = vrot.lane.b32.xlu0 %v5810_v18, %s11681_s23  ;;  %v14766_v31 = vsel %vm6117_vm14, %v6107_v59, %v14758_v16  ;;  %10938 = vmatprep.subr.msk.bf16.mxu1 %vm7389_vm2, %v10937_v46  ;;  %v5826_v18 = vld [vmem:[#allocation2 + $0x6c] sm:$0x3] }
 0x428   :  { %v6358_v1 = vcombine.low %v14762_v33, %v14766_v31 }
 0x429   :  { %6003 = vrot.lane.b32.xlu1 %v5812_v44, %s11681_s23  ;;  %v5821_v44 = vld [vmem:[#allocation2 + $0x44] sm:$0xff]  ;;  %v14831_v58 = vpop.permute.xlu1 %5987  ;;  %8945 = vmatpush1.bf16.msra.mxu0 %v11441_v34 }
 0x42a   :  { %v14783_v21 = vrot.slane %v6358_v1, %v16516_v20  ;;  %7500 = vmatpush1.bf16.msra.mxu1 %v7391_v35  ;;  %v6050_v13 = vpop.permute.xlu0 %6049  ;;  %8946 = vmatprep.subr.bf16.mxu0 %v16517_v49 }
 0x42b   :  { %6039 = vrot.lane.b32.xlu0 %v5814_v17, %s11682_s1  ;;  %10225 = vmatprep.subr.bf16.mxu1 %v16517_v49  ;;  %v6141_v59 = vsel %vm6134_vm15, %v14758_v16, %v6050_v13  ;;  %v5756_v17 = vld [vmem:[#allocation2 + $0x38] sm:$0x3]  ;;  %v6359_v16 = vcombine.high %v14762_v33, %v14766_v31 }
 0x42c   :  { %v10866_v3 = vcombine.low %v6349_v14, %v14783_v21  ;;  %v6360_v55 = vcombine.low %v6141_v59, %v6050_v13  ;;  %v6361_v1 = vcombine.high %v6141_v59, %v6050_v13  ;;  %v6092_v24 = vsel %vm5731_vm13, %v5756_v17, %v5860_v28 }
 0x42d   :  { %6037 = vrot.lane.b32.xlu1 %v5813_v32, %s11682_s1  ;;  %8947 = vmatpush1.bf16.msra.mxu0 %v11442_v12  ;;  %v14853_v38 = vrot.slane %v6359_v16, %v16516_v20 }
 0x42e   :  { %v6755_v30 = vrot.slane %v10866_v3, %v16516_v20  ;;  %v5924_v32 = vpop.permute.xlu0 %5923  ;;  %v14846_v14 = vrot.slane %v6361_v1, %v16516_v20  ;;  %8948 = vmatprep.subr.bf16.mxu0 %v16517_v49 }
 0x42f   :  { %6043 = vrot.lane.b32.xlu0 %v5816_v48, %s11682_s1  ;;  %v6108_v51 = vsel %vm5000_vm11, %v5860_v28, %v5924_v32 }
 0x430   :  { %v6764_v7 = vcombine.high %v6741_v0, %v6755_v30  ;;  %v6763_v4 = vcombine.low %v6741_v0, %v6755_v30  ;;  %v6125_v27 = vsel %vm6117_vm14, %v6108_v51, %v14831_v58  ;;  %v6393_v3 = vcombine.high %v14853_v38, %v14846_v14  ;;  %v5759_v51 = vld [vmem:[#allocation2 + $0x50] sm:$0xff] }
 0x431   :  { %6047 = vrot.lane.b32.xlu1 %v5818_v42, %s11682_s1  ;;  %v6394_v10 = vcombine.low %v6092_v24, %v6125_v27  ;;  %v14843_v42 = vrot.slane %v6360_v55, %v16516_v20  ;;  %8949 = vmatpush1.bf16.msra.mxu0 %v11443_v25 }
 0x432   :  { %v7028_v62 = vpack.c.bf16 %v6764_v7, %v6728_v50  ;;  %v7027_v8 = vpack.c.bf16 %v6763_v4, %v6727_v39  ;;  %8950 = vmatprep.subr.bf16.mxu0 %v16517_v49 }
 0x433   :  { %6045 = vrot.lane.b32.xlu0 %v5817_v15, %s11682_s1  ;;  %v14856_v33 = vrot.slane %v6394_v10, %v16516_v20  ;;  %v6391_v31 = vcombine.high %v14783_v21, %v14843_v42 }
 0x434   :  { %7438 = vmatprep.mubr.bf16.mxu1 %v7028_v62 }
 0x435   :  { %6051 = vrot.lane.b32.xlu1 %v5820_v63, %s11682_s1  ;;  %7439 = vmatmul.mubr.bf16.gmra.mrb[32].mxu1 %v7027_v8  ;;  %v10870_v5 = vcombine.low %v6393_v3, %v14856_v33  ;;  %v5757_v63 = vld [vmem:[#allocation2 + $0x40] sm:$0xff]  ;;  %v10868_v37 = vcombine.low %v6391_v31, %v14853_v38 }
 0x437   :  { %6053 = vrot.lane.b32.xlu0 %v5821_v44, %s11682_s1  ;;  %v6777_v53 = vrot.slane %v10868_v37, %v16516_v20 }
 0x439   :  { %6059 = vrot.lane.b32.xlu1 %v5824_v40, %s11682_s1  ;;  %v6791_v40 = vrot.slane %v10870_v5, %v16516_v20 }
 0x43b   :  { %6055 = vrot.lane.b32.xlu0 %v5822_v47, %s11682_s1  ;;  %v6800_v46 = vcombine.high %v6777_v53, %v6791_v40 }
 0x43d   :  { %6061 = vrot.lane.b32.xlu1 %v5825_v26, %s11682_s1  ;;  %v6799_v26 = vcombine.low %v6777_v53, %v6791_v40 }
 0x43f   :  { %6067 = vrot.lane.b32.xlu0 %v5828_v6, %s11682_s1 }
 0x441   :  { %6063 = vrot.lane.b32.xlu1 %v5826_v18, %s11682_s1 }
 0x45e   :  { %v5926_v19 = vpop.permute.xlu1 %5925 }
 0x45f   :  { %v5862_v48 = vpop.permute.xlu0 %5861 }
 0x460   :  { %v6109_v61 = vsel %vm5000_vm11, %v5862_v48, %v5926_v19  ;;  %v6093_v0 = vsel %vm5731_vm13, %v5757_v63, %v5862_v48  ;;  %v5758_v48 = vld [vmem:[#allocation2 + $0x48] sm:$0x3] }
 0x462   :  { %v5864_v54 = vpop.permute.xlu1 %5863 }
 0x463   :  { %v14865_v30 = vpop.permute.xlu0 %5989  ;;  %v6094_v3 = vsel %vm5731_vm13, %v5758_v48, %v5864_v54 }
 0x464   :  { %v6126_v15 = vsel %vm6117_vm14, %v6109_v61, %v14865_v30  ;;  %v5760_v61 = vld [vmem:[#allocation2 + $0x58] sm:$0x3] }
 0x465   :  { %v6411_v21 = vcombine.low %v6093_v0, %v6126_v15  ;;  %v6412_v50 = vcombine.high %v6093_v0, %v6126_v15 }
 0x466   :  { %v5928_v7 = vpop.permute.xlu1 %5927 }
 0x467   :  { %v6421_v39 = vrot.slane %v6411_v21, %v16516_v20  ;;  %v6428_v4 = vrot.slane %v6412_v50, %v16516_v20  ;;  %v6110_v1 = vsel %vm5000_vm11, %v5864_v54, %v5928_v7 }
 0x469   :  { %v6813_v62 = vrot.slane %v6421_v39, %v16516_v20  ;;  %v6827_v8 = vrot.slane %v6428_v4, %v16516_v20 }
 0x46a   :  { %v14877_v44 = vpop.permute.xlu1 %5991 }
 0x46b   :  { %v6836_v9 = vcombine.high %v6813_v62, %v6827_v8  ;;  %v6835_v35 = vcombine.low %v6813_v62, %v6827_v8  ;;  %v6127_v16 = vsel %vm6117_vm14, %v6110_v1, %v14877_v44 }
 0x46c   :  { %v6447_v5 = vcombine.low %v6094_v3, %v6127_v16  ;;  %v5763_v3 = vld [vmem:[#allocation2 + $0x70] sm:$0xff] }
 0x46d   :  { %v7032_v47 = vpack.c.bf16 %v6836_v9, %v6800_v46  ;;  %v7031_v18 = vpack.c.bf16 %v6835_v35, %v6799_v26  ;;  %v5761_v46 = vld [vmem:[#allocation2 + $0x60] sm:$0xff] }
 0x46e   :  { %v6455_v62 = vrot.slane %v6447_v5, %v16516_v20 }
 0x46f   :  { %7448 = vmatprep.mubr.bf16.mxu1 %v7032_v47 }
 0x470   :  { %7449 = vmatmul.mubr.bf16.gmra.mrb[36].mxu1 %v7031_v18 }
 0x471   :  { %v5930_v6 = vpop.permute.xlu0 %5929 }
 0x472   :  { %v5866_v13 = vpop.permute.xlu1 %5865 }
 0x473   :  { %v6111_v28 = vsel %vm5000_vm11, %v5866_v13, %v5930_v6  ;;  %v6095_v59 = vsel %vm5731_vm13, %v5759_v51, %v5866_v13 }
 0x475   :  { %v6058_v43 = vpop.permute.xlu0 %6057 }
 0x476   :  { %v5994_v2 = vpop.permute.xlu1 %5993 }
 0x477   :  { %v6128_v32 = vsel %vm6117_vm14, %v6111_v28, %v5994_v2  ;;  %v6145_v34 = vsel %vm6134_vm15, %v5994_v2, %v6058_v43 }
 0x478   :  { %v6464_v17 = vcombine.low %v6095_v59, %v6128_v32  ;;  %v6466_v55 = vcombine.low %v6145_v34, %v6058_v43  ;;  %v6465_v12 = vcombine.high %v6095_v59, %v6128_v32  ;;  %v6467_v10 = vcombine.high %v6145_v34, %v6058_v43 }
 0x479   :  { %v5868_v27 = vpop.permute.xlu0 %5867 }
 0x47a   :  { %v6474_v25 = vrot.slane %v6464_v17, %v16516_v20  ;;  %v14888_v19 = vrot.slane %v6466_v55, %v16516_v20  ;;  %v14892_v63 = vrot.slane %v6465_v12, %v16516_v20  ;;  %v14898_v21 = vrot.slane %v6467_v10, %v16516_v20 }
 0x47b   :  { %v6096_v37 = vsel %vm5731_vm13, %v5760_v61, %v5868_v27 }
 0x47c   :  { %v6497_v50 = vcombine.high %v6474_v25, %v14888_v19  ;;  %v6499_v53 = vcombine.high %v14892_v63, %v14898_v21  ;;  %v10872_v18 = vcombine.low %v6455_v62, %v6474_v25 }
 0x47d   :  { %v5932_v24 = vpop.permute.xlu0 %5931 }
 0x47e   :  { %v6112_v0 = vsel %vm5000_vm11, %v5868_v27, %v5932_v24  ;;  %v10874_v8 = vcombine.low %v6497_v50, %v14892_v63  ;;  %v6849_v51 = vrot.slane %v10872_v18, %v16516_v20 }
 0x480   :  { %v6863_v2 = vrot.slane %v10874_v8, %v16516_v20 }
 0x481   :  { %v14895_v15 = vpop.permute.xlu0 %5995 }
 0x482   :  { %v6129_v7 = vsel %vm6117_vm14, %v6112_v0, %v14895_v15  ;;  %v6872_v17 = vcombine.high %v6849_v51, %v6863_v2  ;;  %v6871_v1 = vcombine.low %v6849_v51, %v6863_v2 }
 0x483   :  { %v5870_v31 = vpop.permute.xlu1 %5869  ;;  %v6500_v54 = vcombine.low %v6096_v37, %v6129_v7 }
 0x484   :  { %v6097_v26 = vsel %vm5731_vm13, %v5761_v46, %v5870_v31 }
 0x485   :  { %v14907_v4 = vrot.slane %v6500_v54, %v16516_v20  ;;  %v5934_v40 = vpop.permute.xlu0 %5933  ;;  %v5764_v54 = vld [vmem:[#allocation2 + $0x78] sm:$0x3] }
 0x486   :  { %v6113_v9 = vsel %vm5000_vm11, %v5870_v31, %v5934_v40 }
 0x487   :  { %v14904_v39 = vpop.permute.xlu1 %5997  ;;  %v10876_v6 = vcombine.low %v6499_v53, %v14907_v4 }
 0x488   :  { %v6130_v35 = vsel %vm6117_vm14, %v6113_v9, %v14904_v39 }
 0x489   :  { %v6517_v13 = vcombine.low %v6097_v26, %v6130_v35  ;;  %v5872_v43 = vpop.permute.xlu0 %5871  ;;  %v6885_v59 = vrot.slane %v10876_v6, %v16516_v20  ;;  %v6518_v31 = vcombine.high %v6097_v26, %v6130_v35 }
 0x48b   :  { %v5938_v47 = vpop.permute.xlu1 %5937  ;;  %v6527_v28 = vrot.slane %v6517_v13, %v16516_v20 }
 0x48d   :  { %v6899_v34 = vrot.slane %v6527_v28, %v16516_v20  ;;  %v5936_v27 = vpop.permute.xlu0 %5935 }
 0x48e   :  { %v6114_v9 = vsel %vm5000_vm11, %v5872_v43, %v5936_v27  ;;  %v6534_v27 = vrot.slane %v6518_v31, %v16516_v20 }
 0x48f   :  { %v6066_v32 = vpop.permute.xlu1 %6065  ;;  %v6908_v55 = vcombine.high %v6885_v59, %v6899_v34  ;;  %v6907_v12 = vcombine.low %v6885_v59, %v6899_v34 }
 0x491   :  { %v7036_v16 = vpack.c.bf16 %v6908_v55, %v6872_v17  ;;  %v7035_v10 = vpack.c.bf16 %v6907_v12, %v6871_v1  ;;  %v5874_v25 = vpop.permute.xlu0 %5873 }
 0x492   :  { %v6115_v5 = vsel %vm5000_vm11, %v5874_v25, %v5938_v47  ;;  %v6099_v0 = vsel %vm5731_vm13, %v5763_v3, %v5874_v25  ;;  %v5762_v47 = vld [vmem:[#allocation2 + $0x68] sm:$0x3] }
 0x493   :  { %v5876_v24 = vpop.permute.xlu1 %5875  ;;  %7458 = vmatprep.mubr.bf16.mxu1 %v7036_v16  ;;  %v6098_v34 = vsel %vm5731_vm13, %v5762_v47, %v5872_v43 }
 0x494   :  { %7459 = vmatmul.mubr.bf16.gmra.mrb[40].mxu1 %v7035_v10  ;;  %v6100_v26 = vsel %vm5731_vm13, %v5764_v54, %v5876_v24 }
 0x495   :  { %v6002_v61 = vpop.permute.xlu0 %6001 }
 0x496   :  { %v6132_v50 = vsel %vm6117_vm14, %v6115_v5, %v6002_v61  ;;  %v6149_v37 = vsel %vm6134_vm15, %v6002_v61, %v6066_v32  ;;  %v6921_v61 = vrot.slane %v6534_v27, %v16516_v20 }
 0x497   :  { %v5940_v48 = vpop.permute.xlu1 %5939  ;;  %v6570_v40 = vcombine.low %v6099_v0, %v6132_v50  ;;  %v6571_v62 = vcombine.high %v6099_v0, %v6132_v50  ;;  %v6572_v8 = vcombine.low %v6149_v37, %v6066_v32  ;;  %v6573_v53 = vcombine.high %v6149_v37, %v6066_v32 }
 0x498   :  { %v6116_v7 = vsel %vm5000_vm11, %v5876_v24, %v5940_v48  ;;  %v6286_v32 = vcombine.low %v14605_v56, %v14743_v57  ;;  %vm7373_vm11 = vcmask 293888  }
 0x499   :  { %v6580_v18 = vrot.slane %v6570_v40, %v16516_v20  ;;  %v14936_v6 = vrot.slane %v6571_v62, %v16516_v20  ;;  %v14939_v13 = vrot.slane %v6572_v8, %v16516_v20  ;;  %v14942_v28 = vrot.slane %v6573_v53, %v16516_v20  ;;  %v14944_v2 = vpop.permute.xlu0 %5999 }
 0x49a   :  { %v6131_v51 = vsel %vm6117_vm14, %v6114_v9, %v14944_v2  ;;  %v10863_v48 = vcombine.high %v14601_v11, %v6286_v32 }
 0x49b   :  { %v14928_v46 = vpop.permute.xlu1 %6003  ;;  %v6603_v17 = vcombine.high %v6580_v18, %v14939_v13  ;;  %v6553_v55 = vcombine.low %v6098_v34, %v6131_v51  ;;  %v6605_v12 = vcombine.high %v14936_v6, %v14942_v28 }
 0x49c   :  { %v6133_v35 = vsel %vm6117_vm14, %v6116_v7, %v14928_v46  ;;  %v6690_v27 = vrot.slane %v10863_v48, %v16516_v20  ;;  %vm9798_vm14 = vcmask 916480  }
 0x49d   :  { %v6606_v59 = vcombine.low %v6100_v26, %v6133_v35  ;;  %v10880_v43 = vcombine.low %v6603_v17, %v14936_v6  ;;  %v6561_v16 = vrot.slane %v6553_v55, %v16516_v20  ;;  %v6040_v10 = vpop.permute.xlu0 %6039 }
 0x49e   :  { %v6136_v3 = vsel %vm6134_vm15, %v14546_v22, %v6040_v10 }
 0x49f   :  { %v6038_v1 = vpop.permute.xlu1 %6037  ;;  %v14956_v24 = vrot.slane %v6606_v59, %v16516_v20  ;;  %v10878_v0 = vcombine.low %v6561_v16, %v6580_v18  ;;  %v6236_v50 = vcombine.low %v6136_v3, %v6040_v10  ;;  %v6957_v40 = vrot.slane %v10880_v43, %v16516_v20 }
 0x4a0   :  { %v6135_v56 = vsel %vm6134_vm15, %v14555_v29, %v6038_v1 }
 0x4a1   :  { %v6201_v25 = vcombine.low %v6135_v56, %v6038_v1  ;;  %v10882_v31 = vcombine.low %v6605_v12, %v14956_v24  ;;  %v6202_v5 = vcombine.high %v6135_v56, %v6038_v1  ;;  %v6250_v8 = vrot.slane %v6236_v50, %v16516_v20  ;;  %v6044_v53 = vpop.permute.xlu0 %6043 }
 0x4a2   :  { %v6935_v26 = vrot.slane %v10878_v0, %v16516_v20  ;;  %v6138_v47 = vsel %vm6134_vm15, %v14700_v52, %v6044_v53  ;;  %v6392_v12 = vcombine.low %v14853_v38, %v14846_v14 }
 0x4a3   :  { %v6223_v29 = vrot.slane %v6201_v25, %v16516_v20  ;;  %v6048_v37 = vpop.permute.xlu1 %6047  ;;  %v6230_v7 = vrot.slane %v6202_v5, %v16516_v20  ;;  %v6971_v62 = vrot.slane %v10882_v31, %v16516_v20  ;;  %v10861_v32 = vcombine.low %v6250_v8, %v14601_v11 }
 0x4a4   :  { %v6140_v54 = vsel %vm6134_vm15, %v14697_v45, %v6048_v37  ;;  %v6289_v34 = vcombine.low %v6138_v47, %v6044_v53  ;;  %v6944_v55 = vcombine.high %v6921_v61, %v6935_v26  ;;  %v6943_v1 = vcombine.low %v6921_v61, %v6935_v26 }
 0x4a5   :  { %v14975_v22 = vrot.slane %v6223_v29, %v16516_v20  ;;  %v6342_v9 = vcombine.low %v6140_v54, %v6048_v37  ;;  %v6654_v35 = vrot.slane %v6230_v7, %v16516_v20  ;;  %v6980_v18 = vcombine.high %v6957_v40, %v6971_v62  ;;  %v6046_v43 = vpop.permute.xlu0 %6045 }
 0x4a6   :  { %v6979_v45 = vcombine.low %v6957_v40, %v6971_v62  ;;  %v6676_v52 = vrot.slane %v10861_v32, %v16516_v20  ;;  %v6303_v56 = vrot.slane %v6289_v34, %v16516_v20  ;;  %v6139_v16 = vsel %vm6134_vm15, %v14717_v36, %v6046_v43 }
 0x4a7   :  { %v6356_v51 = vrot.slane %v6342_v9, %v16516_v20  ;;  %v6052_v59 = vpop.permute.xlu1 %6051  ;;  %v7040_v10 = vpack.c.bf16 %v6980_v18, %v6944_v55  ;;  %v6658_v48 = vcombine.high %v14975_v22, %v6654_v35  ;;  %v6307_v3 = vcombine.low %v6139_v16, %v6046_v43 }
 0x4a8   :  { %v6142_v17 = vsel %vm6134_vm15, %v14831_v58, %v6052_v59  ;;  %v7039_v25 = vpack.c.bf16 %v6979_v45, %v6943_v1  ;;  %v6304_v58 = vcombine.low %v14755_v23, %v6303_v56  ;;  %v6308_v38 = vcombine.high %v6139_v16, %v6046_v43 }
 0x4a9   :  { %v6395_v11 = vcombine.low %v6142_v17, %v6052_v59  ;;  %v10867_v31 = vcombine.low %v6356_v51, %v14843_v42  ;;  %7468 = vmatprep.mubr.bf16.mxu1 %v7040_v10  ;;  %v6694_v50 = vcombine.high %v6676_v52, %v6690_v27  ;;  %v6657_v36 = vcombine.low %v14975_v22, %v6654_v35  ;;  %v6054_v23 = vpop.permute.xlu0 %6053 }
 0x4aa   :  { %v10865_v29 = vcombine.high %v14743_v57, %v6304_v58  ;;  %v6329_v37 = vrot.slane %v6307_v3, %v16516_v20  ;;  %7469 = vmatmul.mubr.bf16.gmra.mrb[44].mxu1 %v7039_v25  ;;  %v6336_v54 = vrot.slane %v6308_v38, %v16516_v20  ;;  %v6143_v62 = vsel %vm6134_vm15, %v14865_v30, %v6054_v23 }
 0x4ab   :  { %v6060_v5 = vpop.permute.xlu1 %6059  ;;  %v6409_v61 = vrot.slane %v6395_v11, %v16516_v20  ;;  %v7026_v8 = vpack.c.bf16 %v6694_v50, %v6658_v48  ;;  %v6762_v53 = vrot.slane %v10867_v31, %v16516_v20  ;;  %v6413_v22 = vcombine.low %v6143_v62, %v6054_v23 }
 0x4ac   :  { %v6146_v0 = vsel %vm6134_vm15, %v14895_v15, %v6060_v5  ;;  %v6712_v15 = vrot.slane %v10865_v29, %v16516_v20  ;;  %v6414_v9 = vcombine.high %v6143_v62, %v6054_v23  ;;  %v6726_v26 = vrot.slane %v6329_v37, %v16516_v20 }
 0x4ad   :  { %v6501_v7 = vcombine.low %v6146_v0, %v6060_v5  ;;  %v6410_v40 = vcombine.low %v14856_v33, %v6409_v61  ;;  %10939 = vmatprep.mubr.msk.bf16.mxu1 %vm7373_vm11, %v7026_v8  ;;  %v10869_v30 = vcombine.high %v14843_v42, %v6392_v12  ;;  %v6693_v18 = vcombine.low %v6676_v52, %v6690_v27  ;;  %v6056_v32 = vpop.permute.xlu0 %6055 }
 0x4ae   :  { %v6435_v45 = vrot.slane %v6413_v22, %v16516_v20  ;;  %v6748_v34 = vrot.slane %v6336_v54, %v16516_v20  ;;  %v6442_v51 = vrot.slane %v6414_v9, %v16516_v20  ;;  %v6730_v42 = vcombine.high %v6712_v15, %v6726_v26 }
 0x4af   :  { %v6062_v57 = vpop.permute.xlu1 %6061  ;;  %v10871_v35 = vcombine.high %v14846_v14, %v6410_v40  ;;  %v6515_v47 = vrot.slane %v6501_v7, %v16516_v20  ;;  %v6144_v14 = vsel %vm6134_vm15, %v14877_v44, %v6056_v32  ;;  %v7025_v59 = vpack.c.bf16 %v6693_v18, %v6657_v36 }
 0x4b0   :  { %v6147_v33 = vsel %vm6134_vm15, %v14904_v39, %v6062_v57  ;;  %v6448_v17 = vcombine.low %v6144_v14, %v6056_v32  ;;  %v6766_v27 = vcombine.high %v6748_v34, %v6762_v53  ;;  %v6820_v12 = vrot.slane %v6435_v45, %v16516_v20 }
 0x4b1   :  { %v6519_v55 = vcombine.low %v6147_v33, %v6062_v57  ;;  %v6798_v56 = vrot.slane %v10871_v35, %v16516_v20  ;;  %v6516_v39 = vcombine.low %v14907_v4, %v6515_v47  ;;  %v6068_v52 = vpop.permute.xlu0 %6067  ;;  %v6784_v11 = vrot.slane %v10869_v30, %v16516_v20 }
 0x4b2   :  { %7512 = vmatmul.mubr.bf16.vlgmr.msra.gmra.mrb[28].mxu1 %v7025_v59  ;;  %v6834_v44 = vrot.slane %v6442_v51, %v16516_v20  ;;  %v6462_v16 = vrot.slane %v6448_v17, %v16516_v20  ;;  %v6150_v10 = vsel %vm6134_vm15, %v14928_v46, %v6068_v52  ;;  %v7030_v25 = vpack.c.bf16 %v6766_v27, %v6730_v42  ;;  %v11444_v17 = vld [vmem:[%s16107_s8 + $0x28] sm:$0xff]  }
 0x4b3   :  { %v6064_v1 = vpop.permute.xlu1 %6063  ;;  %v6498_v4 = vcombine.low %v14892_v63, %v14898_v21  ;;  %v6607_v48 = vcombine.low %v6150_v10, %v6068_v52  ;;  %v6765_v58 = vcombine.low %v6748_v34, %v6762_v53  ;;  %v10877_v31 = vcombine.high %v14898_v21, %v6516_v39  ;;  %8951 = vmatpush1.bf16.msra.mxu0 %v11444_v17  ;;  %v7096_v39 = vld [vmem:[%s16108_s7] sm:$0x3]  ;;  %v11448_v42 = vld [vmem:[%s16107_s8 + $0x48] sm:$0xff]  }
 0x4b4   :  { %v6148_v43 = vsel %vm6134_vm15, %v14944_v2, %v6064_v1  ;;  %v6541_v3 = vrot.slane %v6519_v55, %v16516_v20  ;;  %10940 = vmatprep.mubr.msk.bf16.mxu1 %vm7373_vm11, %v7030_v25  ;;  %v6802_v5 = vcombine.high %v6784_v11, %v6798_v56  ;;  %v6729_v38 = vcombine.low %v6712_v15, %v6726_v26  ;;  %v11445_v55 = vld [vmem:[%s16107_s8 + $0x30] sm:$0xff]  }
 0x4b5   :  { %v6554_v2 = vcombine.low %v6148_v43, %v6064_v1  ;;  %v10873_v61 = vcombine.low %v6462_v16, %v14888_v19  ;;  %v6621_v0 = vrot.slane %v6607_v48, %v16516_v20  ;;  %v6838_v46 = vcombine.high %v6820_v12, %v6834_v44  ;;  %8952 = vmatprep.subr.bf16.mxu0 %v16517_v49  ;;  %v11446_v1 = vld [vmem:[%s16107_s8 + $0x38] sm:$0xff]  }
 0x4b6   :  { %v10875_v50 = vcombine.high %v14888_v19, %v6498_v4  ;;  %v7029_v36 = vpack.c.bf16 %v6765_v58, %v6729_v38  ;;  %v6892_v63 = vrot.slane %v10877_v31, %v16516_v20  ;;  %v6906_v29 = vrot.slane %v6541_v3, %v16516_v20 }
 0x4b7   :  { %v6568_v21 = vrot.slane %v6554_v2, %v16516_v20  ;;  %v7034_v37 = vpack.c.bf16 %v6838_v46, %v6802_v5  ;;  %v6856_v23 = vrot.slane %v10873_v61, %v16516_v20  ;;  %v6520_v7 = vcombine.high %v6147_v33, %v6062_v57  ;;  %8953 = vmatpush1.bf16.msra.mxu0 %v11445_v55 }
 0x4b8   :  { %v6622_v54 = vcombine.low %v14956_v24, %v6621_v0  ;;  %v6801_v40 = vcombine.low %v6784_v11, %v6798_v56  ;;  %v6870_v62 = vrot.slane %v10875_v50, %v16516_v20  ;;  %v6604_v19 = vcombine.low %v14936_v6, %v14942_v28  ;;  %8954 = vmatprep.subr.bf16.mxu0 %v16517_v49  ;;  %v11447_v56 = vld [vmem:[%s16107_s8 + $0x40] sm:$0xff]  }
 0x4b9   :  { %v10879_v8 = vcombine.low %v6568_v21, %v14939_v13  ;;  %v6910_v15 = vcombine.high %v6892_v63, %v6906_v29  ;;  %v6837_v53 = vcombine.low %v6820_v12, %v6834_v44  ;;  %v6548_v22 = vrot.slane %v6520_v7, %v16516_v20  ;;  %v16518_v12 = vld [vmem:[#allocation4_spill] sm:$0xff] }
 0x4ba   :  { %7522 = vmatmul.mubr.bf16.gmra.mrb[32].mxu1 %v7029_v36  ;;  %v10883_v9 = vcombine.high %v14942_v28, %v6622_v54  ;;  %v6874_v26 = vcombine.high %v6856_v23, %v6870_v62  ;;  %v10881_v24 = vcombine.high %v14939_v13, %v6604_v19  ;;  %v6909_v30 = vcombine.low %v6892_v63, %v6906_v29 }
 0x4bb   :  { %10941 = vmatprep.mubr.msk.bf16.mxu1 %vm7373_vm11, %v7034_v37  ;;  %v7033_v57 = vpack.c.bf16 %v6837_v53, %v6801_v40  ;;  %v6942_v35 = vrot.slane %v10879_v8, %v16516_v20  ;;  %v6928_v33 = vrot.slane %v6548_v22, %v16516_v20  ;;  %v6873_v32 = vcombine.low %v6856_v23, %v6870_v62 }
 0x4bc   :  { %v7038_v47 = vpack.c.bf16 %v6910_v15, %v6874_v26  ;;  %v6978_v6 = vrot.slane %v10883_v9, %v16516_v20  ;;  %v6964_v18 = vrot.slane %v10881_v24, %v16516_v20  ;;  %8955 = vmatpush1.bf16.msra.mxu0 %v11446_v1  ;;  %v15079_v27 = vrot.slane %v7096_v39, %v12589_v60 }
 0x4bd   :  { %v6946_v45 = vcombine.high %v6928_v33, %v6942_v35  ;;  %v7037_v34 = vpack.c.bf16 %v6909_v30, %v6873_v32  ;;  %v6945_v13 = vcombine.low %v6928_v33, %v6942_v35  ;;  %8956 = vmatprep.subr.bf16.mxu0 %v16517_v49  ;;  %v16519_v52 = vsub.s32 1, %v16518_v12 }
 0x4be   :  { %v6982_v28 = vcombine.high %v6964_v18, %v6978_v6  ;;  %v6981_v14 = vcombine.low %v6964_v18, %v6978_v6 }
 0x4bf   :  { %v15083_v43 = vrot.slane %v7096_v39, %v16519_v52 }
 0x4c0   :  { %v7042_v51 = vpack.c.bf16 %v6982_v28, %v6946_v45  ;;  %v7041_v59 = vpack.c.bf16 %v6981_v14, %v6945_v13  ;;  %8957 = vmatpush1.bf16.msra.mxu0 %v11447_v56 }
 0x4c1   :  { %8958 = vmatprep.subr.bf16.mxu0 %v16517_v49 }
 0x4c2   :  { %7532 = vmatmul.mubr.bf16.gmra.mrb[36].mxu1 %v7033_v57 }
 0x4c3   :  { %10942 = vmatprep.mubr.msk.bf16.mxu1 %vm7373_vm11, %v7038_v47 }
 0x4c4   :  { %8959 = vmatpush1.bf16.msra.mxu0 %v11448_v42 }
 0x4ca   :  { %7542 = vmatmul.mubr.bf16.gmra.mrb[40].mxu1 %v7037_v34 }
 0x4cb   :  { %10943 = vmatprep.mubr.msk.bf16.mxu1 %vm7373_vm11, %v7042_v51 }
 0x4d2   :  { %7552 = vmatmul.mubr.bf16.gmra.mrb[44].mxu1 %v7041_v59 }
 0x585   :  { %v7513_v11 = vpop.f32.mrb[28].mxu1 }
 0x586   :  { %v11091_v44 = vadd.f32 %v7513_v11, %v15079_v27  ;;  %v7515_v16 = vpop.f32.mrb[29].mxu1 }
 0x587   :  { %v11092_v10 = vadd.f32 %v7515_v16, %v15083_v43  ;;  %v7517_v25 = vpop.f32.mrb[30].mxu1 }
 0x588   :  { %v7562_v4 = vmul.f32 0.6666667, %v11091_v44  ;;  %v11093_v48 = vadd.f32 %v7517_v25, %v15079_v27  ;;  %v7519_v58 = vpop.f32.mrb[31].mxu1 }
 0x589   :  { %v7563_v31 = vmul.f32 0.6666667, %v11092_v10  ;;  %v11094_v3 = vadd.f32 %v7519_v58, %v15083_v43 }
 0x58a   :  { %11622 = vtanh.f32 %v7562_v4  ;;  %v7564_v2 = vmul.f32 0.6666667, %v11093_v48 }
 0x58b   :  { %11624 = vtanh.f32 %v7563_v31  ;;  %v7565_v5 = vmul.f32 0.6666667, %v11094_v3 }
 0x58c   :  { %11626 = vtanh.f32 %v7564_v2 }
 0x58d   :  { %11628 = vtanh.f32 %v7565_v5  ;;  %v7523_v38 = vpop.f32.mrb[32].mxu1 }
 0x58e   :  { %v11095_v61 = vadd.f32 %v7523_v38, %v15079_v27  ;;  %v7525_v0 = vpop.f32.mrb[33].mxu1 }
 0x58f   :  { %v11096_v46 = vadd.f32 %v7525_v0, %v15083_v43  ;;  %v7527_v50 = vpop.f32.mrb[34].mxu1 }
 0x590   :  { %v7566_v36 = vmul.f32 0.6666667, %v11095_v61  ;;  %v11097_v63 = vadd.f32 %v7527_v50, %v15079_v27  ;;  %v7529_v29 = vpop.f32.mrb[35].mxu1 }
 0x591   :  { %v11098_v21 = vadd.f32 %v7529_v29, %v15083_v43  ;;  %v7567_v37 = vmul.f32 0.6666667, %v11096_v46 }
 0x592   :  { %11630 = vtanh.f32 %v7566_v36  ;;  %v7568_v23 = vmul.f32 0.6666667, %v11097_v63 }
 0x593   :  { %v7569_v62 = vmul.f32 0.6666667, %v11098_v21  ;;  %11632 = vtanh.f32 %v7567_v37 }
 0x594   :  { %v11623_v7 = vpop.eup %11622  ;;  %11634 = vtanh.f32 %v7568_v23 }
 0x595   :  { %v11625_v54 = vpop.eup %11624  ;;  %v7602_v40 = vmul.f32 1.7159, %v11623_v7  ;;  %v7533_v19 = vpop.f32.mrb[36].mxu1  ;;  %11636 = vtanh.f32 %v7569_v62 }
 0x596   :  { %v11627_v8 = vpop.eup %11626  ;;  %v7603_v15 = vmul.f32 1.7159, %v11625_v54  ;;  %v11099_v53 = vadd.f32 %v7533_v19, %v15079_v27  ;;  %v7535_v22 = vpop.f32.mrb[37].mxu1 }
 0x597   :  { %v11629_v9 = vpop.eup %11628  ;;  %v7604_v26 = vmul.f32 1.7159, %v11627_v8  ;;  %v11100_v57 = vadd.f32 %v7535_v22, %v15083_v43  ;;  %v7537_v24 = vpop.f32.mrb[38].mxu1 }
 0x598   :  { %v7642_v35 = vcombine.low %v7602_v40, %v7603_v15  ;;  %v7643_v47 = vcombine.high %v7602_v40, %v7603_v15  ;;  %v7605_v33 = vmul.f32 1.7159, %v11629_v9  ;;  %v7570_v6 = vmul.f32 0.6666667, %v11099_v53  ;;  %v7539_v30 = vpop.f32.mrb[39].mxu1 }
 0x599   :  { %v7571_v18 = vmul.f32 0.6666667, %v11100_v57  ;;  %v11101_v45 = vadd.f32 %v7537_v24, %v15079_v27  ;;  %v11102_v32 = vadd.f32 %v7539_v30, %v15083_v43 }
 0x59a   :  { %v7650_v28 = vrot.slane %v7642_v35, %v16516_v20  ;;  %v7657_v34 = vrot.slane %v7643_v47, %v16516_v20  ;;  %v7660_v51 = vcombine.low %v7604_v26, %v7605_v33  ;;  %v7661_v13 = vcombine.high %v7604_v26, %v7605_v33 }
 0x59b   :  { %11638 = vtanh.f32 %v7570_v6  ;;  %v15099_v14 = vmul.f32 0.6666667, %v11101_v45  ;;  %v15101_v59 = vmul.f32 0.6666667, %v11102_v32 }
 0x59c   :  { %v11631_v17 = vpop.eup %11630  ;;  %v7658_v55 = vcombine.high %v7650_v28, %v7650_v28  ;;  %v7659_v1 = vcombine.high %v7657_v34, %v7657_v34  ;;  %v10944_v56 = vrot.slane %v7650_v28, 9  ;;  %v10946_v39 = vrot.slane %v7657_v34, 9 }
 0x59d   :  { %v7668_v42 = vrot.slane %v7660_v51, %v16516_v20  ;;  %v7675_v52 = vrot.slane %v7661_v13, %v16516_v20  ;;  %v15105_v11 = vmul.f32 1.7159, %v11631_v17  ;;  %11640 = vtanh.f32 %v7571_v18  ;;  %v15107_v44 = vpop.f32.mrb[40].mxu1  ;;  %v15113_v38 = vpop.eup %11632 }
 0x59e   :  { %v10945_v16 = vrot.slane %v7658_v55, 9  ;;  %v10947_v10 = vrot.slane %v7659_v1, 9  ;;  %v7982_v25 = vadd.f32 %v10944_v56, %v7650_v28  ;;  %v7984_v4 = vadd.f32 %v10946_v39, %v7657_v34  ;;  %v15109_v48 = vpop.f32.mrb[41].mxu1  ;;  %v15119_v63 = vpop.eup %11634 }
 0x59f   :  { %v7676_v58 = vcombine.high %v7668_v42, %v7668_v42  ;;  %v7677_v31 = vcombine.high %v7675_v52, %v7675_v52  ;;  %v10948_v3 = vrot.slane %v7668_v42, 9  ;;  %v10950_v2 = vrot.slane %v7675_v52, 9  ;;  %v15111_v5 = vpop.f32.mrb[42].mxu1  ;;  %v15127_v19 = vpop.eup %11636 }
 0x5a0   :  { %v7983_v61 = vadd.f32 %v10945_v16, %v7658_v55  ;;  %v7985_v0 = vadd.f32 %v10947_v10, %v7659_v1  ;;  %v8065_v46 = vrot.slane %v7982_v25, %v12589_v60  ;;  %v8069_v50 = vrot.slane %v7982_v25, %v12615_v41  ;;  %v15117_v36 = vpop.f32.mrb[43].mxu1 }
 0x5a1   :  { %v8081_v29 = vrot.slane %v7984_v4, %v12589_v60  ;;  %v8085_v21 = vrot.slane %v7984_v4, %v12615_v41  ;;  %v10949_v37 = vrot.slane %v7676_v58, 9  ;;  %v10951_v23 = vrot.slane %v7677_v31, 9 }
 0x5a2   :  { %v8073_v7 = vrot.slane %v7983_v61, %v12589_v60  ;;  %v8077_v54 = vrot.slane %v7983_v61, %v12615_v41  ;;  %v8089_v40 = vrot.slane %v7985_v0, %v12589_v60  ;;  %v8093_v62 = vrot.slane %v7985_v0, %v12615_v41 }
 0x5a3   :  { %v8462_v8 = vpack.c.bf16 %v8065_v46, %v8065_v46  ;;  %v8463_v15 = vpack.c.bf16 %v8069_v50, %v8069_v50  ;;  %v8466_v53 = vpack.c.bf16 %v8081_v29, %v8081_v29  ;;  %v8467_v22 = vpack.c.bf16 %v8085_v21, %v8085_v21 }
 0x5a4   :  { %v8464_v9 = vpack.c.bf16 %v8073_v7, %v8073_v7  ;;  %v8465_v26 = vpack.c.bf16 %v8077_v54, %v8077_v54  ;;  %v8468_v57 = vpack.c.bf16 %v8089_v40, %v8089_v40  ;;  %v8469_v24 = vpack.c.bf16 %v8093_v62, %v8093_v62 }
 0x5a5   :  { %v11639_v35 = vpop.eup %11638  ;;  %v8642_v47 = vunpack.c.l.b16 %v8462_v8  ;;  %v8643_v33 = vunpack.c.l.b16 %v8463_v15  ;;  %v8646_v6 = vunpack.c.l.b16 %v8466_v53  ;;  %v15129_v30 = vunpack.c.l.b16 %v8467_v22  ;;  %v15131_v18 = vpop.f32.mrb[44].mxu1 }
 0x5a6   :  { %v8644_v45 = vunpack.c.l.b16 %v8464_v9  ;;  %v8645_v32 = vunpack.c.l.b16 %v8465_v26  ;;  %v15133_v28 = vunpack.c.l.b16 %v8468_v57  ;;  %v15135_v34 = vunpack.c.l.b16 %v8469_v24  ;;  %v15137_v51 = vpop.f32.mrb[45].mxu1 }
 0x5a7   :  { %v11641_v13 = vpop.eup %11640  ;;  %v8724_v17 = vrot.slane %v8646_v6, 6  ;;  %v7986_v1 = vadd.f32 %v10948_v3, %v7668_v42  ;;  %v7987_v56 = vadd.f32 %v10949_v37, %v7676_v58  ;;  %v15140_v39 = vpop.f32.mrb[46].mxu1  ;;  %v7988_v0 = vadd.f32 %v10950_v2, %v7675_v52 }
 0x5a8   :  { %v8722_v16 = vrot.slane %v8644_v45, 7  ;;  %v8736_v25 = vrot.slane %v8645_v32, 7  ;;  %v15144_v61 = vpop.f32.mrb[47].mxu1  ;;  %v15146_v46 = vadd.f32 %v10951_v23, %v7677_v31  ;;  %v7607_v53 = vmul.f32 1.7159, %v15113_v38 }
 0x5a9   :  { %v8097_v50 = vrot.slane %v7986_v1, %v12589_v60  ;;  %v8101_v29 = vrot.slane %v7986_v1, %v12615_v41  ;;  %v8105_v3 = vrot.slane %v7987_v56, %v12589_v60  ;;  %v8109_v21 = vrot.slane %v7987_v56, %v12615_v41 }
 0x5aa   :  { %v8723_v42 = vsel %vm4518_vm4, %v8722_v16, %v8642_v47  ;;  %v15152_v58 = vsel %vm4518_vm4, %v8736_v25, %v8643_v33  ;;  %v8113_v52 = vrot.slane %v7988_v0, %v12589_v60  ;;  %v15161_v31 = vrot.slane %v7988_v0, %v12615_v41 }
 0x5ab   :  { %v15157_v37 = vsel %vm4521_vm5, %v8724_v17, %v8723_v42  ;;  %v8121_v2 = vrot.slane %v15146_v46, %v12589_v60  ;;  %v8470_v23 = vpack.c.bf16 %v8097_v50, %v8097_v50  ;;  %v8471_v7 = vpack.c.bf16 %v8101_v29, %v8101_v29 }
 0x5ac   :  { %v8472_v54 = vpack.c.bf16 %v8105_v3, %v8105_v3  ;;  %v8473_v40 = vpack.c.bf16 %v8109_v21, %v8109_v21  ;;  %v8474_v62 = vpack.c.bf16 %v8113_v52, %v8113_v52  ;;  %v7678_v33 = vcombine.low %v15105_v11, %v7607_v53 }
 0x5ad   :  { %v8476_v15 = vpack.c.bf16 %v8121_v2, %v8121_v2  ;;  %v15168_v22 = vunpack.c.l.b16 %v8470_v23  ;;  %v15170_v9 = vunpack.c.l.b16 %v8471_v7  ;;  %v7679_v6 = vcombine.high %v15105_v11, %v7607_v53 }
 0x5ae   :  { %v15172_v26 = vunpack.c.l.b16 %v8472_v54  ;;  %v15174_v57 = vunpack.c.l.b16 %v8473_v40  ;;  %v15176_v24 = vunpack.c.l.b16 %v8474_v62  ;;  %v7608_v17 = vmul.f32 1.7159, %v15119_v63 }
 0x5af   :  { %v15178_v47 = vunpack.c.l.b16 %v8476_v15  ;;  %v7686_v56 = vrot.slane %v7678_v33, %v16516_v20  ;;  %v7693_v16 = vrot.slane %v7679_v6, %v16516_v20  ;;  %v7609_v25 = vmul.f32 1.7159, %v15127_v19 }
 0x5b0   :  { %v7610_v0 = vmul.f32 1.7159, %v11639_v35  ;;  %v7611_v50 = vmul.f32 1.7159, %v11641_v13  ;;  %11642 = vtanh.f32 %v15099_v14  ;;  %v15193_v11 = vadd.f32 %v15107_v44, %v15079_v27 }
 0x5b1   :  { %v7694_v29 = vcombine.high %v7686_v56, %v7686_v56  ;;  %v7695_v42 = vcombine.high %v7693_v16, %v7693_v16  ;;  %v10952_v3 = vrot.slane %v7686_v56, 9  ;;  %v10954_v63 = vrot.slane %v7693_v16, 9 }
 0x5b2   :  { %v7696_v21 = vcombine.low %v7608_v17, %v7609_v25  ;;  %v7697_v52 = vcombine.high %v7608_v17, %v7609_v25  ;;  %v7714_v2 = vcombine.low %v7610_v0, %v7611_v50  ;;  %v7715_v23 = vcombine.high %v7610_v0, %v7611_v50 }
 0x5b3   :  { %v10953_v7 = vrot.slane %v7694_v29, 9  ;;  %v10955_v54 = vrot.slane %v7695_v42, 9  ;;  %v7990_v40 = vadd.f32 %v10952_v3, %v7686_v56  ;;  %v7992_v19 = vadd.f32 %v10954_v63, %v7693_v16 }
 0x5b4   :  { %v7704_v35 = vrot.slane %v7696_v21, %v16516_v20  ;;  %v7711_v14 = vrot.slane %v7697_v52, %v16516_v20  ;;  %v15198_v13 = vrot.slane %v7714_v2, %v16516_v20  ;;  %v15201_v44 = vrot.slane %v7715_v23, %v16516_v20 }
 0x5b5   :  { %v7991_v62 = vadd.f32 %v10953_v7, %v7694_v29  ;;  %v7993_v15 = vadd.f32 %v10955_v54, %v7695_v42  ;;  %v8129_v53 = vrot.slane %v7990_v40, %v12589_v60  ;;  %v8133_v33 = vrot.slane %v7990_v40, %v12615_v41 }
 0x5b6   :  { %v8145_v6 = vrot.slane %v7992_v19, %v12589_v60  ;;  %v8149_v17 = vrot.slane %v7992_v19, %v12615_v41  ;;  %v7712_v56 = vcombine.high %v7704_v35, %v7704_v35  ;;  %v7713_v16 = vcombine.high %v7711_v14, %v7711_v14 }
 0x5b7   :  { %v8137_v25 = vrot.slane %v7991_v62, %v12589_v60  ;;  %v8141_v0 = vrot.slane %v7991_v62, %v12615_v41  ;;  %v8153_v50 = vrot.slane %v7993_v15, %v12589_v60  ;;  %v8157_v3 = vrot.slane %v7993_v15, %v12615_v41 }
 0x5b8   :  { %v8478_v29 = vpack.c.bf16 %v8129_v53, %v8129_v53  ;;  %v8479_v42 = vpack.c.bf16 %v8133_v33, %v8133_v33  ;;  %v8482_v63 = vpack.c.bf16 %v8145_v6, %v8145_v6  ;;  %v8483_v21 = vpack.c.bf16 %v8149_v17, %v8149_v17 }
 0x5b9   :  { %v8480_v52 = vpack.c.bf16 %v8137_v25, %v8137_v25  ;;  %v8481_v2 = vpack.c.bf16 %v8141_v0, %v8141_v0  ;;  %v8484_v23 = vpack.c.bf16 %v8153_v50, %v8153_v50  ;;  %v8485_v7 = vpack.c.bf16 %v8157_v3, %v8157_v3 }
 0x5ba   :  { %v11643_v54 = vpop.eup %11642  ;;  %v8658_v40 = vunpack.c.l.b16 %v8478_v29  ;;  %v8659_v19 = vunpack.c.l.b16 %v8479_v42  ;;  %v8662_v1 = vunpack.c.l.b16 %v8482_v63  ;;  %v15211_v38 = vunpack.c.l.b16 %v8483_v21 }
 0x5bb   :  { %v8660_v45 = vunpack.c.l.b16 %v8480_v52  ;;  %v8661_v62 = vunpack.c.l.b16 %v8481_v2  ;;  %v15213_v10 = vunpack.c.l.b16 %v8484_v23  ;;  %v15215_v32 = vunpack.c.l.b16 %v8485_v7 }
 0x5bc   :  { %v8752_v15 = vrot.slane %v8662_v1, 6  ;;  %v10956_v33 = vrot.slane %v7704_v35, 9  ;;  %v10957_v6 = vrot.slane %v7712_v56, 9  ;;  %v10958_v3 = vrot.slane %v7711_v14, 9 }
 0x5bd   :  { %v8750_v17 = vrot.slane %v8660_v45, 7  ;;  %v8764_v0 = vrot.slane %v8661_v62, 7  ;;  %v10959_v29 = vrot.slane %v7713_v16, 9  ;;  %v7730_v1 = vcombine.high %v15198_v13, %v15198_v13 }
 0x5be   :  { %v7994_v42 = vadd.f32 %v10956_v33, %v7704_v35  ;;  %v7995_v63 = vadd.f32 %v10957_v6, %v7712_v56  ;;  %v7731_v45 = vcombine.high %v15201_v44, %v15201_v44  ;;  %v7996_v23 = vadd.f32 %v10958_v3, %v7711_v14 }
 0x5bf   :  { %v8751_v21 = vsel %vm4518_vm4, %v8750_v17, %v8658_v40  ;;  %v15222_v52 = vsel %vm4518_vm4, %v8764_v0, %v8659_v19  ;;  %v15231_v7 = vadd.f32 %v10959_v29, %v7713_v16  ;;  %v10960_v62 = vrot.slane %v15198_v13, 9 }
 0x5c0   :  { %v15229_v2 = vsel %vm4521_vm5, %v8752_v15, %v8751_v21  ;;  %v8161_v35 = vrot.slane %v7994_v42, %v12589_v60  ;;  %v8165_v56 = vrot.slane %v7994_v42, %v12615_v41  ;;  %v8169_v40 = vrot.slane %v7995_v63, %v12589_v60 }
 0x5c1   :  { %v8173_v19 = vrot.slane %v7995_v63, %v12615_v41  ;;  %v8177_v33 = vrot.slane %v7996_v23, %v12589_v60  ;;  %v15240_v6 = vrot.slane %v7996_v23, %v12615_v41  ;;  %v8185_v14 = vrot.slane %v15231_v7, %v12589_v60 }
 0x5c2   :  { %v8486_v16 = vpack.c.bf16 %v8161_v35, %v8161_v35  ;;  %v8487_v15 = vpack.c.bf16 %v8165_v56, %v8165_v56  ;;  %v8488_v17 = vpack.c.bf16 %v8169_v40, %v8169_v40  ;;  %v10961_v3 = vrot.slane %v7730_v1, 9 }
 0x5c3   :  { %v8489_v0 = vpack.c.bf16 %v8173_v19, %v8173_v19  ;;  %v8490_v29 = vpack.c.bf16 %v8177_v33, %v8177_v33  ;;  %v8492_v63 = vpack.c.bf16 %v8185_v14, %v8185_v14  ;;  %v10962_v53 = vrot.slane %v15201_v44, 9 }
 0x5c4   :  { %v15246_v21 = vunpack.c.l.b16 %v8486_v16  ;;  %v15248_v25 = vunpack.c.l.b16 %v8487_v15  ;;  %v15250_v50 = vunpack.c.l.b16 %v8488_v17  ;;  %v10963_v19 = vrot.slane %v7731_v45, 9 }
 0x5c5   :  { %v15252_v23 = vunpack.c.l.b16 %v8489_v0  ;;  %v15255_v35 = vunpack.c.l.b16 %v8490_v29  ;;  %v15257_v56 = vunpack.c.l.b16 %v8492_v63  ;;  %v7998_v16 = vadd.f32 %v10960_v62, %v15198_v13 }
 0x5c6   :  { %v7999_v15 = vadd.f32 %v10961_v3, %v7730_v1  ;;  %v8000_v0 = vadd.f32 %v10962_v53, %v15201_v44  ;;  %v8001_v4 = vadd.f32 %v10963_v19, %v7731_v45  ;;  %v15265_v55 = vmul.f32 1.7159, %v11643_v54 }
 0x5c7   :  { %16520 = vst [vmem:[#allocation9_spill] sm:$0xff] %v15255_v35  ;;  %v8193_v29 = vrot.slane %v7998_v16, %v12589_v60  ;;  %v8197_v63 = vrot.slane %v7998_v16, %v12615_v41  ;;  %11644 = vtanh.f32 %v15101_v59  ;;  %v11106_v59 = vadd.f32 %v15117_v36, %v15083_v43 }
 0x5c8   :  { %v8201_v40 = vrot.slane %v7999_v15, %v12589_v60  ;;  %v8205_v33 = vrot.slane %v7999_v15, %v12615_v41  ;;  %v8209_v14 = vrot.slane %v8000_v0, %v12589_v60  ;;  %v8213_v13 = vrot.slane %v8000_v0, %v12615_v41 }
 0x5c9   :  { %v8217_v1 = vrot.slane %v8001_v4, %v12589_v60  ;;  %v8221_v62 = vrot.slane %v8001_v4, %v12615_v41  ;;  %v8494_v44 = vpack.c.bf16 %v8193_v29, %v8193_v29  ;;  %v8495_v53 = vpack.c.bf16 %v8197_v63, %v8197_v63 }
 0x5ca   :  { %v8496_v54 = vpack.c.bf16 %v8201_v40, %v8201_v40  ;;  %v8497_v45 = vpack.c.bf16 %v8205_v33, %v8205_v33  ;;  %v8498_v3 = vpack.c.bf16 %v8209_v14, %v8209_v14  ;;  %v8499_v19 = vpack.c.bf16 %v8213_v13, %v8213_v13 }
 0x5cb   :  { %v8500_v17 = vpack.c.bf16 %v8217_v1, %v8217_v1  ;;  %v8501_v16 = vpack.c.bf16 %v8221_v62, %v8221_v62  ;;  %v15275_v42 = vunpack.c.l.b16 %v8494_v44  ;;  %v8675_v8 = vunpack.c.l.b16 %v8495_v53 }
 0x5cc   :  { %v15277_v15 = vunpack.c.l.b16 %v8496_v54  ;;  %v8677_v49 = vunpack.c.l.b16 %v8497_v45  ;;  %v15279_v12 = vunpack.c.l.b16 %v8498_v3  ;;  %v15281_v0 = vunpack.c.l.b16 %v8499_v19 }
 0x5cd   :  { %v15283_v35 = vunpack.c.l.b16 %v8500_v17  ;;  %v15285_v4 = vunpack.c.l.b16 %v8501_v16  ;;  %v7574_v14 = vmul.f32 0.6666667, %v15193_v11  ;;  %v11104_v62 = vadd.f32 %v15109_v48, %v15083_v43 }
 0x5ce   :  { %v8792_v33 = vrot.slane %v8677_v49, 7  ;;  %v11105_v49 = vadd.f32 %v15111_v5, %v15079_v27  ;;  %v11107_v11 = vadd.f32 %v15131_v18, %v15079_v27  ;;  %v11108_v44 = vadd.f32 %v15137_v51, %v15083_v43 }
 0x5cf   :  { %11646 = vtanh.f32 %v7574_v14  ;;  %v7575_v53 = vmul.f32 0.6666667, %v11104_v62  ;;  %v11110_v48 = vadd.f32 %v15144_v61, %v15083_v43  ;;  %v8125_v5 = vrot.slane %v15146_v46, %v12615_v41 }
 0x5d0   :  { %v15295_v17 = vsel %vm4518_vm4, %v8792_v33, %v8675_v8  ;;  %v11109_v8 = vadd.f32 %v15140_v39, %v15079_v27  ;;  %v7576_v54 = vmul.f32 0.6666667, %v11105_v49  ;;  %v7577_v45 = vmul.f32 0.6666667, %v11106_v59 }
 0x5d1   :  { %v7578_v3 = vmul.f32 0.6666667, %v11107_v11  ;;  %v7579_v36 = vmul.f32 0.6666667, %v11108_v44  ;;  %v8189_v18 = vrot.slane %v15231_v7, %v12615_v41  ;;  %11648 = vtanh.f32 %v7575_v53  ;;  %v11645_v44 = vpop.eup %11644 }
 0x5d2   :  { %v7580_v19 = vmul.f32 0.6666667, %v11109_v8  ;;  %v7581_v51 = vmul.f32 0.6666667, %v11110_v48  ;;  %v8477_v16 = vpack.c.bf16 %v8125_v5, %v8125_v5  ;;  %11650 = vtanh.f32 %v7576_v54 }
 0x5d3   :  { %v8493_v27 = vpack.c.bf16 %v8189_v18, %v8189_v18  ;;  %v16521_v39 = vpack.c.bf16 %v15161_v31, %v15161_v31  ;;  %v16522_v43 = vpack.c.bf16 %v15240_v6, %v15240_v6  ;;  %11652 = vtanh.f32 %v7577_v45 }
 0x5d4   :  { %v8657_v46 = vunpack.c.l.b16 %v8477_v16  ;;  %v16523_v14 = vrot.slane %v15129_v30, 6  ;;  %v8744_v62 = vrot.slane %v15174_v57, 3  ;;  %11654 = vtanh.f32 %v7578_v3 }
 0x5d5   :  { %v8655_v33 = vunpack.c.l.b16 %v16521_v39  ;;  %v8671_v61 = vunpack.c.l.b16 %v16522_v43  ;;  %v8673_v49 = vunpack.c.l.b16 %v8493_v27  ;;  %v16524_v59 = vrot.slane %v15135_v34, 5 }
 0x5d6   :  { %v8739_v7 = vsel %vm4521_vm5, %v16523_v14, %v15152_v58  ;;  %11656 = vtanh.f32 %v7579_v36  ;;  %v16525_v6 = vrot.slane %v15170_v9, 4  ;;  %v8748_v53 = vrot.slane %v8657_v46, 1 }
 0x5d7   :  { %v8741_v31 = vsel %vm4524_vm6, %v16524_v59, %v8739_v7  ;;  %v8746_v11 = vrot.slane %v8655_v33, 2  ;;  %v16526_v30 = vrot.slane %v15211_v38, 6  ;;  %v7613_v57 = vmul.f32 1.7159, %v11645_v44 }
 0x5d8   :  { %v8743_v8 = vsel %vm4527_vm7, %v16525_v6, %v8741_v31  ;;  %11658 = vtanh.f32 %v7580_v19  ;;  %v16527_v34 = vrot.slane %v15215_v32, 5  ;;  %v16528_v45 = vrot.slane %v15248_v25, 4 }
 0x5d9   :  { %v8767_v58 = vsel %vm4521_vm5, %v16526_v30, %v15222_v52  ;;  %v8745_v54 = vsel %vm4530_vm8, %v8744_v62, %v8743_v8  ;;  %v11647_v5 = vpop.eup %11646  ;;  %11660 = vtanh.f32 %v7581_v51  ;;  %v8772_v38 = vrot.slane %v15252_v23, 3 }
 0x5da   :  { %v8769_v48 = vsel %vm4524_vm6, %v16527_v34, %v8767_v58  ;;  %v8747_v9 = vsel %vm4533_vm9, %v8746_v11, %v8745_v54  ;;  %v7732_v52 = vcombine.low %v15265_v55, %v7613_v57  ;;  %v7733_v36 = vcombine.high %v15265_v55, %v7613_v57 }
 0x5db   :  { %v8771_v3 = vsel %vm4527_vm7, %v16528_v45, %v8769_v48  ;;  %v7614_v18 = vmul.f32 1.7159, %v11647_v5  ;;  %v15348_v19 = vsel %vm4536_vm10, %v8748_v53, %v8747_v9  ;;  %v8774_v16 = vrot.slane %v8671_v61, 2  ;;  %v11649_v46 = vpop.eup %11648 }
 0x5dc   :  { %v8773_v32 = vsel %vm4530_vm8, %v8772_v38, %v8771_v3  ;;  %v8776_v51 = vrot.slane %v8673_v49, 1  ;;  %v16529_v27 = vrot.slane %v15133_v28, 5  ;;  %v7740_v39 = vrot.slane %v7732_v52, %v16516_v20 }
 0x5dd   :  { %v7747_v23 = vrot.slane %v7733_v36, %v16516_v20  ;;  %v16530_v33 = vrot.slane %v15168_v22, 4  ;;  %v8775_v14 = vsel %vm4533_vm9, %v8774_v16, %v8773_v32  ;;  %v16531_v61 = vrot.slane %v15172_v26, 3  ;;  %v11651_v22 = vpop.eup %11650 }
 0x5de   :  { %v8727_v25 = vsel %vm4524_vm6, %v16529_v27, %v15157_v37  ;;  %v16532_v28 = vrot.slane %v15213_v10, 5  ;;  %v7748_v49 = vcombine.high %v7740_v39, %v7740_v39  ;;  %v10964_v31 = vrot.slane %v7740_v39, 9  ;;  %v11653_v44 = vpop.eup %11652 }
 0x5df   :  { %v8729_v55 = vsel %vm4527_vm7, %v16530_v33, %v8727_v25  ;;  %v7749_v59 = vcombine.high %v7747_v23, %v7747_v23  ;;  %v10966_v11 = vrot.slane %v7747_v23, 9  ;;  %v7615_v6 = vmul.f32 1.7159, %v11649_v46 }
 0x5e0   :  { %v8731_v7 = vsel %vm4530_vm8, %v16531_v61, %v8729_v55  ;;  %v15369_v37 = vsel %vm4524_vm6, %v16532_v28, %v15229_v2  ;;  %v7616_v8 = vmul.f32 1.7159, %v11651_v22  ;;  %v15373_v26 = vsel %vm4536_vm10, %v8776_v51, %v8775_v14  ;;  %v11655_v2 = vpop.eup %11654 }
 0x5e1   :  { %v16533_v53 = vrot.slane %v15176_v24, 2  ;;  %v10965_v30 = vrot.slane %v7748_v49, 9  ;;  %v10967_v58 = vrot.slane %v7749_v59, 9  ;;  %v8002_v57 = vadd.f32 %v10964_v31, %v7740_v39  ;;  %v15382_v34 = vpop.eup %11656 }
 0x5e2   :  { %v15380_v54 = vadd.f32 %v10966_v11, %v7747_v23  ;;  %v7750_v48 = vcombine.low %v7614_v18, %v7615_v6  ;;  %v7751_v5 = vcombine.high %v7614_v18, %v7615_v6  ;;  %v7617_v9 = vmul.f32 1.7159, %v11653_v44  ;;  %v15386_v3 = vpop.eup %11658 }
 0x5e3   :  { %v15378_v10 = vsel %vm4533_vm9, %v16533_v53, %v8731_v7  ;;  %v15384_v45 = vmul.f32 1.7159, %v11655_v2  ;;  %v15388_v38 = vadd.f32 %v10965_v30, %v7748_v49  ;;  %v15390_v24 = vadd.f32 %v10967_v58, %v7749_v59  ;;  %v15394_v32 = vpop.eup %11660 }
 0x5e4   :  { %v8225_v52 = vrot.slane %v8002_v57, %v12589_v60  ;;  %v8229_v36 = vrot.slane %v8002_v57, %v12615_v41  ;;  %v15398_v16 = vrot.slane %v15380_v54, %v12615_v41  ;;  %v7758_v18 = vrot.slane %v7750_v48, %v16516_v20 }
 0x5e5   :  { %v7765_v51 = vrot.slane %v7751_v5, %v16516_v20  ;;  %v7768_v27 = vcombine.low %v7616_v8, %v7617_v9  ;;  %v8237_v25 = vrot.slane %v15388_v38, %v12615_v41  ;;  %v7769_v33 = vcombine.high %v7616_v8, %v7617_v9 }
 0x5e6   :  { %v8502_v39 = vpack.c.bf16 %v8225_v52, %v8225_v52  ;;  %v8503_v23 = vpack.c.bf16 %v8229_v36, %v8229_v36  ;;  %v7766_v46 = vcombine.high %v7758_v18, %v7758_v18  ;;  %v10968_v61 = vrot.slane %v7758_v18, 9 }
 0x5e7   :  { %v7767_v14 = vcombine.high %v7765_v51, %v7765_v51  ;;  %v8505_v7 = vpack.c.bf16 %v8237_v25, %v8237_v25  ;;  %v10970_v49 = vrot.slane %v7765_v51, 9  ;;  %v7776_v44 = vrot.slane %v7768_v27, %v16516_v20 }
 0x5e8   :  { %v15406_v28 = vunpack.c.l.b16 %v8502_v39  ;;  %v15408_v22 = vunpack.c.l.b16 %v8503_v23  ;;  %v10969_v59 = vrot.slane %v7766_v46, 9  ;;  %v8006_v11 = vadd.f32 %v10968_v61, %v7758_v18 }
 0x5e9   :  { %v10971_v31 = vrot.slane %v7767_v14, 9  ;;  %v15411_v6 = vunpack.c.l.b16 %v8505_v7  ;;  %v8008_v53 = vadd.f32 %v10970_v49, %v7765_v51  ;;  %v7783_v2 = vrot.slane %v7769_v33, %v16516_v20 }
 0x5ea   :  { %v8007_v30 = vadd.f32 %v10969_v59, %v7766_v46  ;;  %v8257_v57 = vrot.slane %v8006_v11, %v12589_v60  ;;  %v8261_v48 = vrot.slane %v8006_v11, %v12615_v41  ;;  %v7784_v52 = vcombine.high %v7776_v44, %v7776_v44 }
 0x5eb   :  { %v8009_v58 = vadd.f32 %v10971_v31, %v7767_v14  ;;  %v8273_v5 = vrot.slane %v8008_v53, %v12589_v60  ;;  %v8277_v9 = vrot.slane %v8008_v53, %v12615_v41  ;;  %v7785_v36 = vcombine.high %v7783_v2, %v7783_v2 }
 0x5ec   :  { %v8265_v18 = vrot.slane %v8007_v30, %v12589_v60  ;;  %v8269_v27 = vrot.slane %v8007_v30, %v12615_v41  ;;  %v8510_v39 = vpack.c.bf16 %v8257_v57, %v8257_v57  ;;  %v8511_v23 = vpack.c.bf16 %v8261_v48, %v8261_v48 }
 0x5ed   :  { %v8281_v51 = vrot.slane %v8009_v58, %v12589_v60  ;;  %v8285_v25 = vrot.slane %v8009_v58, %v12615_v41  ;;  %v8514_v33 = vpack.c.bf16 %v8273_v5, %v8273_v5  ;;  %v8515_v46 = vpack.c.bf16 %v8277_v9, %v8277_v9 }
 0x5ee   :  { %v8512_v14 = vpack.c.bf16 %v8265_v18, %v8265_v18  ;;  %v8513_v61 = vpack.c.bf16 %v8269_v27, %v8269_v27  ;;  %v15423_v59 = vunpack.c.l.b16 %v8510_v39  ;;  %v8691_v31 = vunpack.c.l.b16 %v8511_v23 }
 0x5ef   :  { %v8516_v7 = vpack.c.bf16 %v8281_v51, %v8281_v51  ;;  %v8517_v49 = vpack.c.bf16 %v8285_v25, %v8285_v25  ;;  %v15425_v11 = vunpack.c.l.b16 %v8514_v33  ;;  %v15427_v53 = vunpack.c.l.b16 %v8515_v46 }
 0x5f0   :  { %v15429_v30 = vunpack.c.l.b16 %v8512_v14  ;;  %v8693_v63 = vunpack.c.l.b16 %v8513_v61  ;;  %v10972_v5 = vrot.slane %v7776_v44, 9  ;;  %v10973_v9 = vrot.slane %v7784_v52, 9 }
 0x5f1   :  { %16534 = vst [vmem:[#allocation6_spill] sm:$0xff] %v15425_v11  ;;  %v15431_v29 = vunpack.c.l.b16 %v8516_v7  ;;  %v15433_v58 = vunpack.c.l.b16 %v8517_v49  ;;  %v10974_v39 = vrot.slane %v7783_v2, 9  ;;  %v10975_v23 = vrot.slane %v7785_v36, 9 }
 0x5f2   :  { %16535 = vst [vmem:[#allocation7_spill] sm:$0xff] %v15429_v30  ;;  %v8820_v51 = vrot.slane %v8693_v63, 7  ;;  %v8010_v33 = vadd.f32 %v10972_v5, %v7776_v44  ;;  %v15440_v46 = vadd.f32 %v10973_v9, %v7784_v52  ;;  %v7619_v61 = vmul.f32 1.7159, %v15382_v34 }
 0x5f3   :  { %16536 = vst [vmem:[#allocation10_spill] sm:$0xff] %v15431_v29  ;;  %v7620_v7 = vmul.f32 1.7159, %v15386_v3  ;;  %v7621_v49 = vmul.f32 1.7159, %v15394_v32  ;;  %v15448_v57 = vadd.f32 %v10974_v39, %v7783_v2  ;;  %v15450_v27 = vadd.f32 %v10975_v23, %v7785_v36 }
 0x5f4   :  { %v15443_v14 = vsel %vm4518_vm4, %v8820_v51, %v8691_v31  ;;  %v8289_v63 = vrot.slane %v8010_v33, %v12589_v60  ;;  %v8293_v18 = vrot.slane %v8010_v33, %v12615_v41  ;;  %v8301_v44 = vrot.slane %v15440_v46, %v12615_v41 }
 0x5f5   :  { %v7786_v52 = vcombine.low %v15384_v45, %v7619_v61  ;;  %v7787_v31 = vcombine.high %v15384_v45, %v7619_v61  ;;  %v7804_v34 = vcombine.low %v7620_v7, %v7621_v49  ;;  %v15460_v3 = vrot.slane %v15448_v57, %v12615_v41 }
 0x5f6   :  { %v8518_v32 = vpack.c.bf16 %v8289_v63, %v8289_v63  ;;  %v8519_v2 = vpack.c.bf16 %v8293_v18, %v8293_v18  ;;  %v7805_v36 = vcombine.high %v7620_v7, %v7621_v49  ;;  %v8521_v5 = vpack.c.bf16 %v8301_v44, %v8301_v44 }
 0x5f7   :  { %v7794_v9 = vrot.slane %v7786_v52, %v16516_v20  ;;  %v7801_v51 = vrot.slane %v7787_v31, %v16516_v20  ;;  %v7812_v39 = vrot.slane %v7804_v34, %v16516_v20 }
 0x5f8   :  { %v15467_v33 = vunpack.c.l.b16 %v8518_v32  ;;  %v15469_v45 = vunpack.c.l.b16 %v8519_v2  ;;  %v7819_v61 = vrot.slane %v7805_v36, %v16516_v20  ;;  %v15472_v40 = vunpack.c.l.b16 %v8521_v5 }
 0x5f9   :  { %v7802_v18 = vcombine.high %v7794_v9, %v7794_v9  ;;  %v7803_v7 = vcombine.high %v7801_v51, %v7801_v51  ;;  %v10976_v49 = vrot.slane %v7794_v9, 9  ;;  %v10978_v44 = vrot.slane %v7801_v51, 9 }
 0x5fa   :  { %16537 = vst [vmem:[#allocation19_spill] sm:$0xff] %v15467_v33  ;;  %v7820_v52 = vcombine.high %v7812_v39, %v7812_v39  ;;  %v7821_v31 = vcombine.high %v7819_v61, %v7819_v61  ;;  %v10980_v8 = vrot.slane %v7812_v39, 9  ;;  %v10982_v2 = vrot.slane %v7819_v61, 9 }
 0x5fb   :  { %v10977_v34 = vrot.slane %v7802_v18, 9  ;;  %v10979_v25 = vrot.slane %v7803_v7, 9  ;;  %v8014_v48 = vadd.f32 %v10976_v49, %v7794_v9  ;;  %v8016_v32 = vadd.f32 %v10978_v44, %v7801_v51 }
 0x5fc   :  { %v10981_v1 = vrot.slane %v7820_v52, 9  ;;  %v10983_v13 = vrot.slane %v7821_v31, 9  ;;  %v8018_v62 = vadd.f32 %v10980_v8, %v7812_v39 }
 0x5fd   :  { %v8015_v23 = vadd.f32 %v10977_v34, %v7802_v18  ;;  %v8017_v20 = vadd.f32 %v10979_v25, %v7803_v7  ;;  %v8321_v36 = vrot.slane %v8014_v48, %v12589_v60  ;;  %v8325_v5 = vrot.slane %v8014_v48, %v12615_v41 }
 0x5fe   :  { %v8337_v55 = vrot.slane %v8016_v32, %v12589_v60  ;;  %v8341_v63 = vrot.slane %v8016_v32, %v12615_v41  ;;  %v15479_v43 = vadd.f32 %v10981_v1, %v7820_v52 }
 0x5ff   :  { %v8329_v9 = vrot.slane %v8015_v23, %v12589_v60  ;;  %v8333_v51 = vrot.slane %v8015_v23, %v12615_v41  ;;  %v8345_v49 = vrot.slane %v8017_v20, %v12589_v60  ;;  %v8349_v18 = vrot.slane %v8017_v20, %v12615_v41 }
 0x600   :  { %v8526_v25 = vpack.c.bf16 %v8321_v36, %v8321_v36  ;;  %v8527_v7 = vpack.c.bf16 %v8325_v5, %v8325_v5  ;;  %v8530_v44 = vpack.c.bf16 %v8337_v55, %v8337_v55  ;;  %v8531_v34 = vpack.c.bf16 %v8341_v63, %v8341_v63 }
 0x601   :  { %v8528_v48 = vpack.c.bf16 %v8329_v9, %v8329_v9  ;;  %v8529_v29 = vpack.c.bf16 %v8333_v51, %v8333_v51  ;;  %v8532_v11 = vpack.c.bf16 %v8345_v49, %v8345_v49  ;;  %v8533_v33 = vpack.c.bf16 %v8349_v18, %v8349_v18 }
 0x602   :  { %v15485_v32 = vunpack.c.l.b16 %v8526_v25  ;;  %v8707_v1 = vunpack.c.l.b16 %v8527_v7  ;;  %v15487_v8 = vunpack.c.l.b16 %v8530_v44  ;;  %v15489_v39 = vunpack.c.l.b16 %v8531_v34 }
 0x603   :  { %v15491_v23 = vunpack.c.l.b16 %v8528_v48  ;;  %v8709_v52 = vunpack.c.l.b16 %v8529_v29  ;;  %v15493_v30 = vunpack.c.l.b16 %v8532_v11  ;;  %v15495_v20 = vunpack.c.l.b16 %v8533_v33 }
 0x604   :  { %v8836_v55 = vrot.slane %v15487_v8, 6  ;;  %v8850_v63 = vrot.slane %v15489_v39, 6  ;;  %v15499_v36 = vadd.f32 %v10982_v2, %v7819_v61  ;;  %v15501_v5 = vadd.f32 %v10983_v13, %v7821_v31 }
 0x605   :  { %v8834_v9 = vrot.slane %v15491_v23, 7  ;;  %v8848_v51 = vrot.slane %v8709_v52, 7  ;;  %v8852_v49 = vrot.slane %v15495_v20, 5  ;;  %v8353_v18 = vrot.slane %v8018_v62, %v12589_v60 }
 0x606   :  { %v8357_v29 = vrot.slane %v8018_v62, %v12615_v41  ;;  %v15509_v11 = vrot.slane %v15479_v43, %v12615_v41  ;;  %v15513_v33 = vrot.slane %v15499_v36, %v12615_v41  ;;  %v8863_v13 = vpack.c.b16 %v15373_v26, %v15348_v19 }
 0x607   :  { %v15518_v61 = vsel %vm4518_vm4, %v8848_v51, %v8707_v1  ;;  %v8534_v31 = vpack.c.bf16 %v8353_v18, %v8353_v18  ;;  %v16538_v2 = vrot.slane %v15178_v47, 1  ;;  %v16539_v25 = vrot.slane %v15246_v21, 4 }
 0x608   :  { %v8535_v44 = vpack.c.bf16 %v8357_v29, %v8357_v29  ;;  %v8537_v34 = vpack.c.bf16 %v15509_v11, %v15509_v11  ;;  %v8539_v19 = vpack.c.bf16 %v15513_v33, %v15513_v33  ;;  %10994 = vmatprep.mubr.msk.bf16.mxu0 %vm598_vm0, %v8863_v13  ;;  %v16540_v26 = vrot.slane %v15250_v50, 3 }
 0x609   :  { %v8735_v62 = vsel %vm4536_vm10, %v16538_v2, %v15378_v10  ;;  %v8757_v7 = vsel %vm4527_vm7, %v16539_v25, %v15369_v37  ;;  %v15536_v48 = vunpack.c.l.b16 %v8534_v31  ;;  %v16541_v10 = vld [vmem:[#allocation9_spill] sm:$0xff]  ;;  %v8253_v37 = vrot.slane %v15390_v24, %v12615_v41 }
 0x60a   :  { %v8759_v47 = vsel %vm4530_vm8, %v16540_v26, %v8757_v7  ;;  %v16542_v1 = vrot.slane %v16541_v10, 2  ;;  %v8317_v52 = vrot.slane %v15450_v27, %v12615_v41  ;;  %v15545_v51 = vunpack.c.l.b16 %v8535_v44 }
 0x60b   :  { %v16543_v18 = vrot.slane %v15257_v56, 1  ;;  %v16544_v29 = vpack.c.bf16 %v15398_v16, %v15398_v16  ;;  %v16545_v31 = vpack.c.bf16 %v15460_v3, %v15460_v3  ;;  %v8509_v7 = vpack.c.bf16 %v8253_v37, %v8253_v37 }
 0x60c   :  { %v8761_v21 = vsel %vm4533_vm9, %v16542_v1, %v8759_v47  ;;  %v8525_v26 = vpack.c.bf16 %v8317_v52, %v8317_v52  ;;  %v16546_v47 = vrot.slane %v15281_v0, 6  ;;  %v8854_v56 = vrot.slane %v15545_v51, 4 }
 0x60d   :  { %v8763_v50 = vsel %vm4536_vm10, %v16543_v18, %v8761_v21  ;;  %v8687_v13 = vunpack.c.l.b16 %v16544_v29  ;;  %v8703_v2 = vunpack.c.l.b16 %v16545_v31  ;;  %v16547_v10 = vrot.slane %v15285_v4, 5 }
 0x60e   :  { %v8862_v25 = vpack.c.b16 %v8763_v50, %v8735_v62  ;;  %v8795_v44 = vsel %vm4521_vm5, %v16546_v47, %v15295_v17  ;;  %v8800_v16 = vrot.slane %v15411_v6, 3  ;;  %v8689_v3 = vunpack.c.l.b16 %v8509_v7 }
 0x60f   :  { %v8797_v1 = vsel %vm4524_vm6, %v16547_v10, %v8795_v44  ;;  %v8802_v21 = vrot.slane %v8687_v13, 2  ;;  %v8705_v18 = vunpack.c.l.b16 %v8525_v26  ;;  %v16548_v62 = vrot.slane %v15408_v22, 4 }
 0x610   :  { %8973 = vmatmul.mubr.bf16.vlgmr.msra.gmra.mrb[56].mxu0 %v8862_v25  ;;  %v16549_v0 = vrot.slane %v15427_v53, 6  ;;  %v16550_v4 = vrot.slane %v15433_v58, 5  ;;  %v8828_v6 = vrot.slane %v15472_v40, 3  ;;  %v8830_v29 = vrot.slane %v8703_v2, 2 }
 0x611   :  { %v8799_v37 = vsel %vm4527_vm7, %v16548_v62, %v8797_v1  ;;  %v8804_v31 = vrot.slane %v8689_v3, 1  ;;  %v16551_v22 = vrot.slane %v15469_v45, 4  ;;  %v8832_v7 = vrot.slane %v8705_v18, 1 }
 0x612   :  { %v8823_v17 = vsel %vm4521_vm5, %v16549_v0, %v15443_v14  ;;  %v8801_v52 = vsel %vm4530_vm8, %v8800_v16, %v8799_v37  ;;  %v8233_v14 = vrot.slane %v15388_v38, %v12589_v60  ;;  %v8241_v58 = vrot.slane %v15380_v54, %v12589_v60 }
 0x613   :  { %v8825_v50 = vsel %vm4524_vm6, %v16550_v4, %v8823_v17  ;;  %v8803_v13 = vsel %vm4533_vm9, %v8802_v21, %v8801_v52  ;;  %v8249_v40 = vrot.slane %v15390_v24, %v12589_v60  ;;  %v8297_v45 = vrot.slane %v15440_v46, %v12589_v60 }
 0x614   :  { %v8827_v25 = vsel %vm4527_vm7, %v16551_v22, %v8825_v50  ;;  %v8805_v2 = vsel %vm4536_vm10, %v8804_v31, %v8803_v13  ;;  %v8305_v47 = vrot.slane %v15448_v57, %v12589_v60  ;;  %v8313_v38 = vrot.slane %v15450_v27, %v12589_v60 }
 0x615   :  { %v8829_v53 = vsel %vm4530_vm8, %v8828_v6, %v8827_v25  ;;  %v8504_v10 = vpack.c.bf16 %v8233_v14, %v8233_v14  ;;  %v8506_v54 = vpack.c.bf16 %v8241_v58, %v8241_v58  ;;  %v8508_v16 = vpack.c.bf16 %v8249_v40, %v8249_v40  ;;  %v16558_v14 = vld [vmem:[#allocation6_spill] sm:$0xff] }
 0x616   :  { %v8831_v26 = vsel %vm4533_vm9, %v8830_v29, %v8829_v53  ;;  %v8520_v24 = vpack.c.bf16 %v8297_v45, %v8297_v45  ;;  %v8522_v21 = vpack.c.bf16 %v8305_v47, %v8305_v47  ;;  %v8524_v3 = vpack.c.bf16 %v8313_v38, %v8313_v38 }
 0x617   :  { %v8833_v44 = vsel %vm4536_vm10, %v8832_v7, %v8831_v26  ;;  %v8684_v18 = vunpack.c.l.b16 %v8504_v10  ;;  %v8686_v62 = vunpack.c.l.b16 %v8506_v54  ;;  %v16552_v46 = vrot.slane %v15277_v15, 7  ;;  %v16557_v7 = vld [vmem:[#allocation19_spill] sm:$0xff]  ;;  %v16560_v26 = vld [vmem:[#allocation10_spill] sm:$0xff] }
 0x618   :  { %v8865_v1 = vpack.c.b16 %v8833_v44, %v8805_v2  ;;  %v8688_v57 = vunpack.c.l.b16 %v8508_v16  ;;  %v8700_v0 = vunpack.c.l.b16 %v8520_v24  ;;  %v8702_v17 = vunpack.c.l.b16 %v8522_v21 }
 0x619   :  { %v8779_v37 = vsel %vm4518_vm4, %v16552_v46, %v15275_v42  ;;  %v16553_v27 = vrot.slane %v15279_v12, 6  ;;  %v8704_v4 = vunpack.c.l.b16 %v8524_v3  ;;  %v16554_v50 = vrot.slane %v15283_v35, 5  ;;  %v16555_v42 = vld [vmem:[#allocation7_spill] sm:$0xff] }
 0x61a   :  { %10995 = vmatprep.mubr.msk.bf16.mxu0 %vm598_vm0, %v8865_v1  ;;  %v8784_v29 = vrot.slane %v15406_v28, 4  ;;  %v8786_v13 = vrot.slane %v8684_v18, 3  ;;  %v8788_v15 = vrot.slane %v8686_v62, 2  ;;  %v8790_v31 = vrot.slane %v8688_v57, 1 }
 0x61b   :  { %v8781_v52 = vsel %vm4521_vm5, %v16553_v27, %v8779_v37  ;;  %v16556_v22 = vrot.slane %v16555_v42, 7  ;;  %v8812_v53 = vrot.slane %v16557_v7, 4  ;;  %v16559_v58 = vrot.slane %v16558_v14, 6 }
 0x61c   :  { %v8783_v6 = vsel %vm4524_vm6, %v16554_v50, %v8781_v52  ;;  %v8814_v40 = vrot.slane %v8700_v0, 3  ;;  %v8816_v2 = vrot.slane %v8702_v17, 2  ;;  %v16561_v45 = vrot.slane %v16560_v26, 5  ;;  %v16562_v26 = vld [vmem:[#allocation4_spill] sm:$0xff] }
 0x61d   :  { %v8807_v25 = vsel %vm4518_vm4, %v16556_v22, %v15423_v59  ;;  %v8785_v12 = vsel %vm4527_vm7, %v8784_v29, %v8783_v6  ;;  %v8818_v44 = vrot.slane %v8704_v4, 1  ;;  %v8381_v59 = vrot.slane %v15501_v5, %v12615_v41 }
 0x61e   :  { %v8809_v35 = vsel %vm4521_vm5, %v16559_v58, %v8807_v25  ;;  %v8787_v28 = vsel %vm4530_vm8, %v8786_v13, %v8785_v12  ;;  %v8717_v54 = vunpack.c.l.b16 %v8537_v34  ;;  %v8719_v1 = vunpack.c.l.b16 %v8539_v19 }
 0x61f   :  { %v8811_v47 = vsel %vm4524_vm6, %v16561_v45, %v8809_v35  ;;  %v8789_v38 = vsel %vm4533_vm9, %v8788_v15, %v8787_v28  ;;  %v8541_v21 = vpack.c.bf16 %v8381_v59, %v8381_v59  ;;  %v8851_v41 = vsel %vm4521_vm5, %v8850_v63, %v15518_v61 }
 0x620   :  { %v8813_v10 = vsel %vm4527_vm7, %v8812_v53, %v8811_v47  ;;  %v8791_v16 = vsel %vm4536_vm10, %v8790_v31, %v8789_v38  ;;  %v8853_v11 = vsel %vm4524_vm6, %v8852_v49, %v8851_v41  ;;  %v8856_v34 = vrot.slane %v8717_v54, 3  ;;  %v15678_v31 = vld [vmem:[%s16110_s10] ss:$0 sm:$0xff] }
 0x621   :  { %v8815_v24 = vsel %vm4530_vm8, %v8814_v40, %v8813_v10  ;;  %v8858_v18 = vrot.slane %v8719_v1, 2  ;;  %v8721_v19 = vunpack.c.l.b16 %v8541_v21  ;;  %v8855_v62 = vsel %vm4527_vm7, %v8854_v56, %v8853_v11 }
 0x622   :  { %v8817_v3 = vsel %vm4533_vm9, %v8816_v2, %v8815_v24  ;;  %v8361_v39 = vrot.slane %v15479_v43, %v12589_v60  ;;  %v8857_v63 = vsel %vm4530_vm8, %v8856_v34, %v8855_v62  ;;  %v8369_v20 = vrot.slane %v15499_v36, %v12589_v60 }
 0x623   :  { %v8819_v33 = vsel %vm4536_vm10, %v8818_v44, %v8817_v3  ;;  %v8377_v49 = vrot.slane %v15501_v5, %v12589_v60  ;;  %v8859_v61 = vsel %vm4533_vm9, %v8858_v18, %v8857_v63  ;;  %v8860_v37 = vrot.slane %v8721_v19, 1 }
 0x624   :  { %v8864_v46 = vpack.c.b16 %v8819_v33, %v8791_v16  ;;  %v8536_v57 = vpack.c.bf16 %v8361_v39, %v8361_v39  ;;  %v8835_v51 = vsel %vm4518_vm4, %v8834_v9, %v15485_v32  ;;  %v8538_v43 = vpack.c.bf16 %v8369_v20, %v8369_v20 }
 0x625   :  { %v8540_v56 = vpack.c.bf16 %v8377_v49, %v8377_v49  ;;  %v8837_v0 = vsel %vm4521_vm5, %v8836_v55, %v8835_v51  ;;  %v8838_v36 = vrot.slane %v15493_v30, 5  ;;  %v8861_v5 = vsel %vm4536_vm10, %v8860_v37, %v8859_v61 }
 0x626   :  { %8981 = vmatmul.mubr.bf16.gmra.mrb[60].mxu0 %v8864_v46  ;;  %v8716_v17 = vunpack.c.l.b16 %v8536_v57  ;;  %v8840_v27 = vrot.slane %v15536_v48, 4  ;;  %v8867_v52 = vpack.c.b16 %v8861_v5, %v8861_v5  ;;  %v8718_v4 = vunpack.c.l.b16 %v8538_v43  ;;  %v15673_v48 = vld [vmem:[%s16109_s9] ss:$0 sm:$0xff] }
 0x627   :  { %v8720_v50 = vunpack.c.l.b16 %v8540_v56  ;;  %v8839_v23 = vsel %vm4524_vm6, %v8838_v36, %v8837_v0  ;;  %v11683_v40 = vmov 1966171168  }
 0x628   :  { %v8841_v32 = vsel %vm4527_vm7, %v8840_v27, %v8839_v23  ;;  %v8842_v9 = vrot.slane %v8716_v17, 3  ;;  %10996 = vmatprep.mubr.msk.bf16.mxu0 %vm598_vm0, %v8867_v52  ;;  %v8844_v8 = vrot.slane %v8718_v4, 2  ;;  %v9042_v2 = vunpack.c.l.s4 %v11683_v40 }
 0x629   :  { %v8846_v6 = vrot.slane %v8720_v50, 1 }
 0x62a   :  { %v8843_v55 = vsel %vm4530_vm8, %v8842_v9, %v8841_v32  ;;  %v9043_v28 = vunpack.c.0.s8 %v9042_v2 }
 0x62b   :  { %v8845_v30 = vsel %vm4533_vm9, %v8844_v8, %v8843_v55 }
 0x62c   :  { %v8847_v29 = vsel %vm4536_vm10, %v8846_v6, %v8845_v30  ;;  %v15685_v45 = vsub.s32 %v9043_v28, %v16562_v26 }
 0x62d   :  { %v8866_v13 = vpack.c.b16 %v8847_v29, %v8847_v29 }
 0x62f   :  { %8989 = vmatmul.mubr.bf16.gmra.mrb[64].mxu0 %v8866_v13 }
 0x6e3   :  { %v8974_v15 = vpop.f32.mrb[56].mxu0 }
 0x6e4   :  { %v9003_v42 = vmul.f32 %v15673_v48, %v8974_v15  ;;  %v8976_v22 = vpop.f32.mrb[57].mxu0 }
 0x6e5   :  { %v8977_v25 = vpop.f32.mrb[58].mxu0 }
 0x6e6   :  { %v9015_v7 = vadd.f32 %v15678_v31, %v9003_v42  ;;  %v9004_v53 = vmul.f32 %v15673_v48, %v8977_v25  ;;  %v8979_v12 = vpop.f32.mrb[59].mxu0 }
 0x6e8   :  { %v9020_v14 = vmul.f32 0.6666667, %v9015_v7  ;;  %v9016_v58 = vadd.f32 %v15678_v31, %v9004_v53 }
 0x6ea   :  { %11662 = vtanh.f32 %v9020_v14  ;;  %v9021_v35 = vmul.f32 0.6666667, %v9016_v58 }
 0x6ec   :  { %11664 = vtanh.f32 %v9021_v35 }
 0x6f4   :  { %v11663_v47 = vpop.eup %11662 }
 0x6f5   :  { %v9030_v44 = vmul.f32 1.7159, %v11663_v47 }
 0x6f6   :  { %v11665_v59 = vpop.eup %11664 }
 0x6f7   :  { %v9040_v10 = vcombine.high %v9030_v44, %v9030_v44  ;;  %v9047_v54 = vrot.slane %v9030_v44, %v15685_v45  ;;  %v9031_v1 = vmul.f32 1.7159, %v11665_v59 }
 0x6f9   :  { %v8982_v38 = vpop.f32.mrb[60].mxu0  ;;  %v9054_v41 = vrot.slane %v9040_v10, %v15685_v45  ;;  %v9055_v3 = vcombine.high %v9047_v54, %v9047_v54  ;;  %v9089_v11 = vcombine.high %v9031_v1, %v9031_v1  ;;  %v9063_v18 = vrot.slane %v9047_v54, %v15685_v45 }
 0x6fa   :  { %v9005_v16 = vmul.f32 %v15673_v48, %v8982_v38  ;;  %v8984_v24 = vpop.f32.mrb[61].mxu0  ;;  %v9096_v33 = vrot.slane %v9031_v1, %v15685_v45 }
 0x6fb   :  { %v8985_v21 = vpop.f32.mrb[62].mxu0  ;;  %v9056_v62 = vcombine.high %v9054_v41, %v9054_v41  ;;  %v9070_v39 = vrot.slane %v9054_v41, %v15685_v45  ;;  %v9077_v46 = vrot.slane %v9055_v3, %v15685_v45  ;;  %v9103_v63 = vrot.slane %v9089_v11, %v15685_v45 }
 0x6fc   :  { %v8987_v34 = vpop.f32.mrb[63].mxu0  ;;  %v9017_v19 = vadd.f32 %v15678_v31, %v9005_v16  ;;  %v9104_v20 = vcombine.high %v9096_v33, %v9096_v33  ;;  %v9112_v49 = vrot.slane %v9096_v33, %v15685_v45  ;;  %v9006_v37 = vmul.f32 %v15673_v48, %v8985_v21 }
 0x6fd   :  { %v9084_v57 = vrot.slane %v9056_v62, %v15685_v45  ;;  %v9086_v51 = vcombine.high %v9070_v39, %v9070_v39  ;;  %v9285_v43 = vcombine.low %v9063_v18, %v9077_v46  ;;  %v10999_v56 = vcombine.high %v9063_v18, %v9077_v46 }
 0x6fe   :  { %v9022_v61 = vmul.f32 0.6666667, %v9017_v19  ;;  %v9307_v0 = vrot.slane %v9070_v39, %v15685_v45  ;;  %v9105_v36 = vcombine.high %v9103_v63, %v9103_v63  ;;  %v9119_v5 = vrot.slane %v9103_v63, %v15685_v45 }
 0x6ff   :  { %v9126_v17 = vrot.slane %v9104_v20, %v15685_v45  ;;  %v9293_v27 = vrot.slane %v9285_v43, %v15685_v45  ;;  %v9300_v52 = vrot.slane %v10999_v56, %v15685_v45  ;;  %v9324_v4 = vcombine.low %v9084_v57, %v9086_v51 }
 0x700   :  { %v9088_v50 = vcombine.high %v9084_v57, %v9084_v57  ;;  %v9133_v23 = vrot.slane %v9105_v36, %v15685_v45  ;;  %v9135_v32 = vcombine.high %v9119_v5, %v9119_v5  ;;  %v9018_v9 = vadd.f32 %v15678_v31, %v9006_v37 }
 0x701   :  { %v9308_v55 = vcombine.low %v9293_v27, %v9300_v52  ;;  %v11000_v30 = vcombine.high %v9112_v49, %v9126_v17  ;;  %v9322_v13 = vrot.slane %v9307_v0, %v15685_v45  ;;  %v9346_v15 = vrot.slane %v9126_v17, %v15685_v45 }
 0x702   :  { %v8990_v8 = vpop.f32.mrb[64].mxu0  ;;  %v9325_v6 = vcombine.low %v9088_v50, %v9112_v49  ;;  %v9364_v42 = vcombine.low %v9119_v5, %v9133_v23  ;;  %11666 = vtanh.f32 %v9022_v61  ;;  %v9332_v7 = vrot.slane %v9324_v4, %v15685_v45 }
 0x703   :  { %v8992_v29 = vpop.f32.mrb[65].mxu0  ;;  %v9315_v25 = vrot.slane %v9308_v55, %v15685_v45  ;;  %v9385_v12 = vrot.slane %v9135_v32, %v15685_v45  ;;  %v9371_v58 = vrot.slane %v11000_v30, %v15685_v45  ;;  %v9023_v40 = vmul.f32 0.6666667, %v9018_v9 }
 0x704   :  { %v8993_v22 = vpop.f32.mrb[66].mxu0  ;;  %v9339_v53 = vrot.slane %v9325_v6, %v15685_v45  ;;  %v9378_v35 = vrot.slane %v9364_v42, %v15685_v45  ;;  %v9007_v2 = vmul.f32 %v15673_v48, %v8990_v8  ;;  %v9361_v10 = vrot.slane %v9346_v15, %v15685_v45 }
 0x705   :  { %v8994_v14 = vpop.f32.mrb[67].mxu0  ;;  %v9323_v28 = vcombine.low %v9315_v25, %v9322_v13  ;;  %11668 = vtanh.f32 %v9023_v40  ;;  %v9400_v1 = vrot.slane %v9385_v12, %v15685_v45  ;;  %v9137_v62 = vcombine.high %v9133_v23, %v9133_v23 }
 0x706   :  { %v9347_v47 = vcombine.low %v9332_v7, %v9339_v53  ;;  %v9386_v44 = vcombine.low %v9371_v58, %v9378_v35  ;;  %v9019_v59 = vadd.f32 %v15678_v31, %v9007_v2 }
 0x707   :  { %9606 = vst.msk [vmem:[#allocation3] sm:$0x1f] %vm9605_vm12, %v9323_v28 }
 0x708   :  { %v9354_v38 = vrot.slane %v9347_v47, %v15685_v45  ;;  %v9393_v54 = vrot.slane %v9386_v44, %v15685_v45  ;;  %v9024_v16 = vmul.f32 0.6666667, %v9019_v59 }
 0x70a   :  { %v9362_v24 = vcombine.low %v9354_v38, %v9361_v10  ;;  %v9401_v21 = vcombine.low %v9393_v54, %v9400_v1  ;;  %11670 = vtanh.f32 %v9024_v16 }
 0x70c   :  { %9607 = vst.msk [vmem:[#allocation3 + $0x8] sm:$0x1f] %vm9605_vm12, %v9362_v24  ;;  %v11667_v48 = vpop.eup %11666  ;;  %9608 = vst.msk [vmem:[#allocation3 + $0x10] sm:$0x1f] %vm9605_vm12, %v9401_v21 }
 0x70d   :  { %v9032_v31 = vmul.f32 1.7159, %v11667_v48 }
 0x70f   :  { %v9138_v41 = vcombine.high %v9032_v31, %v9032_v31  ;;  %v9145_v3 = vrot.slane %v9032_v31, %v15685_v45  ;;  %v11669_v11 = vpop.eup %11668 }
 0x710   :  { %v9033_v19 = vmul.f32 1.7159, %v11669_v11 }
 0x711   :  { %v9152_v34 = vrot.slane %v9138_v41, %v15685_v45  ;;  %v9153_v18 = vcombine.high %v9145_v3, %v9145_v3  ;;  %v9161_v33 = vrot.slane %v9145_v3, %v15685_v45 }
 0x712   :  { %v9187_v51 = vcombine.high %v9033_v19, %v9033_v19  ;;  %v9194_v43 = vrot.slane %v9033_v19, %v15685_v45 }
 0x713   :  { %v9631_v39 = vld [vmem:[#allocation3 + $0xa] sm:$0x1]  ;;  %v9154_v46 = vcombine.high %v9152_v34, %v9152_v34  ;;  %v9168_v63 = vrot.slane %v9152_v34, %v15685_v45  ;;  %v9175_v20 = vrot.slane %v9153_v18, %v15685_v45  ;;  %v9183_v49 = vcombine.high %v9161_v33, %v9161_v33  ;;  %v9632_v61 = vld [vmem:[#allocation3 + $0x12] sm:$0x1]  ;;  %v9623_v54 = vld [vmem:[#allocation3 + $0x9] sm:$0x1] }
 0x714   :  { %v11671_v37 = vpop.eup %11670  ;;  %v9402_v57 = vcombine.low %v9137_v62, %v9161_v33  ;;  %v11239_v56 = vpack.i.bf16 %v9632_v61, %v9631_v39  ;;  %v9201_v52 = vrot.slane %v9187_v51, %v15685_v45  ;;  %v9202_v4 = vcombine.high %v9194_v43, %v9194_v43  ;;  %v9624_v1 = vld [vmem:[#allocation3 + $0x11] sm:$0x1]  ;;  %v9639_v31 = vld [vmem:[#allocation3 + $0xb] sm:$0x1]  ;;  %v9640_v41 = vld [vmem:[#allocation3 + $0x13] sm:$0x1] }
 0x715   :  { %v9182_v0 = vrot.slane %v9154_v46, %v15685_v45  ;;  %v9185_v36 = vcombine.high %v9175_v20, %v9175_v20  ;;  %v9403_v5 = vcombine.low %v9175_v20, %v9183_v49  ;;  %v9034_v17 = vmul.f32 1.7159, %v11671_v37  ;;  %v11450_v18 = vld [vmem:[%s16111_s11 + $0x40] sm:$0xff]  }
 0x716   :  { %v9410_v27 = vrot.slane %v9402_v57, %v15685_v45  ;;  %v9210_v50 = vrot.slane %v9194_v43, %v15685_v45  ;;  %11240 = vrot.lane.b32.xlu1 %v11239_v56, %s16199_s28  ;;  %v9203_v55 = vcombine.high %v9201_v52, %v9201_v52  ;;  %v9217_v6 = vrot.slane %v9201_v52, %v15685_v45  ;;  %v11449_v46 = vld [vmem:[%s16111_s11 + $0x80] sm:$0xff]   ;;  %v11452_v56 = vld [vmem:[%s16111_s11 + $0x48] sm:$0xff]  }
 0x717   :  { %v9417_v23 = vrot.slane %v9403_v5, %v15685_v45  ;;  %v9424_v32 = vrot.slane %v9185_v36, %v15685_v45  ;;  %v9441_v9 = vcombine.low %v9168_v63, %v9182_v0  ;;  %v11001_v8 = vcombine.high %v9168_v63, %v9182_v0  ;;  %v11451_v63 = vld [vmem:[%s16111_s11] sm:$0xff]   ;;  %11040 = vmatprep.subr.bf16.mxu0 %v11450_v18 }
 0x718   :  { %v9224_v30 = vrot.slane %v9202_v4, %v15685_v45  ;;  %v9232_v29 = vcombine.high %v9210_v50, %v9210_v50  ;;  %v9231_v25 = vrot.slane %v9203_v55, %v15685_v45  ;;  %v9463_v53 = vrot.slane %v9210_v50, %v15685_v45  ;;  %10226 = vmatpush1.bf16.msra.mxu1 %v11449_v46 }
 0x719   :  { %v9425_v13 = vcombine.low %v9410_v27, %v9417_v23  ;;  %v9439_v15 = vrot.slane %v9424_v32, %v15685_v45  ;;  %v9449_v42 = vrot.slane %v9441_v9, %v15685_v45  ;;  %v9456_v22 = vrot.slane %v11001_v8, %v15685_v45  ;;  %11041 = vmatpush3.bf16.msra.mxu0 %v11451_v63  ;;  %v9630_v23 = vld [vmem:[#allocation3 + $0x2] sm:$0x1] }
 0x71a   :  { %v9234_v7 = vcombine.high %v9224_v30, %v9224_v30  ;;  %v9480_v12 = vcombine.low %v9224_v30, %v9232_v29  ;;  %v9236_v35 = vcombine.high %v9034_v17, %v9034_v17  ;;  %v9243_v40 = vrot.slane %v9034_v17, %v15685_v45  ;;  %v11454_v17 = vld [vmem:[%s16111_s11 + $0x8] sm:$0xff]   ;;  %11042 = vmatprep.subr.bf16.mxu0 %v11452_v56  ;;  %v9622_v29 = vld [vmem:[#allocation3 + $0x1] sm:$0x1] }
 0x71b   :  { %v9432_v14 = vrot.slane %v9425_v13, %v15685_v45  ;;  %v9464_v58 = vcombine.low %v9449_v42, %v9456_v22  ;;  %v9478_v2 = vrot.slane %v9463_v53, %v15685_v45  ;;  %v9502_v38 = vrot.slane %v9231_v25, %v15685_v45  ;;  %v11453_v22 = vld [vmem:[%s16111_s11 + $0x88] sm:$0xff]  }
 0x71c   :  { %v9481_v28 = vcombine.low %v9234_v7, %v9217_v6  ;;  %v9488_v47 = vrot.slane %v9480_v12, %v15685_v45  ;;  %v9250_v10 = vrot.slane %v9236_v35, %v15685_v45  ;;  %v11002_v24 = vcombine.high %v9217_v6, %v9231_v25 }
 0x71d   :  { %v9440_v44 = vcombine.low %v9432_v14, %v9439_v15  ;;  %v9471_v59 = vrot.slane %v9464_v58, %v15685_v45  ;;  %v9251_v21 = vcombine.high %v9243_v40, %v9243_v40  ;;  %v9259_v48 = vrot.slane %v9243_v40, %v15685_v45  ;;  %11043 = vmatpush3.bf16.msra.mxu0 %v11454_v17  ;;  %v11455_v14 = vld [vmem:[%s16111_s11 + $0x50] sm:$0xff]   ;;  %v9646_v17 = vld [vmem:[#allocation3 + $0x4] sm:$0x1] }
 0x71e   :  { %v9495_v16 = vrot.slane %v9481_v28, %v15685_v45  ;;  %v9252_v11 = vcombine.high %v9250_v10, %v9250_v10  ;;  %v9266_v34 = vrot.slane %v9250_v10, %v15685_v45  ;;  %v11234_v39 = vpack.i.bf16 %v9624_v1, %v9623_v54  ;;  %v11457_v58 = vld [vmem:[%s16111_s11 + $0x10] sm:$0xff]   ;;  %v9638_v28 = vld [vmem:[#allocation3 + $0x3] sm:$0x1]  ;;  %11044 = vmatprep.subr.bf16.mxu0 %v11455_v14  ;;  %v11459_v10 = vld [vmem:[%s16111_s11 + $0x18] sm:$0xff]  }
 0x71f   :  { %9609 = vst.msk [vmem:[#allocation3 + $0x18] sm:$0x1f] %vm9605_vm12, %v9440_v44  ;;  %v9479_v3 = vcombine.low %v9471_v59, %v9478_v2  ;;  %v9273_v19 = vrot.slane %v9251_v21, %v15685_v45  ;;  %v9281_v62 = vcombine.high %v9259_v48, %v9259_v48  ;;  %v9517_v20 = vrot.slane %v9502_v38, %v15685_v45  ;;  %v11458_v59 = vld [vmem:[%s16111_s11 + $0x58] sm:$0xff]  }
 0x720   :  { %v9503_v33 = vcombine.low %v9488_v47, %v9495_v16  ;;  %v9280_v49 = vrot.slane %v9252_v11, %v15685_v45  ;;  %v9282_v61 = vcombine.high %v9266_v34, %v9266_v34  ;;  %v9527_v57 = vrot.slane %v11002_v24, %v15685_v45  ;;  %11235 = vrot.lane.b32.xlu0 %v11234_v39, %s11682_s1  ;;  %v11456_v47 = vld [vmem:[%s16111_s11 + $0x90] sm:$0xff]   ;;  %v11461_v11 = vld [vmem:[%s16111_s11 + $0x60] sm:$0xff]  }
 0x721   :  { %9610 = vst.msk [vmem:[#allocation3 + $0x20] sm:$0x1f] %vm9605_vm12, %v9479_v3  ;;  %v9283_v51 = vcombine.high %v9273_v19, %v9273_v19  ;;  %v9520_v43 = vcombine.low %v9259_v48, %v9273_v19  ;;  %v11244_v5 = vpack.i.bf16 %v9640_v41, %v9639_v31  ;;  %v9541_v4 = vrot.slane %v9281_v62, %v15685_v45  ;;  %v11460_v31 = vld [vmem:[%s16111_s11 + $0x98] sm:$0xff]   ;;  %v11464_v62 = vld [vmem:[%s16111_s11 + $0x68] sm:$0xff]  }
 0x722   :  { %v9510_v37 = vrot.slane %v9503_v33, %v15685_v45  ;;  %v9284_v0 = vcombine.high %v9280_v49, %v9280_v49  ;;  %v9559_v36 = vcombine.low %v9280_v49, %v9282_v61  ;;  %v16563_v32 = vmov 0   ;;  %11045 = vmatpush3.bf16.msra.mxu0 %v11457_v58  ;;  %v11463_v33 = vld [vmem:[%s16111_s11 + $0xa0] sm:$0xff]  }
 0x723   :  { %v9534_v52 = vrot.slane %v9520_v43, %v15685_v45  ;;  %v9558_v50 = vcombine.low %v9283_v51, %v9266_v34  ;;  %10227 = vmatprep.subr.bf16.mxu1 %v16563_v32  ;;  %v9556_v7 = vrot.slane %v9541_v4, %v15685_v45  ;;  %11046 = vmatprep.subr.bf16.mxu0 %v11458_v59  ;;  %v11462_v34 = vld [vmem:[%s16111_s11 + $0x20] sm:$0xff]   ;;  %v11465_v51 = vld [vmem:[%s16111_s11 + $0x28] sm:$0xff]   ;;  %v11467_v4 = vld [vmem:[%s16111_s11 + $0x70] sm:$0xff]  }
 0x724   :  { %v9518_v27 = vcombine.low %v9510_v37, %v9517_v20  ;;  %v9573_v9 = vrot.slane %v9559_v36, %v15685_v45  ;;  %v9580_v6 = vrot.slane %v9284_v0, %v15685_v45  ;;  %11245 = vrot.lane.b32.xlu0 %v11244_v5, %s11684_s17  ;;  %10228 = vmatpush1.bf16.msra.mxu1 %v11453_v22  ;;  %v9647_v20 = vld [vmem:[#allocation3 + $0xc] sm:$0x1]  ;;  %v9648_v37 = vld [vmem:[#allocation3 + $0x14] sm:$0x1]  ;;  %v11685_v22 = vmov 0.0  }
 0x725   :  { %v9542_v8 = vcombine.low %v9527_v57, %v9534_v52  ;;  %v9566_v55 = vrot.slane %v9558_v50, %v15685_v45  ;;  %10229 = vmatprep.subr.bf16.mxu1 %v16563_v32  ;;  %v11289_v36 = vpack.i.bf16 %v9648_v37, %v9647_v20  ;;  %v11466_v52 = vld [vmem:[%s16111_s11 + $0xa8] sm:$0xff]   ;;  %v11468_v50 = vld [vmem:[%s16111_s11 + $0x30] sm:$0xff]  }
 0x726   :  { %9611 = vst.msk [vmem:[#allocation3 + $0x28] sm:$0x1f] %vm9605_vm12, %v9518_v27  ;;  %v9633_v30 = vld [vmem:[#allocation3 + $0x1a] sm:$0x1]  ;;  %v9625_v13 = vld [vmem:[#allocation3 + $0x19] sm:$0x1]  ;;  %v9595_v2 = vrot.slane %v9580_v6, %v15685_v45  ;;  %11047 = vmatpush3.bf16.msra.mxu0 %v11459_v10 }
 0x727   :  { %v11254_v15 = vpack.i.bf16 %v9633_v30, %v9630_v23  ;;  %v11249_v42 = vpack.i.bf16 %v9625_v13, %v9622_v29  ;;  %v9549_v25 = vrot.slane %v9542_v8, %v15685_v45  ;;  %v9581_v53 = vcombine.low %v9566_v55, %v9573_v9  ;;  %v9641_v12 = vld [vmem:[#allocation3 + $0x1b] sm:$0x1]  ;;  %11048 = vmatprep.subr.bf16.mxu0 %v11461_v11  ;;  %v9649_v0 = vld [vmem:[#allocation3 + $0x1c] sm:$0x1]  ;;  %v11469_v55 = vld [vmem:[%s16111_s11 + $0xb0] sm:$0xff]  }
 0x728   :  { %v11259_v44 = vpack.i.bf16 %v9641_v12, %v9638_v28  ;;  %v9634_v54 = vld [vmem:[#allocation3 + $0x22] sm:$0x1]  ;;  %10230 = vmatpush1.bf16.msra.mxu1 %v11456_v47  ;;  %v9626_v48 = vld [vmem:[#allocation3 + $0x21] sm:$0x1]  ;;  %v9642_v41 = vld [vmem:[#allocation3 + $0x23] sm:$0x1]  ;;  %v11299_v9 = vpack.i.bf16 %v9649_v0, %v9646_v17 }
 0x729   :  { %11250 = vrot.lane.b32.xlu1 %v11249_v42, %s11682_s1  ;;  %v9557_v35 = vcombine.low %v9549_v25, %v9556_v7  ;;  %v9588_v40 = vrot.slane %v9581_v53, %v15685_v45  ;;  %11255 = vrot.lane.b32.xlu0 %v11254_v15, %s16199_s28  ;;  %v9650_v27 = vld [vmem:[#allocation3 + $0x24] sm:$0x1]  ;;  %v11470_v6 = vld [vmem:[%s16111_s11 + $0x78] sm:$0xff]  }
 0x72a   :  { %10231 = vmatprep.subr.bf16.mxu1 %v16563_v32  ;;  %11049 = vmatpush3.bf16.msra.mxu0 %v11462_v34  ;;  %v11471_v29 = vld [vmem:[%s16111_s11 + $0x38] sm:$0xff]   ;;  %v11473_v42 = vld [vmem:[%s16111_s11 + $0xc0] sm:$0xff]  }
 0x72b   :  { %v9596_v38 = vcombine.low %v9588_v40, %v9595_v2  ;;  %9612 = vst.msk [vmem:[#allocation3 + $0x30] sm:$0x1f] %vm9605_vm12, %v9557_v35  ;;  %11050 = vmatprep.subr.bf16.mxu0 %v11464_v62  ;;  %v11472_v15 = vld [vmem:[%s16111_s11 + $0xb8] sm:$0xff]   ;;  %v9615_v35 = vld [vmem:[#allocation3 + $0x8] sm:$0x1] }
 0x72c   :  { %10232 = vmatpush1.bf16.msra.mxu1 %v11460_v31  ;;  %v9616_v40 = vld [vmem:[#allocation3 + $0x10] sm:$0x1] }
 0x72d   :  { %11260 = vrot.lane.b32.xlu1 %v11259_v44, %s11684_s17  ;;  %v9635_v1 = vld [vmem:[#allocation3 + $0x2a] sm:$0x1]  ;;  %v9627_v16 = vld [vmem:[#allocation3 + $0x29] sm:$0x1]  ;;  %9613 = vst.msk [vmem:[#allocation3 + $0x38] sm:$0x1f] %vm9605_vm12, %v9596_v38  ;;  %10233 = vmatprep.subr.bf16.mxu1 %v16563_v32 }
 0x72e   :  { %v11269_v24 = vpack.i.bf16 %v9635_v1, %v9634_v54  ;;  %v9643_v21 = vld [vmem:[#allocation3 + $0x2b] sm:$0x1]  ;;  %v11264_v3 = vpack.i.bf16 %v9627_v16, %v9626_v48  ;;  %v9651_v56 = vld [vmem:[#allocation3 + $0x2c] sm:$0x1]  ;;  %11051 = vmatpush3.bf16.msra.mxu0 %v11465_v51 }
 0x72f   :  { %v11274_v18 = vpack.i.bf16 %v9643_v21, %v9642_v41  ;;  %v11304_v23 = vpack.i.bf16 %v9651_v56, %v9650_v27  ;;  %11052 = vmatprep.subr.bf16.mxu0 %v11467_v4 }
 0x730   :  { %11270 = vrot.lane.b32.xlu0 %v11269_v24, %s16199_s28  ;;  %10234 = vmatpush1.bf16.msra.mxu1 %v11463_v33  ;;  %v9614_v33 = vld [vmem:[#allocation3] sm:$0x1] }
 0x731   :  { %11265 = vrot.lane.b32.xlu1 %v11264_v3, %s11682_s1  ;;  %10235 = vmatprep.subr.bf16.mxu1 %v16563_v32 }
 0x732   :  { %v9636_v19 = vld [vmem:[#allocation3 + $0x32] sm:$0x1]  ;;  %v9628_v46 = vld [vmem:[#allocation3 + $0x31] sm:$0x1]  ;;  %v9644_v43 = vld [vmem:[#allocation3 + $0x33] sm:$0x1]  ;;  %11053 = vmatpush3.bf16.msra.mxu0 %v11468_v50 }
 0x733   :  { %v9652_v30 = vld [vmem:[#allocation3 + $0x34] sm:$0x1]  ;;  %11054 = vmatprep.subr.bf16.mxu0 %v11470_v6 }
 0x734   :  { %11275 = vrot.lane.b32.xlu0 %v11274_v18, %s11684_s17  ;;  %v9637_v39 = vld [vmem:[#allocation3 + $0x3a] sm:$0x1]  ;;  %v9629_v63 = vld [vmem:[#allocation3 + $0x39] sm:$0x1]  ;;  %v9645_v57 = vld [vmem:[#allocation3 + $0x3b] sm:$0x1]  ;;  %10236 = vmatpush1.bf16.msra.mxu1 %v11466_v52 }
 0x735   :  { %v11284_v49 = vpack.i.bf16 %v9637_v39, %v9636_v19  ;;  %v11279_v61 = vpack.i.bf16 %v9629_v63, %v9628_v46  ;;  %v11294_v5 = vpack.i.bf16 %v9645_v57, %v9644_v43  ;;  %v9653_v8 = vld [vmem:[#allocation3 + $0x3c] sm:$0x1]  ;;  %10237 = vmatprep.subr.bf16.mxu1 %v16563_v32  ;;  %v9617_v19 = vld [vmem:[#allocation3 + $0x18] sm:$0x1] }
 0x736   :  { %v11309_v13 = vpack.i.bf16 %v9653_v8, %v9652_v30  ;;  %11055 = vmatpush3.bf16.msra.mxu0 %v11471_v29 }
 0x737   :  { %11280 = vrot.lane.b32.xlu1 %v11279_v61, %s11682_s1  ;;  %11071 = vmatprep.subr.bf16.mxu0 %v11685_v22 }
 0x738   :  { %11285 = vrot.lane.b32.xlu0 %v11284_v49, %s16199_s28  ;;  %10238 = vmatpush1.bf16.msra.mxu1 %v11469_v55 }
 0x739   :  { %10239 = vmatprep.subr.bf16.mxu1 %v16563_v32 }
 0x73b   :  { %11295 = vrot.lane.b32.xlu1 %v11294_v5, %s11684_s17 }
 0x73c   :  { %11290 = vrot.lane.b32.xlu0 %v11289_v36, %s16200_s21  ;;  %10240 = vmatpush1.bf16.msra.mxu1 %v11472_v15 }
 0x73d   :  { %10241 = vmatprep.subr.bf16.mxu1 %v16563_v32 }
 0x73f   :  { %11300 = vrot.lane.b32.xlu1 %v11299_v9, %s16200_s21 }
 0x740   :  { %11305 = vrot.lane.b32.xlu0 %v11304_v23, %s16200_s21  ;;  %10242 = vmatpush1.bf16.msra.mxu1 %v11473_v42 }
 0x743   :  { %11310 = vrot.lane.b32.xlu1 %v11309_v13, %s16200_s21 }
 0x788   :  { %v11241_v25 = vpop.permute.xlu1 %11240 }
 0x789   :  { %v11243_v14 = vunpack.i.h.bf16 %v11241_v25  ;;  %v11242_v58 = vunpack.i.l.bf16 %v11241_v25 }
 0x792   :  { %v11236_v7 = vpop.permute.xlu0 %11235 }
 0x793   :  { %v11238_v53 = vunpack.i.h.bf16 %v11236_v7  ;;  %v11237_v12 = vunpack.i.l.bf16 %v11236_v7 }
 0x795   :  { %v9783_v2 = vsel %vm6134_vm15, %v9615_v35, %v11237_v12  ;;  %v9784_v28 = vsel %vm6134_vm15, %v9616_v40, %v11238_v53  ;;  %v9792_v38 = vsel %vm598_vm0, %v11238_v53, %v11243_v14  ;;  %v9791_v10 = vsel %vm598_vm0, %v11237_v12, %v11242_v58  ;;  %v9618_v14 = vld [vmem:[#allocation3 + $0x20] sm:$0x1] }
 0x796   :  { %v15873_v47 = vpop.permute.xlu0 %11245  ;;  %v9819_v32 = vpack.c.bf16 %v9783_v2, %v9783_v2  ;;  %v9823_v54 = vpack.c.bf16 %v9784_v28, %v9784_v28  ;;  %v9619_v2 = vld [vmem:[#allocation3 + $0x28] sm:$0x1] }
 0x797   :  { %v11248_v44 = vunpack.i.h.bf16 %v15873_v47  ;;  %v11247_v59 = vunpack.i.l.bf16 %v15873_v47 }
 0x798   :  { %v9940_v31 = vunpack.c.l.b16 %v9819_v32  ;;  %v9944_v62 = vunpack.c.l.b16 %v9823_v54 }
 0x799   :  { %v9800_v1 = vsel %vm9798_vm14, %v9791_v10, %v11247_v59  ;;  %v9801_v16 = vsel %vm9798_vm14, %v9792_v38, %v11248_v44 }
 0x79a   :  { %v9820_v21 = vpack.c.bf16 %v9800_v1, %v9800_v1  ;;  %v9824_v41 = vpack.c.bf16 %v9801_v16, %v9801_v16  ;;  %v9968_v37 = vrot.slane %v9940_v31, 7  ;;  %v9970_v27 = vrot.slane %v9944_v62, 6 }
 0x79b   :  { %v11251_v24 = vpop.permute.xlu1 %11250  ;;  %v11256_v48 = vpop.permute.xlu0 %11255 }
 0x79c   :  { %v11253_v3 = vunpack.i.h.bf16 %v11251_v24  ;;  %v11252_v11 = vunpack.i.l.bf16 %v11251_v24  ;;  %v11258_v34 = vunpack.i.h.bf16 %v11256_v48  ;;  %v11257_v18 = vunpack.i.l.bf16 %v11256_v48 }
 0x79d   :  { %v9941_v39 = vunpack.c.l.b16 %v9820_v21  ;;  %v9945_v57 = vunpack.c.l.b16 %v9824_v41 }
 0x79e   :  { %v9782_v46 = vsel %vm6134_vm15, %v9614_v33, %v11252_v11  ;;  %v9785_v63 = vsel %vm6134_vm15, %v9617_v19, %v11253_v3  ;;  %v9793_v56 = vsel %vm598_vm0, %v11253_v3, %v11258_v34  ;;  %v9790_v0 = vsel %vm598_vm0, %v11252_v11, %v11257_v18 }
 0x79f   :  { %v15887_v20 = vpop.permute.xlu1 %11260  ;;  %v9815_v49 = vpack.c.bf16 %v9782_v46, %v9782_v46  ;;  %v9827_v61 = vpack.c.bf16 %v9785_v63, %v9785_v63  ;;  %v9982_v52 = vrot.slane %v9941_v39, 7  ;;  %v9984_v42 = vrot.slane %v9945_v57, 6 }
 0x7a0   :  { %v11263_v51 = vunpack.i.h.bf16 %v15887_v20  ;;  %v11262_v43 = vunpack.i.l.bf16 %v15887_v20 }
 0x7a1   :  { %v9936_v36 = vunpack.c.l.b16 %v9815_v49  ;;  %v9948_v5 = vunpack.c.l.b16 %v9827_v61  ;;  %v9621_v61 = vld [vmem:[#allocation3 + $0x38] sm:$0x1] }
 0x7a2   :  { %v11271_v17 = vpop.permute.xlu0 %11270  ;;  %v9799_v4 = vsel %vm9798_vm14, %v9790_v0, %v11262_v43  ;;  %v9802_v50 = vsel %vm9798_vm14, %v9793_v56, %v11263_v51  ;;  %v9620_v56 = vld [vmem:[#allocation3 + $0x30] sm:$0x1] }
 0x7a3   :  { %v11266_v23 = vpop.permute.xlu1 %11265  ;;  %v9969_v9 = vsel %vm4518_vm4, %v9968_v37, %v9936_v36  ;;  %v9972_v8 = vrot.slane %v9948_v5, 5  ;;  %v9816_v55 = vpack.c.bf16 %v9799_v4, %v9799_v4  ;;  %v9828_v6 = vpack.c.bf16 %v9802_v50, %v9802_v50 }
 0x7a4   :  { %v9971_v30 = vsel %vm4521_vm5, %v9970_v27, %v9969_v9  ;;  %v11273_v29 = vunpack.i.h.bf16 %v11271_v17  ;;  %v11268_v13 = vunpack.i.h.bf16 %v11266_v23  ;;  %v11267_v15 = vunpack.i.l.bf16 %v11266_v23 }
 0x7a5   :  { %v9937_v25 = vunpack.c.l.b16 %v9816_v55  ;;  %v9949_v7 = vunpack.c.l.b16 %v9828_v6  ;;  %v11272_v53 = vunpack.i.l.bf16 %v11271_v17  ;;  %v9973_v32 = vsel %vm4524_vm6, %v9972_v8, %v9971_v30 }
 0x7a6   :  { %v15901_v12 = vpop.permute.xlu0 %11275  ;;  %v9795_v40 = vsel %vm598_vm0, %v11268_v13, %v11273_v29  ;;  %v9786_v28 = vsel %vm6134_vm15, %v9618_v14, %v11267_v15  ;;  %v9787_v10 = vsel %vm6134_vm15, %v9619_v2, %v11268_v13 }
 0x7a7   :  { %v11278_v58 = vunpack.i.h.bf16 %v15901_v12  ;;  %v11277_v35 = vunpack.i.l.bf16 %v15901_v12  ;;  %v9983_v38 = vsel %vm4518_vm4, %v9982_v52, %v9937_v25  ;;  %v9794_v54 = vsel %vm598_vm0, %v11267_v15, %v11272_v53 }
 0x7a8   :  { %v9986_v1 = vrot.slane %v9949_v7, 5  ;;  %v9831_v21 = vpack.c.bf16 %v9786_v28, %v9786_v28  ;;  %v9985_v48 = vsel %vm4521_vm5, %v9984_v42, %v9983_v38  ;;  %v9835_v3 = vpack.c.bf16 %v9787_v10, %v9787_v10 }
 0x7a9   :  { %v9804_v16 = vsel %vm9798_vm14, %v9795_v40, %v11278_v58  ;;  %v9803_v24 = vsel %vm9798_vm14, %v9794_v54, %v11277_v35  ;;  %v11281_v34 = vpop.permute.xlu1 %11280 }
 0x7aa   :  { %v9836_v31 = vpack.c.bf16 %v9804_v16, %v9804_v16  ;;  %v9832_v41 = vpack.c.bf16 %v9803_v24, %v9803_v24  ;;  %v11286_v11 = vpop.permute.xlu0 %11285  ;;  %v9952_v18 = vunpack.c.l.b16 %v9831_v21  ;;  %v11283_v62 = vunpack.i.h.bf16 %v11281_v34 }
 0x7ab   :  { %v11288_v33 = vunpack.i.h.bf16 %v11286_v11  ;;  %v11287_v19 = vunpack.i.l.bf16 %v11286_v11  ;;  %v9956_v63 = vunpack.c.l.b16 %v9835_v3  ;;  %v11282_v49 = vunpack.i.l.bf16 %v11281_v34 }
 0x7ac   :  { %v15918_v39 = vunpack.c.l.b16 %v9836_v31  ;;  %v9953_v46 = vunpack.c.l.b16 %v9832_v41  ;;  %v9987_v37 = vsel %vm4524_vm6, %v9986_v1, %v9985_v48  ;;  %v9974_v57 = vrot.slane %v9952_v18, 4 }
 0x7ad   :  { %v9797_v0 = vsel %vm598_vm0, %v11283_v62, %v11288_v33  ;;  %v9789_v36 = vsel %vm6134_vm15, %v9621_v61, %v11283_v62  ;;  %v9976_v17 = vrot.slane %v9956_v63, 3  ;;  %v9788_v52 = vsel %vm6134_vm15, %v9620_v56, %v11282_v49  ;;  %v15925_v50 = vpop.permute.xlu1 %11295 }
 0x7ae   :  { %v9990_v5 = vrot.slane %v15918_v39, 3  ;;  %v9988_v27 = vrot.slane %v9953_v46, 4  ;;  %v11291_v4 = vpop.permute.xlu0 %11290  ;;  %v9975_v23 = vsel %vm4527_vm7, %v9974_v57, %v9973_v32  ;;  %v9796_v9 = vsel %vm598_vm0, %v11282_v49, %v11287_v19 }
 0x7af   :  { %v9839_v8 = vpack.c.bf16 %v9788_v52, %v9788_v52  ;;  %v9843_v55 = vpack.c.bf16 %v9789_v36, %v9789_v36  ;;  %v9977_v6 = vsel %vm4530_vm8, %v9976_v17, %v9975_v23  ;;  %v11293_v30 = vunpack.i.h.bf16 %v11291_v4 }
 0x7b0   :  { %v11292_v29 = vunpack.i.l.bf16 %v11291_v4  ;;  %v11298_v13 = vunpack.i.h.bf16 %v15925_v50  ;;  %v11297_v25 = vunpack.i.l.bf16 %v15925_v50  ;;  %v15933_v7 = vsel %vm4527_vm7, %v9988_v27, %v9987_v37 }
 0x7b1   :  { %v9960_v15 = vunpack.c.l.b16 %v9839_v8  ;;  %v9964_v42 = vunpack.c.l.b16 %v9843_v55  ;;  %v9809_v53 = vsel %vm631_vm1, %v11248_v44, %v11293_v30  ;;  %v9826_v14 = vpack.c.bf16 %v11293_v30, %v11293_v30  ;;  %v11301_v28 = vpop.permute.xlu1 %11300 }
 0x7b2   :  { %v9808_v40 = vsel %vm631_vm1, %v11247_v59, %v11292_v29  ;;  %v9822_v2 = vpack.c.bf16 %v11292_v29, %v11292_v29  ;;  %v9825_v10 = vpack.c.bf16 %v9809_v53, %v9809_v53  ;;  %v9805_v24 = vsel %vm9798_vm14, %v9796_v9, %v11297_v25  ;;  %v11306_v47 = vpop.permute.xlu0 %11305 }
 0x7b3   :  { %v9978_v32 = vrot.slane %v9960_v15, 2  ;;  %v9980_v38 = vrot.slane %v9964_v42, 1  ;;  %v9821_v54 = vpack.c.bf16 %v9808_v40, %v9808_v40  ;;  %v15941_v1 = vunpack.c.l.b16 %v9826_v14 }
 0x7b4   :  { %v9943_v16 = vunpack.c.l.b16 %v9822_v2  ;;  %v9806_v44 = vsel %vm9798_vm14, %v9797_v0, %v11298_v13  ;;  %v9946_v21 = vunpack.c.l.b16 %v9825_v10  ;;  %v9840_v31 = vpack.c.bf16 %v9805_v24, %v9805_v24 }
 0x7b5   :  { %v9979_v59 = vsel %vm4533_vm9, %v9978_v32, %v9977_v6  ;;  %v9942_v48 = vunpack.c.l.b16 %v9821_v54  ;;  %v10012_v3 = vrot.slane %v15941_v1, 6  ;;  %v9844_v34 = vpack.c.bf16 %v9806_v44, %v9806_v44  ;;  %v11311_v18 = vpop.permute.xlu1 %11310 }
 0x7b6   :  { %v15951_v41 = vsel %vm4536_vm10, %v9980_v38, %v9979_v59  ;;  %v10010_v11 = vrot.slane %v9943_v16, 7  ;;  %v9998_v33 = vrot.slane %v9946_v21, 6  ;;  %v9961_v62 = vunpack.c.l.b16 %v9840_v31 }
 0x7b7   :  { %v9996_v19 = vrot.slane %v9942_v48, 7  ;;  %v11308_v46 = vunpack.i.h.bf16 %v11306_v47  ;;  %v9965_v63 = vunpack.c.l.b16 %v9844_v34  ;;  %v11307_v49 = vunpack.i.l.bf16 %v11306_v47 }
 0x7b8   :  { %v11303_v61 = vunpack.i.h.bf16 %v11301_v28  ;;  %v11302_v37 = vunpack.i.l.bf16 %v11301_v28  ;;  %v9992_v57 = vrot.slane %v9961_v62, 2  ;;  %v11313_v36 = vunpack.i.h.bf16 %v11311_v18 }
 0x7b9   :  { %v9812_v56 = vsel %vm631_vm1, %v11278_v58, %v11308_v46  ;;  %v9838_v0 = vpack.c.bf16 %v11308_v46, %v11308_v46  ;;  %v9994_v17 = vrot.slane %v9965_v63, 1  ;;  %v9811_v52 = vsel %vm631_vm1, %v11277_v35, %v11307_v49 }
 0x7ba   :  { %v9837_v27 = vpack.c.bf16 %v9812_v56, %v9812_v56  ;;  %v9834_v4 = vpack.c.bf16 %v11307_v49, %v11307_v49  ;;  %v9833_v9 = vpack.c.bf16 %v9811_v52, %v9811_v52  ;;  %v9810_v8 = vsel %vm631_vm1, %v11263_v51, %v11303_v61 }
 0x7bb   :  { %v9959_v23 = vunpack.c.l.b16 %v9838_v0  ;;  %v9830_v55 = vpack.c.bf16 %v11303_v61, %v11303_v61  ;;  %v9829_v29 = vpack.c.bf16 %v9810_v8, %v9810_v8  ;;  %v9807_v58 = vsel %vm631_vm1, %v11262_v43, %v11302_v37  ;;  %v11479_v8 = vld [vmem:[%s16112_s13 + $0x28] sm:$0xff]  }
 0x7bc   :  { %v9958_v6 = vunpack.c.l.b16 %v9837_v27  ;;  %v9955_v30 = vunpack.c.l.b16 %v9834_v4  ;;  %v9954_v42 = vunpack.c.l.b16 %v9833_v9  ;;  %v9817_v53 = vpack.c.bf16 %v9807_v58, %v9807_v58  ;;  %v11476_v4 = vld [vmem:[%s16112_s13 + $0x10] sm:$0xff]   ;;  %v11478_v9 = vld [vmem:[%s16112_s13 + $0x20] sm:$0xff]  }
 0x7bd   :  { %v10018_v15 = vrot.slane %v9959_v23, 3  ;;  %v9951_v12 = vunpack.c.l.b16 %v9830_v55  ;;  %v9950_v40 = vunpack.c.l.b16 %v9829_v29  ;;  %v9818_v2 = vpack.c.bf16 %v11302_v37, %v11302_v37  ;;  %v11474_v37 = vld [vmem:[%s16112_s13] sm:$0xff]   ;;  %v11477_v23 = vld [vmem:[%s16112_s13 + $0x18] sm:$0xff]   ;;  %v11480_v55 = vld [vmem:[%s16112_s13 + $0x30] sm:$0xff]  }
 0x7be   :  { %v10004_v35 = vrot.slane %v9958_v6, 3  ;;  %v10016_v14 = vrot.slane %v9955_v30, 4  ;;  %v10002_v28 = vrot.slane %v9954_v42, 4  ;;  %v9938_v38 = vunpack.c.l.b16 %v9817_v53  ;;  %v11481_v6 = vld [vmem:[%s16112_s13 + $0x38] ss:$0 sps:$4 sm:$0xff]  }
 0x7bf   :  { %v10014_v32 = vrot.slane %v9951_v12, 5  ;;  %v9846_v51 = vpack.c.bf16 %v11313_v36, %v11313_v36  ;;  %v10000_v10 = vrot.slane %v9950_v40, 5  ;;  %v9939_v54 = vunpack.c.l.b16 %v9818_v2 }
 0x7c0   :  { %v11312_v1 = vunpack.i.l.bf16 %v11311_v18  ;;  %v9814_v20 = vsel %vm631_vm1, %v11298_v13, %v11313_v36  ;;  %v9997_v43 = vsel %vm4518_vm4, %v9996_v19, %v9938_v38  ;;  %v9991_v44 = vsel %vm4530_vm8, %v9990_v5, %v15933_v7 }
 0x7c1   :  { %v9967_v16 = vunpack.c.l.b16 %v9846_v51  ;;  %v9845_v24 = vpack.c.bf16 %v9814_v20, %v9814_v20  ;;  %v9999_v47 = vsel %vm4521_vm5, %v9998_v33, %v9997_v43  ;;  %v10011_v59 = vsel %vm4518_vm4, %v10010_v11, %v9939_v54  ;;  %v11030_v54 = vld [vmem:[%s16114_s14] ss:$0 sm:$0xff] }
 0x7c2   :  { %v9813_v21 = vsel %vm631_vm1, %v11297_v25, %v11312_v1  ;;  %v9842_v48 = vpack.c.bf16 %v11312_v1, %v11312_v1  ;;  %v10001_v13 = vsel %vm4524_vm6, %v10000_v10, %v9999_v47  ;;  %v10013_v31 = vsel %vm4521_vm5, %v10012_v3, %v10011_v59 }
 0x7c3   :  { %v10022_v34 = vrot.slane %v9967_v16, 1  ;;  %v9841_v18 = vpack.c.bf16 %v9813_v21, %v9813_v21  ;;  %v10003_v19 = vsel %vm4527_vm7, %v10002_v28, %v10001_v13  ;;  %v10015_v39 = vsel %vm4524_vm6, %v10014_v32, %v10013_v31 }
 0x7c4   :  { %v9963_v5 = vunpack.c.l.b16 %v9842_v48  ;;  %v9966_v7 = vunpack.c.l.b16 %v9845_v24  ;;  %v10017_v33 = vsel %vm4527_vm7, %v10016_v14, %v10015_v39  ;;  %v10005_v50 = vsel %vm4530_vm8, %v10004_v35, %v10003_v19  ;;  %v10433_v19 = vld [vmem:[%s16115_s15] sm:$0xff] }
 0x7c5   :  { %v9962_v11 = vunpack.c.l.b16 %v9841_v18  ;;  %v9993_v25 = vsel %vm4533_vm9, %v9992_v57, %v9991_v44  ;;  %v10019_v46 = vsel %vm4530_vm8, %v10018_v15, %v10017_v33  ;;  %v10024_v0 = vpack.c.b16 %v15951_v41, %v15951_v41  ;;  %v11475_v41 = vld [vmem:[%s16112_s13 + $0x8] sm:$0xff]   ;;  %v11003_v15 = vld [vmem:[%s16113_s12] ss:$0 sm:$0xff] }
 0x7c6   :  { %v10008_v62 = vrot.slane %v9966_v7, 1  ;;  %v10020_v63 = vrot.slane %v9963_v5, 2  ;;  %v9995_v3 = vsel %vm4536_vm10, %v9994_v17, %v9993_v25  ;;  %vm10181_vm0 = vcmask 130048   ;;  %v16041_v18 = vld [vmem:[%s16115_s15 + $0x8] sm:$0x3] }
 0x7c7   :  { %v10006_v49 = vrot.slane %v9962_v11, 2  ;;  %v10025_v61 = vpack.c.b16 %v9995_v3, %v9995_v3  ;;  %vm11686_vm1 = vmmov 0   ;;  %v10341_v30 = vsel %vm5022_vm3, %v11481_v6, 0 }
 0x7c8   :  { %v10021_v56 = vsel %vm4533_vm9, %v10020_v63, %v10019_v46  ;;  %vm10336_vm3 = vcmask 982016   ;;  %vm10510_vm15 = vcmask 680960  }
 0x7c9   :  { %v10007_v36 = vsel %vm4533_vm9, %v10006_v49, %v10005_v50  ;;  %10217 = vmatprep.mubr.bf16.mxu0 %v10025_v61  ;;  %v10023_v57 = vsel %vm4536_vm10, %v10022_v34, %v10021_v56 }
 0x7ca   :  { %v10009_v27 = vsel %vm4536_vm10, %v10008_v62, %v10007_v36  ;;  %10218 = vmatmul.mubr.bf16.vlgmr.msra.gmra.mrb[68].mxu0 %v10024_v0  ;;  %v10027_v17 = vpack.c.b16 %v10023_v57, %v10023_v57 }
 0x7cb   :  { %v10026_v52 = vpack.c.b16 %v10009_v27, %v10009_v27  ;;  %11072 = vmatpush3.bf16.msra.mxu0 %v11474_v37  ;;  %11087 = vmatprep.mubr.msk.bf16.mxu0 %vm11686_vm1, %v11685_v22 }
 0x7cc   :  { %11029 = vmatprep.mubr.msk.bf16.mxu1 %vm10181_vm0, %v10027_v17  ;;  %11073 = vmatprep.subr.bf16.mxu0 %v11685_v22 }
 0x7cd   :  { %10258 = vmatmul.mubr.bf16.vlgmr.msra.gmra.mrb[48].mxu1 %v10026_v52 }
 0x7cf   :  { %11074 = vmatpush3.bf16.msra.mxu0 %v11475_v41 }
 0x7d0   :  { %11075 = vmatprep.subr.bf16.mxu0 %v11685_v22 }
 0x7d3   :  { %11076 = vmatpush3.bf16.msra.mxu0 %v11476_v4 }
 0x7d4   :  { %11077 = vmatprep.subr.bf16.mxu0 %v11685_v22 }
 0x7d7   :  { %11078 = vmatpush3.bf16.msra.mxu0 %v11477_v23 }
 0x7d8   :  { %11079 = vmatprep.subr.bf16.mxu0 %v11685_v22 }
 0x7db   :  { %11080 = vmatpush3.bf16.msra.mxu0 %v11478_v9 }
 0x7dc   :  { %11081 = vmatprep.subr.bf16.mxu0 %v11685_v22 }
 0x7df   :  { %11082 = vmatpush3.bf16.msra.mxu0 %v11479_v8 }
 0x7e0   :  { %11083 = vmatprep.subr.bf16.mxu0 %v11685_v22 }
 0x7e3   :  { %11084 = vmatpush3.bf16.msra.mxu0 %v11480_v55 }
 0x7e4   :  { %11085 = vmatprep.subr.bf16.mxu0 %v11685_v22 }
 0x7e7   :  { %11086 = vmatpush3.bf16.msra.mxu0 %v10341_v30 }
 0x89d   :  { %v11056_v29 = vpop.f32.mrb[68].mxu0 }
 0x89e   :  { %v11057_v58 = vpop.f32.mrb[69].mxu0 }
 0x89f   :  { %v11058_v42 = vadd.f32 %v11057_v58, %v11056_v29  ;;  %v11059_v12 = vpop.f32.mrb[70].mxu0 }
 0x8a0   :  { %v11060_v53 = vpop.f32.mrb[71].mxu0  ;;  %v10259_v35 = vpop.f32.mrb[48].mxu1 }
 0x8a1   :  { %v10220_v14 = vadd.f32 %v11058_v42, %v11003_v15  ;;  %v10261_v40 = vpop.f32.mrb[49].mxu1 }
 0x8a2   :  { %v10262_v2 = vpop.f32.mrb[50].mxu1 }
 0x8a3   :  { %v10260_v28 = vadd.f32 %v10259_v35, %v10220_v14  ;;  %v10263_v32 = vpop.f32.mrb[51].mxu1 }
 0x8a5   :  { %v10265_v38 = vmul.f32 0.6666667, %v10260_v28 }
 0x8a7   :  { %11672 = vtanh.f32 %v10265_v38 }
 0x8b1   :  { %v11673_v22 = vpop.eup %11672 }
 0x8b2   :  { %v10267_v51 = vmul.f32 1.7159, %v11673_v22 }
 0x8b4   :  { %v10268_v10 = vpack.c.bf16 %v10267_v51, %v10267_v51 }
 0x8b6   :  { %11088 = vmatmul.mubr.msk.bf16.vlgmr.msra.gmra.mrb[72].mxu0 %vm10336_vm3, %v10268_v10 }
 0x989   :  { %v10377_v1 = vpop.f32.mrb[72].mxu0 }
 0x98a   :  { %v10378_v20 = vadd.f32 %v11030_v54, %v10377_v1  ;;  %v11089_v43 = vpop.f32.mrb[73].mxu0 }
 0x98b   :  { %v10380_v16 = vpop.f32.mrb[74].mxu0 }
 0x98c   :  { %v10384_v24 = vcombine.high %v10378_v20, %v10378_v20  ;;  %v10391_v44 = vrot.slane %v10378_v20, %v15685_v45  ;;  %v11090_v47 = vpop.f32.mrb[75].mxu0 }
 0x98e   :  { %v10398_v59 = vrot.slane %v10384_v24, %v15685_v45  ;;  %v10399_v21 = vcombine.high %v10391_v44, %v10391_v44  ;;  %v10407_v48 = vrot.slane %v10391_v44, %v15685_v45 }
 0x990   :  { %v10414_v13 = vrot.slane %v10398_v59, %v15685_v45  ;;  %v10421_v31 = vrot.slane %v10399_v21, %v15685_v45  ;;  %v10429_v34 = vcombine.high %v10407_v48, %v10407_v48  ;;  %v10400_v39 = vcombine.high %v10398_v59, %v10398_v59 }
 0x991   :  { %v10438_v5 = vrot.slane %v10407_v48, %v12589_v60 }
 0x992   :  { %v10446_v7 = vrot.slane %v10429_v34, %v12589_v60  ;;  %v10442_v33 = vrot.slane %v10421_v31, %v12589_v60  ;;  %v10454_v11 = vrot.slane %v10414_v13, %v12589_v60  ;;  %v10431_v50 = vcombine.high %v10421_v31, %v10421_v31 }
 0x993   :  { %v10476_v25 = vsub.f32 %v10438_v5, %v16041_v18  ;;  %v10475_v62 = vsub.f32 %v10438_v5, %v10433_v19  ;;  %v10428_v0 = vrot.slane %v10400_v39, %v15685_v45  ;;  %v10430_v45 = vcombine.high %v10414_v13, %v10414_v13 }
 0x994   :  { %v10479_v46 = vsub.f32 %v10446_v7, %v10433_v19  ;;  %v10477_v63 = vsub.f32 %v10442_v33, %v10433_v19  ;;  %v10478_v61 = vsub.f32 %v10442_v33, %v16041_v18  ;;  %v10483_v37 = vsub.f32 %v10454_v11, %v10433_v19 }
 0x995   :  { %v10492_v3 = vmul.f32 %v10476_v25, %v10476_v25  ;;  %v10491_v49 = vmul.f32 %v10475_v62, %v10475_v62  ;;  %v10450_v56 = vrot.slane %v10431_v50, %v12589_v60  ;;  %v10480_v4 = vsub.f32 %v10446_v7, %v16041_v18 }
 0x996   :  { %v10495_v27 = vmul.f32 %v10479_v46, %v10479_v46  ;;  %v10493_v17 = vmul.f32 %v10477_v63, %v10477_v63  ;;  %v10494_v52 = vmul.f32 %v10478_v61, %v10478_v61  ;;  %v10499_v41 = vmul.f32 %v10483_v37, %v10483_v37 }
 0x997   :  { %v10511_v36 = vsel %vm10510_vm15, %v10492_v3, 0.0  ;;  %v10507_v57 = vsel %vm5731_vm13, %v10491_v49, 0.0  ;;  %v10481_v23 = vsub.f32 %v10450_v56, %v10433_v19  ;;  %v10458_v55 = vrot.slane %v10428_v0, %v12589_v60 }
 0x998   :  { %10512 = vadd.xlane.f32.xlu1 %v10511_v36  ;;  %10508 = vadd.xlane.f32.xlu0 %v10507_v57  ;;  %v10520_v9 = vsel %vm5731_vm13, %v10495_v27, 0.0  ;;  %v10514_v8 = vsel %vm5731_vm13, %v10493_v17, 0.0  ;;  %v10517_v6 = vsel %vm10510_vm15, %v10494_v52, 0.0  ;;  %v10532_v30 = vsel %vm5731_vm13, %v10499_v41, 0.0 }
 0x999   :  { %v10496_v29 = vmul.f32 %v10480_v4, %v10480_v4  ;;  %v10497_v58 = vmul.f32 %v10481_v23, %v10481_v23  ;;  %v10484_v15 = vsub.f32 %v10454_v11, %v16041_v18  ;;  %v10485_v42 = vsub.f32 %v10458_v55, %v10433_v19 }
 0x99a   :  { %v10462_v12 = vrot.slane %v10430_v45, %v12589_v60  ;;  %v10432_v53 = vcombine.high %v10428_v0, %v10428_v0  ;;  %v10482_v40 = vsub.f32 %v10450_v56, %v16041_v18  ;;  %v10486_v51 = vsub.f32 %v10458_v55, %v16041_v18 }
 0x99b   :  { %v10523_v35 = vsel %vm10510_vm15, %v10496_v29, 0.0  ;;  %v10526_v14 = vsel %vm5731_vm13, %v10497_v58, 0.0  ;;  %v10500_v2 = vmul.f32 %v10484_v15, %v10484_v15  ;;  %v10501_v28 = vmul.f32 %v10485_v42, %v10485_v42 }
 0x99c   :  { %10521 = vadd.xlane.f32.xlu1 %v10520_v9  ;;  %10515 = vadd.xlane.f32.xlu0 %v10514_v8  ;;  %v10487_v32 = vsub.f32 %v10462_v12, %v10433_v19  ;;  %v10466_v38 = vrot.slane %v10432_v53, %v12589_v60  ;;  %v10498_v22 = vmul.f32 %v10482_v40, %v10482_v40  ;;  %v16564_v50 = vlaneseq }
 0x99d   :  { %v10535_v10 = vsel %vm10510_vm15, %v10500_v2, 0.0  ;;  %v10538_v54 = vsel %vm5731_vm13, %v10501_v28, 0.0  ;;  %v10502_v43 = vmul.f32 %v10486_v51, %v10486_v51  ;;  %v10488_v60 = vsub.f32 %v10462_v12, %v16041_v18 }
 0x99e   :  { %v10503_v1 = vmul.f32 %v10487_v32, %v10487_v32  ;;  %v10489_v20 = vsub.f32 %v10466_v38, %v10433_v19  ;;  %v10529_v16 = vsel %vm10510_vm15, %v10498_v22, 0.0  ;;  %v10490_v48 = vsub.f32 %v10466_v38, %v16041_v18 }
 0x99f   :  { %v10541_v47 = vsel %vm10510_vm15, %v10502_v43, 0.0  ;;  %v10504_v21 = vmul.f32 %v10488_v60, %v10488_v60  ;;  %v10573_v25 = vand.u32 127, %v16564_v50 }
 0x9a0   :  { %10518 = vadd.xlane.f32.xlu0 %v10517_v6  ;;  %10533 = vadd.xlane.f32.xlu1 %v10532_v30  ;;  %v10544_v24 = vsel %vm5731_vm13, %v10503_v1, 0.0  ;;  %v10505_v44 = vmul.f32 %v10489_v20, %v10489_v20  ;;  %v10506_v31 = vmul.f32 %v10490_v48, %v10490_v48 }
 0x9a1   :  { %v10547_v13 = vsel %vm10510_vm15, %v10504_v21, 0.0  ;;  %v10578_v18 = vadd.s32 4294967288, %v10573_v25  ;;  %v10576_v61 = vsub.s32 %v10573_v25, %v16562_v26 }
 0x9a2   :  { %v10550_v59 = vsel %vm5731_vm13, %v10505_v44, 0.0  ;;  %v10553_v34 = vsel %vm10510_vm15, %v10506_v31, 0.0  ;;  %vm10583_vm13 = vcmask 130112  }
 0x9a3   :  { %v10581_v49 = vsub.s32 %v10578_v18, %v16562_v26 }
 0x9a4   :  { %10524 = vadd.xlane.f32.xlu0 %v10523_v35  ;;  %10527 = vadd.xlane.f32.xlu1 %v10526_v14 }
 0x9a8   :  { %10536 = vadd.xlane.f32.xlu0 %v10535_v10  ;;  %10539 = vadd.xlane.f32.xlu1 %v10538_v54 }
 0x9ac   :  { %10530 = vadd.xlane.f32.xlu0 %v10529_v16  ;;  %10545 = vadd.xlane.f32.xlu1 %v10544_v24 }
 0x9b0   :  { %10542 = vadd.xlane.f32.xlu0 %v10541_v47  ;;  %10551 = vadd.xlane.f32.xlu1 %v10550_v59 }
 0x9b4   :  { %10548 = vadd.xlane.f32.xlu0 %v10547_v13 }
 0x9b8   :  { %10554 = vadd.xlane.f32.xlu0 %v10553_v34 }
 0xa25   :  { %v10513_v19 = vpop.xlane.xlu1 %10512  ;;  %v10509_v39 = vpop.xlane.xlu0 %10508 }
 0xa26   :  { %v10582_v36 = vrot.slane %v10513_v19, %v10581_v49  ;;  %v10577_v57 = vrot.slane %v10509_v39, %v10576_v61 }
 0xa28   :  { %v10584_v55 = vsel %vm10583_vm13, %v10582_v36, %v10577_v57 }
 0xa29   :  { %v10522_v5 = vpop.xlane.xlu1 %10521  ;;  %v10516_v7 = vpop.xlane.xlu0 %10515 }
 0xa2a   :  { %v10588_v27 = vrot.slane %v10516_v7, %v10576_v61  ;;  %v10597_v52 = vrot.slane %v10522_v5, %v10576_v61 }
 0xa2d   :  { %v10519_v33 = vpop.xlane.xlu0 %10518  ;;  %v10534_v11 = vpop.xlane.xlu1 %10533 }
 0xa2e   :  { %v10592_v56 = vrot.slane %v10519_v33, %v10581_v49  ;;  %v10615_v12 = vrot.slane %v10534_v11, %v10576_v61 }
 0xa30   :  { %v10593_v23 = vsel %vm10583_vm13, %v10592_v56, %v10588_v27 }
 0xa31   :  { %v10525_v62 = vpop.xlane.xlu0 %10524  ;;  %v10528_v46 = vpop.xlane.xlu1 %10527  ;;  %v10648_v6 = vsel %vm4518_vm4, %v10593_v23, %v10584_v55  ;;  %vm10656_vm4 = vcmask 80896  }
 0xa32   :  { %v10601_v0 = vrot.slane %v10525_v62, %v10581_v49  ;;  %v10606_v9 = vrot.slane %v10528_v46, %v10576_v61 }
 0xa34   :  { %v10602_v8 = vsel %vm10583_vm13, %v10601_v0, %v10597_v52 }
 0xa35   :  { %v10537_v63 = vpop.xlane.xlu0 %10536  ;;  %v10540_v3 = vpop.xlane.xlu1 %10539  ;;  %v10649_v58 = vsel %vm4521_vm5, %v10602_v8, %v10648_v6 }
 0xa36   :  { %v10619_v30 = vrot.slane %v10537_v63, %v10581_v49  ;;  %v10624_v15 = vrot.slane %v10540_v3, %v10576_v61 }
 0xa38   :  { %v10620_v2 = vsel %vm10583_vm13, %v10619_v30, %v10615_v12 }
 0xa39   :  { %v10531_v37 = vpop.xlane.xlu0 %10530  ;;  %v10546_v41 = vpop.xlane.xlu1 %10545 }
 0xa3a   :  { %v10610_v17 = vrot.slane %v10531_v37, %v10581_v49  ;;  %v10633_v35 = vrot.slane %v10546_v41, %v10576_v61 }
 0xa3c   :  { %v10611_v26 = vsel %vm10583_vm13, %v10610_v17, %v10606_v9 }
 0xa3d   :  { %v10543_v4 = vpop.xlane.xlu0 %10542  ;;  %v10650_v53 = vsel %vm4524_vm6, %v10611_v26, %v10649_v58  ;;  %v10552_v14 = vpop.xlane.xlu1 %10551 }
 0xa3e   :  { %v10628_v45 = vrot.slane %v10543_v4, %v10581_v49  ;;  %v10651_v38 = vsel %vm4527_vm7, %v10620_v2, %v10650_v53  ;;  %v10642_v22 = vrot.slane %v10552_v14, %v10576_v61 }
 0xa40   :  { %v10629_v40 = vsel %vm10583_vm13, %v10628_v45, %v10624_v15 }
 0xa41   :  { %v10549_v29 = vpop.xlane.xlu0 %10548  ;;  %v10652_v10 = vsel %vm4530_vm8, %v10629_v40, %v10651_v38 }
 0xa42   :  { %v10637_v42 = vrot.slane %v10549_v29, %v10581_v49 }
 0xa44   :  { %v10638_v28 = vsel %vm10583_vm13, %v10637_v42, %v10633_v35 }
 0xa45   :  { %v10555_v32 = vpop.xlane.xlu0 %10554  ;;  %v10653_v54 = vsel %vm4533_vm9, %v10638_v28, %v10652_v10 }
 0xa46   :  { %v10646_v51 = vrot.slane %v10555_v32, %v10581_v49 }
 0xa48   :  { %v10647_v1 = vsel %vm10583_vm13, %v10646_v51, %v10642_v22 }
 0xa49   :  { %v10654_v20 = vsel %vm4536_vm10, %v10647_v1, %v10653_v54 }
 0xa4a   :  { %10657 = vst.msk [vmem:[%s16116_s16] sm:$0xff] %vm10656_vm4, %v10654_v20 }

</bundles_post_ra>
